<compile_context>
chip_gen: v6e
topology: v6e:2x2x1
jax: 0.10.0
libtpu: 0.0.40
codegen_flags: <defaults>
</compile_context>

<pallas_src>
import functools

import jax
import jax.numpy as jnp
from jax import lax
from jax.experimental import pallas as pl
from jax.experimental.pallas import tpu as pltpu

F = 1000          # logical feature count of every Linear / BatchNorm1d
FP = 1024         # lane-padded feature count (multiple of 128)
EPS = 1e-5        # BatchNorm1d default eps
NUM_LAYERS = 3


def block13_kernel(x_ref, w_ref, bgb_ref, o_ref):
    """Single invocation, all 3 layers unrolled.

    x_ref  : (N, FP)        bf16  lane-padded input activations
    w_ref  : (3, FP, FP)    bf16  per-layer weights, pre-transposed to (in, out)
    bgb_ref: (3, 3, FP)     f32   rows per layer: [bias, gamma, beta]
    o_ref  : (N, FP)        f32   final output
    """
    act = x_ref[...]                    # bf16, carried in registers across layers
    n = act.shape[0]
    inv_n = 1.0 / n

    for l in range(NUM_LAYERS):         # static unroll
        # Linear (MXU, f32 accumulation) + bias.
        h = jnp.dot(act, w_ref[l], preferred_element_type=jnp.float32)
        bgb = bgb_ref[l]                # (3, FP) f32
        h = h + bgb[0:1, :]

        # BatchNorm1d, training mode: batch mean + biased batch variance (two-pass).
        mean = jnp.sum(h, axis=0, keepdims=True) * inv_n
        d = h - mean
        var = jnp.sum(d * d, axis=0, keepdims=True) * inv_n

        gamma = bgb[1:2, :]
        beta = bgb[2:3, :]
        scale = gamma * lax.rsqrt(var + EPS)
        out = jnp.maximum(d * scale + beta, 0.0)     # BN affine + ReLU

        if l == NUM_LAYERS - 1:
            o_ref[...] = out
        else:
            act = out.astype(jnp.bfloat16)


def prepare_params(params):
    """One-time prep (hoisted out of the call path).

    params: list of 3 tuples (w (F,F) already transposed to (in,out), b (1,F),
    gamma (1,F), beta (1,F)).  Returns (w_stack bf16 (3,FP,FP), bgb_stack f32 (3,3,FP)).
    """
    pad = FP - F
    ws, bgbs = [], []
    for (w, b, gamma, beta) in params:
        ws.append(jnp.pad(w, ((0, pad), (0, pad))).astype(jnp.bfloat16))
        b_p = jnp.pad(b, ((0, 0), (0, pad)))                           # pad 0
        g_p = jnp.pad(gamma, ((0, 0), (0, pad)), constant_values=1.0)  # pad 1
        be_p = jnp.pad(beta, ((0, 0), (0, pad)))                       # pad 0
        bgbs.append(jnp.concatenate([b_p, g_p, be_p], axis=0))         # (3, FP)
    w_stack = jnp.stack(ws, axis=0)      # (3, FP, FP) bf16  (~6 MiB total)
    bgb_stack = jnp.stack(bgbs, axis=0)  # (3, 3, FP)  f32
    return jax.device_put(w_stack), jax.device_put(bgb_stack)


@functools.partial(jax.jit, donate_argnums=())
def test_block13(x, w_stack, bgb_stack):
    """x: (N, F) f32.  w_stack/bgb_stack: output of prepare_params (device-resident)."""
    n = x.shape[0]
    assert n <= 2048, "full-batch-resident design; add batch tiling for larger n"
    x_p = jnp.pad(x, ((0, 0), (0, FP - F))).astype(jnp.bfloat16)

    out_p = pl.pallas_call(
        block13_kernel,
        out_shape=jax.ShapeDtypeStruct((n, FP), jnp.float32),
        in_specs=[
            pl.BlockSpec(memory_space=pltpu.MemorySpace.VMEM),   # x      (n, FP) bf16
            pl.BlockSpec(memory_space=pltpu.MemorySpace.VMEM),   # weights (3, FP, FP) bf16
            pl.BlockSpec(memory_space=pltpu.MemorySpace.VMEM),   # bias/gamma/beta (3, 3, FP)
        ],
        out_specs=pl.BlockSpec(memory_space=pltpu.MemorySpace.VMEM),
        compiler_params=pltpu.CompilerParams(
            vmem_limit_bytes=32 << 20,   # actual residency ~6.2 MiB at n=8
        ),
    )(x_p, w_stack, bgb_stack)
    return out_p[:, :F]


def init_params(key):
    """Deterministic init matching torch.nn.Linear defaults:
    weight, bias ~ U(-1/sqrt(fan_in), 1/sqrt(fan_in)); BN gamma=1, beta=0."""
    params = []
    k = 1.0 / jnp.sqrt(jnp.float32(F))
    for _ in range(NUM_LAYERS):
        key, kw, kb = jax.random.split(key, 3)
        # torch weight is (out, in); we store its transpose (in, out).
        w = jax.random.uniform(kw, (F, F), jnp.float32, minval=-k, maxval=k)
        b = jax.random.uniform(kb, (1, F), jnp.float32, minval=-k, maxval=k)
        gamma = jnp.ones((1, F), jnp.float32)
        beta = jnp.zeros((1, F), jnp.float32)
        params.append((w, b, gamma, beta))
    return params


def reference(x, params):
    """Pure-JAX f32 reference of the module forward (training-mode BN)."""
    h = x
    for (w, b, gamma, beta) in params:
        y = h @ w + b
        mean = jnp.mean(y, axis=0, keepdims=True)
        var = jnp.mean(jnp.square(y - mean), axis=0, keepdims=True)
        y = (y - mean) * lax.rsqrt(var + EPS) * gamma + beta
        h = jnp.maximum(y, 0.0)
    return h


if __name__ == "__main__":
    key = jax.random.PRNGKey(0)
    key, kx = jax.random.split(key)
    N = 8
    x = jax.random.normal(kx, (N, F), jnp.float32)
    params = init_params(key)

    w_stack, bgb_stack = prepare_params(params)   # one-time, off the hot path

    out = jax.block_until_ready(test_block13(x, w_stack, bgb_stack))
    assert out.shape == (N, F) and out.dtype == jnp.float32

    ref = jax.block_until_ready(reference(x, params))
    max_err = float(jnp.max(jnp.abs(out - ref)))
    # bf16 weights/activations on the MXU (3 chained 1000-term dots) vs f32 reference.
    assert max_err < 0.25, f"max abs error vs f32 reference too large: {max_err}"
    print("KERNEL_OK")
</pallas_src>

<mosaic_0001>
module attributes {stable_mosaic.version = 11 : i64} {
  func.func @block13_kernel(%arg0: memref<8x1024xbf16, #tpu.memory_space<vmem>>, %arg1: memref<3x1024x1024xbf16, #tpu.memory_space<vmem>>, %arg2: memref<3x3x1024xf32, #tpu.memory_space<vmem>>, %arg3: memref<8x1024xf32, #tpu.memory_space<vmem>>) attributes {dimension_semantics = [], scalar_prefetch = 0 : i64, scratch_operands = 0 : i64, tpu.core_type = #tpu.core_type<tc>} {
    %c0 = arith.constant 0 : index
    %c0_0 = arith.constant 0 : index
    %0 = vector.load %arg0[%c0, %c0_0] : memref<8x1024xbf16, #tpu.memory_space<vmem>>, vector<8x1024xbf16>
    %c0_1 = arith.constant 0 : index
    %c0_2 = arith.constant 0 : index
    %c0_3 = arith.constant 0 : index
    %1 = vector.load %arg1[%c0_1, %c0_2, %c0_3] : memref<3x1024x1024xbf16, #tpu.memory_space<vmem>>, vector<1x1024x1024xbf16>
    %2 = vector.shape_cast %1 : vector<1x1024x1024xbf16> to vector<1024x1024xbf16>
    %cst = arith.constant dense<0.000000e+00> : vector<8x1024xf32>
    %3 = tpu.matmul %0, %2, %cst {dimension_numbers = #tpu.dot_dimension_numbers<[1], [0], [0], [1], [0, 0, 1, 1], [], []>} : vector<8x1024xbf16>, vector<1024x1024xbf16>, vector<8x1024xf32> -> vector<8x1024xf32>
    %c0_4 = arith.constant 0 : index
    %c0_5 = arith.constant 0 : index
    %c0_6 = arith.constant 0 : index
    %4 = vector.load %arg2[%c0_4, %c0_5, %c0_6] : memref<3x3x1024xf32, #tpu.memory_space<vmem>>, vector<1x3x1024xf32>
    %5 = vector.shape_cast %4 : vector<1x3x1024xf32> to vector<3x1024xf32>
    %6 = vector.extract_strided_slice %5 {offsets = [0, 0], sizes = [1, 1024], strides = [1, 1]} : vector<3x1024xf32> to vector<1x1024xf32>
    %7 = vector.broadcast %6 : vector<1x1024xf32> to vector<8x1024xf32>
    %8 = arith.addf %3, %7 : vector<8x1024xf32>
    %cst_7 = arith.constant dense<0.000000e+00> : vector<1024xf32>
    %9 = vector.multi_reduction <add>, %8, %cst_7 [0] : vector<8x1024xf32> to vector<1024xf32>
    %10 = vector.shape_cast %9 : vector<1024xf32> to vector<1x1024xf32>
    %cst_8 = arith.constant 1.250000e-01 : f32
    %11 = vector.broadcast %cst_8 : f32 to vector<1x1024xf32>
    %12 = arith.mulf %10, %11 : vector<1x1024xf32>
    %13 = vector.broadcast %12 : vector<1x1024xf32> to vector<8x1024xf32>
    %14 = arith.subf %8, %13 : vector<8x1024xf32>
    %15 = arith.mulf %14, %14 : vector<8x1024xf32>
    %cst_9 = arith.constant dense<0.000000e+00> : vector<1024xf32>
    %16 = vector.multi_reduction <add>, %15, %cst_9 [0] : vector<8x1024xf32> to vector<1024xf32>
    %17 = vector.shape_cast %16 : vector<1024xf32> to vector<1x1024xf32>
    %cst_10 = arith.constant 1.250000e-01 : f32
    %18 = vector.broadcast %cst_10 : f32 to vector<1x1024xf32>
    %19 = arith.mulf %17, %18 : vector<1x1024xf32>
    %20 = vector.extract_strided_slice %5 {offsets = [1, 0], sizes = [1, 1024], strides = [1, 1]} : vector<3x1024xf32> to vector<1x1024xf32>
    %21 = vector.extract_strided_slice %5 {offsets = [2, 0], sizes = [1, 1024], strides = [1, 1]} : vector<3x1024xf32> to vector<1x1024xf32>
    %cst_11 = arith.constant 9.99999974E-6 : f32
    %22 = vector.broadcast %cst_11 : f32 to vector<1x1024xf32>
    %23 = arith.addf %19, %22 : vector<1x1024xf32>
    %24 = math.rsqrt %23 : vector<1x1024xf32>
    %25 = arith.mulf %20, %24 : vector<1x1024xf32>
    %26 = vector.broadcast %25 : vector<1x1024xf32> to vector<8x1024xf32>
    %27 = arith.mulf %14, %26 : vector<8x1024xf32>
    %28 = vector.broadcast %21 : vector<1x1024xf32> to vector<8x1024xf32>
    %29 = arith.addf %27, %28 : vector<8x1024xf32>
    %cst_12 = arith.constant 0.000000e+00 : f32
    %30 = vector.broadcast %cst_12 : f32 to vector<8x1024xf32>
    %31 = arith.maximumf %29, %30 : vector<8x1024xf32>
    %32 = arith.truncf %31 : vector<8x1024xf32> to vector<8x1024xbf16>
    %c1 = arith.constant 1 : index
    %c0_13 = arith.constant 0 : index
    %c0_14 = arith.constant 0 : index
    %33 = vector.load %arg1[%c1, %c0_13, %c0_14] : memref<3x1024x1024xbf16, #tpu.memory_space<vmem>>, vector<1x1024x1024xbf16>
    %34 = vector.shape_cast %33 : vector<1x1024x1024xbf16> to vector<1024x1024xbf16>
    %cst_15 = arith.constant dense<0.000000e+00> : vector<8x1024xf32>
    %35 = tpu.matmul %32, %34, %cst_15 {dimension_numbers = #tpu.dot_dimension_numbers<[1], [0], [0], [1], [0, 0, 1, 1], [], []>} : vector<8x1024xbf16>, vector<1024x1024xbf16>, vector<8x1024xf32> -> vector<8x1024xf32>
    %c1_16 = arith.constant 1 : index
    %c0_17 = arith.constant 0 : index
    %c0_18 = arith.constant 0 : index
    %36 = vector.load %arg2[%c1_16, %c0_17, %c0_18] : memref<3x3x1024xf32, #tpu.memory_space<vmem>>, vector<1x3x1024xf32>
    %37 = vector.shape_cast %36 : vector<1x3x1024xf32> to vector<3x1024xf32>
    %38 = vector.extract_strided_slice %37 {offsets = [0, 0], sizes = [1, 1024], strides = [1, 1]} : vector<3x1024xf32> to vector<1x1024xf32>
    %39 = vector.broadcast %38 : vector<1x1024xf32> to vector<8x1024xf32>
    %40 = arith.addf %35, %39 : vector<8x1024xf32>
    %cst_19 = arith.constant dense<0.000000e+00> : vector<1024xf32>
    %41 = vector.multi_reduction <add>, %40, %cst_19 [0] : vector<8x1024xf32> to vector<1024xf32>
    %42 = vector.shape_cast %41 : vector<1024xf32> to vector<1x1024xf32>
    %cst_20 = arith.constant 1.250000e-01 : f32
    %43 = vector.broadcast %cst_20 : f32 to vector<1x1024xf32>
    %44 = arith.mulf %42, %43 : vector<1x1024xf32>
    %45 = vector.broadcast %44 : vector<1x1024xf32> to vector<8x1024xf32>
    %46 = arith.subf %40, %45 : vector<8x1024xf32>
    %47 = arith.mulf %46, %46 : vector<8x1024xf32>
    %cst_21 = arith.constant dense<0.000000e+00> : vector<1024xf32>
    %48 = vector.multi_reduction <add>, %47, %cst_21 [0] : vector<8x1024xf32> to vector<1024xf32>
    %49 = vector.shape_cast %48 : vector<1024xf32> to vector<1x1024xf32>
    %cst_22 = arith.constant 1.250000e-01 : f32
    %50 = vector.broadcast %cst_22 : f32 to vector<1x1024xf32>
    %51 = arith.mulf %49, %50 : vector<1x1024xf32>
    %52 = vector.extract_strided_slice %37 {offsets = [1, 0], sizes = [1, 1024], strides = [1, 1]} : vector<3x1024xf32> to vector<1x1024xf32>
    %53 = vector.extract_strided_slice %37 {offsets = [2, 0], sizes = [1, 1024], strides = [1, 1]} : vector<3x1024xf32> to vector<1x1024xf32>
    %cst_23 = arith.constant 9.99999974E-6 : f32
    %54 = vector.broadcast %cst_23 : f32 to vector<1x1024xf32>
    %55 = arith.addf %51, %54 : vector<1x1024xf32>
    %56 = math.rsqrt %55 : vector<1x1024xf32>
    %57 = arith.mulf %52, %56 : vector<1x1024xf32>
    %58 = vector.broadcast %57 : vector<1x1024xf32> to vector<8x1024xf32>
    %59 = arith.mulf %46, %58 : vector<8x1024xf32>
    %60 = vector.broadcast %53 : vector<1x1024xf32> to vector<8x1024xf32>
    %61 = arith.addf %59, %60 : vector<8x1024xf32>
    %cst_24 = arith.constant 0.000000e+00 : f32
    %62 = vector.broadcast %cst_24 : f32 to vector<8x1024xf32>
    %63 = arith.maximumf %61, %62 : vector<8x1024xf32>
    %64 = arith.truncf %63 : vector<8x1024xf32> to vector<8x1024xbf16>
    %c2 = arith.constant 2 : index
    %c0_25 = arith.constant 0 : index
    %c0_26 = arith.constant 0 : index
    %65 = vector.load %arg1[%c2, %c0_25, %c0_26] : memref<3x1024x1024xbf16, #tpu.memory_space<vmem>>, vector<1x1024x1024xbf16>
    %66 = vector.shape_cast %65 : vector<1x1024x1024xbf16> to vector<1024x1024xbf16>
    %cst_27 = arith.constant dense<0.000000e+00> : vector<8x1024xf32>
    %67 = tpu.matmul %64, %66, %cst_27 {dimension_numbers = #tpu.dot_dimension_numbers<[1], [0], [0], [1], [0, 0, 1, 1], [], []>} : vector<8x1024xbf16>, vector<1024x1024xbf16>, vector<8x1024xf32> -> vector<8x1024xf32>
    %c2_28 = arith.constant 2 : index
    %c0_29 = arith.constant 0 : index
    %c0_30 = arith.constant 0 : index
    %68 = vector.load %arg2[%c2_28, %c0_29, %c0_30] : memref<3x3x1024xf32, #tpu.memory_space<vmem>>, vector<1x3x1024xf32>
    %69 = vector.shape_cast %68 : vector<1x3x1024xf32> to vector<3x1024xf32>
    %70 = vector.extract_strided_slice %69 {offsets = [0, 0], sizes = [1, 1024], strides = [1, 1]} : vector<3x1024xf32> to vector<1x1024xf32>
    %71 = vector.broadcast %70 : vector<1x1024xf32> to vector<8x1024xf32>
    %72 = arith.addf %67, %71 : vector<8x1024xf32>
    %cst_31 = arith.constant dense<0.000000e+00> : vector<1024xf32>
    %73 = vector.multi_reduction <add>, %72, %cst_31 [0] : vector<8x1024xf32> to vector<1024xf32>
    %74 = vector.shape_cast %73 : vector<1024xf32> to vector<1x1024xf32>
    %cst_32 = arith.constant 1.250000e-01 : f32
    %75 = vector.broadcast %cst_32 : f32 to vector<1x1024xf32>
    %76 = arith.mulf %74, %75 : vector<1x1024xf32>
    %77 = vector.broadcast %76 : vector<1x1024xf32> to vector<8x1024xf32>
    %78 = arith.subf %72, %77 : vector<8x1024xf32>
    %79 = arith.mulf %78, %78 : vector<8x1024xf32>
    %cst_33 = arith.constant dense<0.000000e+00> : vector<1024xf32>
    %80 = vector.multi_reduction <add>, %79, %cst_33 [0] : vector<8x1024xf32> to vector<1024xf32>
    %81 = vector.shape_cast %80 : vector<1024xf32> to vector<1x1024xf32>
    %cst_34 = arith.constant 1.250000e-01 : f32
    %82 = vector.broadcast %cst_34 : f32 to vector<1x1024xf32>
    %83 = arith.mulf %81, %82 : vector<1x1024xf32>
    %84 = vector.extract_strided_slice %69 {offsets = [1, 0], sizes = [1, 1024], strides = [1, 1]} : vector<3x1024xf32> to vector<1x1024xf32>
    %85 = vector.extract_strided_slice %69 {offsets = [2, 0], sizes = [1, 1024], strides = [1, 1]} : vector<3x1024xf32> to vector<1x1024xf32>
    %cst_35 = arith.constant 9.99999974E-6 : f32
    %86 = vector.broadcast %cst_35 : f32 to vector<1x1024xf32>
    %87 = arith.addf %83, %86 : vector<1x1024xf32>
    %88 = math.rsqrt %87 : vector<1x1024xf32>
    %89 = arith.mulf %84, %88 : vector<1x1024xf32>
    %90 = vector.broadcast %89 : vector<1x1024xf32> to vector<8x1024xf32>
    %91 = arith.mulf %78, %90 : vector<8x1024xf32>
    %92 = vector.broadcast %85 : vector<1x1024xf32> to vector<8x1024xf32>
    %93 = arith.addf %91, %92 : vector<8x1024xf32>
    %cst_36 = arith.constant 0.000000e+00 : f32
    %94 = vector.broadcast %cst_36 : f32 to vector<8x1024xf32>
    %95 = arith.maximumf %93, %94 : vector<8x1024xf32>
    %c0_37 = arith.constant 0 : index
    %c0_38 = arith.constant 0 : index
    %96 = vector.load %arg3[%c0_37, %c0_38] : memref<8x1024xf32, #tpu.memory_space<vmem>>, vector<8x1024xf32>
    tpu.vector_store %arg3[%c0_37, %c0_38], %95 {strides = array<i32>} : memref<8x1024xf32, #tpu.memory_space<vmem>>, vector<8x1024xf32>,
    return
  }
}

</mosaic_0001>

<bundles_post_ra>
// kernel: test_block13.1
= control target key start
LH: loop header
LB: loop body
LE: loop exit
PB: predicated region body
PF: predicated region fallthrough
CT: control target
= control target key end

     0   :  { %8 = vsyncpa [#allocation3], 0  ;;  %s15072_s0 = inlined_call_operand.vmem [shape: bf16[8,1024], index: 0, kind: input, shape index: {}]   ;;  %s15073_s1 = inlined_call_operand.hbm [shape: bf16[3,1024,1024], index: 1, kind: input, shape index: {}]   ;;  %s15074_s2 = inlined_call_operand.hbm [shape: f32[3,3,1024], index: 2, kind: input, shape index: {}]   ;;  %s15075_s3 = inlined_call_operand.hbm [shape: f32[8,1024], index: 3, kind: output, shape index: {}]  }
   0x1   :  { %9 = vsyncpa [#allocation6], 0 }
   0x2   :  { %10 = vsyncpa [#allocation4], 0  ;;  %s14237_s12 = smov [#allocation2]  }
   0x3   :  { %s18_s13 = sshll.u32 %s14237_s12, 4  ;;  %s19_s13 = int_to_ptr.vmem [resolvable:$true] %s18_s13 }
   0x4   :  { %s14179_s14 = scalar_lea.vmem %s19_s13, 196608  ;;  %p14184_p1 = scmp.lt.s32.totalorder %s19_s13, %s19_s13 }
   0x5   :  { %p14180_p0 = scmp.ne.s32.totalorder %s19_s13, %s14179_s14  ;;  %p14185_p2 = scmp.lt.s32.totalorder %s14179_s14, %s14179_s14 }
   0x7   :  { %p14186_p3 = por %p14185_p2, %p14184_p1 }
   0x9   :  { %p14187_p4 = pnand %p14186_p3, %p14180_p0 }
   0xb   :  { %14190 = shalt.err (!%p14187_p4)
}
   0xc   :  { %s14238_s15 = smov 512   ;;  %s14239_s16 = smov 32  }
   0xd   :  { %24 = dma.hbm_to_vmem [thread:$0]  %s15073_s1, 196608, %s19_s13, [#allocation3], %s14238_s15, %s14238_s15, %s14239_s16  }
   0xe   :  { %s14240_s19 = smov [#allocation5]  }
   0xf   :  { %s30_s20 = sshll.u32 %s14240_s19, 4  ;;  %s31_s20 = int_to_ptr.vmem [resolvable:$true] %s30_s20 }
  0x10   :  { %s14199_s21 = scalar_lea.vmem %s31_s20, 1536  ;;  %p14204_p6 = scmp.lt.s32.totalorder %s31_s20, %s31_s20 }
  0x11   :  { %p14200_p5 = scmp.ne.s32.totalorder %s31_s20, %s14199_s21  ;;  %p14205_p7 = scmp.lt.s32.totalorder %s14199_s21, %s14199_s21 }
  0x13   :  { %p14206_p8 = por %p14205_p7, %p14204_p6 }
  0x15   :  { %p14207_p9 = pnand %p14206_p8, %p14200_p5 }
  0x17   :  { %14210 = shalt.err (!%p14207_p9)
}
  0x18   :  { %36 = dma.hbm_to_vmem [thread:$0]  %s15074_s2, 1536, %s31_s20, [#allocation6], %s14238_s15, %s14238_s15, %s14239_s16  }
  0x19   :  { %14231 = dma.done.wait [#allocation3], 196608  }
  0x1a   :  { %14232 = vsyncadd [#allocation3], 4294770688 }
  0x1b   :  { %14233 = dma.done.wait [#allocation6], 1536  }
  0x1c   :  { %14234 = vsyncadd [#allocation6], 4294965760  ;;  %v103_v0 = vld [vmem:[#allocation2 + $0x1c0] sm:$0xff]  ;;  %v14276_v54 = vld [vmem:[%s15072_s0 + $0x8] sm:$0xff] }
  0x1d   :  { %v107_v1 = vld [vmem:[#allocation2 + $0x1e0] sm:$0xff]  ;;  %v14284_v59 = vcombine.high %v14276_v54, %v14276_v54 }
  0x1e   :  { %v231_v2 = vld [vmem:[#allocation2 + $0x5c0] sm:$0xff]  ;;  %v12628_v3 = vcombine.high %v103_v0, %v107_v1  ;;  %v12627_v5 = vcombine.low %v103_v0, %v107_v1 }
  0x1f   :  { %v235_v4 = vld [vmem:[#allocation2 + $0x5e0] sm:$0xff]  ;;  %3300 = vmatprep.mubr.bf16.mxu1 %v14284_v59 }
  0x20   :  { %v95_v6 = vld [vmem:[#allocation2 + $0x180] sm:$0xff]  ;;  %v12756_v8 = vcombine.high %v231_v2, %v235_v4  ;;  %v12755_v9 = vcombine.low %v231_v2, %v235_v4  ;;  %3227 = vmatprep.subr.bf16.mxu0 %v12628_v3 }
  0x21   :  { %v99_v7 = vld [vmem:[#allocation2 + $0x1a0] sm:$0xff]  ;;  %3228 = vmatpush1.bf16.msra.mxu0 %v12627_v5 }
  0x22   :  { %v12620_v10 = vcombine.high %v95_v6, %v99_v7  ;;  %v223_v11 = vld [vmem:[#allocation2 + $0x580] sm:$0xff]  ;;  %3268 = vmatprep.subr.bf16.mxu1 %v12756_v8  ;;  %v12619_v18 = vcombine.low %v95_v6, %v99_v7 }
  0x23   :  { %v227_v12 = vld [vmem:[#allocation2 + $0x5a0] sm:$0xff]  ;;  %3269 = vmatpush1.bf16.msra.mxu1 %v12755_v9 }
  0x24   :  { %v87_v13 = vld [vmem:[#allocation2 + $0x140] sm:$0xff]  ;;  %v12748_v14 = vcombine.high %v223_v11, %v227_v12  ;;  %3229 = vmatprep.subr.bf16.mxu0 %v12620_v10  ;;  %v12747_v19 = vcombine.low %v223_v11, %v227_v12 }
  0x25   :  { %v91_v15 = vld [vmem:[#allocation2 + $0x160] sm:$0xff]  ;;  %3230 = vmatpush1.bf16.msra.mxu0 %v12619_v18 }
  0x26   :  { %v215_v16 = vld [vmem:[#allocation2 + $0x540] sm:$0xff]  ;;  %v12612_v20 = vcombine.high %v87_v13, %v91_v15  ;;  %3270 = vmatprep.subr.bf16.mxu1 %v12748_v14  ;;  %v12611_v26 = vcombine.low %v87_v13, %v91_v15 }
  0x27   :  { %v219_v17 = vld [vmem:[#allocation2 + $0x560] sm:$0xff]  ;;  %3271 = vmatpush1.bf16.msra.mxu1 %v12747_v19 }
  0x28   :  { %v12740_v21 = vcombine.high %v215_v16, %v219_v17  ;;  %v79_v22 = vld [vmem:[#allocation2 + $0x100] sm:$0xff]  ;;  %3231 = vmatprep.subr.bf16.mxu0 %v12612_v20  ;;  %v12739_v27 = vcombine.low %v215_v16, %v219_v17 }
  0x29   :  { %v83_v23 = vld [vmem:[#allocation2 + $0x120] sm:$0xff]  ;;  %3232 = vmatpush1.bf16.msra.mxu0 %v12611_v26 }
  0x2a   :  { %v207_v24 = vld [vmem:[#allocation2 + $0x500] sm:$0xff]  ;;  %v12604_v28 = vcombine.high %v79_v22, %v83_v23  ;;  %3272 = vmatprep.subr.bf16.mxu1 %v12740_v21  ;;  %v12603_v34 = vcombine.low %v79_v22, %v83_v23 }
  0x2b   :  { %v211_v25 = vld [vmem:[#allocation2 + $0x520] sm:$0xff]  ;;  %3273 = vmatpush1.bf16.msra.mxu1 %v12739_v27 }
  0x2c   :  { %v12732_v29 = vcombine.high %v207_v24, %v211_v25  ;;  %v71_v30 = vld [vmem:[#allocation2 + $0xc0] sm:$0xff]  ;;  %3233 = vmatprep.subr.bf16.mxu0 %v12604_v28  ;;  %v12731_v35 = vcombine.low %v207_v24, %v211_v25 }
  0x2d   :  { %v75_v31 = vld [vmem:[#allocation2 + $0xe0] sm:$0xff]  ;;  %3234 = vmatpush1.bf16.msra.mxu0 %v12603_v34 }
  0x2e   :  { %v199_v32 = vld [vmem:[#allocation2 + $0x4c0] sm:$0xff]  ;;  %v12596_v36 = vcombine.high %v71_v30, %v75_v31  ;;  %3274 = vmatprep.subr.bf16.mxu1 %v12732_v29  ;;  %v12595_v42 = vcombine.low %v71_v30, %v75_v31 }
  0x2f   :  { %v203_v33 = vld [vmem:[#allocation2 + $0x4e0] sm:$0xff]  ;;  %3275 = vmatpush1.bf16.msra.mxu1 %v12731_v35 }
  0x30   :  { %v12724_v37 = vcombine.high %v199_v32, %v203_v33  ;;  %v63_v38 = vld [vmem:[#allocation2 + $0x80] sm:$0xff]  ;;  %3235 = vmatprep.subr.bf16.mxu0 %v12596_v36  ;;  %v12723_v43 = vcombine.low %v199_v32, %v203_v33 }
  0x31   :  { %v67_v39 = vld [vmem:[#allocation2 + $0xa0] sm:$0xff]  ;;  %3236 = vmatpush1.bf16.msra.mxu0 %v12595_v42 }
  0x32   :  { %v191_v40 = vld [vmem:[#allocation2 + $0x480] sm:$0xff]  ;;  %v12588_v44 = vcombine.high %v63_v38, %v67_v39  ;;  %3276 = vmatprep.subr.bf16.mxu1 %v12724_v37  ;;  %v12587_v50 = vcombine.low %v63_v38, %v67_v39 }
  0x33   :  { %v195_v41 = vld [vmem:[#allocation2 + $0x4a0] sm:$0xff]  ;;  %3277 = vmatpush1.bf16.msra.mxu1 %v12723_v43 }
  0x34   :  { %v12716_v45 = vcombine.high %v191_v40, %v195_v41  ;;  %v55_v46 = vld [vmem:[#allocation2 + $0x40] sm:$0xff]  ;;  %3237 = vmatprep.subr.bf16.mxu0 %v12588_v44  ;;  %v12715_v51 = vcombine.low %v191_v40, %v195_v41 }
  0x35   :  { %v59_v47 = vld [vmem:[#allocation2 + $0x60] sm:$0xff]  ;;  %3238 = vmatpush1.bf16.msra.mxu0 %v12587_v50 }
  0x36   :  { %v183_v48 = vld [vmem:[#allocation2 + $0x440] sm:$0xff]  ;;  %v12580_v52 = vcombine.high %v55_v46, %v59_v47  ;;  %3278 = vmatprep.subr.bf16.mxu1 %v12716_v45  ;;  %v12579_v62 = vcombine.low %v55_v46, %v59_v47 }
  0x37   :  { %v187_v49 = vld [vmem:[#allocation2 + $0x460] sm:$0xff]  ;;  %3279 = vmatpush1.bf16.msra.mxu1 %v12715_v51 }
  0x38   :  { %v14271_v53 = vld [vmem:[%s15072_s0] sm:$0xff]  ;;  %v12708_v55 = vcombine.high %v183_v48, %v187_v49  ;;  %3239 = vmatprep.subr.bf16.mxu0 %v12580_v52  ;;  %v12707_v63 = vcombine.low %v183_v48, %v187_v49 }
  0x39   :  { %v47_v56 = vld [vmem:[#allocation2] sm:$0xff]  ;;  %v14280_v58 = vcombine.high %v14271_v53, %v14271_v53  ;;  %3240 = vmatpush1.bf16.msra.mxu0 %v12579_v62 }
  0x3a   :  { %v51_v57 = vld [vmem:[#allocation2 + $0x20] sm:$0xff]  ;;  %3280 = vmatprep.subr.bf16.mxu1 %v12708_v55 }
  0x3b   :  { %v175_v60 = vld [vmem:[#allocation2 + $0x400] sm:$0xff]  ;;  %3259 = vmatprep.mubr.bf16.mxu0 %v14280_v58  ;;  %v12572_v0 = vcombine.high %v47_v56, %v51_v57  ;;  %v12571_v6 = vcombine.low %v47_v56, %v51_v57  ;;  %3281 = vmatpush1.bf16.msra.mxu1 %v12707_v63 }
  0x3c   :  { %v179_v61 = vld [vmem:[#allocation2 + $0x420] sm:$0xff] }
  0x3d   :  { %v12700_v1 = vcombine.high %v175_v60, %v179_v61  ;;  %v167_v2 = vld [vmem:[#allocation2 + $0x3c0] sm:$0xff]  ;;  %3241 = vmatprep.subr.bf16.mxu0 %v12572_v0  ;;  %v12699_v7 = vcombine.low %v175_v60, %v179_v61 }
  0x3e   :  { %v171_v3 = vld [vmem:[#allocation2 + $0x3e0] sm:$0xff]  ;;  %3242 = vmatpush1.bf16.msra.mxu0 %v12571_v6 }
  0x3f   :  { %v295_v4 = vld [vmem:[#allocation2 + $0x7c0] sm:$0xff]  ;;  %v12692_v8 = vcombine.high %v167_v2, %v171_v3  ;;  %3282 = vmatprep.subr.bf16.mxu1 %v12700_v1  ;;  %v12691_v14 = vcombine.low %v167_v2, %v171_v3 }
  0x40   :  { %v299_v5 = vld [vmem:[#allocation2 + $0x7e0] sm:$0xff]  ;;  %3283 = vmatpush1.bf16.msra.mxu1 %v12699_v7 }
  0x41   :  { %v12820_v9 = vcombine.high %v295_v4, %v299_v5  ;;  %v159_v10 = vld [vmem:[#allocation2 + $0x380] sm:$0xff]  ;;  %3243 = vmatprep.subr.bf16.mxu0 %v12692_v8  ;;  %v12819_v15 = vcombine.low %v295_v4, %v299_v5 }
  0x42   :  { %v163_v11 = vld [vmem:[#allocation2 + $0x3a0] sm:$0xff]  ;;  %3244 = vmatpush2.bf16.msra.mxu0 %v12691_v14 }
  0x43   :  { %v287_v12 = vld [vmem:[#allocation2 + $0x780] sm:$0xff]  ;;  %v12684_v16 = vcombine.high %v159_v10, %v163_v11  ;;  %3284 = vmatprep.subr.bf16.mxu1 %v12820_v9  ;;  %v12683_v22 = vcombine.low %v159_v10, %v163_v11 }
  0x44   :  { %v291_v13 = vld [vmem:[#allocation2 + $0x7a0] sm:$0xff]  ;;  %3285 = vmatpush2.bf16.msra.mxu1 %v12819_v15 }
  0x45   :  { %v12812_v17 = vcombine.high %v287_v12, %v291_v13  ;;  %v151_v18 = vld [vmem:[#allocation2 + $0x340] sm:$0xff]  ;;  %3245 = vmatprep.subr.bf16.mxu0 %v12684_v16  ;;  %v12811_v23 = vcombine.low %v287_v12, %v291_v13  ;;  %v14290_v16 = vcombine.low %v14271_v53, %v14271_v53 }
  0x46   :  { %v155_v19 = vld [vmem:[#allocation2 + $0x360] sm:$0xff]  ;;  %3246 = vmatpush2.bf16.msra.mxu0 %v12683_v22  ;;  %v14304_v22 = vld [vmem:[%s15072_s0 + $0x18] sm:$0xff] }
  0x47   :  { %v279_v20 = vld [vmem:[#allocation2 + $0x740] sm:$0xff]  ;;  %v12676_v24 = vcombine.high %v151_v18, %v155_v19  ;;  %3286 = vmatprep.subr.bf16.mxu1 %v12812_v17  ;;  %v12675_v30 = vcombine.low %v151_v18, %v155_v19  ;;  %v14295_v19 = vld [vmem:[%s15072_s0 + $0x10] sm:$0xff]  ;;  %s14241_s0 = smov [#allocation7]  }
  0x48   :  { %v283_v21 = vld [vmem:[#allocation2 + $0x760] sm:$0xff]  ;;  %3287 = vmatpush2.bf16.msra.mxu1 %v12811_v23  ;;  %s12553_s30 = sshll.u32 %s14241_s0, 4  ;;  %s12554_s30 = int_to_ptr.vmem [resolvable:$true] %s12553_s30 }
  0x49   :  { %v12804_v25 = vcombine.high %v279_v20, %v283_v21  ;;  %v143_v26 = vld [vmem:[#allocation2 + $0x300] sm:$0xff]  ;;  %3247 = vmatprep.subr.bf16.mxu0 %v12676_v24  ;;  %v12803_v31 = vcombine.low %v279_v20, %v283_v21  ;;  %v14299_v20 = vcombine.low %v14276_v54, %v14276_v54  ;;  %s14211_s4 = scalar_lea.vmem %s12554_s30, 1024  ;;  %p14216_p11 = scmp.lt.s32.totalorder %s12554_s30, %s12554_s30 }
  0x4a   :  { %v147_v27 = vld [vmem:[#allocation2 + $0x320] sm:$0xff]  ;;  %3248 = vmatpush2.bf16.msra.mxu0 %v12675_v30  ;;  %p14212_p10 = scmp.ne.s32.totalorder %s12554_s30, %s14211_s4  ;;  %p14217_p12 = scmp.lt.s32.totalorder %s14211_s4, %s14211_s4 }
  0x4b   :  { %v271_v28 = vld [vmem:[#allocation2 + $0x700] sm:$0xff]  ;;  %v12668_v32 = vcombine.high %v143_v26, %v147_v27  ;;  %3288 = vmatprep.subr.bf16.mxu1 %v12804_v25  ;;  %v12667_v38 = vcombine.low %v143_v26, %v147_v27  ;;  %v14308_v27 = vcombine.high %v14295_v19, %v14295_v19 }
  0x4c   :  { %v275_v29 = vld [vmem:[#allocation2 + $0x720] sm:$0xff]  ;;  %3289 = vmatpush2.bf16.msra.mxu1 %v12803_v31  ;;  %p14218_p13 = por %p14217_p12, %p14216_p11 }
  0x4d   :  { %v12796_v33 = vcombine.high %v271_v28, %v275_v29  ;;  %v135_v34 = vld [vmem:[#allocation2 + $0x2c0] sm:$0xff]  ;;  %3249 = vmatprep.subr.bf16.mxu0 %v12668_v32  ;;  %v12795_v39 = vcombine.low %v271_v28, %v275_v29  ;;  %v14313_v29 = vcombine.high %v14304_v22, %v14304_v22 }
  0x4e   :  { %v139_v35 = vld [vmem:[#allocation2 + $0x2e0] sm:$0xff]  ;;  %3250 = vmatpush2.bf16.msra.mxu0 %v12667_v38  ;;  %p14219_p0 = pnand %p14218_p13, %p14212_p10 }
  0x4f   :  { %v263_v36 = vld [vmem:[#allocation2 + $0x6c0] sm:$0xff]  ;;  %v12660_v40 = vcombine.high %v135_v34, %v139_v35  ;;  %3290 = vmatprep.subr.bf16.mxu1 %v12796_v33  ;;  %v12659_v46 = vcombine.low %v135_v34, %v139_v35 }
  0x50   :  { %v267_v37 = vld [vmem:[#allocation2 + $0x6e0] sm:$0xff]  ;;  %3291 = vmatpush2.bf16.msra.mxu1 %v12795_v39 }
  0x51   :  { %v12788_v41 = vcombine.high %v263_v36, %v267_v37  ;;  %v127_v42 = vld [vmem:[#allocation2 + $0x280] sm:$0xff]  ;;  %3251 = vmatprep.subr.bf16.mxu0 %v12660_v40  ;;  %v12787_v47 = vcombine.low %v263_v36, %v267_v37 }
  0x52   :  { %v131_v43 = vld [vmem:[#allocation2 + $0x2a0] sm:$0xff]  ;;  %3252 = vmatpush2.bf16.msra.mxu0 %v12659_v46 }
  0x53   :  { %v255_v44 = vld [vmem:[#allocation2 + $0x680] sm:$0xff]  ;;  %v12652_v48 = vcombine.high %v127_v42, %v131_v43  ;;  %3292 = vmatprep.subr.bf16.mxu1 %v12788_v41  ;;  %v12651_v56 = vcombine.low %v127_v42, %v131_v43 }
  0x54   :  { %v259_v45 = vld [vmem:[#allocation2 + $0x6a0] sm:$0xff]  ;;  %3293 = vmatpush2.bf16.msra.mxu1 %v12787_v47 }
  0x55   :  { %v12780_v49 = vcombine.high %v255_v44, %v259_v45  ;;  %v119_v50 = vld [vmem:[#allocation2 + $0x240] sm:$0xff]  ;;  %3253 = vmatprep.subr.bf16.mxu0 %v12652_v48  ;;  %v12779_v57 = vcombine.low %v255_v44, %v259_v45 }
  0x56   :  { %v123_v51 = vld [vmem:[#allocation2 + $0x260] sm:$0xff]  ;;  %3254 = vmatpush2.bf16.msra.mxu0 %v12651_v56 }
  0x57   :  { %v247_v52 = vld [vmem:[#allocation2 + $0x640] sm:$0xff]  ;;  %v12644_v60 = vcombine.high %v119_v50, %v123_v51  ;;  %3294 = vmatprep.subr.bf16.mxu1 %v12780_v49  ;;  %v12643_v2 = vcombine.low %v119_v50, %v123_v51 }
  0x58   :  { %v251_v55 = vld [vmem:[#allocation2 + $0x660] sm:$0xff]  ;;  %3295 = vmatpush2.bf16.msra.mxu1 %v12779_v57 }
  0x59   :  { %v12772_v61 = vcombine.high %v247_v52, %v251_v55  ;;  %v111_v62 = vld [vmem:[#allocation2 + $0x200] sm:$0xff]  ;;  %3255 = vmatprep.subr.bf16.mxu0 %v12644_v60  ;;  %v12771_v3 = vcombine.low %v247_v52, %v251_v55 }
  0x5a   :  { %v115_v63 = vld [vmem:[#allocation2 + $0x220] sm:$0xff]  ;;  %3256 = vmatpush2.bf16.msra.mxu0 %v12643_v2 }
  0x5b   :  { %v239_v0 = vld [vmem:[#allocation2 + $0x600] sm:$0xff]  ;;  %v12636_v4 = vcombine.high %v111_v62, %v115_v63  ;;  %3296 = vmatprep.subr.bf16.mxu1 %v12772_v61  ;;  %v12635_v10 = vcombine.low %v111_v62, %v115_v63 }
  0x5c   :  { %v243_v1 = vld [vmem:[#allocation2 + $0x620] sm:$0xff]  ;;  %3297 = vmatpush2.bf16.msra.mxu1 %v12771_v3 }
  0x5d   :  { %v12764_v5 = vcombine.high %v239_v0, %v243_v1  ;;  %v359_v6 = vld [vmem:[#allocation2 + $0x9c0] sm:$0xff]  ;;  %3257 = vmatprep.subr.bf16.mxu0 %v12636_v4  ;;  %v12763_v11 = vcombine.low %v239_v0, %v243_v1 }
  0x5e   :  { %v363_v7 = vld [vmem:[#allocation2 + $0x9e0] sm:$0xff]  ;;  %3258 = vmatpush2.bf16.msra.mxu0 %v12635_v10 }
  0x5f   :  { %v487_v8 = vld [vmem:[#allocation2 + $0xdc0] sm:$0xff]  ;;  %v12884_v12 = vcombine.high %v359_v6, %v363_v7  ;;  %3298 = vmatprep.subr.bf16.mxu1 %v12764_v5  ;;  %v12883_v21 = vcombine.low %v359_v6, %v363_v7 }
  0x60   :  { %v491_v9 = vld [vmem:[#allocation2 + $0xde0] sm:$0xff]  ;;  %3299 = vmatpush2.bf16.msra.mxu1 %v12763_v11 }
  0x61   :  { %v13012_v13 = vcombine.high %v487_v8, %v491_v9  ;;  %v351_v14 = vld [vmem:[#allocation2 + $0x980] sm:$0xff]  ;;  %3309 = vmatprep.subr.bf16.mxu0 %v12884_v12  ;;  %v13011_v53 = vcombine.low %v487_v8, %v491_v9  ;;  %3260 = vmatmul.mubr.bf16.vlgmr.msra.gmra.mxu0 %v14290_v16 }
  0x62   :  { %v355_v15 = vld [vmem:[#allocation2 + $0x9a0] sm:$0xff]  ;;  %3310 = vmatpush1.bf16.msra.mxu0 %v12883_v21  ;;  %3341 = vmatprep.mubr.bf16.mxu0 %v14308_v27 }
  0x63   :  { %v479_v17 = vld [vmem:[#allocation2 + $0xd80] sm:$0xff]  ;;  %v12876_v23 = vcombine.high %v351_v14, %v355_v15  ;;  %3350 = vmatprep.subr.bf16.mxu1 %v13012_v13  ;;  %3301 = vmatmul.mubr.bf16.vlgmr.msra.gmra.mxu1 %v14299_v20  ;;  %v12875_v30 = vcombine.low %v351_v14, %v355_v15 }
  0x64   :  { %v483_v18 = vld [vmem:[#allocation2 + $0xda0] sm:$0xff]  ;;  %3351 = vmatpush1.bf16.msra.mxu1 %v13011_v53  ;;  %3382 = vmatprep.mubr.bf16.mxu1 %v14313_v29 }
  0x65   :  { %v13004_v24 = vcombine.high %v479_v17, %v483_v18  ;;  %v343_v25 = vld [vmem:[#allocation2 + $0x940] sm:$0xff]  ;;  %3311 = vmatprep.subr.bf16.mxu0 %v12876_v23  ;;  %v13003_v31 = vcombine.low %v479_v17, %v483_v18 }
  0x66   :  { %v347_v26 = vld [vmem:[#allocation2 + $0x960] sm:$0xff]  ;;  %3312 = vmatpush1.bf16.msra.mxu0 %v12875_v30 }
  0x67   :  { %v471_v54 = vld [vmem:[#allocation2 + $0xd40] sm:$0xff]  ;;  %v12868_v32 = vcombine.high %v343_v25, %v347_v26  ;;  %3352 = vmatprep.subr.bf16.mxu1 %v13004_v24  ;;  %v12867_v38 = vcombine.low %v343_v25, %v347_v26 }
  0x68   :  { %v475_v28 = vld [vmem:[#allocation2 + $0xd60] sm:$0xff]  ;;  %3353 = vmatpush1.bf16.msra.mxu1 %v13003_v31 }
  0x69   :  { %v12996_v33 = vcombine.high %v471_v54, %v475_v28  ;;  %v335_v34 = vld [vmem:[#allocation2 + $0x900] sm:$0xff]  ;;  %3313 = vmatprep.subr.bf16.mxu0 %v12868_v32  ;;  %v12995_v39 = vcombine.low %v471_v54, %v475_v28 }
  0x6a   :  { %v339_v35 = vld [vmem:[#allocation2 + $0x920] sm:$0xff]  ;;  %3314 = vmatpush1.bf16.msra.mxu0 %v12867_v38 }
  0x6b   :  { %v463_v36 = vld [vmem:[#allocation2 + $0xd00] sm:$0xff]  ;;  %v12860_v40 = vcombine.high %v335_v34, %v339_v35  ;;  %3354 = vmatprep.subr.bf16.mxu1 %v12996_v33  ;;  %v12859_v46 = vcombine.low %v335_v34, %v339_v35 }
  0x6c   :  { %v467_v37 = vld [vmem:[#allocation2 + $0xd20] sm:$0xff]  ;;  %3355 = vmatpush1.bf16.msra.mxu1 %v12995_v39 }
  0x6d   :  { %v12988_v41 = vcombine.high %v463_v36, %v467_v37  ;;  %v327_v42 = vld [vmem:[#allocation2 + $0x8c0] sm:$0xff]  ;;  %3315 = vmatprep.subr.bf16.mxu0 %v12860_v40  ;;  %v12987_v47 = vcombine.low %v463_v36, %v467_v37 }
  0x6e   :  { %v331_v43 = vld [vmem:[#allocation2 + $0x8e0] sm:$0xff]  ;;  %3316 = vmatpush1.bf16.msra.mxu0 %v12859_v46 }
  0x6f   :  { %v455_v44 = vld [vmem:[#allocation2 + $0xcc0] sm:$0xff]  ;;  %v12852_v48 = vcombine.high %v327_v42, %v331_v43  ;;  %3356 = vmatprep.subr.bf16.mxu1 %v12988_v41  ;;  %v12851_v56 = vcombine.low %v327_v42, %v331_v43 }
  0x70   :  { %v459_v45 = vld [vmem:[#allocation2 + $0xce0] sm:$0xff]  ;;  %3357 = vmatpush1.bf16.msra.mxu1 %v12987_v47 }
  0x71   :  { %v12980_v49 = vcombine.high %v455_v44, %v459_v45  ;;  %v319_v50 = vld [vmem:[#allocation2 + $0x880] sm:$0xff]  ;;  %3317 = vmatprep.subr.bf16.mxu0 %v12852_v48  ;;  %v12979_v57 = vcombine.low %v455_v44, %v459_v45 }
  0x72   :  { %v323_v51 = vld [vmem:[#allocation2 + $0x8a0] sm:$0xff]  ;;  %3318 = vmatpush1.bf16.msra.mxu0 %v12851_v56 }
  0x73   :  { %v447_v52 = vld [vmem:[#allocation2 + $0xc80] sm:$0xff]  ;;  %v12844_v60 = vcombine.high %v319_v50, %v323_v51  ;;  %3358 = vmatprep.subr.bf16.mxu1 %v12980_v49  ;;  %v12843_v2 = vcombine.low %v319_v50, %v323_v51 }
  0x74   :  { %v451_v55 = vld [vmem:[#allocation2 + $0xca0] sm:$0xff]  ;;  %3359 = vmatpush1.bf16.msra.mxu1 %v12979_v57 }
  0x75   :  { %v12972_v61 = vcombine.high %v447_v52, %v451_v55  ;;  %v311_v62 = vld [vmem:[#allocation2 + $0x840] sm:$0xff]  ;;  %3319 = vmatprep.subr.bf16.mxu0 %v12844_v60  ;;  %v12971_v3 = vcombine.low %v447_v52, %v451_v55 }
  0x76   :  { %v315_v63 = vld [vmem:[#allocation2 + $0x860] sm:$0xff]  ;;  %3320 = vmatpush1.bf16.msra.mxu0 %v12843_v2 }
  0x77   :  { %v439_v0 = vld [vmem:[#allocation2 + $0xc40] sm:$0xff]  ;;  %v12836_v4 = vcombine.high %v311_v62, %v315_v63  ;;  %3360 = vmatprep.subr.bf16.mxu1 %v12972_v61  ;;  %v12835_v10 = vcombine.low %v311_v62, %v315_v63 }
  0x78   :  { %v443_v1 = vld [vmem:[#allocation2 + $0xc60] sm:$0xff]  ;;  %3361 = vmatpush1.bf16.msra.mxu1 %v12971_v3 }
  0x79   :  { %v12964_v5 = vcombine.high %v439_v0, %v443_v1  ;;  %v303_v6 = vld [vmem:[#allocation2 + $0x800] sm:$0xff]  ;;  %3321 = vmatprep.subr.bf16.mxu0 %v12836_v4  ;;  %v12963_v11 = vcombine.low %v439_v0, %v443_v1 }
  0x7a   :  { %v307_v7 = vld [vmem:[#allocation2 + $0x820] sm:$0xff]  ;;  %3322 = vmatpush1.bf16.msra.mxu0 %v12835_v10 }
  0x7b   :  { %v431_v8 = vld [vmem:[#allocation2 + $0xc00] sm:$0xff]  ;;  %v12828_v12 = vcombine.high %v303_v6, %v307_v7  ;;  %3362 = vmatprep.subr.bf16.mxu1 %v12964_v5  ;;  %v12827_v21 = vcombine.low %v303_v6, %v307_v7 }
  0x7c   :  { %v435_v9 = vld [vmem:[#allocation2 + $0xc20] sm:$0xff]  ;;  %3363 = vmatpush1.bf16.msra.mxu1 %v12963_v11 }
  0x7d   :  { %v12956_v13 = vcombine.high %v431_v8, %v435_v9  ;;  %v423_v14 = vld [vmem:[#allocation2 + $0xbc0] sm:$0xff]  ;;  %3323 = vmatprep.subr.bf16.mxu0 %v12828_v12  ;;  %v12955_v53 = vcombine.low %v431_v8, %v435_v9 }
  0x7e   :  { %v427_v15 = vld [vmem:[#allocation2 + $0xbe0] sm:$0xff]  ;;  %3324 = vmatpush1.bf16.msra.mxu0 %v12827_v21 }
  0x7f   :  { %v551_v17 = vld [vmem:[#allocation2 + $0xfc0] sm:$0xff]  ;;  %v12948_v23 = vcombine.high %v423_v14, %v427_v15  ;;  %3364 = vmatprep.subr.bf16.mxu1 %v12956_v13  ;;  %v12947_v30 = vcombine.low %v423_v14, %v427_v15 }
  0x80   :  { %v555_v18 = vld [vmem:[#allocation2 + $0xfe0] sm:$0xff]  ;;  %3365 = vmatpush1.bf16.msra.mxu1 %v12955_v53 }
  0x81   :  { %v13076_v24 = vcombine.high %v551_v17, %v555_v18  ;;  %v415_v25 = vld [vmem:[#allocation2 + $0xb80] sm:$0xff]  ;;  %3325 = vmatprep.subr.bf16.mxu0 %v12948_v23  ;;  %v13075_v31 = vcombine.low %v551_v17, %v555_v18 }
  0x82   :  { %v419_v26 = vld [vmem:[#allocation2 + $0xba0] sm:$0xff]  ;;  %3326 = vmatpush2.bf16.msra.mxu0 %v12947_v30 }
  0x83   :  { %v543_v54 = vld [vmem:[#allocation2 + $0xf80] sm:$0xff]  ;;  %v12940_v32 = vcombine.high %v415_v25, %v419_v26  ;;  %3366 = vmatprep.subr.bf16.mxu1 %v13076_v24  ;;  %v12939_v38 = vcombine.low %v415_v25, %v419_v26  ;;  %v104_v25 = vld [vmem:[#allocation2 + $0x1c8] sm:$0xff] }
  0x84   :  { %v547_v28 = vld [vmem:[#allocation2 + $0xfa0] sm:$0xff]  ;;  %3367 = vmatpush2.bf16.msra.mxu1 %v13075_v31  ;;  %v108_v26 = vld [vmem:[#allocation2 + $0x1e8] sm:$0xff] }
  0x85   :  { %v13068_v33 = vcombine.high %v543_v54, %v547_v28  ;;  %v407_v34 = vld [vmem:[#allocation2 + $0xb40] sm:$0xff]  ;;  %3327 = vmatprep.subr.bf16.mxu0 %v12940_v32  ;;  %v13067_v39 = vcombine.low %v543_v54, %v547_v28  ;;  %v232_v54 = vld [vmem:[#allocation2 + $0x5c8] sm:$0xff]  ;;  %v12630_v32 = vcombine.high %v104_v25, %v108_v26 }
  0x86   :  { %v411_v35 = vld [vmem:[#allocation2 + $0xb60] sm:$0xff]  ;;  %3328 = vmatpush2.bf16.msra.mxu0 %v12939_v38  ;;  %v236_v28 = vld [vmem:[#allocation2 + $0x5e8] sm:$0xff] }
  0x87   :  { %v535_v36 = vld [vmem:[#allocation2 + $0xf40] sm:$0xff]  ;;  %v12932_v40 = vcombine.high %v407_v34, %v411_v35  ;;  %3368 = vmatprep.subr.bf16.mxu1 %v13068_v33  ;;  %v12931_v46 = vcombine.low %v407_v34, %v411_v35  ;;  %v12758_v33 = vcombine.high %v232_v54, %v236_v28  ;;  %v96_v34 = vld [vmem:[#allocation2 + $0x188] sm:$0xff] }
  0x88   :  { %v539_v37 = vld [vmem:[#allocation2 + $0xf60] sm:$0xff]  ;;  %3369 = vmatpush2.bf16.msra.mxu1 %v13067_v39  ;;  %v100_v35 = vld [vmem:[#allocation2 + $0x1a8] sm:$0xff]  ;;  %v14324_v39 = vcombine.low %v14304_v22, %v14304_v22 }
  0x89   :  { %v13060_v41 = vcombine.high %v535_v36, %v539_v37  ;;  %v399_v42 = vld [vmem:[#allocation2 + $0xb00] sm:$0xff]  ;;  %3329 = vmatprep.subr.bf16.mxu0 %v12932_v40  ;;  %v13059_v47 = vcombine.low %v535_v36, %v539_v37  ;;  %v14320_v36 = vcombine.low %v14295_v19, %v14295_v19  ;;  %v224_v37 = vld [vmem:[#allocation2 + $0x588] sm:$0xff]  ;;  %v12629_v40 = vcombine.low %v104_v25, %v108_v26 }
  0x8a   :  { %v403_v43 = vld [vmem:[#allocation2 + $0xb20] sm:$0xff]  ;;  %3330 = vmatpush2.bf16.msra.mxu0 %v12931_v46  ;;  %v228_v38 = vld [vmem:[#allocation2 + $0x5a8] sm:$0xff] }
  0x8b   :  { %v527_v44 = vld [vmem:[#allocation2 + $0xf00] sm:$0xff]  ;;  %v12924_v48 = vcombine.high %v399_v42, %v403_v43  ;;  %3370 = vmatprep.subr.bf16.mxu1 %v13060_v41  ;;  %v12923_v56 = vcombine.low %v399_v42, %v403_v43  ;;  %v12757_v41 = vcombine.low %v232_v54, %v236_v28  ;;  %v12622_v42 = vcombine.high %v96_v34, %v100_v35  ;;  %v216_v19 = vld [vmem:[#allocation2 + $0x548] sm:$0xff] }
  0x8c   :  { %v531_v45 = vld [vmem:[#allocation2 + $0xf20] sm:$0xff]  ;;  %3371 = vmatpush2.bf16.msra.mxu1 %v13059_v47  ;;  %v12750_v43 = vcombine.high %v224_v37, %v228_v38  ;;  %v220_v46 = vld [vmem:[#allocation2 + $0x568] sm:$0xff]  ;;  %v12621_v47 = vcombine.low %v96_v34, %v100_v35  ;;  %v12749_v22 = vcombine.low %v224_v37, %v228_v38 }
  0x8d   :  { %v13052_v49 = vcombine.high %v527_v44, %v531_v45  ;;  %v391_v50 = vld [vmem:[#allocation2 + $0xac0] sm:$0xff]  ;;  %3331 = vmatprep.subr.bf16.mxu0 %v12924_v48  ;;  %v13051_v57 = vcombine.low %v527_v44, %v531_v45  ;;  %v88_v44 = vld [vmem:[#allocation2 + $0x148] sm:$0xff] }
  0x8e   :  { %v395_v51 = vld [vmem:[#allocation2 + $0xae0] sm:$0xff]  ;;  %3332 = vmatpush2.bf16.msra.mxu0 %v12923_v56  ;;  %v92_v45 = vld [vmem:[#allocation2 + $0x168] sm:$0xff] }
  0x8f   :  { %v519_v52 = vld [vmem:[#allocation2 + $0xec0] sm:$0xff]  ;;  %v12916_v60 = vcombine.high %v391_v50, %v395_v51  ;;  %3372 = vmatprep.subr.bf16.mxu1 %v13052_v49  ;;  %v12915_v2 = vcombine.low %v391_v50, %v395_v51  ;;  %v12614_v48 = vcombine.high %v88_v44, %v92_v45  ;;  %v12742_v49 = vcombine.high %v216_v19, %v220_v46  ;;  %v80_v50 = vld [vmem:[#allocation2 + $0x108] sm:$0xff] }
  0x90   :  { %v523_v55 = vld [vmem:[#allocation2 + $0xee0] sm:$0xff]  ;;  %3373 = vmatpush2.bf16.msra.mxu1 %v13051_v57  ;;  %v84_v51 = vld [vmem:[#allocation2 + $0x128] sm:$0xff]  ;;  %v12613_v56 = vcombine.low %v88_v44, %v92_v45  ;;  %v12741_v57 = vcombine.low %v216_v19, %v220_v46 }
  0x91   :  { %v13044_v61 = vcombine.high %v519_v52, %v523_v55  ;;  %v383_v62 = vld [vmem:[#allocation2 + $0xa80] sm:$0xff]  ;;  %3333 = vmatprep.subr.bf16.mxu0 %v12916_v60  ;;  %v13043_v3 = vcombine.low %v519_v52, %v523_v55  ;;  %v208_v52 = vld [vmem:[#allocation2 + $0x508] sm:$0xff]  ;;  %v12606_v60 = vcombine.high %v80_v50, %v84_v51 }
  0x92   :  { %v387_v63 = vld [vmem:[#allocation2 + $0xaa0] sm:$0xff]  ;;  %3334 = vmatpush2.bf16.msra.mxu0 %v12915_v2  ;;  %v212_v55 = vld [vmem:[#allocation2 + $0x528] sm:$0xff]  ;;  %v12605_v2 = vcombine.low %v80_v50, %v84_v51 }
  0x93   :  { %v511_v0 = vld [vmem:[#allocation2 + $0xe80] sm:$0xff]  ;;  %v12908_v4 = vcombine.high %v383_v62, %v387_v63  ;;  %3374 = vmatprep.subr.bf16.mxu1 %v13044_v61  ;;  %v12907_v10 = vcombine.low %v383_v62, %v387_v63  ;;  %v12734_v61 = vcombine.high %v208_v52, %v212_v55  ;;  %v72_v62 = vld [vmem:[#allocation2 + $0xc8] sm:$0xff] }
  0x94   :  { %v515_v1 = vld [vmem:[#allocation2 + $0xea0] sm:$0xff]  ;;  %3375 = vmatpush2.bf16.msra.mxu1 %v13043_v3  ;;  %v76_v63 = vld [vmem:[#allocation2 + $0xe8] sm:$0xff]  ;;  %v12733_v3 = vcombine.low %v208_v52, %v212_v55 }
  0x95   :  { %v13036_v5 = vcombine.high %v511_v0, %v515_v1  ;;  %v375_v6 = vld [vmem:[#allocation2 + $0xa40] sm:$0xff]  ;;  %3335 = vmatprep.subr.bf16.mxu0 %v12908_v4  ;;  %v13035_v11 = vcombine.low %v511_v0, %v515_v1  ;;  %v200_v0 = vld [vmem:[#allocation2 + $0x4c8] sm:$0xff]  ;;  %v12598_v4 = vcombine.high %v72_v62, %v76_v63 }
  0x96   :  { %v379_v7 = vld [vmem:[#allocation2 + $0xa60] sm:$0xff]  ;;  %3336 = vmatpush2.bf16.msra.mxu0 %v12907_v10  ;;  %v204_v1 = vld [vmem:[#allocation2 + $0x4e8] sm:$0xff]  ;;  %v12597_v10 = vcombine.low %v72_v62, %v76_v63 }
  0x97   :  { %v503_v8 = vld [vmem:[#allocation2 + $0xe40] sm:$0xff]  ;;  %v12900_v12 = vcombine.high %v375_v6, %v379_v7  ;;  %3376 = vmatprep.subr.bf16.mxu1 %v13036_v5  ;;  %v12899_v21 = vcombine.low %v375_v6, %v379_v7  ;;  %v12726_v5 = vcombine.high %v200_v0, %v204_v1  ;;  %v64_v6 = vld [vmem:[#allocation2 + $0x88] sm:$0xff] }
  0x98   :  { %v507_v9 = vld [vmem:[#allocation2 + $0xe60] sm:$0xff]  ;;  %3377 = vmatpush2.bf16.msra.mxu1 %v13035_v11  ;;  %v68_v7 = vld [vmem:[#allocation2 + $0xa8] sm:$0xff]  ;;  %v12725_v11 = vcombine.low %v200_v0, %v204_v1 }
  0x99   :  { %v13028_v13 = vcombine.high %v503_v8, %v507_v9  ;;  %v367_v14 = vld [vmem:[#allocation2 + $0xa00] sm:$0xff]  ;;  %3337 = vmatprep.subr.bf16.mxu0 %v12900_v12  ;;  %v13027_v53 = vcombine.low %v503_v8, %v507_v9  ;;  %v192_v8 = vld [vmem:[#allocation2 + $0x488] sm:$0xff]  ;;  %v12590_v12 = vcombine.high %v64_v6, %v68_v7 }
  0x9a   :  { %v371_v15 = vld [vmem:[#allocation2 + $0xa20] sm:$0xff]  ;;  %3338 = vmatpush2.bf16.msra.mxu0 %v12899_v21  ;;  %v196_v9 = vld [vmem:[#allocation2 + $0x4a8] sm:$0xff]  ;;  %v12589_v21 = vcombine.low %v64_v6, %v68_v7 }
  0x9b   :  { %v495_v17 = vld [vmem:[#allocation2 + $0xe00] sm:$0xff]  ;;  %v12892_v23 = vcombine.high %v367_v14, %v371_v15  ;;  %3378 = vmatprep.subr.bf16.mxu1 %v13028_v13  ;;  %v12891_v30 = vcombine.low %v367_v14, %v371_v15  ;;  %v12718_v13 = vcombine.high %v192_v8, %v196_v9  ;;  %v56_v14 = vld [vmem:[#allocation2 + $0x48] sm:$0xff] }
  0x9c   :  { %v499_v18 = vld [vmem:[#allocation2 + $0xe20] sm:$0xff]  ;;  %3379 = vmatpush2.bf16.msra.mxu1 %v13027_v53  ;;  %v60_v15 = vld [vmem:[#allocation2 + $0x68] sm:$0xff]  ;;  %v12717_v53 = vcombine.low %v192_v8, %v196_v9 }
  0x9d   :  { %v13020_v24 = vcombine.high %v495_v17, %v499_v18  ;;  %3339 = vmatprep.subr.bf16.mxu0 %v12892_v23  ;;  %v13019_v31 = vcombine.low %v495_v17, %v499_v18  ;;  %v184_v17 = vld [vmem:[#allocation2 + $0x448] sm:$0xff]  ;;  %v12582_v23 = vcombine.high %v56_v14, %v60_v15 }
  0x9e   :  { %3340 = vmatpush2.bf16.msra.mxu0 %v12891_v30  ;;  %v188_v18 = vld [vmem:[#allocation2 + $0x468] sm:$0xff]  ;;  %v12581_v30 = vcombine.low %v56_v14, %v60_v15 }
  0x9f   :  { %3380 = vmatprep.subr.bf16.mxu1 %v13020_v24  ;;  %3391 = vmatprep.subr.bf16.mxu0 %v12630_v32  ;;  %v12710_v24 = vcombine.high %v184_v17, %v188_v18  ;;  %v48_v25 = vld [vmem:[#allocation2 + $0x8] sm:$0xff] }
  0xa0   :  { %3381 = vmatpush2.bf16.msra.mxu1 %v13019_v31  ;;  %v52_v26 = vld [vmem:[#allocation2 + $0x28] sm:$0xff]  ;;  %v12709_v31 = vcombine.low %v184_v17, %v188_v18 }
  0xa1   :  { %3432 = vmatprep.subr.bf16.mxu1 %v12758_v33  ;;  %3342 = vmatmul.mubr.bf16.vlgmr.msra.gmra.mxu0 %v14320_v36  ;;  %v176_v54 = vld [vmem:[#allocation2 + $0x408] sm:$0xff]  ;;  %v12574_v32 = vcombine.high %v48_v25, %v52_v26 }
  0xa2   :  { %3392 = vmatpush1.bf16.msra.mxu0 %v12629_v40  ;;  %3423 = vmatprep.mubr.bf16.mxu0 %v14280_v58  ;;  %v180_v28 = vld [vmem:[#allocation2 + $0x428] sm:$0xff]  ;;  %v12573_v40 = vcombine.low %v48_v25, %v52_v26 }
  0xa3   :  { %3383 = vmatmul.mubr.bf16.vlgmr.msra.gmra.mxu1 %v14324_v39  ;;  %3393 = vmatprep.subr.bf16.mxu0 %v12622_v42  ;;  %v12702_v33 = vcombine.high %v176_v54, %v180_v28  ;;  %v168_v34 = vld [vmem:[#allocation2 + $0x3c8] sm:$0xff] }
  0xa4   :  { %3433 = vmatpush1.bf16.msra.mxu1 %v12757_v41  ;;  %3464 = vmatprep.mubr.bf16.mxu1 %v14284_v59  ;;  %v172_v35 = vld [vmem:[#allocation2 + $0x3e8] sm:$0xff]  ;;  %v12701_v41 = vcombine.low %v176_v54, %v180_v28 }
  0xa5   :  { %3434 = vmatprep.subr.bf16.mxu1 %v12750_v43  ;;  %v296_v37 = vld [vmem:[#allocation2 + $0x7c8] sm:$0xff]  ;;  %v12694_v42 = vcombine.high %v168_v34, %v172_v35 }
  0xa6   :  { %3394 = vmatpush1.bf16.msra.mxu0 %v12621_v47  ;;  %v300_v38 = vld [vmem:[#allocation2 + $0x7e8] sm:$0xff]  ;;  %v12693_v47 = vcombine.low %v168_v34, %v172_v35 }
  0xa7   :  { %3395 = vmatprep.subr.bf16.mxu0 %v12614_v48  ;;  %v12822_v43 = vcombine.high %v296_v37, %v300_v38  ;;  %v160_v44 = vld [vmem:[#allocation2 + $0x388] sm:$0xff] }
  0xa8   :  { %3435 = vmatpush1.bf16.msra.mxu1 %v12749_v22  ;;  %v164_v45 = vld [vmem:[#allocation2 + $0x3a8] sm:$0xff]  ;;  %v12821_v22 = vcombine.low %v296_v37, %v300_v38 }
  0xa9   :  { %3436 = vmatprep.subr.bf16.mxu1 %v12742_v49  ;;  %v288_v19 = vld [vmem:[#allocation2 + $0x788] sm:$0xff]  ;;  %v12686_v48 = vcombine.high %v160_v44, %v164_v45 }
  0xaa   :  { %3396 = vmatpush1.bf16.msra.mxu0 %v12613_v56  ;;  %v292_v46 = vld [vmem:[#allocation2 + $0x7a8] sm:$0xff]  ;;  %v12685_v56 = vcombine.low %v160_v44, %v164_v45 }
  0xab   :  { %3397 = vmatprep.subr.bf16.mxu0 %v12606_v60  ;;  %v12814_v49 = vcombine.high %v288_v19, %v292_v46  ;;  %v152_v50 = vld [vmem:[#allocation2 + $0x348] sm:$0xff] }
  0xac   :  { %3437 = vmatpush1.bf16.msra.mxu1 %v12741_v57  ;;  %v156_v51 = vld [vmem:[#allocation2 + $0x368] sm:$0xff]  ;;  %v12813_v57 = vcombine.low %v288_v19, %v292_v46 }
  0xad   :  { %3438 = vmatprep.subr.bf16.mxu1 %v12734_v61  ;;  %v280_v52 = vld [vmem:[#allocation2 + $0x748] sm:$0xff]  ;;  %v12678_v60 = vcombine.high %v152_v50, %v156_v51 }
  0xae   :  { %3398 = vmatpush1.bf16.msra.mxu0 %v12605_v2  ;;  %v284_v55 = vld [vmem:[#allocation2 + $0x768] sm:$0xff]  ;;  %v12677_v2 = vcombine.low %v152_v50, %v156_v51 }
  0xaf   :  { %3399 = vmatprep.subr.bf16.mxu0 %v12598_v4  ;;  %v12806_v61 = vcombine.high %v280_v52, %v284_v55  ;;  %v144_v62 = vld [vmem:[#allocation2 + $0x308] sm:$0xff] }
  0xb0   :  { %3439 = vmatpush1.bf16.msra.mxu1 %v12733_v3  ;;  %v148_v63 = vld [vmem:[#allocation2 + $0x328] sm:$0xff]  ;;  %v12805_v3 = vcombine.low %v280_v52, %v284_v55 }
  0xb1   :  { %3440 = vmatprep.subr.bf16.mxu1 %v12726_v5  ;;  %v272_v0 = vld [vmem:[#allocation2 + $0x708] sm:$0xff]  ;;  %v12670_v4 = vcombine.high %v144_v62, %v148_v63 }
  0xb2   :  { %3400 = vmatpush1.bf16.msra.mxu0 %v12597_v10  ;;  %v276_v1 = vld [vmem:[#allocation2 + $0x728] sm:$0xff]  ;;  %v12669_v10 = vcombine.low %v144_v62, %v148_v63 }
  0xb3   :  { %3401 = vmatprep.subr.bf16.mxu0 %v12590_v12  ;;  %v12798_v5 = vcombine.high %v272_v0, %v276_v1  ;;  %v136_v6 = vld [vmem:[#allocation2 + $0x2c8] sm:$0xff] }
  0xb4   :  { %3441 = vmatpush1.bf16.msra.mxu1 %v12725_v11  ;;  %v140_v7 = vld [vmem:[#allocation2 + $0x2e8] sm:$0xff]  ;;  %v12797_v11 = vcombine.low %v272_v0, %v276_v1 }
  0xb5   :  { %3442 = vmatprep.subr.bf16.mxu1 %v12718_v13  ;;  %v264_v8 = vld [vmem:[#allocation2 + $0x6c8] sm:$0xff]  ;;  %v12662_v12 = vcombine.high %v136_v6, %v140_v7 }
  0xb6   :  { %3402 = vmatpush1.bf16.msra.mxu0 %v12589_v21  ;;  %v268_v9 = vld [vmem:[#allocation2 + $0x6e8] sm:$0xff]  ;;  %v12661_v21 = vcombine.low %v136_v6, %v140_v7 }
  0xb7   :  { %3403 = vmatprep.subr.bf16.mxu0 %v12582_v23  ;;  %v12790_v13 = vcombine.high %v264_v8, %v268_v9  ;;  %v128_v14 = vld [vmem:[#allocation2 + $0x288] sm:$0xff] }
  0xb8   :  { %3443 = vmatpush1.bf16.msra.mxu1 %v12717_v53  ;;  %v132_v15 = vld [vmem:[#allocation2 + $0x2a8] sm:$0xff]  ;;  %v12789_v53 = vcombine.low %v264_v8, %v268_v9 }
  0xb9   :  { %3444 = vmatprep.subr.bf16.mxu1 %v12710_v24  ;;  %v256_v17 = vld [vmem:[#allocation2 + $0x688] sm:$0xff]  ;;  %v12654_v23 = vcombine.high %v128_v14, %v132_v15 }
  0xba   :  { %3404 = vmatpush1.bf16.msra.mxu0 %v12581_v30  ;;  %v260_v18 = vld [vmem:[#allocation2 + $0x6a8] sm:$0xff]  ;;  %v12653_v30 = vcombine.low %v128_v14, %v132_v15 }
  0xbb   :  { %3405 = vmatprep.subr.bf16.mxu0 %v12574_v32  ;;  %v12782_v24 = vcombine.high %v256_v17, %v260_v18  ;;  %v120_v25 = vld [vmem:[#allocation2 + $0x248] sm:$0xff] }
  0xbc   :  { %3445 = vmatpush1.bf16.msra.mxu1 %v12709_v31  ;;  %v124_v26 = vld [vmem:[#allocation2 + $0x268] sm:$0xff]  ;;  %v12781_v31 = vcombine.low %v256_v17, %v260_v18 }
  0xbd   :  { %3446 = vmatprep.subr.bf16.mxu1 %v12702_v33  ;;  %v248_v54 = vld [vmem:[#allocation2 + $0x648] sm:$0xff]  ;;  %v12646_v32 = vcombine.high %v120_v25, %v124_v26 }
  0xbe   :  { %3406 = vmatpush1.bf16.msra.mxu0 %v12573_v40  ;;  %v252_v28 = vld [vmem:[#allocation2 + $0x668] sm:$0xff]  ;;  %v12645_v40 = vcombine.low %v120_v25, %v124_v26 }
  0xbf   :  { %3407 = vmatprep.subr.bf16.mxu0 %v12694_v42  ;;  %v12774_v33 = vcombine.high %v248_v54, %v252_v28  ;;  %v112_v34 = vld [vmem:[#allocation2 + $0x208] sm:$0xff] }
  0xc0   :  { %3447 = vmatpush1.bf16.msra.mxu1 %v12701_v41  ;;  %v116_v35 = vld [vmem:[#allocation2 + $0x228] sm:$0xff]  ;;  %v12773_v41 = vcombine.low %v248_v54, %v252_v28 }
  0xc1   :  { %3448 = vmatprep.subr.bf16.mxu1 %v12822_v43  ;;  %v240_v37 = vld [vmem:[#allocation2 + $0x608] sm:$0xff]  ;;  %v12638_v42 = vcombine.high %v112_v34, %v116_v35 }
  0xc2   :  { %3408 = vmatpush2.bf16.msra.mxu0 %v12693_v47  ;;  %v244_v38 = vld [vmem:[#allocation2 + $0x628] sm:$0xff]  ;;  %v12637_v47 = vcombine.low %v112_v34, %v116_v35 }
  0xc3   :  { %3409 = vmatprep.subr.bf16.mxu0 %v12686_v48  ;;  %v12766_v43 = vcombine.high %v240_v37, %v244_v38  ;;  %v360_v44 = vld [vmem:[#allocation2 + $0x9c8] sm:$0xff] }
  0xc4   :  { %3449 = vmatpush2.bf16.msra.mxu1 %v12821_v22  ;;  %v364_v45 = vld [vmem:[#allocation2 + $0x9e8] sm:$0xff]  ;;  %v12765_v22 = vcombine.low %v240_v37, %v244_v38 }
  0xc5   :  { %3450 = vmatprep.subr.bf16.mxu1 %v12814_v49  ;;  %v488_v19 = vld [vmem:[#allocation2 + $0xdc8] sm:$0xff]  ;;  %v12886_v48 = vcombine.high %v360_v44, %v364_v45 }
  0xc6   :  { %3410 = vmatpush2.bf16.msra.mxu0 %v12685_v56  ;;  %v492_v46 = vld [vmem:[#allocation2 + $0xde8] sm:$0xff]  ;;  %v12885_v56 = vcombine.low %v360_v44, %v364_v45 }
  0xc7   :  { %3411 = vmatprep.subr.bf16.mxu0 %v12678_v60  ;;  %v13014_v49 = vcombine.high %v488_v19, %v492_v46  ;;  %v352_v50 = vld [vmem:[#allocation2 + $0x988] sm:$0xff] }
  0xc8   :  { %3451 = vmatpush2.bf16.msra.mxu1 %v12813_v57  ;;  %v356_v51 = vld [vmem:[#allocation2 + $0x9a8] sm:$0xff]  ;;  %v13013_v57 = vcombine.low %v488_v19, %v492_v46 }
  0xc9   :  { %3452 = vmatprep.subr.bf16.mxu1 %v12806_v61  ;;  %v480_v52 = vld [vmem:[#allocation2 + $0xd88] sm:$0xff]  ;;  %v12878_v60 = vcombine.high %v352_v50, %v356_v51 }
  0xca   :  { %3412 = vmatpush2.bf16.msra.mxu0 %v12677_v2  ;;  %v484_v55 = vld [vmem:[#allocation2 + $0xda8] sm:$0xff]  ;;  %v12877_v2 = vcombine.low %v352_v50, %v356_v51 }
  0xcb   :  { %3413 = vmatprep.subr.bf16.mxu0 %v12670_v4  ;;  %v13006_v61 = vcombine.high %v480_v52, %v484_v55  ;;  %v344_v62 = vld [vmem:[#allocation2 + $0x948] sm:$0xff] }
  0xcc   :  { %3453 = vmatpush2.bf16.msra.mxu1 %v12805_v3  ;;  %v348_v63 = vld [vmem:[#allocation2 + $0x968] sm:$0xff]  ;;  %v13005_v3 = vcombine.low %v480_v52, %v484_v55 }
  0xcd   :  { %3454 = vmatprep.subr.bf16.mxu1 %v12798_v5  ;;  %v472_v0 = vld [vmem:[#allocation2 + $0xd48] sm:$0xff]  ;;  %v12870_v4 = vcombine.high %v344_v62, %v348_v63 }
  0xce   :  { %3414 = vmatpush2.bf16.msra.mxu0 %v12669_v10  ;;  %v476_v1 = vld [vmem:[#allocation2 + $0xd68] sm:$0xff]  ;;  %v12869_v10 = vcombine.low %v344_v62, %v348_v63 }
  0xcf   :  { %3415 = vmatprep.subr.bf16.mxu0 %v12662_v12  ;;  %v12998_v5 = vcombine.high %v472_v0, %v476_v1  ;;  %v336_v6 = vld [vmem:[#allocation2 + $0x908] sm:$0xff] }
  0xd0   :  { %3455 = vmatpush2.bf16.msra.mxu1 %v12797_v11  ;;  %v340_v7 = vld [vmem:[#allocation2 + $0x928] sm:$0xff]  ;;  %v12997_v11 = vcombine.low %v472_v0, %v476_v1 }
  0xd1   :  { %3456 = vmatprep.subr.bf16.mxu1 %v12790_v13  ;;  %v464_v8 = vld [vmem:[#allocation2 + $0xd08] sm:$0xff]  ;;  %v12862_v12 = vcombine.high %v336_v6, %v340_v7 }
  0xd2   :  { %3416 = vmatpush2.bf16.msra.mxu0 %v12661_v21  ;;  %v468_v9 = vld [vmem:[#allocation2 + $0xd28] sm:$0xff]  ;;  %v12861_v21 = vcombine.low %v336_v6, %v340_v7 }
  0xd3   :  { %3417 = vmatprep.subr.bf16.mxu0 %v12654_v23  ;;  %v12990_v13 = vcombine.high %v464_v8, %v468_v9  ;;  %v328_v14 = vld [vmem:[#allocation2 + $0x8c8] sm:$0xff] }
  0xd4   :  { %3457 = vmatpush2.bf16.msra.mxu1 %v12789_v53  ;;  %v332_v15 = vld [vmem:[#allocation2 + $0x8e8] sm:$0xff]  ;;  %v12989_v53 = vcombine.low %v464_v8, %v468_v9 }
  0xd5   :  { %3458 = vmatprep.subr.bf16.mxu1 %v12782_v24  ;;  %v456_v17 = vld [vmem:[#allocation2 + $0xcc8] sm:$0xff]  ;;  %v12854_v23 = vcombine.high %v328_v14, %v332_v15 }
  0xd6   :  { %3418 = vmatpush2.bf16.msra.mxu0 %v12653_v30  ;;  %v460_v18 = vld [vmem:[#allocation2 + $0xce8] sm:$0xff]  ;;  %v12853_v30 = vcombine.low %v328_v14, %v332_v15 }
  0xd7   :  { %3419 = vmatprep.subr.bf16.mxu0 %v12646_v32  ;;  %v12982_v24 = vcombine.high %v456_v17, %v460_v18  ;;  %v320_v25 = vld [vmem:[#allocation2 + $0x888] sm:$0xff] }
  0xd8   :  { %3459 = vmatpush2.bf16.msra.mxu1 %v12781_v31  ;;  %v324_v26 = vld [vmem:[#allocation2 + $0x8a8] sm:$0xff]  ;;  %v12981_v31 = vcombine.low %v456_v17, %v460_v18 }
  0xd9   :  { %3460 = vmatprep.subr.bf16.mxu1 %v12774_v33  ;;  %v448_v54 = vld [vmem:[#allocation2 + $0xc88] sm:$0xff]  ;;  %v12846_v32 = vcombine.high %v320_v25, %v324_v26 }
  0xda   :  { %3420 = vmatpush2.bf16.msra.mxu0 %v12645_v40  ;;  %v452_v28 = vld [vmem:[#allocation2 + $0xca8] sm:$0xff]  ;;  %v12845_v40 = vcombine.low %v320_v25, %v324_v26 }
  0xdb   :  { %3421 = vmatprep.subr.bf16.mxu0 %v12638_v42  ;;  %v12974_v33 = vcombine.high %v448_v54, %v452_v28  ;;  %v312_v34 = vld [vmem:[#allocation2 + $0x848] sm:$0xff] }
  0xdc   :  { %3461 = vmatpush2.bf16.msra.mxu1 %v12773_v41  ;;  %v316_v35 = vld [vmem:[#allocation2 + $0x868] sm:$0xff]  ;;  %v12973_v41 = vcombine.low %v448_v54, %v452_v28 }
  0xdd   :  { %3462 = vmatprep.subr.bf16.mxu1 %v12766_v43  ;;  %v440_v37 = vld [vmem:[#allocation2 + $0xc48] sm:$0xff]  ;;  %v12838_v42 = vcombine.high %v312_v34, %v316_v35 }
  0xde   :  { %3422 = vmatpush2.bf16.msra.mxu0 %v12637_v47  ;;  %v444_v38 = vld [vmem:[#allocation2 + $0xc68] sm:$0xff]  ;;  %v12837_v47 = vcombine.low %v312_v34, %v316_v35 }
  0xdf   :  { %3473 = vmatprep.subr.bf16.mxu0 %v12886_v48  ;;  %v12966_v43 = vcombine.high %v440_v37, %v444_v38  ;;  %v304_v44 = vld [vmem:[#allocation2 + $0x808] sm:$0xff] }
  0xe0   :  { %3463 = vmatpush2.bf16.msra.mxu1 %v12765_v22  ;;  %v308_v45 = vld [vmem:[#allocation2 + $0x828] sm:$0xff]  ;;  %v12965_v22 = vcombine.low %v440_v37, %v444_v38 }
  0xe1   :  { %3514 = vmatprep.subr.bf16.mxu1 %v13014_v49  ;;  %3424 = vmatmul.mubr.bf16.vlgmr.msra.gmra.mxu0 %v14290_v16  ;;  %v432_v19 = vld [vmem:[#allocation2 + $0xc08] sm:$0xff]  ;;  %v12830_v48 = vcombine.high %v304_v44, %v308_v45 }
  0xe2   :  { %3474 = vmatpush1.bf16.msra.mxu0 %v12885_v56  ;;  %3505 = vmatprep.mubr.bf16.mxu0 %v14308_v27  ;;  %v436_v46 = vld [vmem:[#allocation2 + $0xc28] sm:$0xff]  ;;  %v12829_v56 = vcombine.low %v304_v44, %v308_v45 }
  0xe3   :  { %3465 = vmatmul.mubr.bf16.vlgmr.msra.gmra.mxu1 %v14299_v20  ;;  %3475 = vmatprep.subr.bf16.mxu0 %v12878_v60  ;;  %v12958_v49 = vcombine.high %v432_v19, %v436_v46  ;;  %v424_v50 = vld [vmem:[#allocation2 + $0xbc8] sm:$0xff] }
  0xe4   :  { %3515 = vmatpush1.bf16.msra.mxu1 %v13013_v57  ;;  %3546 = vmatprep.mubr.bf16.mxu1 %v14313_v29  ;;  %v428_v51 = vld [vmem:[#allocation2 + $0xbe8] sm:$0xff]  ;;  %v12957_v57 = vcombine.low %v432_v19, %v436_v46 }
  0xe5   :  { %3516 = vmatprep.subr.bf16.mxu1 %v13006_v61  ;;  %v552_v52 = vld [vmem:[#allocation2 + $0xfc8] sm:$0xff]  ;;  %v12950_v60 = vcombine.high %v424_v50, %v428_v51 }
  0xe6   :  { %3476 = vmatpush1.bf16.msra.mxu0 %v12877_v2  ;;  %v556_v55 = vld [vmem:[#allocation2 + $0xfe8] sm:$0xff]  ;;  %v12949_v2 = vcombine.low %v424_v50, %v428_v51 }
  0xe7   :  { %3477 = vmatprep.subr.bf16.mxu0 %v12870_v4  ;;  %v13078_v61 = vcombine.high %v552_v52, %v556_v55  ;;  %v416_v62 = vld [vmem:[#allocation2 + $0xb88] sm:$0xff] }
  0xe8   :  { %3517 = vmatpush1.bf16.msra.mxu1 %v13005_v3  ;;  %v420_v63 = vld [vmem:[#allocation2 + $0xba8] sm:$0xff]  ;;  %v13077_v3 = vcombine.low %v552_v52, %v556_v55 }
  0xe9   :  { %3518 = vmatprep.subr.bf16.mxu1 %v12998_v5  ;;  %v544_v0 = vld [vmem:[#allocation2 + $0xf88] sm:$0xff]  ;;  %v12942_v4 = vcombine.high %v416_v62, %v420_v63 }
  0xea   :  { %3478 = vmatpush1.bf16.msra.mxu0 %v12869_v10  ;;  %v548_v1 = vld [vmem:[#allocation2 + $0xfa8] sm:$0xff]  ;;  %v12941_v10 = vcombine.low %v416_v62, %v420_v63 }
  0xeb   :  { %3479 = vmatprep.subr.bf16.mxu0 %v12862_v12  ;;  %v13070_v5 = vcombine.high %v544_v0, %v548_v1  ;;  %v408_v6 = vld [vmem:[#allocation2 + $0xb48] sm:$0xff] }
  0xec   :  { %3519 = vmatpush1.bf16.msra.mxu1 %v12997_v11  ;;  %v412_v7 = vld [vmem:[#allocation2 + $0xb68] sm:$0xff]  ;;  %v13069_v11 = vcombine.low %v544_v0, %v548_v1  ;;  %v14339_v0 = vld [vmem:[#allocation5] sm:$0x77] }
  0xed   :  { %3520 = vmatprep.subr.bf16.mxu1 %v12990_v13  ;;  %v536_v8 = vld [vmem:[#allocation2 + $0xf48] sm:$0xff]  ;;  %v12934_v12 = vcombine.high %v408_v6, %v412_v7 }
  0xee   :  { %3480 = vmatpush1.bf16.msra.mxu0 %v12861_v21  ;;  %v540_v9 = vld [vmem:[#allocation2 + $0xf68] sm:$0xff]  ;;  %v12933_v21 = vcombine.low %v408_v6, %v412_v7  ;;  %v237_v6 = vld [vmem:[#allocation2 + $0x5f0] sm:$0xff] }
  0xef   :  { %3481 = vmatprep.subr.bf16.mxu0 %v12854_v23  ;;  %v13062_v13 = vcombine.high %v536_v8, %v540_v9  ;;  %v400_v14 = vld [vmem:[#allocation2 + $0xb08] sm:$0xff] }
  0xf0   :  { %3521 = vmatpush1.bf16.msra.mxu1 %v12989_v53  ;;  %v404_v15 = vld [vmem:[#allocation2 + $0xb28] sm:$0xff]  ;;  %v13061_v53 = vcombine.low %v536_v8, %v540_v9 }
  0xf1   :  { %3522 = vmatprep.subr.bf16.mxu1 %v12982_v24  ;;  %v528_v17 = vld [vmem:[#allocation2 + $0xf08] sm:$0xff]  ;;  %v12926_v23 = vcombine.high %v400_v14, %v404_v15 }
  0xf2   :  { %3482 = vmatpush1.bf16.msra.mxu0 %v12853_v30  ;;  %v532_v18 = vld [vmem:[#allocation2 + $0xf28] sm:$0xff]  ;;  %v12925_v30 = vcombine.low %v400_v14, %v404_v15  ;;  %v101_v14 = vld [vmem:[#allocation2 + $0x1b0] sm:$0xff] }
  0xf3   :  { %3483 = vmatprep.subr.bf16.mxu0 %v12846_v32  ;;  %v13054_v24 = vcombine.high %v528_v17, %v532_v18  ;;  %v392_v25 = vld [vmem:[#allocation2 + $0xac8] sm:$0xff]  ;;  %v225_v15 = vld [vmem:[#allocation2 + $0x590] sm:$0xff] }
  0xf4   :  { %3523 = vmatpush1.bf16.msra.mxu1 %v12981_v31  ;;  %v396_v26 = vld [vmem:[#allocation2 + $0xae8] sm:$0xff]  ;;  %v13053_v31 = vcombine.low %v528_v17, %v532_v18  ;;  %v229_v17 = vld [vmem:[#allocation2 + $0x5b0] sm:$0xff] }
  0xf5   :  { %3524 = vmatprep.subr.bf16.mxu1 %v12974_v33  ;;  %v520_v54 = vld [vmem:[#allocation2 + $0xec8] sm:$0xff]  ;;  %v12918_v32 = vcombine.high %v392_v25, %v396_v26 }
  0xf6   :  { %3484 = vmatpush1.bf16.msra.mxu0 %v12845_v40  ;;  %v524_v28 = vld [vmem:[#allocation2 + $0xee8] sm:$0xff]  ;;  %v12917_v40 = vcombine.low %v392_v25, %v396_v26  ;;  %v12752_v25 = vcombine.high %v225_v15, %v229_v17  ;;  %v89_v26 = vld [vmem:[#allocation2 + $0x150] sm:$0xff] }
  0xf7   :  { %3485 = vmatprep.subr.bf16.mxu0 %v12838_v42  ;;  %v13046_v33 = vcombine.high %v520_v54, %v524_v28  ;;  %v384_v34 = vld [vmem:[#allocation2 + $0xa88] sm:$0xff]  ;;  %v13045_v42 = vcombine.low %v520_v54, %v524_v28  ;;  %v93_v54 = vld [vmem:[#allocation2 + $0x170] sm:$0xff] }
  0xf8   :  { %3525 = vmatpush1.bf16.msra.mxu1 %v12973_v41  ;;  %v388_v35 = vld [vmem:[#allocation2 + $0xaa8] sm:$0xff]  ;;  %v567_v41 = vlaneseq }
  0xf9   :  { %3526 = vmatprep.subr.bf16.mxu1 %v12966_v43  ;;  %v512_v37 = vld [vmem:[#allocation2 + $0xe88] sm:$0xff]  ;;  %v12910_v43 = vcombine.high %v384_v34, %v388_v35 }
  0xfa   :  { %3486 = vmatpush1.bf16.msra.mxu0 %v12837_v47  ;;  %v516_v38 = vld [vmem:[#allocation2 + $0xea8] sm:$0xff] }
  0xfb   :  { %3487 = vmatprep.subr.bf16.mxu0 %v12830_v48  ;;  %v13038_v44 = vcombine.high %v512_v37, %v516_v38  ;;  %v376_v45 = vld [vmem:[#allocation2 + $0xa48] sm:$0xff]  ;;  %v14334_v48 = vshrl.u32 %v567_v41, 7 }
  0xfc   :  { %3527 = vmatpush1.bf16.msra.mxu1 %v12965_v22  ;;  %v380_v19 = vld [vmem:[#allocation2 + $0xa68] sm:$0xff]  ;;  %v12909_v22 = vcombine.low %v384_v34, %v388_v35 }
  0xfd   :  { %3528 = vmatprep.subr.bf16.mxu1 %v12958_v49  ;;  %v504_v46 = vld [vmem:[#allocation2 + $0xe48] sm:$0xff]  ;;  %v13037_v49 = vcombine.low %v512_v37, %v516_v38  ;;  %v12902_v50 = vcombine.high %v376_v45, %v380_v19  ;;  %v12751_v37 = vcombine.low %v225_v15, %v229_v17  ;;  %v12616_v38 = vcombine.high %v89_v26, %v93_v54  ;;  %v57_v15 = vld [vmem:[#allocation2 + $0x50] sm:$0xff] }
  0xfe   :  { %3488 = vmatpush1.bf16.msra.mxu0 %v12829_v56  ;;  %v508_v47 = vld [vmem:[#allocation2 + $0xe68] sm:$0xff]  ;;  %v61_v17 = vld [vmem:[#allocation2 + $0x70] sm:$0xff] }
  0xff   :  { %3489 = vmatprep.subr.bf16.mxu0 %v12950_v60  ;;  %v13030_v51 = vcombine.high %v504_v46, %v508_v47  ;;  %v368_v52 = vld [vmem:[#allocation2 + $0xa08] sm:$0xff]  ;;  %v12901_v60 = vcombine.low %v376_v45, %v380_v19  ;;  %v13029_v62 = vcombine.low %v504_v46, %v508_v47  ;;  %v85_v45 = vld [vmem:[#allocation2 + $0x130] sm:$0xff] }
 0x100   :  { %3529 = vmatpush1.bf16.msra.mxu1 %v12957_v57  ;;  %v372_v55 = vld [vmem:[#allocation2 + $0xa28] sm:$0xff]  ;;  %v209_v46 = vld [vmem:[#allocation2 + $0x510] sm:$0xff] }
 0x101   :  { %3530 = vmatprep.subr.bf16.mxu1 %v13078_v61  ;;  %v496_v56 = vld [vmem:[#allocation2 + $0xe08] sm:$0xff]  ;;  %v14337_v61 = vsub.s32 0, %v14334_v48  ;;  %v12894_v63 = vcombine.high %v368_v52, %v372_v55  ;;  %v12893_v7 = vcombine.low %v368_v52, %v372_v55  ;;  %v213_v47 = vld [vmem:[#allocation2 + $0x530] sm:$0xff] }
 0x102   :  { %3490 = vmatpush2.bf16.msra.mxu0 %v12949_v2  ;;  %v500_v57 = vld [vmem:[#allocation2 + $0xe28] sm:$0xff]  ;;  %v105_v2 = vld [vmem:[#allocation2 + $0x1d0] sm:$0xff] }
 0x103   :  { %3491 = vmatprep.subr.bf16.mxu0 %v12942_v4  ;;  %v13022_v1 = vcombine.high %v496_v56, %v500_v57  ;;  %v14342_v4 = vsub.s32 4, %v14334_v48  ;;  %v570_v8 = vrot.slane %v14339_v0, %v14337_v61  ;;  %v13021_v9 = vcombine.low %v496_v56, %v500_v57 }
 0x104   :  { %3531 = vmatpush2.bf16.msra.mxu1 %v13077_v3  ;;  %v109_v3 = vld [vmem:[#allocation2 + $0x1f0] sm:$0xff]  ;;  %v12736_v57 = vcombine.high %v209_v46, %v213_v47 }
 0x105   :  { %3532 = vmatprep.subr.bf16.mxu1 %v13070_v5  ;;  %v233_v5 = vld [vmem:[#allocation2 + $0x5d0] sm:$0xff]  ;;  %v610_v18 = vrot.slane %v570_v8, %v14337_v61 }
 0x106   :  { %3492 = vmatpush2.bf16.msra.mxu0 %v12941_v10  ;;  %v12632_v10 = vcombine.high %v105_v2, %v109_v3  ;;  %v69_v8 = vld [vmem:[#allocation2 + $0xb0] sm:$0xff] }
 0x107   :  { %3493 = vmatprep.subr.bf16.mxu0 %v12934_v12  ;;  %v574_v12 = vrot.slane %v14339_v0, %v14342_v4 }
 0x108   :  { %3533 = vmatpush2.bf16.msra.mxu1 %v13069_v11  ;;  %v12760_v11 = vcombine.high %v233_v5, %v237_v6 }
 0x109   :  { %3534 = vmatprep.subr.bf16.mxu1 %v13062_v13  ;;  %v97_v13 = vld [vmem:[#allocation2 + $0x190] sm:$0xff] }
 0x10a   :  { %3494 = vmatpush2.bf16.msra.mxu0 %v12933_v21  ;;  %v12631_v21 = vcombine.low %v105_v2, %v109_v3  ;;  %v12623_v34 = vcombine.low %v97_v13, %v101_v14  ;;  %v12735_v3 = vcombine.low %v209_v46, %v213_v47  ;;  %v165_v46 = vld [vmem:[#allocation2 + $0x3b0] sm:$0xff] }
 0x10b   :  { %3495 = vmatprep.subr.bf16.mxu0 %v12926_v23  ;;  %v12624_v23 = vcombine.high %v97_v13, %v101_v14  ;;  %v289_v47 = vld [vmem:[#allocation2 + $0x790] sm:$0xff] }
 0x10c   :  { %3535 = vmatpush2.bf16.msra.mxu1 %v13061_v53  ;;  %v12759_v53 = vcombine.low %v233_v5, %v237_v6 }
 0x10d   :  { %3536 = vmatprep.subr.bf16.mxu1 %v13054_v24  ;;  %v614_v24 = vrot.slane %v574_v12, %v14337_v61 }
 0x10e   :  { %3496 = vmatpush2.bf16.msra.mxu0 %v12925_v30  ;;  %v217_v30 = vld [vmem:[#allocation2 + $0x550] sm:$0xff] }
 0x10f   :  { %3497 = vmatprep.subr.bf16.mxu0 %v12918_v32 }
 0x110   :  { %3537 = vmatpush2.bf16.msra.mxu1 %v13053_v31  ;;  %v221_v31 = vld [vmem:[#allocation2 + $0x570] sm:$0xff] }
 0x111   :  { %3538 = vmatprep.subr.bf16.mxu1 %v13046_v33  ;;  %v12743_v52 = vcombine.low %v217_v30, %v221_v31 }
 0x112   :  { %3498 = vmatpush2.bf16.msra.mxu0 %v12917_v40 }
 0x113   :  { %3499 = vmatprep.subr.bf16.mxu0 %v12910_v43  ;;  %v12744_v43 = vcombine.high %v217_v30, %v221_v31  ;;  %v181_v30 = vld [vmem:[#allocation2 + $0x430] sm:$0xff]  ;;  %v12583_v31 = vcombine.low %v57_v15, %v61_v17 }
 0x114   :  { %3539 = vmatpush2.bf16.msra.mxu1 %v13045_v42 }
 0x115   :  { %3540 = vmatprep.subr.bf16.mxu1 %v13038_v44  ;;  %v81_v44 = vld [vmem:[#allocation2 + $0x110] sm:$0xff] }
 0x116   :  { %3500 = vmatpush2.bf16.msra.mxu0 %v12909_v22  ;;  %v12608_v55 = vcombine.high %v81_v44, %v85_v45  ;;  %v12607_v2 = vcombine.low %v81_v44, %v85_v45 }
 0x117   :  { %3501 = vmatprep.subr.bf16.mxu0 %v12902_v50  ;;  %v12615_v50 = vcombine.low %v89_v26, %v93_v54  ;;  %v49_v26 = vld [vmem:[#allocation2 + $0x10] sm:$0xff] }
 0x118   :  { %3541 = vmatpush2.bf16.msra.mxu1 %v13037_v49  ;;  %v53_v54 = vld [vmem:[#allocation2 + $0x30] sm:$0xff] }
 0x119   :  { %3542 = vmatprep.subr.bf16.mxu1 %v13030_v51 }
 0x11a   :  { %3502 = vmatpush2.bf16.msra.mxu0 %v12901_v60  ;;  %v73_v60 = vld [vmem:[#allocation2 + $0xd0] sm:$0xff] }
 0x11b   :  { %3503 = vmatprep.subr.bf16.mxu0 %v12894_v63  ;;  %v201_v63 = vld [vmem:[#allocation2 + $0x4d0] sm:$0xff] }
 0x11c   :  { %3543 = vmatpush2.bf16.msra.mxu1 %v13029_v62  ;;  %v77_v62 = vld [vmem:[#allocation2 + $0xf0] sm:$0xff] }
 0x11d   :  { %3544 = vmatprep.subr.bf16.mxu1 %v13022_v1  ;;  %v205_v1 = vld [vmem:[#allocation2 + $0x4f0] sm:$0xff]  ;;  %v12600_v5 = vcombine.high %v73_v60, %v77_v62 }
 0x11e   :  { %3504 = vmatpush2.bf16.msra.mxu0 %v12893_v7  ;;  %v12728_v6 = vcombine.high %v201_v63, %v205_v1  ;;  %v65_v7 = vld [vmem:[#allocation2 + $0x90] sm:$0xff]  ;;  %v12727_v12 = vcombine.low %v201_v63, %v205_v1 }
 0x11f   :  { %3555 = vmatprep.subr.bf16.mxu0 %v12632_v10  ;;  %v197_v10 = vld [vmem:[#allocation2 + $0x4b0] sm:$0xff]  ;;  %v12592_v13 = vcombine.high %v65_v7, %v69_v8 }
 0x120   :  { %3545 = vmatpush2.bf16.msra.mxu1 %v13021_v9  ;;  %v193_v9 = vld [vmem:[#allocation2 + $0x490] sm:$0xff] }
 0x121   :  { %3596 = vmatprep.subr.bf16.mxu1 %v12760_v11  ;;  %v3261_v28 = vpop.f32.mrf.mxu0  ;;  %3506 = vmatmul.mubr.bf16.vlgmr.msra.gmra.mxu0 %v14320_v36  ;;  %v12599_v11 = vcombine.low %v73_v60, %v77_v62  ;;  %v12720_v14 = vcombine.high %v193_v9, %v197_v10  ;;  %v281_v60 = vld [vmem:[#allocation2 + $0x750] sm:$0xff] }
 0x122   :  { %v3262_v32 = vadd.f32 %v3261_v28, %v610_v18  ;;  %3556 = vmatpush1.bf16.msra.mxu0 %v12631_v21  ;;  %3587 = vmatprep.mubr.bf16.mxu0 %v14280_v58  ;;  %v185_v18 = vld [vmem:[#allocation2 + $0x450] sm:$0xff] }
 0x123   :  { %v3302_v33 = vpop.f32.mrf.mxu1  ;;  %3547 = vmatmul.mubr.bf16.vlgmr.msra.gmra.mxu1 %v14324_v39  ;;  %v3263_v35 = vpop.f32.mrf.mxu0  ;;  %3557 = vmatprep.subr.bf16.mxu0 %v12624_v23  ;;  %v189_v21 = vld [vmem:[#allocation2 + $0x470] sm:$0xff]  ;;  %v12719_v23 = vcombine.low %v193_v9, %v197_v10 }
 0x124   :  { %3597 = vmatpush1.bf16.msra.mxu1 %v12759_v53  ;;  %v14352_v40 = vadd.f32 %v3302_v33, %v3262_v32  ;;  %v3264_v41 = vadd.f32 %v3263_v35, %v614_v24  ;;  %3628 = vmatprep.mubr.bf16.mxu1 %v14284_v59  ;;  %v12591_v53 = vcombine.low %v65_v7, %v69_v8  ;;  %v177_v28 = vld [vmem:[#allocation2 + $0x410] sm:$0xff] }
 0x125   :  { %v3304_v42 = vpop.f32.mrf.mxu1  ;;  %3598 = vmatprep.subr.bf16.mxu1 %v12752_v25  ;;  %v3265_v19 = vpop.f32.mrf.mxu0  ;;  %v12584_v24 = vcombine.high %v57_v15, %v61_v17  ;;  %v12712_v25 = vcombine.high %v185_v18, %v189_v21  ;;  %v12711_v32 = vcombine.low %v185_v18, %v189_v21  ;;  %v12576_v33 = vcombine.high %v49_v26, %v53_v54  ;;  %v169_v35 = vld [vmem:[#allocation2 + $0x3d0] sm:$0xff] }
 0x126   :  { %v14356_v22 = vadd.f32 %v3304_v42, %v3264_v41  ;;  %3558 = vmatpush1.bf16.msra.mxu0 %v12623_v34  ;;  %v12704_v34 = vcombine.high %v177_v28, %v181_v30  ;;  %v301_v41 = vld [vmem:[#allocation2 + $0x7f0] sm:$0xff]  ;;  %v12575_v42 = vcombine.low %v49_v26, %v53_v54 }
 0x127   :  { %v3306_v49 = vpop.f32.mrf.mxu1  ;;  %v3266_v51 = vpop.f32.mrf.mxu0  ;;  %3559 = vmatprep.subr.bf16.mxu0 %v12616_v38  ;;  %v297_v38 = vld [vmem:[#allocation2 + $0x7d0] sm:$0xff] }
 0x128   :  { %3599 = vmatpush1.bf16.msra.mxu1 %v12751_v37  ;;  %v173_v37 = vld [vmem:[#allocation2 + $0x3f0] sm:$0xff]  ;;  %v12824_v45 = vcombine.high %v297_v38, %v301_v41  ;;  %v12823_v51 = vcombine.low %v297_v38, %v301_v41 }
 0x129   :  { %v3307_v56 = vpop.f32.mrf.mxu1  ;;  %3600 = vmatprep.subr.bf16.mxu1 %v12744_v43  ;;  %v12703_v43 = vcombine.low %v177_v28, %v181_v30  ;;  %v12696_v44 = vcombine.high %v169_v35, %v173_v37  ;;  %v161_v19 = vld [vmem:[#allocation2 + $0x390] sm:$0xff] }
 0x12a   :  { %3560 = vmatpush1.bf16.msra.mxu0 %v12615_v50  ;;  %v293_v49 = vld [vmem:[#allocation2 + $0x7b0] sm:$0xff]  ;;  %v12695_v50 = vcombine.low %v169_v35, %v173_v37  ;;  %v12687_v63 = vcombine.low %v161_v19, %v165_v46 }
 0x12b   :  { %3561 = vmatprep.subr.bf16.mxu0 %v12608_v55  ;;  %v12816_v55 = vcombine.high %v289_v47, %v293_v49  ;;  %v153_v56 = vld [vmem:[#allocation2 + $0x350] sm:$0xff]  ;;  %v12815_v1 = vcombine.low %v289_v47, %v293_v49 }
 0x12c   :  { %3601 = vmatpush1.bf16.msra.mxu1 %v12743_v52  ;;  %v12688_v52 = vcombine.high %v161_v19, %v165_v46  ;;  %v285_v62 = vld [vmem:[#allocation2 + $0x770] sm:$0xff] }
 0x12d   :  { %3602 = vmatprep.subr.bf16.mxu1 %v12736_v57  ;;  %v157_v57 = vld [vmem:[#allocation2 + $0x370] sm:$0xff]  ;;  %v12807_v10 = vcombine.low %v281_v60, %v285_v62 }
 0x12e   :  { %3562 = vmatpush1.bf16.msra.mxu0 %v12607_v2  ;;  %v12680_v2 = vcombine.high %v153_v56, %v157_v57  ;;  %v273_v7 = vld [vmem:[#allocation2 + $0x710] sm:$0xff]  ;;  %v12679_v9 = vcombine.low %v153_v56, %v157_v57 }
 0x12f   :  { %3563 = vmatprep.subr.bf16.mxu0 %v12600_v5  ;;  %v145_v5 = vld [vmem:[#allocation2 + $0x310] sm:$0xff] }
 0x130   :  { %3603 = vmatpush1.bf16.msra.mxu1 %v12735_v3  ;;  %v12808_v3 = vcombine.high %v281_v60, %v285_v62  ;;  %v277_v8 = vld [vmem:[#allocation2 + $0x730] sm:$0xff] }
 0x131   :  { %3604 = vmatprep.subr.bf16.mxu1 %v12728_v6  ;;  %v149_v6 = vld [vmem:[#allocation2 + $0x330] sm:$0xff]  ;;  %v12799_v21 = vcombine.low %v273_v7, %v277_v8 }
 0x132   :  { %3564 = vmatpush1.bf16.msra.mxu0 %v12599_v11  ;;  %v12672_v11 = vcombine.high %v145_v5, %v149_v6  ;;  %v265_v15 = vld [vmem:[#allocation2 + $0x6d0] sm:$0xff]  ;;  %v12671_v18 = vcombine.low %v145_v5, %v149_v6 }
 0x133   :  { %3565 = vmatprep.subr.bf16.mxu0 %v12592_v13  ;;  %v137_v13 = vld [vmem:[#allocation2 + $0x2d0] sm:$0xff] }
 0x134   :  { %3605 = vmatpush1.bf16.msra.mxu1 %v12727_v12  ;;  %v12800_v12 = vcombine.high %v273_v7, %v277_v8  ;;  %v269_v17 = vld [vmem:[#allocation2 + $0x6f0] sm:$0xff] }
 0x135   :  { %3606 = vmatprep.subr.bf16.mxu1 %v12720_v14  ;;  %v141_v14 = vld [vmem:[#allocation2 + $0x2f0] sm:$0xff]  ;;  %v12791_v30 = vcombine.low %v265_v15, %v269_v17 }
 0x136   :  { %3566 = vmatpush1.bf16.msra.mxu0 %v12591_v53  ;;  %v12664_v53 = vcombine.high %v137_v13, %v141_v14  ;;  %v257_v26 = vld [vmem:[#allocation2 + $0x690] sm:$0xff]  ;;  %v12663_v28 = vcombine.low %v137_v13, %v141_v14 }
 0x137   :  { %3567 = vmatprep.subr.bf16.mxu0 %v12584_v24  ;;  %v129_v24 = vld [vmem:[#allocation2 + $0x290] sm:$0xff] }
 0x138   :  { %3607 = vmatpush1.bf16.msra.mxu1 %v12719_v23  ;;  %v12792_v23 = vcombine.high %v265_v15, %v269_v17  ;;  %v261_v54 = vld [vmem:[#allocation2 + $0x6b0] sm:$0xff] }
 0x139   :  { %3608 = vmatprep.subr.bf16.mxu1 %v12712_v25  ;;  %v133_v25 = vld [vmem:[#allocation2 + $0x2b0] sm:$0xff]  ;;  %v12783_v41 = vcombine.low %v257_v26, %v261_v54 }
 0x13a   :  { %3568 = vmatpush1.bf16.msra.mxu0 %v12583_v31  ;;  %v12656_v31 = vcombine.high %v129_v24, %v133_v25  ;;  %v249_v35 = vld [vmem:[#allocation2 + $0x650] sm:$0xff]  ;;  %v12655_v38 = vcombine.low %v129_v24, %v133_v25 }
 0x13b   :  { %3569 = vmatprep.subr.bf16.mxu0 %v12576_v33  ;;  %v121_v33 = vld [vmem:[#allocation2 + $0x250] sm:$0xff] }
 0x13c   :  { %3609 = vmatpush1.bf16.msra.mxu1 %v12711_v32  ;;  %v12784_v32 = vcombine.high %v257_v26, %v261_v54  ;;  %v253_v37 = vld [vmem:[#allocation2 + $0x670] sm:$0xff] }
 0x13d   :  { %3610 = vmatprep.subr.bf16.mxu1 %v12704_v34  ;;  %v125_v34 = vld [vmem:[#allocation2 + $0x270] sm:$0xff]  ;;  %v12775_v49 = vcombine.low %v249_v35, %v253_v37 }
 0x13e   :  { %3570 = vmatpush1.bf16.msra.mxu0 %v12575_v42  ;;  %v12648_v42 = vcombine.high %v121_v33, %v125_v34  ;;  %v241_v19 = vld [vmem:[#allocation2 + $0x610] sm:$0xff]  ;;  %v12647_v47 = vcombine.low %v121_v33, %v125_v34 }
 0x13f   :  { %3571 = vmatprep.subr.bf16.mxu0 %v12696_v44  ;;  %v113_v44 = vld [vmem:[#allocation2 + $0x210] sm:$0xff] }
 0x140   :  { %3611 = vmatpush1.bf16.msra.mxu1 %v12703_v43  ;;  %v12776_v43 = vcombine.high %v249_v35, %v253_v37  ;;  %v245_v46 = vld [vmem:[#allocation2 + $0x630] sm:$0xff] }
 0x141   :  { %3612 = vmatprep.subr.bf16.mxu1 %v12824_v45  ;;  %v117_v45 = vld [vmem:[#allocation2 + $0x230] sm:$0xff]  ;;  %v12767_v62 = vcombine.low %v241_v19, %v245_v46 }
 0x142   :  { %3572 = vmatpush2.bf16.msra.mxu0 %v12695_v50  ;;  %v12640_v50 = vcombine.high %v113_v44, %v117_v45  ;;  %v489_v56 = vld [vmem:[#allocation2 + $0xdd0] sm:$0xff]  ;;  %v12639_v60 = vcombine.low %v113_v44, %v117_v45 }
 0x143   :  { %3573 = vmatprep.subr.bf16.mxu0 %v12688_v52  ;;  %v361_v52 = vld [vmem:[#allocation2 + $0x9d0] sm:$0xff] }
 0x144   :  { %3613 = vmatpush2.bf16.msra.mxu1 %v12823_v51  ;;  %v12768_v51 = vcombine.high %v241_v19, %v245_v46  ;;  %v493_v57 = vld [vmem:[#allocation2 + $0xdf0] sm:$0xff] }
 0x145   :  { %3614 = vmatprep.subr.bf16.mxu1 %v12816_v55  ;;  %v365_v55 = vld [vmem:[#allocation2 + $0x9f0] sm:$0xff]  ;;  %v13015_v8 = vcombine.low %v489_v56, %v493_v57 }
 0x146   :  { %3574 = vmatpush2.bf16.msra.mxu0 %v12687_v63  ;;  %v12888_v63 = vcombine.high %v361_v52, %v365_v55  ;;  %v481_v5 = vld [vmem:[#allocation2 + $0xd90] sm:$0xff]  ;;  %v12887_v7 = vcombine.low %v361_v52, %v365_v55 }
 0x147   :  { %3575 = vmatprep.subr.bf16.mxu0 %v12680_v2  ;;  %v353_v2 = vld [vmem:[#allocation2 + $0x990] sm:$0xff] }
 0x148   :  { %3615 = vmatpush2.bf16.msra.mxu1 %v12815_v1  ;;  %v13016_v1 = vcombine.high %v489_v56, %v493_v57  ;;  %v485_v6 = vld [vmem:[#allocation2 + $0xdb0] sm:$0xff] }
 0x149   :  { %3616 = vmatprep.subr.bf16.mxu1 %v12808_v3  ;;  %v357_v3 = vld [vmem:[#allocation2 + $0x9b0] sm:$0xff] }
 0x14a   :  { %3576 = vmatpush2.bf16.msra.mxu0 %v12679_v9  ;;  %v12880_v9 = vcombine.high %v353_v2, %v357_v3  ;;  %v473_v14 = vld [vmem:[#allocation2 + $0xd50] sm:$0xff] }
 0x14b   :  { %3577 = vmatprep.subr.bf16.mxu0 %v12672_v11  ;;  %v345_v11 = vld [vmem:[#allocation2 + $0x950] sm:$0xff] }
 0x14c   :  { %3617 = vmatpush2.bf16.msra.mxu1 %v12807_v10  ;;  %v13008_v10 = vcombine.high %v481_v5, %v485_v6  ;;  %v477_v15 = vld [vmem:[#allocation2 + $0xd70] sm:$0xff] }
 0x14d   :  { %3618 = vmatprep.subr.bf16.mxu1 %v12800_v12  ;;  %v349_v12 = vld [vmem:[#allocation2 + $0x970] sm:$0xff] }
 0x14e   :  { %3578 = vmatpush2.bf16.msra.mxu0 %v12671_v18  ;;  %v12872_v24 = vcombine.high %v345_v11, %v349_v12  ;;  %v469_v33 = vld [vmem:[#allocation2 + $0xd30] sm:$0xff] }
 0x14f   :  { %3579 = vmatprep.subr.bf16.mxu0 %v12664_v53  ;;  %v329_v46 = vld [vmem:[#allocation2 + $0x8d0] sm:$0xff] }
 0x150   :  { %3619 = vmatpush2.bf16.msra.mxu1 %v12799_v21  ;;  %v12879_v21 = vcombine.low %v353_v2, %v357_v3  ;;  %v325_v2 = vld [vmem:[#allocation2 + $0x8b0] sm:$0xff] }
 0x151   :  { %3620 = vmatprep.subr.bf16.mxu1 %v12792_v23  ;;  %v13007_v23 = vcombine.low %v481_v5, %v485_v6  ;;  %v449_v3 = vld [vmem:[#allocation2 + $0xc90] sm:$0xff] }
 0x152   :  { %3580 = vmatpush2.bf16.msra.mxu0 %v12663_v28  ;;  %v13000_v28 = vcombine.high %v473_v14, %v477_v15  ;;  %v453_v5 = vld [vmem:[#allocation2 + $0xcb0] sm:$0xff] }
 0x153   :  { %3581 = vmatprep.subr.bf16.mxu0 %v12656_v31  ;;  %v341_v31 = vld [vmem:[#allocation2 + $0x930] sm:$0xff] }
 0x154   :  { %3621 = vmatpush2.bf16.msra.mxu1 %v12791_v30  ;;  %v337_v30 = vld [vmem:[#allocation2 + $0x910] sm:$0xff] }
 0x155   :  { %3622 = vmatprep.subr.bf16.mxu1 %v12784_v32  ;;  %v465_v32 = vld [vmem:[#allocation2 + $0xd10] sm:$0xff]  ;;  %v12863_v55 = vcombine.low %v337_v30, %v341_v31 }
 0x156   :  { %3582 = vmatpush2.bf16.msra.mxu0 %v12655_v38  ;;  %v12871_v38 = vcombine.low %v345_v11, %v349_v12  ;;  %v12992_v19 = vcombine.high %v465_v32, %v469_v33  ;;  %v12991_v56 = vcombine.low %v465_v32, %v469_v33  ;;  %v433_v32 = vld [vmem:[#allocation2 + $0xc10] sm:$0xff] }
 0x157   :  { %3583 = vmatprep.subr.bf16.mxu0 %v12648_v42  ;;  %v12864_v42 = vcombine.high %v337_v30, %v341_v31  ;;  %v305_v31 = vld [vmem:[#allocation2 + $0x810] sm:$0xff] }
 0x158   :  { %3623 = vmatpush2.bf16.msra.mxu1 %v12783_v41  ;;  %v12999_v41 = vcombine.low %v473_v14, %v477_v15  ;;  %v313_v14 = vld [vmem:[#allocation2 + $0x850] sm:$0xff] }
 0x159   :  { %3624 = vmatprep.subr.bf16.mxu1 %v12776_v43  ;;  %v317_v15 = vld [vmem:[#allocation2 + $0x870] sm:$0xff] }
 0x15a   :  { %3584 = vmatpush2.bf16.msra.mxu0 %v12647_v47  ;;  %v333_v47 = vld [vmem:[#allocation2 + $0x8f0] sm:$0xff] }
 0x15b   :  { %3585 = vmatprep.subr.bf16.mxu0 %v12640_v50  ;;  %v461_v50 = vld [vmem:[#allocation2 + $0xcf0] sm:$0xff]  ;;  %v12856_v57 = vcombine.high %v329_v46, %v333_v47 }
 0x15c   :  { %3625 = vmatpush2.bf16.msra.mxu1 %v12775_v49  ;;  %v457_v49 = vld [vmem:[#allocation2 + $0xcd0] sm:$0xff] }
 0x15d   :  { %3626 = vmatprep.subr.bf16.mxu1 %v12768_v51  ;;  %v437_v33 = vld [vmem:[#allocation2 + $0xc30] sm:$0xff] }
 0x15e   :  { %3586 = vmatpush2.bf16.msra.mxu0 %v12639_v60 }
 0x15f   :  { %3637 = vmatprep.subr.bf16.mxu0 %v12888_v63  ;;  %v12984_v63 = vcombine.high %v457_v49, %v461_v50 }
 0x160   :  { %3627 = vmatpush2.bf16.msra.mxu1 %v12767_v62 }
 0x161   :  { %3678 = vmatprep.subr.bf16.mxu1 %v13016_v1  ;;  %v3343_v13 = vpop.f32.mrf.mxu0  ;;  %3588 = vmatmul.mubr.bf16.vlgmr.msra.gmra.mxu0 %v14290_v16  ;;  %v321_v1 = vld [vmem:[#allocation2 + $0x890] sm:$0xff] }
 0x162   :  { %v3344_v17 = vadd.f32 %v3343_v13, %v14352_v40  ;;  %3638 = vmatpush1.bf16.msra.mxu0 %v12887_v7  ;;  %3669 = vmatprep.mubr.bf16.mxu0 %v14308_v27  ;;  %v12976_v13 = vcombine.high %v449_v3, %v453_v5 }
 0x163   :  { %v3384_v18 = vpop.f32.mrf.mxu1  ;;  %3629 = vmatmul.mubr.bf16.vlgmr.msra.gmra.mxu1 %v14299_v20  ;;  %v3345_v53 = vpop.f32.mrf.mxu0  ;;  %3639 = vmatprep.subr.bf16.mxu0 %v12880_v9  ;;  %v12983_v9 = vcombine.low %v457_v49, %v461_v50  ;;  %v12959_v50 = vcombine.low %v433_v32, %v437_v33 }
 0x164   :  { %3679 = vmatpush1.bf16.msra.mxu1 %v13015_v8  ;;  %v14361_v25 = vadd.f32 %v3384_v18, %v3344_v17  ;;  %v3346_v26 = vadd.f32 %v3345_v53, %v14356_v22  ;;  %3710 = vmatprep.mubr.bf16.mxu1 %v14313_v29  ;;  %v12855_v8 = vcombine.low %v329_v46, %v333_v47  ;;  %v441_v17 = vld [vmem:[#allocation2 + $0xc50] sm:$0xff] }
 0x165   :  { %v3386_v54 = vpop.f32.mrf.mxu1  ;;  %3680 = vmatprep.subr.bf16.mxu1 %v13008_v10  ;;  %v3347_v40 = vpop.f32.mrf.mxu0  ;;  %v12848_v10 = vcombine.high %v321_v1, %v325_v2  ;;  %v445_v18 = vld [vmem:[#allocation2 + $0xc70] sm:$0xff] }
 0x166   :  { %v3883_v34 = vrot.slane %v14361_v25, 4  ;;  %v14367_v35 = vadd.f32 %v3386_v54, %v3346_v26  ;;  %3640 = vmatpush1.bf16.msra.mxu0 %v12879_v21  ;;  %v12840_v26 = vcombine.high %v313_v14, %v317_v15  ;;  %v12968_v30 = vcombine.high %v441_v17, %v445_v18  ;;  %v309_v40 = vld [vmem:[#allocation2 + $0x830] sm:$0xff] }
 0x167   :  { %v3388_v37 = vpop.f32.mrf.mxu1  ;;  %v3348_v22 = vpop.f32.mrf.mxu0  ;;  %3641 = vmatprep.subr.bf16.mxu0 %v12872_v24  ;;  %v12975_v24 = vcombine.low %v449_v3, %v453_v5  ;;  %v557_v46 = vld [vmem:[#allocation2 + $0xff0] sm:$0xff] }
 0x168   :  { %3681 = vmatpush1.bf16.msra.mxu1 %v13007_v23  ;;  %v3884_v43 = vadd.f32 %v3883_v34, %v14361_v25  ;;  %v3889_v44 = vrot.slane %v14367_v35, 4  ;;  %v12847_v23 = vcombine.low %v321_v1, %v325_v2  ;;  %v12967_v22 = vcombine.low %v441_v17, %v445_v18 }
 0x169   :  { %v3389_v45 = vpop.f32.mrf.mxu1  ;;  %3682 = vmatprep.subr.bf16.mxu1 %v13000_v28 }
 0x16a   :  { %v3885_v51 = vrot.slane %v3884_v43, 2  ;;  %v3890_v52 = vadd.f32 %v3889_v44, %v14367_v35  ;;  %3642 = vmatpush1.bf16.msra.mxu0 %v12871_v38  ;;  %v12839_v38 = vcombine.low %v313_v14, %v317_v15  ;;  %v425_v44 = vld [vmem:[#allocation2 + $0xbd0] sm:$0xff] }
 0x16b   :  { %3643 = vmatprep.subr.bf16.mxu0 %v12864_v42  ;;  %v429_v45 = vld [vmem:[#allocation2 + $0xbf0] sm:$0xff] }
 0x16c   :  { %3683 = vmatpush1.bf16.msra.mxu1 %v12999_v41  ;;  %v3886_v60 = vadd.f32 %v3885_v51, %v3884_v43  ;;  %v3891_v62 = vrot.slane %v3890_v52, 2  ;;  %v12960_v43 = vcombine.high %v433_v32, %v437_v33  ;;  %v12952_v51 = vcombine.high %v425_v44, %v429_v45 }
 0x16d   :  { %3684 = vmatprep.subr.bf16.mxu1 %v12992_v19  ;;  %v553_v19 = vld [vmem:[#allocation2 + $0xfd0] sm:$0xff]  ;;  %v12951_v3 = vcombine.low %v425_v44, %v429_v45 }
 0x16e   :  { %v3887_v6 = vrot.slane %v3886_v60, 1  ;;  %v3892_v7 = vadd.f32 %v3891_v62, %v3890_v52  ;;  %3644 = vmatpush1.bf16.msra.mxu0 %v12863_v55  ;;  %v545_v62 = vld [vmem:[#allocation2 + $0xf90] sm:$0xff]  ;;  %v13079_v5 = vcombine.low %v553_v19, %v557_v46 }
 0x16f   :  { %3645 = vmatprep.subr.bf16.mxu0 %v12856_v57  ;;  %v417_v57 = vld [vmem:[#allocation2 + $0xb90] sm:$0xff] }
 0x170   :  { %3685 = vmatpush1.bf16.msra.mxu1 %v12991_v56  ;;  %v3888_v11 = vadd.f32 %v3887_v6, %v3886_v60  ;;  %v3893_v12 = vrot.slane %v3892_v7, 1  ;;  %v13080_v56 = vcombine.high %v553_v19, %v557_v46  ;;  %v421_v60 = vld [vmem:[#allocation2 + $0xbb0] sm:$0xff] }
 0x171   :  { %3686 = vmatprep.subr.bf16.mxu1 %v12984_v63  ;;  %v549_v63 = vld [vmem:[#allocation2 + $0xfb0] sm:$0xff]  ;;  %v12944_v6 = vcombine.high %v417_v57, %v421_v60  ;;  %v12943_v17 = vcombine.low %v417_v57, %v421_v60 }
 0x172   :  { %v3931_v21 = vmul.f32 0.125, %v3888_v11  ;;  %v3894_v53 = vadd.f32 %v3893_v12, %v3892_v7  ;;  %3646 = vmatpush1.bf16.msra.mxu0 %v12855_v8  ;;  %v413_v11 = vld [vmem:[#allocation2 + $0xb70] sm:$0xff]  ;;  %v13071_v18 = vcombine.low %v545_v62, %v549_v63 }
 0x173   :  { %3647 = vmatprep.subr.bf16.mxu0 %v12848_v10  ;;  %v409_v10 = vld [vmem:[#allocation2 + $0xb50] sm:$0xff] }
 0x174   :  { %3687 = vmatpush1.bf16.msra.mxu1 %v12983_v9  ;;  %v14373_v54 = vsub.f32 %v14361_v25, %v3931_v21  ;;  %v3932_v28 = vmul.f32 0.125, %v3894_v53  ;;  %v12832_v25 = vcombine.high %v305_v31, %v309_v40  ;;  %v13072_v9 = vcombine.high %v545_v62, %v549_v63  ;;  %v537_v12 = vld [vmem:[#allocation2 + $0xf50] sm:$0xff] }
 0x175   :  { %3688 = vmatprep.subr.bf16.mxu1 %v12976_v13  ;;  %v541_v13 = vld [vmem:[#allocation2 + $0xf70] sm:$0xff]  ;;  %v12936_v21 = vcombine.high %v409_v10, %v413_v11  ;;  %v12935_v33 = vcombine.low %v409_v10, %v413_v11 }
 0x176   :  { %v3947_v34 = vmul.f32 %v14373_v54, %v14373_v54  ;;  %v14378_v37 = vsub.f32 %v14367_v35, %v3932_v28  ;;  %3648 = vmatpush1.bf16.msra.mxu0 %v12847_v23  ;;  %v12831_v35 = vcombine.low %v305_v31, %v309_v40  ;;  %v405_v28 = vld [vmem:[#allocation2 + $0xb30] sm:$0xff] }
 0x177   :  { %3649 = vmatprep.subr.bf16.mxu0 %v12840_v26  ;;  %v401_v26 = vld [vmem:[#allocation2 + $0xb10] sm:$0xff] }
 0x178   :  { %3689 = vmatpush1.bf16.msra.mxu1 %v12975_v24  ;;  %v3955_v41 = vrot.slane %v3947_v34, 4  ;;  %v3948_v42 = vmul.f32 %v14378_v37, %v14378_v37  ;;  %v13064_v24 = vcombine.high %v537_v12, %v541_v13  ;;  %v533_v31 = vld [vmem:[#allocation2 + $0xf30] sm:$0xff]  ;;  %v12927_v45 = vcombine.low %v401_v26, %v405_v28 }
 0x179   :  { %3690 = vmatprep.subr.bf16.mxu1 %v12968_v30  ;;  %v529_v30 = vld [vmem:[#allocation2 + $0xf10] sm:$0xff] }
 0x17a   :  { %v3956_v47 = vadd.f32 %v3955_v41, %v3947_v34  ;;  %v3961_v49 = vrot.slane %v3948_v42, 4  ;;  %3650 = vmatpush1.bf16.msra.mxu0 %v12839_v38  ;;  %v13063_v34 = vcombine.low %v537_v12, %v541_v13  ;;  %v12928_v38 = vcombine.high %v401_v26, %v405_v28  ;;  %v393_v41 = vld [vmem:[#allocation2 + $0xad0] sm:$0xff] }
 0x17b   :  { %3651 = vmatprep.subr.bf16.mxu0 %v12832_v25  ;;  %v13056_v25 = vcombine.high %v529_v30, %v533_v31  ;;  %v525_v44 = vld [vmem:[#allocation2 + $0xef0] sm:$0xff]  ;;  %v13055_v19 = vcombine.low %v529_v30, %v533_v31  ;;  %v14383_v28 = vsub.s32 1, %v14334_v48  ;;  %v14386_v30 = vsub.s32 5, %v14334_v48 }
 0x17c   :  { %3691 = vmatpush1.bf16.msra.mxu1 %v12967_v22  ;;  %v3957_v52 = vrot.slane %v3956_v47, 2  ;;  %v3962_v55 = vadd.f32 %v3961_v49, %v3948_v42  ;;  %v397_v42 = vld [vmem:[#allocation2 + $0xaf0] sm:$0xff] }
 0x17d   :  { %3692 = vmatprep.subr.bf16.mxu1 %v12960_v43  ;;  %v521_v43 = vld [vmem:[#allocation2 + $0xed0] sm:$0xff]  ;;  %v12920_v46 = vcombine.high %v393_v41, %v397_v42 }
 0x17e   :  { %v3958_v1 = vadd.f32 %v3957_v52, %v3956_v47  ;;  %v3963_v2 = vrot.slane %v3962_v55, 2  ;;  %3652 = vmatpush1.bf16.msra.mxu0 %v12831_v35  ;;  %v13048_v47 = vcombine.high %v521_v43, %v525_v44  ;;  %v385_v49 = vld [vmem:[#allocation2 + $0xa90] sm:$0xff]  ;;  %v12919_v52 = vcombine.low %v393_v41, %v397_v42  ;;  %v230_v41 = vld [vmem:[#allocation2 + $0x5b8] sm:$0xff] }
 0x17f   :  { %3653 = vmatprep.subr.bf16.mxu0 %v12952_v51  ;;  %v389_v35 = vld [vmem:[#allocation2 + $0xab0] sm:$0xff] }
 0x180   :  { %3693 = vmatpush1.bf16.msra.mxu1 %v12959_v50  ;;  %v3959_v7 = vrot.slane %v3958_v1, 1  ;;  %v3964_v8 = vadd.f32 %v3963_v2, %v3962_v55  ;;  %v513_v50 = vld [vmem:[#allocation2 + $0xe90] sm:$0xff]  ;;  %v13047_v55 = vcombine.low %v521_v43, %v525_v44  ;;  %v12911_v2 = vcombine.low %v385_v49, %v389_v35 }
 0x181   :  { %3694 = vmatprep.subr.bf16.mxu1 %v13080_v56  ;;  %v517_v51 = vld [vmem:[#allocation2 + $0xeb0] sm:$0xff]  ;;  %v12912_v56 = vcombine.high %v385_v49, %v389_v35  ;;  %v94_v49 = vld [vmem:[#allocation2 + $0x178] sm:$0xff] }
 0x182   :  { %v3960_v14 = vadd.f32 %v3959_v7, %v3958_v1  ;;  %v3965_v15 = vrot.slane %v3964_v8, 1  ;;  %3654 = vmatpush2.bf16.msra.mxu0 %v12951_v3  ;;  %v13040_v57 = vcombine.high %v513_v50, %v517_v51  ;;  %v377_v60 = vld [vmem:[#allocation2 + $0xa50] sm:$0xff]  ;;  %v13039_v3 = vcombine.low %v513_v50, %v517_v51  ;;  %v218_v51 = vld [vmem:[#allocation2 + $0x558] sm:$0xff] }
 0x183   :  { %3655 = vmatprep.subr.bf16.mxu0 %v12944_v6  ;;  %v381_v62 = vld [vmem:[#allocation2 + $0xa70] sm:$0xff] }
 0x184   :  { %3695 = vmatpush2.bf16.msra.mxu1 %v13079_v5  ;;  %v4003_v53 = vmul.f32 0.125, %v3960_v14  ;;  %v3966_v23 = vadd.f32 %v3965_v15, %v3964_v8  ;;  %v505_v63 = vld [vmem:[#allocation2 + $0xe50] sm:$0xff]  ;;  %v12904_v5 = vcombine.high %v377_v60, %v381_v62  ;;  %v12903_v12 = vcombine.low %v377_v60, %v381_v62 }
 0x185   :  { %3696 = vmatprep.subr.bf16.mxu1 %v13072_v9  ;;  %v509_v1 = vld [vmem:[#allocation2 + $0xe70] sm:$0xff] }
 0x186   :  { %v4011_v40 = vadd.f32 1e-05, %v4003_v53  ;;  %v4004_v32 = vmul.f32 0.125, %v3966_v23  ;;  %3656 = vmatpush2.bf16.msra.mxu0 %v12943_v17  ;;  %v13032_v6 = vcombine.high %v505_v63, %v509_v1  ;;  %v369_v7 = vld [vmem:[#allocation2 + $0xa10] sm:$0xff]  ;;  %v13031_v14 = vcombine.low %v505_v63, %v509_v1  ;;  %v110_v53 = vld [vmem:[#allocation2 + $0x1f8] sm:$0xff] }
 0x187   :  { %3657 = vmatprep.subr.bf16.mxu0 %v12936_v21  ;;  %v373_v8 = vld [vmem:[#allocation2 + $0xa30] sm:$0xff]  ;;  %v106_v21 = vld [vmem:[#allocation2 + $0x1d8] sm:$0xff] }
 0x188   :  { %3697 = vmatpush2.bf16.msra.mxu1 %v13071_v18  ;;  %v4012_v22 = vadd.f32 1e-05, %v4004_v32  ;;  %14120 = vrsqrt.f32 %v4011_v40  ;;  %v497_v9 = vld [vmem:[#allocation2 + $0xe10] sm:$0xff]  ;;  %v12896_v15 = vcombine.high %v369_v7, %v373_v8  ;;  %v234_v23 = vld [vmem:[#allocation2 + $0x5d8] sm:$0xff]  ;;  %v12895_v31 = vcombine.low %v369_v7, %v373_v8 }
 0x189   :  { %3698 = vmatprep.subr.bf16.mxu1 %v13064_v24  ;;  %v501_v10 = vld [vmem:[#allocation2 + $0xe30] sm:$0xff]  ;;  %v238_v24 = vld [vmem:[#allocation2 + $0x5f8] sm:$0xff]  ;;  %v12634_v32 = vcombine.high %v106_v21, %v110_v53  ;;  %v12633_v43 = vcombine.low %v106_v21, %v110_v53 }
 0x18a   :  { %14122 = vrsqrt.f32 %v4012_v22  ;;  %3658 = vmatpush2.bf16.msra.mxu0 %v12935_v33  ;;  %v13024_v18 = vcombine.high %v497_v9, %v501_v10  ;;  %v13023_v40 = vcombine.low %v497_v9, %v501_v10  ;;  %v102_v22 = vld [vmem:[#allocation2 + $0x1b8] sm:$0xff] }
 0x18b   :  { %3659 = vmatprep.subr.bf16.mxu0 %v12928_v38  ;;  %v98_v38 = vld [vmem:[#allocation2 + $0x198] sm:$0xff] }
 0x18c   :  { %3699 = vmatpush2.bf16.msra.mxu1 %v13063_v34  ;;  %v12762_v34 = vcombine.high %v234_v23, %v238_v24  ;;  %v210_v7 = vld [vmem:[#allocation2 + $0x518] sm:$0xff] }
 0x18d   :  { %3700 = vmatprep.subr.bf16.mxu1 %v13056_v25  ;;  %v226_v25 = vld [vmem:[#allocation2 + $0x598] sm:$0xff] }
 0x18e   :  { %3660 = vmatpush2.bf16.msra.mxu0 %v12927_v45  ;;  %v12761_v45 = vcombine.low %v234_v23, %v238_v24  ;;  %v12753_v62 = vcombine.low %v226_v25, %v230_v41  ;;  %v214_v8 = vld [vmem:[#allocation2 + $0x538] sm:$0xff] }
 0x18f   :  { %3661 = vmatprep.subr.bf16.mxu0 %v12920_v46  ;;  %v66_v24 = vld [vmem:[#allocation2 + $0x98] sm:$0xff] }
 0x190   :  { %3701 = vmatpush2.bf16.msra.mxu1 %v13055_v19  ;;  %v12626_v19 = vcombine.high %v98_v38, %v102_v22 }
 0x191   :  { %3702 = vmatprep.subr.bf16.mxu1 %v13048_v47  ;;  %v90_v47 = vld [vmem:[#allocation2 + $0x158] sm:$0xff] }
 0x192   :  { %3662 = vmatpush2.bf16.msra.mxu0 %v12919_v52  ;;  %v222_v52 = vld [vmem:[#allocation2 + $0x578] sm:$0xff]  ;;  %v12618_v63 = vcombine.high %v90_v47, %v94_v49  ;;  %v12617_v10 = vcombine.low %v90_v47, %v94_v49 }
 0x193   :  { %3663 = vmatprep.subr.bf16.mxu0 %v12912_v56  ;;  %v178_v47 = vld [vmem:[#allocation2 + $0x418] sm:$0xff] }
 0x194   :  { %3703 = vmatpush2.bf16.msra.mxu1 %v13047_v55  ;;  %v182_v49 = vld [vmem:[#allocation2 + $0x438] sm:$0xff] }
 0x195   :  { %3704 = vmatprep.subr.bf16.mxu1 %v13040_v57  ;;  %v14121_v11 = vpop.eup %14120  ;;  %v12625_v57 = vcombine.low %v98_v38, %v102_v22  ;;  %v58_v22 = vld [vmem:[#allocation2 + $0x58] sm:$0xff] }
 0x196   :  { %3664 = vmatpush2.bf16.msra.mxu0 %v12911_v2 }
 0x197   :  { %v14123_v13 = vpop.eup %14122  ;;  %3665 = vmatprep.subr.bf16.mxu0 %v12904_v5  ;;  %v86_v5 = vld [vmem:[#allocation2 + $0x138] sm:$0xff] }
 0x198   :  { %3705 = vmatpush2.bf16.msra.mxu1 %v13039_v3  ;;  %v4035_v17 = vcombine.low %v14121_v11, %v14123_v13  ;;  %v82_v3 = vld [vmem:[#allocation2 + $0x118] sm:$0xff] }
 0x199   :  { %3706 = vmatprep.subr.bf16.mxu1 %v13032_v6  ;;  %v12609_v21 = vcombine.low %v82_v3, %v86_v5 }
 0x19a   :  { %v4039_v26 = vrot.slane %v4035_v17, 7  ;;  %3666 = vmatpush2.bf16.msra.mxu0 %v12903_v12  ;;  %v12610_v12 = vcombine.high %v82_v3, %v86_v5  ;;  %v78_v17 = vld [vmem:[#allocation2 + $0xf8] sm:$0xff] }
 0x19b   :  { %3667 = vmatprep.subr.bf16.mxu0 %v12896_v15  ;;  %v74_v15 = vld [vmem:[#allocation2 + $0xd8] sm:$0xff] }
 0x19c   :  { %3707 = vmatpush2.bf16.msra.mxu1 %v13031_v14  ;;  %v4047_v33 = vmul.f32 %v4039_v26, %v14339_v0  ;;  %v12754_v0 = vcombine.high %v226_v25, %v230_v41  ;;  %v12738_v14 = vcombine.high %v210_v7, %v214_v8  ;;  %v12602_v53 = vcombine.high %v74_v15, %v78_v17  ;;  %v70_v26 = vld [vmem:[#allocation2 + $0xb8] sm:$0xff] }
 0x19d   :  { %3708 = vmatprep.subr.bf16.mxu1 %v13024_v18  ;;  %v202_v18 = vld [vmem:[#allocation2 + $0x4d8] sm:$0xff] }
 0x19e   :  { %v4062_v42 = vrot.slane %v4047_v33, %v14386_v30  ;;  %3668 = vmatpush2.bf16.msra.mxu0 %v12895_v31  ;;  %v4058_v44 = vrot.slane %v4047_v33, %v14383_v28  ;;  %v194_v31 = vld [vmem:[#allocation2 + $0x498] sm:$0xff] }
 0x19f   :  { %3719 = vmatprep.subr.bf16.mxu0 %v12634_v32  ;;  %v12601_v32 = vcombine.low %v74_v15, %v78_v17  ;;  %v62_v25 = vld [vmem:[#allocation2 + $0x78] sm:$0xff] }
 0x1a0   :  { %3709 = vmatpush2.bf16.msra.mxu1 %v13023_v40  ;;  %v4102_v46 = vrot.slane %v4062_v42, %v14383_v28  ;;  %v4098_v35 = vrot.slane %v4058_v44, %v14383_v28  ;;  %v198_v40 = vld [vmem:[#allocation2 + $0x4b8] sm:$0xff] }
 0x1a1   :  { %3760 = vmatprep.subr.bf16.mxu1 %v12762_v34  ;;  %v14393_v50 = vpop.f32.mrf.mxu0  ;;  %3670 = vmatmul.mubr.bf16.vlgmr.msra.gmra.mxu0 %v14320_v36  ;;  %v12594_v34 = vcombine.high %v66_v24, %v70_v26  ;;  %v12722_v38 = vcombine.high %v194_v31, %v198_v40  ;;  %v186_v41 = vld [vmem:[#allocation2 + $0x458] sm:$0xff]  ;;  %v12721_v44 = vcombine.low %v194_v31, %v198_v40 }
 0x1a2   :  { %v14397_v55 = vmul.f32 %v4102_v46, %v14378_v37  ;;  %3720 = vmatpush1.bf16.msra.mxu0 %v12633_v43  ;;  %v14405_v1 = vmul.f32 %v4098_v35, %v14373_v54  ;;  %v12746_v37 = vcombine.high %v218_v51, %v222_v52  ;;  %3751 = vmatprep.mubr.bf16.mxu0 %v14280_v58  ;;  %v206_v58 = vld [vmem:[#allocation2 + $0x4f8] sm:$0xff] }
 0x1a3   :  { %v14399_v56 = vpop.f32.mrf.mxu1  ;;  %3711 = vmatmul.mubr.bf16.vlgmr.msra.gmra.mxu1 %v14324_v39  ;;  %v14402_v60 = vpop.f32.mrf.mxu0  ;;  %3721 = vmatprep.subr.bf16.mxu0 %v12626_v19  ;;  %v12745_v54 = vcombine.low %v218_v51, %v222_v52  ;;  %v12730_v23 = vcombine.high %v202_v18, %v206_v58  ;;  %v12729_v33 = vcombine.low %v202_v18, %v206_v58  ;;  %v190_v42 = vld [vmem:[#allocation2 + $0x478] sm:$0xff] }
 0x1a4   :  { %3761 = vmatpush1.bf16.msra.mxu1 %v12761_v45  ;;  %3792 = vmatprep.mubr.bf16.mxu1 %v14284_v59  ;;  %v12737_v59 = vcombine.low %v210_v7, %v214_v8  ;;  %v12593_v43 = vcombine.low %v66_v24, %v70_v26  ;;  %v12586_v45 = vcombine.high %v58_v22, %v62_v25  ;;  %v50_v46 = vld [vmem:[#allocation2 + $0x18] sm:$0xff] }
 0x1a5   :  { %v14407_v2 = vpop.f32.mrf.mxu1  ;;  %3762 = vmatprep.subr.bf16.mxu1 %v12754_v0  ;;  %v3429_v6 = vpop.f32.mrf.mxu0  ;;  %v12714_v19 = vcombine.high %v186_v41, %v190_v42  ;;  %v54_v0 = vld [vmem:[#allocation2 + $0x38] sm:$0xff]  ;;  %v12585_v35 = vcombine.low %v58_v22, %v62_v25  ;;  %v12713_v51 = vcombine.low %v186_v41, %v190_v42 }
 0x1a6   :  { %3722 = vmatpush1.bf16.msra.mxu0 %v12625_v57  ;;  %v12578_v52 = vcombine.high %v50_v46, %v54_v0  ;;  %v12706_v57 = vcombine.high %v178_v47, %v182_v49  ;;  %v302_v3 = vld [vmem:[#allocation2 + $0x7f8] sm:$0xff]  ;;  %v12577_v5 = vcombine.low %v50_v46, %v54_v0  ;;  %v12705_v6 = vcombine.low %v178_v47, %v182_v49 }
 0x1a7   :  { %v3470_v9 = vpop.f32.mrf.mxu1  ;;  %v3430_v11 = vpop.f32.mrf.mxu0  ;;  %3723 = vmatprep.subr.bf16.mxu0 %v12618_v63  ;;  %v174_v63 = vld [vmem:[#allocation2 + $0x3f8] sm:$0xff] }
 0x1a8   :  { %3763 = vmatpush1.bf16.msra.mxu1 %v12753_v62  ;;  %v170_v62 = vld [vmem:[#allocation2 + $0x3d8] sm:$0xff] }
 0x1a9   :  { %v3471_v13 = vpop.f32.mrf.mxu1  ;;  %3764 = vmatprep.subr.bf16.mxu1 %v12746_v37  ;;  %v298_v37 = vld [vmem:[#allocation2 + $0x7d8] sm:$0xff]  ;;  %v12698_v7 = vcombine.high %v170_v62, %v174_v63 }
 0x1aa   :  { %3724 = vmatpush1.bf16.msra.mxu0 %v12617_v10  ;;  %v12826_v8 = vcombine.high %v298_v37, %v302_v3  ;;  %v162_v9 = vld [vmem:[#allocation2 + $0x398] sm:$0xff]  ;;  %v12825_v13 = vcombine.low %v298_v37, %v302_v3  ;;  %v14411_v3 = vld [vmem:[#allocation5 + $0x8] sm:$0x77] }
 0x1ab   :  { %3725 = vmatprep.subr.bf16.mxu0 %v12610_v12  ;;  %v166_v10 = vld [vmem:[#allocation2 + $0x3b8] sm:$0xff]  ;;  %v12697_v12 = vcombine.low %v170_v62, %v174_v63 }
 0x1ac   :  { %3765 = vmatpush1.bf16.msra.mxu1 %v12745_v54  ;;  %v290_v11 = vld [vmem:[#allocation2 + $0x798] sm:$0xff] }
 0x1ad   :  { %3766 = vmatprep.subr.bf16.mxu1 %v12738_v14  ;;  %v294_v54 = vld [vmem:[#allocation2 + $0x7b8] sm:$0xff]  ;;  %v12690_v14 = vcombine.high %v162_v9, %v166_v10 }
 0x1ae   :  { %3726 = vmatpush1.bf16.msra.mxu0 %v12609_v21  ;;  %v12818_v15 = vcombine.high %v290_v11, %v294_v54  ;;  %v154_v17 = vld [vmem:[#allocation2 + $0x358] sm:$0xff] }
 0x1af   :  { %3727 = vmatprep.subr.bf16.mxu0 %v12602_v53  ;;  %v158_v18 = vld [vmem:[#allocation2 + $0x378] sm:$0xff]  ;;  %v12817_v53 = vcombine.low %v290_v11, %v294_v54 }
 0x1b0   :  { %3767 = vmatpush1.bf16.msra.mxu1 %v12737_v59  ;;  %v282_v58 = vld [vmem:[#allocation2 + $0x758] sm:$0xff]  ;;  %v12689_v59 = vcombine.low %v162_v9, %v166_v10  ;;  %v578_v10 = vrot.slane %v14411_v3, %v14337_v61 }
 0x1b1   :  { %3768 = vmatprep.subr.bf16.mxu1 %v12730_v23  ;;  %v286_v21 = vld [vmem:[#allocation2 + $0x778] sm:$0xff]  ;;  %v12682_v23 = vcombine.high %v154_v17, %v158_v18 }
 0x1b2   :  { %3728 = vmatpush1.bf16.msra.mxu0 %v12601_v32  ;;  %v12810_v24 = vcombine.high %v282_v58, %v286_v21  ;;  %v146_v26 = vld [vmem:[#allocation2 + $0x318] sm:$0xff] }
 0x1b3   :  { %3729 = vmatprep.subr.bf16.mxu0 %v12594_v34  ;;  %v150_v31 = vld [vmem:[#allocation2 + $0x338] sm:$0xff]  ;;  %v12809_v34 = vcombine.low %v282_v58, %v286_v21  ;;  %v618_v21 = vrot.slane %v578_v10, %v14337_v61 }
 0x1b4   :  { %3769 = vmatpush1.bf16.msra.mxu1 %v12729_v33  ;;  %v274_v40 = vld [vmem:[#allocation2 + $0x718] sm:$0xff]  ;;  %v12681_v33 = vcombine.low %v154_v17, %v158_v18 }
 0x1b5   :  { %3770 = vmatprep.subr.bf16.mxu1 %v12722_v38  ;;  %v278_v32 = vld [vmem:[#allocation2 + $0x738] sm:$0xff]  ;;  %v12674_v38 = vcombine.high %v146_v26, %v150_v31 }
 0x1b6   :  { %3730 = vmatpush1.bf16.msra.mxu0 %v12593_v43  ;;  %v12802_v22 = vcombine.high %v274_v40, %v278_v32  ;;  %v138_v25 = vld [vmem:[#allocation2 + $0x2d8] sm:$0xff] }
 0x1b7   :  { %3731 = vmatprep.subr.bf16.mxu0 %v12586_v45  ;;  %v142_v41 = vld [vmem:[#allocation2 + $0x2f8] sm:$0xff]  ;;  %v12801_v45 = vcombine.low %v274_v40, %v278_v32 }
 0x1b8   :  { %3771 = vmatpush1.bf16.msra.mxu1 %v12721_v44  ;;  %v266_v42 = vld [vmem:[#allocation2 + $0x6d8] sm:$0xff]  ;;  %v12673_v44 = vcombine.low %v146_v26, %v150_v31 }
 0x1b9   :  { %3772 = vmatprep.subr.bf16.mxu1 %v12714_v19  ;;  %v270_v43 = vld [vmem:[#allocation2 + $0x6f8] sm:$0xff]  ;;  %v12666_v19 = vcombine.high %v138_v25, %v142_v41 }
 0x1ba   :  { %3732 = vmatpush1.bf16.msra.mxu0 %v12585_v35  ;;  %v12794_v46 = vcombine.high %v266_v42, %v270_v43  ;;  %v130_v0 = vld [vmem:[#allocation2 + $0x298] sm:$0xff] }
 0x1bb   :  { %3733 = vmatprep.subr.bf16.mxu0 %v12578_v52  ;;  %v134_v47 = vld [vmem:[#allocation2 + $0x2b8] sm:$0xff]  ;;  %v12793_v52 = vcombine.low %v266_v42, %v270_v43 }
 0x1bc   :  { %3773 = vmatpush1.bf16.msra.mxu1 %v12713_v51  ;;  %v258_v49 = vld [vmem:[#allocation2 + $0x698] sm:$0xff]  ;;  %v12665_v51 = vcombine.low %v138_v25, %v142_v41 }
 0x1bd   :  { %3774 = vmatprep.subr.bf16.mxu1 %v12706_v57  ;;  %v262_v35 = vld [vmem:[#allocation2 + $0x6b8] sm:$0xff]  ;;  %v12658_v57 = vcombine.high %v130_v0, %v134_v47 }
 0x1be   :  { %3734 = vmatpush1.bf16.msra.mxu0 %v12577_v5  ;;  %v12786_v62 = vcombine.high %v258_v49, %v262_v35  ;;  %v122_v63 = vld [vmem:[#allocation2 + $0x258] sm:$0xff] }
 0x1bf   :  { %3735 = vmatprep.subr.bf16.mxu0 %v12698_v7  ;;  %v126_v37 = vld [vmem:[#allocation2 + $0x278] sm:$0xff]  ;;  %v12657_v7 = vcombine.low %v130_v0, %v134_v47 }
 0x1c0   :  { %3775 = vmatpush1.bf16.msra.mxu1 %v12705_v6  ;;  %v250_v5 = vld [vmem:[#allocation2 + $0x658] sm:$0xff]  ;;  %v12650_v9 = vcombine.high %v122_v63, %v126_v37  ;;  %v12649_v17 = vcombine.low %v122_v63, %v126_v37 }
 0x1c1   :  { %3776 = vmatprep.subr.bf16.mxu1 %v12826_v8  ;;  %v254_v6 = vld [vmem:[#allocation2 + $0x678] sm:$0xff]  ;;  %v12785_v8 = vcombine.low %v258_v49, %v262_v35 }
 0x1c2   :  { %3736 = vmatpush2.bf16.msra.mxu0 %v12697_v12  ;;  %v12778_v11 = vcombine.high %v250_v5, %v254_v6  ;;  %v114_v54 = vld [vmem:[#allocation2 + $0x218] sm:$0xff]  ;;  %v12777_v18 = vcombine.low %v250_v5, %v254_v6 }
 0x1c3   :  { %3737 = vmatprep.subr.bf16.mxu0 %v12690_v14  ;;  %v118_v12 = vld [vmem:[#allocation2 + $0x238] sm:$0xff] }
 0x1c4   :  { %3777 = vmatpush2.bf16.msra.mxu1 %v12825_v13  ;;  %v242_v13 = vld [vmem:[#allocation2 + $0x618] sm:$0xff]  ;;  %v12642_v58 = vcombine.high %v114_v54, %v118_v12  ;;  %v12641_v40 = vcombine.low %v114_v54, %v118_v12 }
 0x1c5   :  { %3778 = vmatprep.subr.bf16.mxu1 %v12818_v15  ;;  %v246_v14 = vld [vmem:[#allocation2 + $0x638] sm:$0xff]  ;;  %v582_v15 = vrot.slane %v14411_v3, %v14342_v4 }
 0x1c6   :  { %3738 = vmatpush2.bf16.msra.mxu0 %v12689_v59  ;;  %v12770_v59 = vcombine.high %v242_v13, %v246_v14  ;;  %v494_v26 = vld [vmem:[#allocation2 + $0xdf8] sm:$0xff]  ;;  %v12769_v32 = vcombine.low %v242_v13, %v246_v14 }
 0x1c7   :  { %3739 = vmatprep.subr.bf16.mxu0 %v12682_v23  ;;  %v366_v23 = vld [vmem:[#allocation2 + $0x9f8] sm:$0xff]  ;;  %v622_v31 = vrot.slane %v582_v15, %v14337_v61 }
 0x1c8   :  { %3779 = vmatpush2.bf16.msra.mxu1 %v12817_v53  ;;  %v362_v53 = vld [vmem:[#allocation2 + $0x9d8] sm:$0xff] }
 0x1c9   :  { %3780 = vmatprep.subr.bf16.mxu1 %v12810_v24  ;;  %v490_v24 = vld [vmem:[#allocation2 + $0xdd8] sm:$0xff]  ;;  %v3428_v43 = vadd.f32 %v14402_v60, %v622_v31 }
 0x1ca   :  { %3740 = vmatpush2.bf16.msra.mxu0 %v12681_v33  ;;  %v12890_v33 = vcombine.high %v362_v53, %v366_v23  ;;  %v358_v25 = vld [vmem:[#allocation2 + $0x9b8] sm:$0xff] }
 0x1cb   :  { %3741 = vmatprep.subr.bf16.mxu0 %v12674_v38  ;;  %v13018_v38 = vcombine.high %v490_v24, %v494_v26  ;;  %v482_v41 = vld [vmem:[#allocation2 + $0xd98] sm:$0xff] }
 0x1cc   :  { %3781 = vmatpush2.bf16.msra.mxu1 %v12809_v34  ;;  %v3426_v34 = vadd.f32 %v14393_v50, %v618_v21  ;;  %v486_v42 = vld [vmem:[#allocation2 + $0xdb8] sm:$0xff] }
 0x1cd   :  { %3782 = vmatprep.subr.bf16.mxu1 %v12802_v22  ;;  %v354_v22 = vld [vmem:[#allocation2 + $0x998] sm:$0xff]  ;;  %v13010_v0 = vcombine.high %v482_v41, %v486_v42 }
 0x1ce   :  { %3742 = vmatpush2.bf16.msra.mxu0 %v12673_v44  ;;  %v12889_v44 = vcombine.low %v362_v53, %v366_v23  ;;  %v346_v47 = vld [vmem:[#allocation2 + $0x958] sm:$0xff] }
 0x1cf   :  { %3743 = vmatprep.subr.bf16.mxu0 %v12666_v19  ;;  %v12882_v19 = vcombine.high %v354_v22, %v358_v25  ;;  %v350_v50 = vld [vmem:[#allocation2 + $0x978] sm:$0xff] }
 0x1d0   :  { %3783 = vmatpush2.bf16.msra.mxu1 %v12801_v45  ;;  %v13017_v45 = vcombine.low %v490_v24, %v494_v26  ;;  %v474_v35 = vld [vmem:[#allocation2 + $0xd58] sm:$0xff]  ;;  %v12874_v37 = vcombine.high %v346_v47, %v350_v50  ;;  %v12873_v13 = vcombine.low %v346_v47, %v350_v50 }
 0x1d1   :  { %3784 = vmatprep.subr.bf16.mxu1 %v12794_v46  ;;  %v3467_v46 = vadd.f32 %v14399_v56, %v3426_v34  ;;  %v13009_v56 = vcombine.low %v482_v41, %v486_v42  ;;  %v466_v10 = vld [vmem:[#allocation2 + $0xd18] sm:$0xff] }
 0x1d2   :  { %3744 = vmatpush2.bf16.msra.mxu0 %v12665_v51  ;;  %v478_v51 = vld [vmem:[#allocation2 + $0xd78] sm:$0xff] }
 0x1d3   :  { %3745 = vmatprep.subr.bf16.mxu0 %v12658_v57  ;;  %v13001_v15 = vcombine.low %v474_v35, %v478_v51  ;;  %v458_v53 = vld [vmem:[#allocation2 + $0xcd8] sm:$0xff] }
 0x1d4   :  { %3785 = vmatpush2.bf16.msra.mxu1 %v12793_v52  ;;  %v3469_v52 = vadd.f32 %v14407_v2, %v3428_v43  ;;  %v462_v23 = vld [vmem:[#allocation2 + $0xcf8] sm:$0xff] }
 0x1d5   :  { %3786 = vmatprep.subr.bf16.mxu1 %v12786_v62  ;;  %v12881_v62 = vcombine.low %v354_v22, %v358_v25  ;;  %v322_v22 = vld [vmem:[#allocation2 + $0x898] sm:$0xff] }
 0x1d6   :  { %3746 = vmatpush2.bf16.msra.mxu0 %v12657_v7  ;;  %v326_v25 = vld [vmem:[#allocation2 + $0x8b8] sm:$0xff] }
 0x1d7   :  { %3747 = vmatprep.subr.bf16.mxu0 %v12650_v9  ;;  %v342_v9 = vld [vmem:[#allocation2 + $0x938] sm:$0xff] }
 0x1d8   :  { %3787 = vmatpush2.bf16.msra.mxu1 %v12785_v8  ;;  %v338_v8 = vld [vmem:[#allocation2 + $0x918] sm:$0xff] }
 0x1d9   :  { %3788 = vmatprep.subr.bf16.mxu1 %v12778_v11  ;;  %v12865_v31 = vcombine.low %v338_v8, %v342_v9  ;;  %v450_v41 = vld [vmem:[#allocation2 + $0xc98] sm:$0xff] }
 0x1da   :  { %3748 = vmatpush2.bf16.msra.mxu0 %v12649_v17  ;;  %v12866_v17 = vcombine.high %v338_v8, %v342_v9  ;;  %v454_v42 = vld [vmem:[#allocation2 + $0xcb8] sm:$0xff] }
 0x1db   :  { %3749 = vmatprep.subr.bf16.mxu0 %v12642_v58  ;;  %v12978_v50 = vcombine.high %v450_v41, %v454_v42  ;;  %v310_v8 = vld [vmem:[#allocation2 + $0x838] sm:$0xff] }
 0x1dc   :  { %3789 = vmatpush2.bf16.msra.mxu1 %v12777_v18  ;;  %v434_v9 = vld [vmem:[#allocation2 + $0xc18] sm:$0xff] }
 0x1dd   :  { %3790 = vmatprep.subr.bf16.mxu1 %v12770_v59  ;;  %v334_v59 = vld [vmem:[#allocation2 + $0x8f8] sm:$0xff] }
 0x1de   :  { %3750 = vmatpush2.bf16.msra.mxu0 %v12641_v40 }
 0x1df   :  { %3801 = vmatprep.subr.bf16.mxu0 %v12890_v33 }
 0x1e0   :  { %3791 = vmatpush2.bf16.msra.mxu1 %v12769_v32 }
 0x1e1   :  { %3842 = vmatprep.subr.bf16.mxu1 %v13018_v38  ;;  %v3507_v49 = vpop.f32.mrf.mxu0  ;;  %3752 = vmatmul.mubr.bf16.vlgmr.msra.gmra.mxu0 %v14290_v16  ;;  %v13002_v16 = vcombine.high %v474_v35, %v478_v51  ;;  %v12986_v38 = vcombine.high %v458_v53, %v462_v23  ;;  %v318_v35 = vld [vmem:[#allocation2 + $0x878] sm:$0xff] }
 0x1e2   :  { %v3508_v60 = vadd.f32 %v3507_v49, %v3467_v46  ;;  %3802 = vmatpush1.bf16.msra.mxu0 %v12889_v44  ;;  %3833 = vmatprep.mubr.bf16.mxu0 %v14308_v27  ;;  %v12850_v46 = vcombine.high %v322_v22, %v326_v25  ;;  %v314_v49 = vld [vmem:[#allocation2 + $0x858] sm:$0xff] }
 0x1e3   :  { %v3548_v57 = vpop.f32.mrf.mxu1  ;;  %3793 = vmatmul.mubr.bf16.vlgmr.msra.gmra.mxu1 %v14299_v20  ;;  %v3509_v63 = vpop.f32.mrf.mxu0  ;;  %3803 = vmatprep.subr.bf16.mxu0 %v12882_v19  ;;  %v470_v20 = vld [vmem:[#allocation2 + $0xd38] sm:$0xff]  ;;  %v12985_v19 = vcombine.low %v458_v53, %v462_v23 }
 0x1e4   :  { %3843 = vmatpush1.bf16.msra.mxu1 %v13017_v45  ;;  %v14425_v5 = vadd.f32 %v3548_v57, %v3508_v60  ;;  %v3510_v6 = vadd.f32 %v3509_v63, %v3469_v52  ;;  %3874 = vmatprep.mubr.bf16.mxu1 %v14313_v29  ;;  %v12994_v21 = vcombine.high %v466_v10, %v470_v20  ;;  %v330_v29 = vld [vmem:[#allocation2 + $0x8d8] sm:$0xff] }
 0x1e5   :  { %v3550_v7 = vpop.f32.mrf.mxu1  ;;  %3844 = vmatprep.subr.bf16.mxu1 %v13010_v0  ;;  %v3511_v2 = vpop.f32.mrf.mxu0  ;;  %v12993_v40 = vcombine.low %v466_v10, %v470_v20  ;;  %v12858_v32 = vcombine.high %v330_v29, %v334_v59  ;;  %v12857_v45 = vcombine.low %v330_v29, %v334_v59  ;;  %v442_v51 = vld [vmem:[#allocation2 + $0xc58] sm:$0xff]  ;;  %v12977_v63 = vcombine.low %v450_v41, %v454_v42 }
 0x1e6   :  { %v3895_v11 = vrot.slane %v14425_v5, 4  ;;  %v14430_v54 = vadd.f32 %v3550_v7, %v3510_v6  ;;  %3804 = vmatpush1.bf16.msra.mxu0 %v12881_v62  ;;  %v446_v52 = vld [vmem:[#allocation2 + $0xc78] sm:$0xff]  ;;  %v12849_v62 = vcombine.low %v322_v22, %v326_v25 }
 0x1e7   :  { %v3552_v12 = vpop.f32.mrf.mxu1  ;;  %v3512_v14 = vpop.f32.mrf.mxu0  ;;  %3805 = vmatprep.subr.bf16.mxu0 %v12874_v37  ;;  %v12970_v7 = vcombine.high %v442_v51, %v446_v52  ;;  %v438_v2 = vld [vmem:[#allocation2 + $0xc38] sm:$0xff] }
 0x1e8   :  { %3845 = vmatpush1.bf16.msra.mxu1 %v13009_v56  ;;  %v3896_v18 = vadd.f32 %v3895_v11, %v14425_v5  ;;  %v3901_v27 = vrot.slane %v14430_v54, 4  ;;  %v12842_v56 = vcombine.high %v314_v49, %v318_v35  ;;  %v12841_v11 = vcombine.low %v314_v49, %v318_v35 }
 0x1e9   :  { %v3553_v58 = vpop.f32.mrf.mxu1  ;;  %3846 = vmatprep.subr.bf16.mxu1 %v13002_v16  ;;  %v306_v16 = vld [vmem:[#allocation2 + $0x818] sm:$0xff]  ;;  %v12969_v12 = vcombine.low %v442_v51, %v446_v52  ;;  %v12961_v59 = vcombine.low %v434_v9, %v438_v2 }
 0x1ea   :  { %v3897_v24 = vrot.slane %v3896_v18, 2  ;;  %v3902_v26 = vadd.f32 %v3901_v27, %v14430_v54  ;;  %3806 = vmatpush1.bf16.msra.mxu0 %v12873_v13  ;;  %v554_v27 = vld [vmem:[#allocation2 + $0xfd8] sm:$0xff] }
 0x1eb   :  { %3807 = vmatprep.subr.bf16.mxu0 %v12866_v17  ;;  %v426_v17 = vld [vmem:[#allocation2 + $0xbd8] sm:$0xff] }
 0x1ec   :  { %3847 = vmatpush1.bf16.msra.mxu1 %v13001_v15  ;;  %v3898_v33 = vadd.f32 %v3897_v24, %v3896_v18  ;;  %v3903_v34 = vrot.slane %v3902_v26, 2  ;;  %v12962_v15 = vcombine.high %v434_v9, %v438_v2  ;;  %v430_v18 = vld [vmem:[#allocation2 + $0xbf8] sm:$0xff] }
 0x1ed   :  { %3848 = vmatprep.subr.bf16.mxu1 %v12994_v21  ;;  %v558_v58 = vld [vmem:[#allocation2 + $0xff8] sm:$0xff]  ;;  %v12954_v53 = vcombine.high %v426_v17, %v430_v18  ;;  %v12953_v22 = vcombine.low %v426_v17, %v430_v18 }
 0x1ee   :  { %v3899_v43 = vrot.slane %v3898_v33, 1  ;;  %v3904_v44 = vadd.f32 %v3903_v34, %v3902_v26  ;;  %3808 = vmatpush1.bf16.msra.mxu0 %v12865_v31  ;;  %v13082_v26 = vcombine.high %v554_v27, %v558_v58  ;;  %v418_v31 = vld [vmem:[#allocation2 + $0xb98] sm:$0xff]  ;;  %v13081_v25 = vcombine.low %v554_v27, %v558_v58 }
 0x1ef   :  { %3809 = vmatprep.subr.bf16.mxu0 %v12858_v32  ;;  %v546_v32 = vld [vmem:[#allocation2 + $0xf98] sm:$0xff] }
 0x1f0   :  { %3849 = vmatpush1.bf16.msra.mxu1 %v12993_v40  ;;  %v3900_v0 = vadd.f32 %v3899_v43, %v3898_v33  ;;  %v3905_v47 = vrot.slane %v3904_v44, 1  ;;  %v422_v40 = vld [vmem:[#allocation2 + $0xbb8] sm:$0xff] }
 0x1f1   :  { %3850 = vmatprep.subr.bf16.mxu1 %v12986_v38  ;;  %v550_v33 = vld [vmem:[#allocation2 + $0xfb8] sm:$0xff]  ;;  %v12946_v41 = vcombine.high %v418_v31, %v422_v40  ;;  %v12945_v49 = vcombine.low %v418_v31, %v422_v40 }
 0x1f2   :  { %v3933_v60 = vmul.f32 0.125, %v3900_v0  ;;  %v3906_v57 = vadd.f32 %v3905_v47, %v3904_v44  ;;  %3810 = vmatpush1.bf16.msra.mxu0 %v12857_v45  ;;  %v13074_v44 = vcombine.high %v546_v32, %v550_v33  ;;  %v410_v45 = vld [vmem:[#allocation2 + $0xb58] sm:$0xff]  ;;  %v13073_v35 = vcombine.low %v546_v32, %v550_v33 }
 0x1f3   :  { %3811 = vmatprep.subr.bf16.mxu0 %v12850_v46  ;;  %v538_v46 = vld [vmem:[#allocation2 + $0xf58] sm:$0xff] }
 0x1f4   :  { %3851 = vmatpush1.bf16.msra.mxu1 %v12985_v19  ;;  %v14436_v37 = vsub.f32 %v14425_v5, %v3933_v60  ;;  %v3934_v6 = vmul.f32 0.125, %v3906_v57  ;;  %v12834_v5 = vcombine.high %v306_v16, %v310_v8  ;;  %v414_v19 = vld [vmem:[#allocation2 + $0xb78] sm:$0xff] }
 0x1f5   :  { %3852 = vmatprep.subr.bf16.mxu1 %v12978_v50  ;;  %v542_v0 = vld [vmem:[#allocation2 + $0xf78] sm:$0xff]  ;;  %v12938_v51 = vcombine.high %v410_v45, %v414_v19 }
 0x1f6   :  { %v3949_v10 = vmul.f32 %v14436_v37, %v14436_v37  ;;  %v14441_v20 = vsub.f32 %v14430_v54, %v3934_v6  ;;  %3812 = vmatpush1.bf16.msra.mxu0 %v12849_v62  ;;  %v12833_v54 = vcombine.low %v306_v16, %v310_v8  ;;  %v13066_v57 = vcombine.high %v538_v46, %v542_v0  ;;  %v402_v62 = vld [vmem:[#allocation2 + $0xb18] sm:$0xff] }
 0x1f7   :  { %3813 = vmatprep.subr.bf16.mxu0 %v12842_v56  ;;  %v530_v56 = vld [vmem:[#allocation2 + $0xf18] sm:$0xff]  ;;  %v12937_v8 = vcombine.low %v410_v45, %v414_v19  ;;  %v13065_v9 = vcombine.low %v538_v46, %v542_v0 }
 0x1f8   :  { %3853 = vmatpush1.bf16.msra.mxu1 %v12977_v63  ;;  %v3967_v13 = vrot.slane %v3949_v10, 4  ;;  %v3950_v14 = vmul.f32 %v14441_v20, %v14441_v20  ;;  %v406_v63 = vld [vmem:[#allocation2 + $0xb38] sm:$0xff] }
 0x1f9   :  { %3854 = vmatprep.subr.bf16.mxu1 %v12970_v7  ;;  %v534_v6 = vld [vmem:[#allocation2 + $0xf38] sm:$0xff]  ;;  %v12930_v2 = vcombine.high %v402_v62, %v406_v63 }
 0x1fa   :  { %v3968_v21 = vadd.f32 %v3967_v13, %v3949_v10  ;;  %v3973_v29 = vrot.slane %v3950_v14, 4  ;;  %3814 = vmatpush1.bf16.msra.mxu0 %v12841_v11  ;;  %v13058_v11 = vcombine.high %v530_v56, %v534_v6  ;;  %v522_v13 = vld [vmem:[#allocation2 + $0xed8] sm:$0xff]  ;;  %v13057_v17 = vcombine.low %v530_v56, %v534_v6 }
 0x1fb   :  { %3815 = vmatprep.subr.bf16.mxu0 %v12834_v5  ;;  %v398_v5 = vld [vmem:[#allocation2 + $0xaf8] sm:$0xff] }
 0x1fc   :  { %3855 = vmatpush1.bf16.msra.mxu1 %v12969_v12  ;;  %v3969_v23 = vrot.slane %v3968_v21, 2  ;;  %v3974_v24 = vadd.f32 %v3973_v29, %v3950_v14  ;;  %v394_v12 = vld [vmem:[#allocation2 + $0xad8] sm:$0xff] }
 0x1fd   :  { %3856 = vmatprep.subr.bf16.mxu1 %v12962_v15  ;;  %v526_v14 = vld [vmem:[#allocation2 + $0xef8] sm:$0xff]  ;;  %v12929_v15 = vcombine.low %v402_v62, %v406_v63  ;;  %v12922_v18 = vcombine.high %v394_v12, %v398_v5  ;;  %v4416_v62 = vld [vmem:[#allocation2 + $0x15c0] sm:$0xff] }
 0x1fe   :  { %v3970_v34 = vadd.f32 %v3969_v23, %v3968_v21  ;;  %v3975_v38 = vrot.slane %v3974_v24, 2  ;;  %3816 = vmatpush1.bf16.msra.mxu0 %v12833_v54  ;;  %v13050_v27 = vcombine.high %v522_v13, %v526_v14  ;;  %v386_v58 = vld [vmem:[#allocation2 + $0xa98] sm:$0xff]  ;;  %v13049_v23 = vcombine.low %v522_v13, %v526_v14  ;;  %v4420_v63 = vld [vmem:[#allocation2 + $0x15e0] sm:$0xff] }
 0x1ff   :  { %3817 = vmatprep.subr.bf16.mxu0 %v12954_v53  ;;  %v390_v21 = vld [vmem:[#allocation2 + $0xab8] sm:$0xff]  ;;  %v12921_v53 = vcombine.low %v394_v12, %v398_v5  ;;  %v4284_v5 = vld [vmem:[#allocation2 + $0x11a0] sm:$0xff] }
 0x200   :  { %3857 = vmatpush1.bf16.msra.mxu1 %v12961_v59  ;;  %v3971_v42 = vrot.slane %v3970_v34, 1  ;;  %v3976_v43 = vadd.f32 %v3975_v38, %v3974_v24  ;;  %v514_v29 = vld [vmem:[#allocation2 + $0xe98] sm:$0xff]  ;;  %v14446_v59 = vsub.s32 6, %v14334_v48  ;;  %v12914_v24 = vcombine.high %v386_v58, %v390_v21  ;;  %v4408_v13 = vld [vmem:[#allocation2 + $0x1580] sm:$0xff] }
 0x201   :  { %3858 = vmatprep.subr.bf16.mxu1 %v13082_v26  ;;  %v518_v54 = vld [vmem:[#allocation2 + $0xeb8] sm:$0xff] }
 0x202   :  { %v3972_v47 = vadd.f32 %v3971_v42, %v3970_v34  ;;  %v3977_v50 = vrot.slane %v3976_v43, 1  ;;  %3818 = vmatpush2.bf16.msra.mxu0 %v12953_v22  ;;  %v13042_v26 = vcombine.high %v514_v29, %v518_v54  ;;  %v378_v31 = vld [vmem:[#allocation2 + $0xa58] sm:$0xff]  ;;  %v14448_v34 = vld [vmem:[#allocation5] sm:$0x77]  ;;  %v12913_v22 = vcombine.low %v386_v58, %v390_v21 }
 0x203   :  { %3819 = vmatprep.subr.bf16.mxu0 %v12946_v41  ;;  %v382_v40 = vld [vmem:[#allocation2 + $0xa78] sm:$0xff]  ;;  %v4142_v38 = vrot.slane %v14448_v34, %v14446_v59  ;;  %v13041_v41 = vcombine.low %v514_v29, %v518_v54  ;;  %v4272_v21 = vld [vmem:[#allocation2 + $0x1140] sm:$0xff] }
 0x204   :  { %3859 = vmatpush2.bf16.msra.mxu1 %v13081_v25  ;;  %v4005_v52 = vmul.f32 0.125, %v3972_v47  ;;  %v3978_v60 = vadd.f32 %v3977_v50, %v3976_v43  ;;  %v506_v32 = vld [vmem:[#allocation2 + $0xe58] sm:$0xff]  ;;  %v14453_v25 = vsub.s32 2, %v14334_v48  ;;  %v12906_v42 = vcombine.high %v378_v31, %v382_v40  ;;  %v4276_v29 = vld [vmem:[#allocation2 + $0x1160] sm:$0xff] }
 0x205   :  { %3860 = vmatprep.subr.bf16.mxu1 %v13074_v44  ;;  %v510_v33 = vld [vmem:[#allocation2 + $0xe78] sm:$0xff]  ;;  %v12905_v50 = vcombine.low %v378_v31, %v382_v40 }
 0x206   :  { %v4013_v7 = vadd.f32 1e-05, %v4005_v52  ;;  %v4006_v16 = vmul.f32 0.125, %v3978_v60  ;;  %3820 = vmatpush2.bf16.msra.mxu0 %v12945_v49  ;;  %v13034_v43 = vcombine.high %v506_v32, %v510_v33  ;;  %v370_v44 = vld [vmem:[#allocation2 + $0xa18] sm:$0xff]  ;;  %v4182_v0 = vrot.slane %v4142_v38, %v14453_v25  ;;  %v4288_v60 = vld [vmem:[#allocation2 + $0x11c0] sm:$0xff] }
 0x207   :  { %3821 = vmatprep.subr.bf16.mxu0 %v12938_v51  ;;  %v374_v45 = vld [vmem:[#allocation2 + $0xa38] sm:$0xff]  ;;  %v13033_v48 = vcombine.low %v506_v32, %v510_v33 }
 0x208   :  { %3861 = vmatpush2.bf16.msra.mxu1 %v13073_v35  ;;  %v4014_v10 = vadd.f32 1e-05, %v4006_v16  ;;  %14124 = vrsqrt.f32 %v4013_v7  ;;  %v498_v19 = vld [vmem:[#allocation2 + $0xe18] sm:$0xff]  ;;  %v12898_v35 = vcombine.high %v370_v44, %v374_v45  ;;  %v4208_v56 = vadd.f32 %v4182_v0, %v14397_v55  ;;  %v4412_v55 = vld [vmem:[#allocation2 + $0x15a0] sm:$0xff] }
 0x209   :  { %3862 = vmatprep.subr.bf16.mxu1 %v13066_v57  ;;  %v502_v46 = vld [vmem:[#allocation2 + $0xe38] sm:$0xff]  ;;  %v4292_v57 = vld [vmem:[#allocation2 + $0x11e0] sm:$0xff]  ;;  %v12897_v7 = vcombine.low %v370_v44, %v374_v45  ;;  %v13260_v58 = vcombine.high %v4408_v13, %v4412_v55  ;;  %v13259_v38 = vcombine.low %v4408_v13, %v4412_v55 }
 0x20a   :  { %14126 = vrsqrt.f32 %v4014_v10  ;;  %3822 = vmatpush2.bf16.msra.mxu0 %v12937_v8  ;;  %v13026_v52 = vcombine.high %v498_v19, %v502_v46  ;;  %v13025_v16 = vcombine.low %v498_v19, %v502_v46  ;;  %v13140_v8 = vcombine.high %v4288_v60, %v4292_v57  ;;  %v4280_v10 = vld [vmem:[#allocation2 + $0x1180] sm:$0xff] }
 0x20b   :  { %3823 = vmatprep.subr.bf16.mxu0 %v12930_v2  ;;  %v13268_v2 = vcombine.high %v4416_v62, %v4420_v63  ;;  %v4216_v12 = vmax.f32 %v4208_v56, 0.0  ;;  %v13131_v32 = vcombine.low %v4280_v10, %v4284_v5  ;;  %v4392_v45 = vld [vmem:[#allocation2 + $0x1500] sm:$0xff]  ;;  %v13123_v46 = vcombine.low %v4272_v21, %v4276_v29 }
 0x20c   :  { %3863 = vmatpush2.bf16.msra.mxu1 %v13065_v9  ;;  %v4240_v55 = vld [vmem:[#allocation2 + $0x1040] sm:$0xff] }
 0x20d   :  { %3864 = vmatprep.subr.bf16.mxu1 %v13058_v11  ;;  %v4150_v11 = vrot.slane %v14411_v3, %v14446_v59 }
 0x20e   :  { %3824 = vmatpush2.bf16.msra.mxu0 %v12929_v15  ;;  %v13139_v15 = vcombine.low %v4288_v60, %v4292_v57  ;;  %v4260_v60 = vld [vmem:[#allocation2 + $0x10e0] sm:$0xff] }
 0x20f   :  { %3825 = vmatprep.subr.bf16.mxu0 %v12922_v18  ;;  %v4190_v54 = vrot.slane %v4150_v11, %v14453_v25  ;;  %v4384_v57 = vld [vmem:[#allocation2 + $0x14c0] sm:$0xff] }
 0x210   :  { %3865 = vmatpush2.bf16.msra.mxu1 %v13057_v17  ;;  %v13267_v17 = vcombine.low %v4416_v62, %v4420_v63  ;;  %v4388_v62 = vld [vmem:[#allocation2 + $0x14e0] sm:$0xff] }
 0x211   :  { %3866 = vmatprep.subr.bf16.mxu1 %v13050_v27  ;;  %v13132_v27 = vcombine.high %v4280_v10, %v4284_v5  ;;  %v4380_v10 = vld [vmem:[#allocation2 + $0x14a0] sm:$0xff] }
 0x212   :  { %3826 = vmatpush2.bf16.msra.mxu0 %v12921_v53 }
 0x213   :  { %3827 = vmatprep.subr.bf16.mxu0 %v12914_v24  ;;  %v4400_v24 = vld [vmem:[#allocation2 + $0x1540] sm:$0xff] }
 0x214   :  { %3867 = vmatpush2.bf16.msra.mxu1 %v13049_v23  ;;  %v14469_v23 = vpack.c.bf16 %v4216_v12, %v4216_v12  ;;  %v13235_v12 = vcombine.low %v4384_v57, %v4388_v62 }
 0x215   :  { %3868 = vmatprep.subr.bf16.mxu1 %v13042_v26  ;;  %v14125_v47 = vpop.eup %14124  ;;  %v4404_v26 = vld [vmem:[#allocation2 + $0x1560] sm:$0xff] }
 0x216   :  { %3828 = vmatpush2.bf16.msra.mxu0 %v12913_v22  ;;  %v13124_v22 = vcombine.high %v4272_v21, %v4276_v29  ;;  %v4232_v29 = vld [vmem:[#allocation2 + $0x1000] sm:$0xff] }
 0x217   :  { %v14127_v49 = vpop.eup %14126  ;;  %3829 = vmatprep.subr.bf16.mxu0 %v12906_v42 }
 0x218   :  { %3869 = vmatpush2.bf16.msra.mxu1 %v13041_v41  ;;  %v4036_v51 = vcombine.low %v14125_v47, %v14127_v49  ;;  %v13252_v41 = vcombine.high %v4400_v24, %v4404_v26 }
 0x219   :  { %3870 = vmatprep.subr.bf16.mxu1 %v13034_v43  ;;  %v4268_v43 = vld [vmem:[#allocation2 + $0x1120] sm:$0xff] }
 0x21a   :  { %v4040_v6 = vrot.slane %v4036_v51, 7  ;;  %3830 = vmatpush2.bf16.msra.mxu0 %v12905_v50  ;;  %v13251_v50 = vcombine.low %v4400_v24, %v4404_v26  ;;  %v4360_v24 = vld [vmem:[#allocation2 + $0x1400] sm:$0xff] }
 0x21b   :  { %3831 = vmatprep.subr.bf16.mxu0 %v12898_v35  ;;  %v4364_v26 = vld [vmem:[#allocation2 + $0x1420] sm:$0xff] }
 0x21c   :  { %3871 = vmatpush2.bf16.msra.mxu1 %v13033_v48  ;;  %v14458_v9 = vmul.f32 %v4040_v6, %v14411_v3 }
 0x21d   :  { %3872 = vmatprep.subr.bf16.mxu1 %v13026_v52  ;;  %v4256_v52 = vld [vmem:[#allocation2 + $0x10c0] sm:$0xff] }
 0x21e   :  { %v4070_v14 = vrot.slane %v14458_v9, %v14386_v30  ;;  %3832 = vmatpush2.bf16.msra.mxu0 %v12897_v7  ;;  %v13108_v6 = vcombine.high %v4256_v52, %v4260_v60  ;;  %v13236_v7 = vcombine.high %v4384_v57, %v4388_v62  ;;  %v13107_v11 = vcombine.low %v4256_v52, %v4260_v60  ;;  %v4336_v60 = vld [vmem:[#allocation2 + $0x1340] sm:$0xff] }
 0x21f   :  { %7385 = vmatprep.subr.bf16.mxu0 %v13140_v8  ;;  %v4252_v8 = vld [vmem:[#allocation2 + $0x10a0] sm:$0xff] }
 0x220   :  { %3873 = vmatpush2.bf16.msra.mxu1 %v13025_v16  ;;  %v4110_v18 = vrot.slane %v4070_v14, %v14383_v28  ;;  %v4248_v16 = vld [vmem:[#allocation2 + $0x1080] sm:$0xff] }
 0x221   :  { %7426 = vmatprep.subr.bf16.mxu1 %v13268_v2  ;;  %v14466_v53 = vpop.f32.mrf.mxu0  ;;  %3834 = vmatmul.mubr.bf16.vlgmr.msra.gmra.mxu0 %v14320_v36  ;;  %v4376_v2 = vld [vmem:[#allocation2 + $0x1480] sm:$0xff]  ;;  %v13100_v5 = vcombine.high %v4248_v16, %v4252_v8 }
 0x222   :  { %v4130_v31 = vmul.f32 %v4110_v18, %v14441_v20  ;;  %7386 = vmatpush1.bf16.msra.mxu0 %v13139_v15  ;;  %7417 = vmatprep.mubr.bf16.mxu0 %v14469_v23  ;;  %v4264_v20 = vld [vmem:[#allocation2 + $0x1100] sm:$0xff]  ;;  %v13228_v13 = vcombine.high %v4376_v2, %v4380_v10  ;;  %v13099_v18 = vcombine.low %v4248_v16, %v4252_v8 }
 0x223   :  { %v14472_v40 = vpop.f32.mrf.mxu1  ;;  %3875 = vmatmul.mubr.bf16.vlgmr.msra.gmra.mxu1 %v14324_v39  ;;  %v14476_v33 = vpop.f32.mrf.mxu0  ;;  %7387 = vmatprep.subr.bf16.mxu0 %v13132_v27  ;;  %v4396_v39 = vld [vmem:[#allocation2 + $0x1520] sm:$0xff]  ;;  %v13116_v49 = vcombine.high %v4264_v20, %v4268_v43  ;;  %v13115_v63 = vcombine.low %v4264_v20, %v4268_v43  ;;  %v13227_v27 = vcombine.low %v4376_v2, %v4380_v10 }
 0x224   :  { %7427 = vmatpush1.bf16.msra.mxu1 %v13267_v17  ;;  %v4210_v42 = vadd.f32 %v4190_v54, %v4130_v31  ;;  %v13244_v51 = vcombine.high %v4392_v45, %v4396_v39  ;;  %v13243_v56 = vcombine.low %v4392_v45, %v4396_v39  ;;  %v4244_v14 = vld [vmem:[#allocation2 + $0x1060] sm:$0xff]  ;;  %v13211_v45 = vcombine.low %v4360_v24, %v4364_v26 }
 0x225   :  { %v14478_v36 = vpop.f32.mrf.mxu1  ;;  %7428 = vmatprep.subr.bf16.mxu1 %v13260_v58  ;;  %v3593_v44 = vpop.f32.mrf.mxu0  ;;  %v4368_v15 = vld [vmem:[#allocation2 + $0x1440] sm:$0xff]  ;;  %v13092_v58 = vcombine.high %v4240_v55, %v4244_v14  ;;  %v13091_v31 = vcombine.low %v4240_v55, %v4244_v14 }
 0x226   :  { %7388 = vmatpush1.bf16.msra.mxu0 %v13131_v32  ;;  %v4218_v0 = vmax.f32 %v4210_v42, 0.0  ;;  %v4372_v17 = vld [vmem:[#allocation2 + $0x1460] sm:$0xff] }
 0x227   :  { %v3634_v19 = vpop.f32.mrf.mxu1  ;;  %v3594_v47 = vpop.f32.mrf.mxu0  ;;  %7389 = vmatprep.subr.bf16.mxu0 %v13124_v22  ;;  %v13220_v21 = vcombine.high %v4368_v15, %v4372_v17  ;;  %v4236_v54 = vld [vmem:[#allocation2 + $0x1020] sm:$0xff]  ;;  %v13219_v32 = vcombine.low %v4368_v15, %v4372_v17  ;;  %v13212_v22 = vcombine.high %v4360_v24, %v4364_v26  ;;  %v4066_v26 = vrot.slane %v14458_v9, %v14383_v28 }
 0x228   :  { %7429 = vmatpush1.bf16.msra.mxu1 %v13259_v38  ;;  %v14480_v35 = vpack.c.bf16 %v4218_v0, %v4218_v0  ;;  %v13084_v38 = vcombine.high %v4232_v29, %v4236_v54  ;;  %v4356_v42 = vld [vmem:[#allocation2 + $0x13e0] sm:$0xff]  ;;  %v13083_v44 = vcombine.low %v4232_v29, %v4236_v54  ;;  %v4146_v9 = vrot.slane %v14411_v3, %v14453_v25 }
 0x229   :  { %v3635_v48 = vpop.f32.mrf.mxu1  ;;  %7430 = vmatprep.subr.bf16.mxu1 %v13252_v41  ;;  %v4352_v41 = vld [vmem:[#allocation2 + $0x13c0] sm:$0xff] }
 0x22a   :  { %7390 = vmatpush1.bf16.msra.mxu0 %v13123_v46  ;;  %7458 = vmatprep.mubr.bf16.mxu1 %v14480_v35  ;;  %v4480_v20 = vld [vmem:[#allocation2 + $0x17c0] sm:$0xff]  ;;  %v13204_v39 = vcombine.high %v4352_v41, %v4356_v42 }
 0x22b   :  { %7391 = vmatprep.subr.bf16.mxu0 %v13116_v49  ;;  %v4484_v43 = vld [vmem:[#allocation2 + $0x17e0] sm:$0xff]  ;;  %v13203_v49 = vcombine.low %v4352_v41, %v4356_v42  ;;  %v4138_v42 = vrot.slane %v14448_v34, %v14453_v25 }
 0x22c   :  { %7431 = vmatpush1.bf16.msra.mxu1 %v13251_v50  ;;  %v13332_v19 = vcombine.high %v4480_v20, %v4484_v43  ;;  %v4344_v46 = vld [vmem:[#allocation2 + $0x1380] sm:$0xff]  ;;  %v13331_v48 = vcombine.low %v4480_v20, %v4484_v43 }
 0x22d   :  { %7432 = vmatprep.subr.bf16.mxu1 %v13244_v51  ;;  %v4348_v0 = vld [vmem:[#allocation2 + $0x13a0] sm:$0xff]  ;;  %v4178_v34 = vrot.slane %v4138_v42, %v14453_v25 }
 0x22e   :  { %7392 = vmatpush1.bf16.msra.mxu0 %v13115_v63  ;;  %v4472_v47 = vld [vmem:[#allocation2 + $0x1780] sm:$0xff]  ;;  %v13196_v51 = vcombine.high %v4344_v46, %v4348_v0 }
 0x22f   :  { %7393 = vmatprep.subr.bf16.mxu0 %v13108_v6  ;;  %v4476_v50 = vld [vmem:[#allocation2 + $0x17a0] sm:$0xff] }
 0x230   :  { %7433 = vmatpush1.bf16.msra.mxu1 %v13243_v56  ;;  %v13324_v52 = vcombine.high %v4472_v47, %v4476_v50  ;;  %v4340_v57 = vld [vmem:[#allocation2 + $0x1360] sm:$0xff]  ;;  %v13195_v56 = vcombine.low %v4344_v46, %v4348_v0  ;;  %v13323_v6 = vcombine.low %v4472_v47, %v4476_v50 }
 0x231   :  { %7434 = vmatprep.subr.bf16.mxu1 %v13236_v7  ;;  %v4464_v62 = vld [vmem:[#allocation2 + $0x1740] sm:$0xff]  ;;  %v13188_v7 = vcombine.high %v4336_v60, %v4340_v57 }
 0x232   :  { %7394 = vmatpush1.bf16.msra.mxu0 %v13107_v11  ;;  %v4468_v63 = vld [vmem:[#allocation2 + $0x1760] sm:$0xff] }
 0x233   :  { %7395 = vmatprep.subr.bf16.mxu0 %v13100_v5  ;;  %v13316_v16 = vcombine.high %v4464_v62, %v4468_v63  ;;  %v4328_v8 = vld [vmem:[#allocation2 + $0x1300] sm:$0xff]  ;;  %v13315_v5 = vcombine.low %v4464_v62, %v4468_v63 }
 0x234   :  { %7435 = vmatpush1.bf16.msra.mxu1 %v13235_v12  ;;  %v4332_v2 = vld [vmem:[#allocation2 + $0x1320] sm:$0xff]  ;;  %v13187_v12 = vcombine.low %v4336_v60, %v4340_v57  ;;  %v4186_v60 = vrot.slane %v4146_v9, %v14453_v25 }
 0x235   :  { %7436 = vmatprep.subr.bf16.mxu1 %v13228_v13  ;;  %v4456_v10 = vld [vmem:[#allocation2 + $0x1700] sm:$0xff]  ;;  %v13180_v13 = vcombine.high %v4328_v8, %v4332_v2 }
 0x236   :  { %7396 = vmatpush1.bf16.msra.mxu0 %v13099_v18  ;;  %v4460_v11 = vld [vmem:[#allocation2 + $0x1720] sm:$0xff] }
 0x237   :  { %7397 = vmatprep.subr.bf16.mxu0 %v13092_v58  ;;  %v13308_v55 = vcombine.high %v4456_v10, %v4460_v11  ;;  %v4320_v14 = vld [vmem:[#allocation2 + $0x12c0] sm:$0xff]  ;;  %v13307_v58 = vcombine.low %v4456_v10, %v4460_v11 }
 0x238   :  { %7437 = vmatpush1.bf16.msra.mxu1 %v13227_v27  ;;  %v4324_v15 = vld [vmem:[#allocation2 + $0x12e0] sm:$0xff]  ;;  %v13179_v27 = vcombine.low %v4328_v8, %v4332_v2 }
 0x239   :  { %7438 = vmatprep.subr.bf16.mxu1 %v13220_v21  ;;  %v4448_v17 = vld [vmem:[#allocation2 + $0x16c0] sm:$0xff]  ;;  %v13172_v21 = vcombine.high %v4320_v14, %v4324_v15 }
 0x23a   :  { %7398 = vmatpush1.bf16.msra.mxu0 %v13091_v31  ;;  %v4452_v18 = vld [vmem:[#allocation2 + $0x16e0] sm:$0xff] }
 0x23b   :  { %7399 = vmatprep.subr.bf16.mxu0 %v13084_v38  ;;  %v13300_v29 = vcombine.high %v4448_v17, %v4452_v18  ;;  %v4312_v54 = vld [vmem:[#allocation2 + $0x1280] sm:$0xff]  ;;  %v13171_v38 = vcombine.low %v4320_v14, %v4324_v15 }
 0x23c   :  { %7439 = vmatpush1.bf16.msra.mxu1 %v13219_v32  ;;  %v4316_v24 = vld [vmem:[#allocation2 + $0x12a0] sm:$0xff] }
 0x23d   :  { %7440 = vmatprep.subr.bf16.mxu1 %v13212_v22  ;;  %v4440_v31 = vld [vmem:[#allocation2 + $0x1680] sm:$0xff]  ;;  %v13299_v22 = vcombine.low %v4448_v17, %v4452_v18  ;;  %v13164_v41 = vcombine.high %v4312_v54, %v4316_v24  ;;  %v13163_v0 = vcombine.low %v4312_v54, %v4316_v24 }
 0x23e   :  { %7400 = vmatpush1.bf16.msra.mxu0 %v13083_v44  ;;  %v4444_v32 = vld [vmem:[#allocation2 + $0x16a0] sm:$0xff] }
 0x23f   :  { %7401 = vmatprep.subr.bf16.mxu0 %v13204_v39  ;;  %v13292_v20 = vcombine.high %v4440_v31, %v4444_v32  ;;  %v4304_v43 = vld [vmem:[#allocation2 + $0x1240] sm:$0xff]  ;;  %v14490_v39 = vld [vmem:[#allocation5 + $0x10] sm:$0x77]  ;;  %v13291_v47 = vcombine.low %v4440_v31, %v4444_v32 }
 0x240   :  { %7441 = vmatpush1.bf16.msra.mxu1 %v13211_v45  ;;  %v4308_v44 = vld [vmem:[#allocation2 + $0x1260] sm:$0xff]  ;;  %v4106_v45 = vrot.slane %v4066_v26, %v14383_v28  ;;  %v590_v63 = vrot.slane %v14490_v39, %v14342_v4 }
 0x241   :  { %7442 = vmatprep.subr.bf16.mxu1 %v13332_v19  ;;  %v4432_v19 = vld [vmem:[#allocation2 + $0x1640] sm:$0xff]  ;;  %v13156_v50 = vcombine.high %v4304_v43, %v4308_v44 }
 0x242   :  { %7402 = vmatpush2.bf16.msra.mxu0 %v13203_v49  ;;  %v4436_v46 = vld [vmem:[#allocation2 + $0x1660] sm:$0xff]  ;;  %v586_v49 = vrot.slane %v14490_v39, %v14337_v61  ;;  %v4129_v3 = vmul.f32 %v4106_v45, %v14436_v37 }
 0x243   :  { %7403 = vmatprep.subr.bf16.mxu0 %v13196_v51  ;;  %v4296_v51 = vld [vmem:[#allocation2 + $0x1200] sm:$0xff] }
 0x244   :  { %7443 = vmatpush2.bf16.msra.mxu1 %v13331_v48  ;;  %v13284_v48 = vcombine.high %v4432_v19, %v4436_v46  ;;  %v4424_v57 = vld [vmem:[#allocation2 + $0x1600] sm:$0xff]  ;;  %v626_v8 = vrot.slane %v586_v49, %v14337_v61  ;;  %v4209_v37 = vadd.f32 %v4186_v60, %v4129_v3 }
 0x245   :  { %7444 = vmatprep.subr.bf16.mxu1 %v13324_v52  ;;  %v4300_v52 = vld [vmem:[#allocation2 + $0x1220] sm:$0xff] }
 0x246   :  { %7404 = vmatpush2.bf16.msra.mxu0 %v13195_v56  ;;  %v4428_v62 = vld [vmem:[#allocation2 + $0x1620] sm:$0xff]  ;;  %v13155_v56 = vcombine.low %v4304_v43, %v4308_v44  ;;  %v3590_v15 = vadd.f32 %v14466_v53, %v626_v8 }
 0x247   :  { %7405 = vmatprep.subr.bf16.mxu0 %v13188_v7  ;;  %v13148_v7 = vcombine.high %v4296_v51, %v4300_v52  ;;  %v13276_v2 = vcombine.high %v4424_v57, %v4428_v62  ;;  %v4544_v10 = vld [vmem:[#allocation2 + $0x19c0] sm:$0xff] }
 0x248   :  { %7445 = vmatpush2.bf16.msra.mxu1 %v13323_v6  ;;  %v13283_v6 = vcombine.low %v4432_v19, %v4436_v46  ;;  %v4548_v11 = vld [vmem:[#allocation2 + $0x19e0] sm:$0xff]  ;;  %v3631_v54 = vadd.f32 %v14472_v40, %v3590_v15 }
 0x249   :  { %7446 = vmatprep.subr.bf16.mxu1 %v13316_v16  ;;  %v4207_v16 = vadd.f32 %v4178_v34, %v14405_v1  ;;  %v13396_v14 = vcombine.high %v4544_v10, %v4548_v11  ;;  %v4217_v1 = vmax.f32 %v4209_v37, 0.0  ;;  %v4536_v17 = vld [vmem:[#allocation2 + $0x1980] sm:$0xff] }
 0x24a   :  { %7406 = vmatpush2.bf16.msra.mxu0 %v13187_v12  ;;  %v630_v12 = vrot.slane %v590_v63, %v14337_v61  ;;  %v4540_v18 = vld [vmem:[#allocation2 + $0x19a0] sm:$0xff] }
 0x24b   :  { %7407 = vmatprep.subr.bf16.mxu0 %v13180_v13  ;;  %v13275_v13 = vcombine.low %v4424_v57, %v4428_v62  ;;  %v14507_v24 = vpack.c.bf16 %v4217_v1, %v4217_v1  ;;  %v4528_v26 = vld [vmem:[#allocation2 + $0x1940] sm:$0xff] }
 0x24c   :  { %7447 = vmatpush2.bf16.msra.mxu1 %v13315_v5  ;;  %v13147_v5 = vcombine.low %v4296_v51, %v4300_v52  ;;  %v4532_v31 = vld [vmem:[#allocation2 + $0x1960] sm:$0xff] }
 0x24d   :  { %7448 = vmatprep.subr.bf16.mxu1 %v13308_v55  ;;  %v4215_v55 = vmax.f32 %v4207_v16, 0.0  ;;  %v13380_v42 = vcombine.high %v4528_v26, %v4532_v31  ;;  %v4520_v44 = vld [vmem:[#allocation2 + $0x1900] sm:$0xff] }
 0x24e   :  { %7408 = vmatpush2.bf16.msra.mxu0 %v13179_v27  ;;  %v3592_v27 = vadd.f32 %v14476_v33, %v630_v12  ;;  %v4524_v45 = vld [vmem:[#allocation2 + $0x1920] sm:$0xff] }
 0x24f   :  { %7409 = vmatprep.subr.bf16.mxu0 %v13172_v21  ;;  %v14504_v21 = vpack.c.bf16 %v4215_v55, %v4215_v55  ;;  %v4512_v51 = vld [vmem:[#allocation2 + $0x18c0] sm:$0xff]  ;;  %v13371_v63 = vcombine.low %v4520_v44, %v4524_v45 }
 0x250   :  { %7449 = vmatpush2.bf16.msra.mxu1 %v13307_v58  ;;  %v13395_v58 = vcombine.low %v4544_v10, %v4548_v11  ;;  %v3633_v32 = vadd.f32 %v14478_v36, %v3592_v27  ;;  %v13379_v36 = vcombine.low %v4528_v26, %v4532_v31  ;;  %v4516_v52 = vld [vmem:[#allocation2 + $0x18e0] sm:$0xff] }
 0x251   :  { %7450 = vmatprep.subr.bf16.mxu1 %v13300_v29  ;;  %v13388_v29 = vcombine.high %v4536_v17, %v4540_v18  ;;  %v4672_v3 = vld [vmem:[#allocation2 + $0x1dc0] sm:$0xff] }
 0x252   :  { %7410 = vmatpush2.bf16.msra.mxu0 %v13171_v38  ;;  %v4676_v60 = vld [vmem:[#allocation2 + $0x1de0] sm:$0xff] }
 0x253   :  { %7411 = vmatprep.subr.bf16.mxu0 %v13164_v41  ;;  %v4508_v37 = vld [vmem:[#allocation2 + $0x18a0] sm:$0xff] }
 0x254   :  { %7451 = vmatpush2.bf16.msra.mxu1 %v13299_v22  ;;  %v13387_v22 = vcombine.low %v4536_v17, %v4540_v18  ;;  %v4664_v10 = vld [vmem:[#allocation2 + $0x1d80] sm:$0xff] }
 0x255   :  { %7452 = vmatprep.subr.bf16.mxu1 %v13292_v20  ;;  %v4668_v11 = vld [vmem:[#allocation2 + $0x1da0] sm:$0xff] }
 0x256   :  { %7412 = vmatpush2.bf16.msra.mxu0 %v13163_v0  ;;  %v13516_v55 = vcombine.high %v4664_v10, %v4668_v11  ;;  %v13515_v15 = vcombine.low %v4664_v10, %v4668_v11  ;;  %v4496_v18 = vld [vmem:[#allocation2 + $0x1840] sm:$0xff] }
 0x257   :  { %7413 = vmatprep.subr.bf16.mxu0 %v13156_v50  ;;  %v13372_v50 = vcombine.high %v4520_v44, %v4524_v45  ;;  %v4500_v27 = vld [vmem:[#allocation2 + $0x1860] sm:$0xff] }
 0x258   :  { %7453 = vmatpush2.bf16.msra.mxu1 %v13291_v47 }
 0x259   :  { %7454 = vmatprep.subr.bf16.mxu1 %v13284_v48 }
 0x25a   :  { %7414 = vmatpush2.bf16.msra.mxu0 %v13155_v56  ;;  %v13524_v56 = vcombine.high %v4672_v3, %v4676_v60 }
 0x25b   :  { %7415 = vmatprep.subr.bf16.mxu0 %v13148_v7  ;;  %v13523_v7 = vcombine.low %v4672_v3, %v4676_v60 }
 0x25c   :  { %7455 = vmatpush2.bf16.msra.mxu1 %v13283_v6  ;;  %v13364_v6 = vcombine.high %v4512_v51, %v4516_v52 }
 0x25d   :  { %7456 = vmatprep.subr.bf16.mxu1 %v13276_v2  ;;  %v4504_v2 = vld [vmem:[#allocation2 + $0x1880] sm:$0xff] }
 0x25e   :  { %7416 = vmatpush2.bf16.msra.mxu0 %v13147_v5  ;;  %v13355_v31 = vcombine.low %v4504_v2, %v4508_v37 }
 0x25f   :  { %7467 = vmatprep.subr.bf16.mxu0 %v13396_v14  ;;  %v13356_v14 = vcombine.high %v4504_v2, %v4508_v37 }
 0x260   :  { %7457 = vmatpush2.bf16.msra.mxu1 %v13275_v13  ;;  %v13363_v13 = vcombine.low %v4512_v51, %v4516_v52 }
 0x261   :  { %v3671_v53 = vpop.f32.mrf.mxu0  ;;  %7418 = vmatmul.mubr.bf16.vlgmr.msra.gmra.mxu0 %v14504_v21  ;;  %7508 = vmatprep.subr.bf16.mxu1 %v13524_v56  ;;  %v4600_v56 = vld [vmem:[#allocation2 + $0x1b80] sm:$0xff] }
 0x262   :  { %v3672_v38 = vadd.f32 %v3671_v53, %v3631_v54  ;;  %7468 = vmatpush1.bf16.msra.mxu0 %v13395_v58  ;;  %v4656_v58 = vld [vmem:[#allocation2 + $0x1d40] sm:$0xff] }
 0x263   :  { %v3712_v33 = vpop.f32.mrf.mxu1  ;;  %7459 = vmatmul.mubr.bf16.vlgmr.msra.gmra.mxu1 %v14507_v24  ;;  %v3673_v41 = vpop.f32.mrf.mxu0  ;;  %7469 = vmatprep.subr.bf16.mxu0 %v13388_v29  ;;  %v4660_v29 = vld [vmem:[#allocation2 + $0x1d60] sm:$0xff] }
 0x264   :  { %v3713_v20 = vadd.f32 %v3712_v33, %v3672_v38  ;;  %v3674_v40 = vadd.f32 %v3673_v41, %v3633_v32  ;;  %7509 = vmatpush1.bf16.msra.mxu1 %v13523_v7  ;;  %v13508_v53 = vcombine.high %v4656_v58, %v4660_v29  ;;  %v13348_v32 = vcombine.high %v4496_v18, %v4500_v27  ;;  %v4488_v41 = vld [vmem:[#allocation2 + $0x1800] sm:$0xff] }
 0x265   :  { %v3714_v43 = vpop.f32.mrf.mxu1  ;;  %v3675_v9 = vpop.f32.mrf.mxu0  ;;  %7510 = vmatprep.subr.bf16.mxu1 %v13516_v55  ;;  %v13507_v38 = vcombine.low %v4656_v58, %v4660_v29  ;;  %v4632_v7 = vld [vmem:[#allocation2 + $0x1c80] sm:$0xff] }
 0x266   :  { %v3907_v19 = vrot.slane %v3713_v20, 4  ;;  %v14512_v46 = vadd.f32 %v3714_v43, %v3674_v40  ;;  %7470 = vmatpush1.bf16.msra.mxu0 %v13387_v22  ;;  %v4648_v40 = vld [vmem:[#allocation2 + $0x1d00] sm:$0xff]  ;;  %v13347_v9 = vcombine.low %v4496_v18, %v4500_v27 }
 0x267   :  { %v3716_v0 = vpop.f32.mrf.mxu1  ;;  %v3676_v47 = vpop.f32.mrf.mxu0  ;;  %7471 = vmatprep.subr.bf16.mxu0 %v13380_v42  ;;  %v4492_v42 = vld [vmem:[#allocation2 + $0x1820] sm:$0xff] }
 0x268   :  { %v3908_v34 = vadd.f32 %v3907_v19, %v3713_v20  ;;  %v3913_v49 = vrot.slane %v14512_v46, 4  ;;  %7511 = vmatpush1.bf16.msra.mxu1 %v13515_v15  ;;  %v4652_v43 = vld [vmem:[#allocation2 + $0x1d20] sm:$0xff]  ;;  %v13340_v0 = vcombine.high %v4488_v41, %v4492_v42 }
 0x269   :  { %v3717_v48 = vpop.f32.mrf.mxu1  ;;  %7512 = vmatprep.subr.bf16.mxu1 %v13508_v53  ;;  %v13500_v19 = vcombine.high %v4648_v40, %v4652_v43  ;;  %v4592_v55 = vld [vmem:[#allocation2 + $0x1b40] sm:$0xff] }
 0x26a   :  { %v3909_v57 = vrot.slane %v3908_v34, 2  ;;  %v3914_v62 = vadd.f32 %v3913_v49, %v14512_v46  ;;  %7472 = vmatpush1.bf16.msra.mxu0 %v13379_v36  ;;  %v4640_v49 = vld [vmem:[#allocation2 + $0x1cc0] sm:$0xff] }
 0x26b   :  { %7473 = vmatprep.subr.bf16.mxu0 %v13372_v50  ;;  %v4608_v50 = vld [vmem:[#allocation2 + $0x1bc0] sm:$0xff] }
 0x26c   :  { %v3910_v16 = vadd.f32 %v3909_v57, %v3908_v34  ;;  %v3915_v8 = vrot.slane %v3914_v62, 2  ;;  %7513 = vmatpush1.bf16.msra.mxu1 %v13507_v38  ;;  %v4612_v34 = vld [vmem:[#allocation2 + $0x1be0] sm:$0xff] }
 0x26d   :  { %7514 = vmatprep.subr.bf16.mxu1 %v13500_v19  ;;  %v4644_v48 = vld [vmem:[#allocation2 + $0x1ce0] sm:$0xff]  ;;  %v13460_v60 = vcombine.high %v4608_v50, %v4612_v34  ;;  %v13459_v37 = vcombine.low %v4608_v50, %v4612_v34 }
 0x26e   :  { %v3911_v12 = vrot.slane %v3910_v16, 1  ;;  %v3916_v5 = vadd.f32 %v3915_v8, %v3914_v62  ;;  %7474 = vmatpush1.bf16.msra.mxu0 %v13371_v63  ;;  %v13492_v3 = vcombine.high %v4640_v49, %v4644_v48  ;;  %v13491_v57 = vcombine.low %v4640_v49, %v4644_v48  ;;  %v4624_v15 = vld [vmem:[#allocation2 + $0x1c40] sm:$0xff] }
 0x26f   :  { %7475 = vmatprep.subr.bf16.mxu0 %v13364_v6  ;;  %v4604_v6 = vld [vmem:[#allocation2 + $0x1ba0] sm:$0xff] }
 0x270   :  { %v3912_v1 = vadd.f32 %v3911_v12, %v3910_v16  ;;  %v3917_v17 = vrot.slane %v3916_v5, 1  ;;  %v4636_v16 = vld [vmem:[#allocation2 + $0x1ca0] sm:$0xff]  ;;  %v13452_v11 = vcombine.high %v4600_v56, %v4604_v6  ;;  %v13451_v27 = vcombine.low %v4600_v56, %v4604_v6 }
 0x271   :  { %v13484_v10 = vcombine.high %v4632_v7, %v4636_v16  ;;  %v13483_v12 = vcombine.low %v4632_v7, %v4636_v16  ;;  %v4584_v53 = vld [vmem:[#allocation2 + $0x1b00] sm:$0xff] }
 0x272   :  { %v3935_v54 = vmul.f32 0.125, %v3912_v1  ;;  %v3918_v26 = vadd.f32 %v3917_v17, %v3916_v5  ;;  %7476 = vmatpush1.bf16.msra.mxu0 %v13363_v13  ;;  %v4628_v1 = vld [vmem:[#allocation2 + $0x1c60] sm:$0xff] }
 0x273   :  { %7477 = vmatprep.subr.bf16.mxu0 %v13356_v14  ;;  %v4596_v14 = vld [vmem:[#allocation2 + $0x1b60] sm:$0xff]  ;;  %v13476_v58 = vcombine.high %v4624_v15, %v4628_v1 }
 0x274   :  { %v14516_v33 = vsub.f32 %v3713_v20, %v3935_v54  ;;  %v3936_v22 = vmul.f32 0.125, %v3918_v26  ;;  %v13499_v20 = vcombine.low %v4648_v40, %v4652_v43  ;;  %v13444_v29 = vcombine.high %v4592_v55, %v4596_v14  ;;  %v4616_v38 = vld [vmem:[#allocation2 + $0x1c00] sm:$0xff] }
 0x275   :  { %v13475_v54 = vcombine.low %v4624_v15, %v4628_v1  ;;  %v13443_v40 = vcombine.low %v4592_v55, %v4596_v14  ;;  %v4560_v56 = vld [vmem:[#allocation2 + $0x1a40] sm:$0xff] }
 0x276   :  { %v3951_v44 = vmul.f32 %v14516_v33, %v14516_v33  ;;  %v14521_v45 = vsub.f32 %v14512_v46, %v3936_v22  ;;  %7478 = vmatpush1.bf16.msra.mxu0 %v13355_v31  ;;  %7515 = vmatpush1.bf16.msra.mxu1 %v13499_v20  ;;  %v13339_v46 = vcombine.low %v4488_v41, %v4492_v42  ;;  %v4620_v22 = vld [vmem:[#allocation2 + $0x1c20] sm:$0xff] }
 0x277   :  { %7479 = vmatprep.subr.bf16.mxu0 %v13348_v32  ;;  %7516 = vmatprep.subr.bf16.mxu1 %v13492_v3  ;;  %v4588_v32 = vld [vmem:[#allocation2 + $0x1b20] sm:$0xff]  ;;  %v13468_v43 = vcombine.high %v4616_v38, %v4620_v22 }
 0x278   :  { %v3979_v36 = vrot.slane %v3951_v44, 4  ;;  %v3952_v47 = vmul.f32 %v14521_v45, %v14521_v45  ;;  %v4580_v20 = vld [vmem:[#allocation2 + $0x1ae0] sm:$0xff]  ;;  %v13435_v50 = vcombine.low %v4584_v53, %v4588_v32 }
 0x279   :  { %v4732_v3 = vld [vmem:[#allocation2 + $0x1fa0] sm:$0xff] }
 0x27a   :  { %v3980_v51 = vadd.f32 %v3979_v36, %v3951_v44  ;;  %v3985_v52 = vrot.slane %v3952_v47, 4  ;;  %7480 = vmatpush1.bf16.msra.mxu0 %v13347_v9  ;;  %7517 = vmatpush1.bf16.msra.mxu1 %v13491_v57  ;;  %v13436_v44 = vcombine.high %v4584_v53, %v4588_v32  ;;  %v13467_v9 = vcombine.low %v4616_v38, %v4620_v22  ;;  %v4736_v36 = vld [vmem:[#allocation2 + $0x1fc0] sm:$0xff] }
 0x27b   :  { %7481 = vmatprep.subr.bf16.mxu0 %v13340_v0  ;;  %7518 = vmatprep.subr.bf16.mxu1 %v13484_v10  ;;  %v4576_v0 = vld [vmem:[#allocation2 + $0x1ac0] sm:$0xff] }
 0x27c   :  { %v3981_v62 = vrot.slane %v3980_v51, 2  ;;  %v3986_v63 = vadd.f32 %v3985_v52, %v3952_v47  ;;  %v4740_v47 = vld [vmem:[#allocation2 + $0x1fe0] sm:$0xff]  ;;  %v13428_v49 = vcombine.high %v4576_v0, %v4580_v20 }
 0x27d   :  { %v13588_v34 = vcombine.high %v4736_v36, %v4740_v47  ;;  %v13587_v48 = vcombine.low %v4736_v36, %v4740_v47  ;;  %v4572_v52 = vld [vmem:[#allocation2 + $0x1aa0] sm:$0xff] }
 0x27e   :  { %v3982_v8 = vadd.f32 %v3981_v62, %v3980_v51  ;;  %v3987_v2 = vrot.slane %v3986_v63, 2  ;;  %7482 = vmatpush1.bf16.msra.mxu0 %v13339_v46  ;;  %7519 = vmatpush1.bf16.msra.mxu1 %v13483_v12  ;;  %v4568_v51 = vld [vmem:[#allocation2 + $0x1a80] sm:$0xff] }
 0x27f   :  { %7483 = vmatprep.subr.bf16.mxu0 %v13460_v60  ;;  %7520 = vmatprep.subr.bf16.mxu1 %v13476_v58  ;;  %v4728_v46 = vld [vmem:[#allocation2 + $0x1f80] sm:$0xff]  ;;  %v13427_v60 = vcombine.low %v4576_v0, %v4580_v20  ;;  %v13420_v62 = vcombine.high %v4568_v51, %v4572_v52  ;;  %v14525_v58 = vld [vmem:[#allocation2 + $0x11c8] sm:$0xff] }
 0x280   :  { %v3983_v5 = vrot.slane %v3982_v8, 1  ;;  %v3988_v13 = vadd.f32 %v3987_v2, %v3986_v63  ;;  %v13580_v57 = vcombine.high %v4728_v46, %v4732_v3  ;;  %v13579_v63 = vcombine.low %v4728_v46, %v4732_v3  ;;  %v4564_v6 = vld [vmem:[#allocation2 + $0x1a60] sm:$0xff] }
 0x281   :  { %v4720_v7 = vld [vmem:[#allocation2 + $0x1f40] sm:$0xff]  ;;  %v13411_v14 = vcombine.low %v4560_v56, %v4564_v6 }
 0x282   :  { %v3984_v17 = vadd.f32 %v3983_v5, %v3982_v8  ;;  %v3989_v18 = vrot.slane %v3988_v13, 1  ;;  %7484 = vmatpush2.bf16.msra.mxu0 %v13459_v37  ;;  %7521 = vmatpush1.bf16.msra.mxu1 %v13475_v54  ;;  %v4724_v16 = vld [vmem:[#allocation2 + $0x1f60] sm:$0xff]  ;;  %v13419_v8 = vcombine.low %v4568_v51, %v4572_v52  ;;  %v13412_v37 = vcombine.high %v4560_v56, %v4564_v6 }
 0x283   :  { %7485 = vmatprep.subr.bf16.mxu0 %v13452_v11  ;;  %7522 = vmatprep.subr.bf16.mxu1 %v13468_v43  ;;  %v13572_v2 = vcombine.high %v4720_v7, %v4724_v16  ;;  %v13571_v10 = vcombine.low %v4720_v7, %v4724_v16  ;;  %v4552_v11 = vld [vmem:[#allocation2 + $0x1a00] sm:$0xff] }
 0x284   :  { %v4007_v26 = vmul.f32 0.125, %v3984_v17  ;;  %v3990_v31 = vadd.f32 %v3989_v18, %v3988_v13  ;;  %v4556_v12 = vld [vmem:[#allocation2 + $0x1a20] sm:$0xff] }
 0x285   :  { %v4712_v5 = vld [vmem:[#allocation2 + $0x1f00] sm:$0xff]  ;;  %v13404_v17 = vcombine.high %v4552_v11, %v4556_v12  ;;  %v13403_v53 = vcombine.low %v4552_v11, %v4556_v12 }
 0x286   :  { %v4015_v41 = vadd.f32 1e-05, %v4007_v26  ;;  %v4008_v42 = vmul.f32 0.125, %v3990_v31  ;;  %7486 = vmatpush2.bf16.msra.mxu0 %v13451_v27  ;;  %7523 = vmatpush1.bf16.msra.mxu1 %v13467_v9  ;;  %v4716_v13 = vld [vmem:[#allocation2 + $0x1f20] sm:$0xff] }
 0x287   :  { %7487 = vmatprep.subr.bf16.mxu0 %v13444_v29  ;;  %7524 = vmatprep.subr.bf16.mxu1 %v13588_v34  ;;  %v13564_v15 = vcombine.high %v4712_v5, %v4716_v13  ;;  %v13563_v18 = vcombine.low %v4712_v5, %v4716_v13  ;;  %v14527_v29 = vld [vmem:[#allocation2 + $0x11e8] sm:$0xff]  ;;  %v4704_v54 = vld [vmem:[#allocation2 + $0x1ec0] sm:$0xff] }
 0x288   :  { %v4016_v19 = vadd.f32 1e-05, %v4008_v42  ;;  %14128 = vrsqrt.f32 %v4015_v41  ;;  %v4708_v26 = vld [vmem:[#allocation2 + $0x1ee0] sm:$0xff]  ;;  %v13142_v38 = vcombine.high %v14525_v58, %v14527_v29  ;;  %v4158_v42 = vrot.slane %v14490_v39, %v14446_v59 }
 0x289   :  { %v13556_v32 = vcombine.high %v4704_v54, %v4708_v26  ;;  %v13555_v22 = vcombine.low %v4704_v54, %v4708_v26  ;;  %v4696_v43 = vld [vmem:[#allocation2 + $0x1e80] sm:$0xff] }
 0x28a   :  { %14130 = vrsqrt.f32 %v4016_v19  ;;  %7488 = vmatpush2.bf16.msra.mxu0 %v13443_v40  ;;  %7525 = vmatpush2.bf16.msra.mxu1 %v13587_v48  ;;  %v4154_v40 = vrot.slane %v14490_v39, %v14453_v25  ;;  %v4198_v47 = vrot.slane %v4158_v42, %v14453_v25  ;;  %v4692_v48 = vld [vmem:[#allocation2 + $0x1e60] sm:$0xff] }
 0x28b   :  { %7489 = vmatprep.subr.bf16.mxu0 %v13436_v44  ;;  %7526 = vmatprep.subr.bf16.mxu1 %v13580_v57  ;;  %v4700_v44 = vld [vmem:[#allocation2 + $0x1ea0] sm:$0xff] }
 0x28c   :  { %v13548_v0 = vcombine.high %v4696_v43, %v4700_v44  ;;  %v13547_v20 = vcombine.low %v4696_v43, %v4700_v44  ;;  %v4680_v7 = vld [vmem:[#allocation2 + $0x1e00] sm:$0xff]  ;;  %v4249_v43 = vld [vmem:[#allocation2 + $0x1088] sm:$0xff] }
 0x28d   :  { %v4684_v16 = vld [vmem:[#allocation2 + $0x1e20] sm:$0xff]  ;;  %v4253_v44 = vld [vmem:[#allocation2 + $0x10a8] sm:$0xff] }
 0x28e   :  { %7490 = vmatpush2.bf16.msra.mxu0 %v13435_v50  ;;  %7527 = vmatpush2.bf16.msra.mxu1 %v13579_v63  ;;  %v13531_v11 = vcombine.low %v4680_v7, %v4684_v16  ;;  %v13532_v12 = vcombine.high %v4680_v7, %v4684_v16  ;;  %v4337_v16 = vld [vmem:[#allocation2 + $0x1348] sm:$0xff] }
 0x28f   :  { %7491 = vmatprep.subr.bf16.mxu0 %v13428_v49  ;;  %7528 = vmatprep.subr.bf16.mxu1 %v13572_v2  ;;  %v4688_v49 = vld [vmem:[#allocation2 + $0x1e40] sm:$0xff] }
 0x290   :  { %v13540_v57 = vcombine.high %v4688_v49, %v4692_v48 }
 0x292   :  { %7492 = vmatpush2.bf16.msra.mxu0 %v13427_v60  ;;  %7529 = vmatpush2.bf16.msra.mxu1 %v13571_v10  ;;  %v13539_v60 = vcombine.low %v4688_v49, %v4692_v48  ;;  %v4285_v10 = vld [vmem:[#allocation2 + $0x11a8] sm:$0xff] }
 0x293   :  { %7493 = vmatprep.subr.bf16.mxu0 %v13420_v62  ;;  %7530 = vmatprep.subr.bf16.mxu1 %v13564_v15 }
 0x295   :  { %v14129_v55 = vpop.eup %14128 }
 0x296   :  { %7494 = vmatpush2.bf16.msra.mxu0 %v13419_v8  ;;  %7531 = vmatpush2.bf16.msra.mxu1 %v13563_v18  ;;  %v4273_v18 = vld [vmem:[#allocation2 + $0x1148] sm:$0xff] }
 0x297   :  { %v14131_v1 = vpop.eup %14130  ;;  %7495 = vmatprep.subr.bf16.mxu0 %v13412_v37  ;;  %7532 = vmatprep.subr.bf16.mxu1 %v13556_v32 }
 0x298   :  { %v4037_v27 = vcombine.low %v14129_v55, %v14131_v1  ;;  %v13141_v55 = vcombine.low %v14525_v58, %v14527_v29  ;;  %v14558_v1 = vld [vmem:[#allocation2 + $0x15c8] sm:$0xff] }
 0x29a   :  { %v4041_v31 = vrot.slane %v4037_v27, 7  ;;  %7496 = vmatpush2.bf16.msra.mxu0 %v13411_v14  ;;  %7533 = vmatpush2.bf16.msra.mxu1 %v13555_v22  ;;  %v4277_v27 = vld [vmem:[#allocation2 + $0x1168] sm:$0xff] }
 0x29b   :  { %7497 = vmatprep.subr.bf16.mxu0 %v13404_v17  ;;  %7534 = vmatprep.subr.bf16.mxu1 %v13548_v0  ;;  %v14560_v17 = vld [vmem:[#allocation2 + $0x15e8] sm:$0xff]  ;;  %v13126_v29 = vcombine.high %v4273_v18, %v4277_v27  ;;  %v13125_v32 = vcombine.low %v4273_v18, %v4277_v27 }
 0x29c   :  { %v4049_v41 = vmul.f32 %v4041_v31, %v14490_v39  ;;  %v4194_v39 = vrot.slane %v4154_v40, %v14453_v25  ;;  %v13269_v54 = vcombine.low %v14558_v1, %v14560_v17  ;;  %v13270_v26 = vcombine.high %v14558_v1, %v14560_v17  ;;  %v4265_v31 = vld [vmem:[#allocation2 + $0x1108] sm:$0xff] }
 0x29d   :  { %v4257_v22 = vld [vmem:[#allocation2 + $0x10c8] sm:$0xff] }
 0x29e   :  { %v4078_v9 = vrot.slane %v4049_v41, %v14386_v30  ;;  %7498 = vmatpush2.bf16.msra.mxu0 %v13403_v53  ;;  %v4074_v19 = vrot.slane %v4049_v41, %v14383_v28  ;;  %7535 = vmatpush2.bf16.msra.mxu1 %v13547_v20  ;;  %v4269_v53 = vld [vmem:[#allocation2 + $0x1128] sm:$0xff] }
 0x29f   :  { %7549 = vmatprep.subr.bf16.mxu0 %v13142_v38  ;;  %7536 = vmatprep.subr.bf16.mxu1 %v13540_v57  ;;  %v13118_v38 = vcombine.high %v4265_v31, %v4269_v53  ;;  %v4261_v41 = vld [vmem:[#allocation2 + $0x10e8] sm:$0xff]  ;;  %v13117_v42 = vcombine.low %v4265_v31, %v4269_v53 }
 0x2a0   :  { %v4118_v36 = vrot.slane %v4078_v9, %v14383_v28  ;;  %v4114_v50 = vrot.slane %v4074_v19, %v14383_v28  ;;  %v13110_v40 = vcombine.high %v4257_v22, %v4261_v41  ;;  %v13109_v9 = vcombine.low %v4257_v22, %v4261_v41  ;;  %v4241_v0 = vld [vmem:[#allocation2 + $0x1048] sm:$0xff] }
 0x2a1   :  { %v14542_v34 = vpop.f32.mrf.mxu0  ;;  %v13102_v19 = vcombine.high %v4249_v43, %v4253_v44  ;;  %v4245_v20 = vld [vmem:[#allocation2 + $0x1068] sm:$0xff] }
 0x2a2   :  { %v4132_v51 = vmul.f32 %v4118_v36, %v14521_v45  ;;  %v4131_v46 = vmul.f32 %v4114_v50, %v14516_v33  ;;  %v4281_v45 = vld [vmem:[#allocation2 + $0x1188] sm:$0xff]  ;;  %7537 = vmatpush2.bf16.msra.mxu1 %v13539_v60  ;;  %v13101_v36 = vcombine.low %v4249_v43, %v4253_v44  ;;  %v13093_v49 = vcombine.low %v4241_v0, %v4245_v20 }
 0x2a3   :  { %v14545_v52 = vpop.f32.mrf.mxu1  ;;  %v14548_v3 = vpop.f32.mrf.mxu0  ;;  %v13134_v15 = vcombine.high %v4281_v45, %v4285_v10  ;;  %7538 = vmatprep.subr.bf16.mxu1 %v13532_v12  ;;  %v13133_v58 = vcombine.low %v4281_v45, %v4285_v10  ;;  %v4233_v50 = vld [vmem:[#allocation2 + $0x1008] sm:$0xff] }
 0x2a4   :  { %v4212_v63 = vadd.f32 %v4198_v47, %v4132_v51  ;;  %v4211_v56 = vadd.f32 %v4194_v39, %v4131_v46  ;;  %v13094_v47 = vcombine.high %v4241_v0, %v4245_v20  ;;  %v4237_v39 = vld [vmem:[#allocation2 + $0x1028] sm:$0xff] }
 0x2a5   :  { %v14550_v62 = vpop.f32.mrf.mxu1  ;;  %v3757_v6 = vpop.f32.mrf.mxu0  ;;  %v13086_v48 = vcombine.high %v4233_v50, %v4237_v39  ;;  %v4353_v51 = vld [vmem:[#allocation2 + $0x13c8] sm:$0xff]  ;;  %v13085_v60 = vcombine.low %v4233_v50, %v4237_v39 }
 0x2a6   :  { %v4220_v2 = vmax.f32 %v4212_v63, 0.0  ;;  %v4219_v37 = vmax.f32 %v4211_v56, 0.0  ;;  %7539 = vmatpush2.bf16.msra.mxu1 %v13531_v11  ;;  %v4357_v46 = vld [vmem:[#allocation2 + $0x13e8] sm:$0xff] }
 0x2a7   :  { %v3798_v8 = vpop.f32.mrf.mxu1  ;;  %v3758_v33 = vpop.f32.mrf.mxu0  ;;  %7590 = vmatprep.subr.bf16.mxu1 %v13270_v26  ;;  %v13206_v57 = vcombine.high %v4353_v51, %v4357_v46  ;;  %v4345_v63 = vld [vmem:[#allocation2 + $0x1388] sm:$0xff]  ;;  %v13205_v6 = vcombine.low %v4353_v51, %v4357_v46 }
 0x2a8   :  { %v14552_v13 = vpack.c.bf16 %v4220_v2, %v4220_v2  ;;  %v14556_v14 = vpack.c.bf16 %v4219_v37, %v4219_v37  ;;  %v4349_v56 = vld [vmem:[#allocation2 + $0x13a8] sm:$0xff]  ;;  %v14569_v33 = vld [vmem:[#allocation5 + $0x18] sm:$0x77] }
 0x2a9   :  { %v3799_v5 = vpop.f32.mrf.mxu1  ;;  %v13198_v7 = vcombine.high %v4345_v63, %v4349_v56  ;;  %v4341_v8 = vld [vmem:[#allocation2 + $0x1368] sm:$0xff]  ;;  %v13197_v2 = vcombine.low %v4345_v63, %v4349_v56  ;;  %v598_v26 = vrot.slane %v14569_v33, %v14342_v4 }
 0x2aa   :  { %7499 = vmatprep.mubr.bf16.mxu0 %v14552_v13  ;;  %v13190_v37 = vcombine.high %v4337_v16, %v4341_v8  ;;  %v4329_v45 = vld [vmem:[#allocation2 + $0x1308] sm:$0xff]  ;;  %v13189_v11 = vcombine.low %v4337_v16, %v4341_v8 }
 0x2ab   :  { %7500 = vmatmul.mubr.bf16.vlgmr.msra.gmra.mxu0 %v14556_v14  ;;  %v4333_v10 = vld [vmem:[#allocation2 + $0x1328] sm:$0xff] }
 0x2ac   :  { %7550 = vmatpush1.bf16.msra.mxu0 %v13141_v55  ;;  %7581 = vmatprep.mubr.bf16.mxu0 %v14469_v23  ;;  %v13182_v12 = vcombine.high %v4329_v45, %v4333_v10  ;;  %v4321_v5 = vld [vmem:[#allocation2 + $0x12c8] sm:$0xff]  ;;  %v13181_v18 = vcombine.low %v4329_v45, %v4333_v10 }
 0x2ad   :  { %7551 = vmatprep.subr.bf16.mxu0 %v13134_v15  ;;  %v4325_v55 = vld [vmem:[#allocation2 + $0x12e8] sm:$0xff]  ;;  %v594_v15 = vrot.slane %v14569_v33, %v14337_v61 }
 0x2ae   :  { %v13174_v27 = vcombine.high %v4321_v5, %v4325_v55  ;;  %v13173_v53 = vcombine.low %v4321_v5, %v4325_v55  ;;  %v4305_v22 = vld [vmem:[#allocation2 + $0x1248] sm:$0xff] }
 0x2af   :  { %v634_v31 = vrot.slane %v594_v15, %v14337_v61  ;;  %v4309_v41 = vld [vmem:[#allocation2 + $0x1268] sm:$0xff] }
 0x2b0   :  { %7552 = vmatpush1.bf16.msra.mxu0 %v13133_v58  ;;  %v4313_v58 = vld [vmem:[#allocation2 + $0x1288] sm:$0xff]  ;;  %v13158_v43 = vcombine.high %v4305_v22, %v4309_v41  ;;  %v13157_v20 = vcombine.low %v4305_v22, %v4309_v41 }
 0x2b1   :  { %7553 = vmatprep.subr.bf16.mxu0 %v13126_v29  ;;  %v4317_v29 = vld [vmem:[#allocation2 + $0x12a8] sm:$0xff] }
 0x2b2   :  { %v4537_v16 = vld [vmem:[#allocation2 + $0x1988] sm:$0xff] }
 0x2b3   :  { %v4541_v8 = vld [vmem:[#allocation2 + $0x19a8] sm:$0xff] }
 0x2b4   :  { %7554 = vmatpush1.bf16.msra.mxu0 %v13125_v32  ;;  %v13166_v32 = vcombine.high %v4313_v58, %v4317_v29  ;;  %v4529_v55 = vld [vmem:[#allocation2 + $0x1948] sm:$0xff] }
 0x2b5   :  { %7555 = vmatprep.subr.bf16.mxu0 %v13118_v38  ;;  %v638_v38 = vrot.slane %v598_v26, %v14337_v61  ;;  %v4533_v15 = vld [vmem:[#allocation2 + $0x1968] sm:$0xff]  ;;  %v13389_v26 = vcombine.low %v4537_v16, %v4541_v8 }
 0x2b6   :  { %v13381_v41 = vcombine.low %v4529_v55, %v4533_v15 }
 0x2b7   :  { %v3756_v44 = vadd.f32 %v14548_v3, %v638_v38 }
 0x2b8   :  { %7556 = vmatpush1.bf16.msra.mxu0 %v13117_v42  ;;  %v3754_v42 = vadd.f32 %v14542_v34, %v634_v31  ;;  %v4545_v34 = vld [vmem:[#allocation2 + $0x19c8] sm:$0xff] }
 0x2b9   :  { %7557 = vmatprep.subr.bf16.mxu0 %v13110_v40  ;;  %v13165_v40 = vcombine.low %v4313_v58, %v4317_v29  ;;  %v3797_v50 = vadd.f32 %v14550_v62, %v3756_v44  ;;  %v13382_v58 = vcombine.high %v4529_v55, %v4533_v15  ;;  %v4513_v44 = vld [vmem:[#allocation2 + $0x18c8] sm:$0xff] }
 0x2ba   :  { %v3795_v0 = vadd.f32 %v14545_v52, %v3754_v42  ;;  %v4609_v55 = vld [vmem:[#allocation2 + $0x1bc8] sm:$0xff] }
 0x2bb   :  { %v4613_v15 = vld [vmem:[#allocation2 + $0x1be8] sm:$0xff] }
 0x2bc   :  { %7558 = vmatpush1.bf16.msra.mxu0 %v13109_v9  ;;  %v4297_v9 = vld [vmem:[#allocation2 + $0x1208] sm:$0xff] }
 0x2bd   :  { %7559 = vmatprep.subr.bf16.mxu0 %v13102_v19  ;;  %v4301_v19 = vld [vmem:[#allocation2 + $0x1228] sm:$0xff] }
 0x2be   :  { %v13149_v3 = vcombine.low %v4297_v9, %v4301_v19 }
 0x2c0   :  { %7560 = vmatpush1.bf16.msra.mxu0 %v13101_v36 }
 0x2c1   :  { %7561 = vmatprep.subr.bf16.mxu0 %v13094_v47  ;;  %v13150_v47 = vcombine.high %v4297_v9, %v4301_v19  ;;  %v4517_v9 = vld [vmem:[#allocation2 + $0x18e8] sm:$0xff] }
 0x2c4   :  { %7562 = vmatpush1.bf16.msra.mxu0 %v13093_v49 }
 0x2c5   :  { %7563 = vmatprep.subr.bf16.mxu0 %v13086_v48  ;;  %v4549_v48 = vld [vmem:[#allocation2 + $0x19e8] sm:$0xff] }
 0x2c6   :  { %v13398_v52 = vcombine.high %v4545_v34, %v4549_v48  ;;  %v13397_v10 = vcombine.low %v4545_v34, %v4549_v48 }
 0x2c8   :  { %7564 = vmatpush1.bf16.msra.mxu0 %v13085_v60 }
 0x2c9   :  { %7565 = vmatprep.subr.bf16.mxu0 %v13206_v57 }
 0x2cc   :  { %7566 = vmatpush2.bf16.msra.mxu0 %v13205_v6 }
 0x2cd   :  { %7567 = vmatprep.subr.bf16.mxu0 %v13198_v7 }
 0x2d0   :  { %7568 = vmatpush2.bf16.msra.mxu0 %v13197_v2 }
 0x2d1   :  { %7569 = vmatprep.subr.bf16.mxu0 %v13190_v37 }
 0x2d4   :  { %7570 = vmatpush2.bf16.msra.mxu0 %v13189_v11  ;;  %v13390_v11 = vcombine.high %v4537_v16, %v4541_v8 }
 0x2d5   :  { %7571 = vmatprep.subr.bf16.mxu0 %v13182_v12 }
 0x2d8   :  { %7572 = vmatpush2.bf16.msra.mxu0 %v13181_v18 }
 0x2d9   :  { %7573 = vmatprep.subr.bf16.mxu0 %v13174_v27 }
 0x2dc   :  { %7574 = vmatpush2.bf16.msra.mxu0 %v13173_v53  ;;  %v4521_v53 = vld [vmem:[#allocation2 + $0x1908] sm:$0xff] }
 0x2dd   :  { %7575 = vmatprep.subr.bf16.mxu0 %v13166_v32  ;;  %v4525_v32 = vld [vmem:[#allocation2 + $0x1928] sm:$0xff] }
 0x2de   :  { %v13374_v42 = vcombine.high %v4521_v53, %v4525_v32 }
 0x2e0   :  { %7576 = vmatpush2.bf16.msra.mxu0 %v13165_v40 }
 0x2e1   :  { %v3835_v36 = vpop.f32.mrf.mxu0  ;;  %7577 = vmatprep.subr.bf16.mxu0 %v13158_v43 }
 0x2e2   :  { %v3836_v39 = vadd.f32 %v3835_v36, %v3795_v0  ;;  %v13366_v36 = vcombine.high %v4513_v44, %v4517_v9 }
 0x2e3   :  { %v3876_v49 = vpop.f32.mrf.mxu1  ;;  %v3837_v51 = vpop.f32.mrf.mxu0 }
 0x2e4   :  { %v3877_v46 = vadd.f32 %v3876_v49, %v3836_v39  ;;  %v3838_v60 = vadd.f32 %v3837_v51, %v3797_v50  ;;  %7578 = vmatpush2.bf16.msra.mxu0 %v13157_v20  ;;  %v13373_v20 = vcombine.low %v4521_v53, %v4525_v32  ;;  %v4505_v39 = vld [vmem:[#allocation2 + $0x1888] sm:$0xff]  ;;  %v13365_v51 = vcombine.low %v4513_v44, %v4517_v9 }
 0x2e5   :  { %v3878_v57 = vpop.f32.mrf.mxu1  ;;  %v3839_v63 = vpop.f32.mrf.mxu0  ;;  %7579 = vmatprep.subr.bf16.mxu0 %v13150_v47  ;;  %v4509_v49 = vld [vmem:[#allocation2 + $0x18a8] sm:$0xff] }
 0x2e6   :  { %v3919_v56 = vrot.slane %v3877_v46, 4  ;;  %v3879_v6 = vadd.f32 %v3878_v57, %v3838_v60  ;;  %v4501_v63 = vld [vmem:[#allocation2 + $0x1868] sm:$0xff] }
 0x2e7   :  { %v3880_v7 = vpop.f32.mrf.mxu1  ;;  %v3840_v2 = vpop.f32.mrf.mxu0  ;;  %v4601_v53 = vld [vmem:[#allocation2 + $0x1b88] sm:$0xff] }
 0x2e8   :  { %v3920_v62 = vadd.f32 %v3919_v56, %v3877_v46  ;;  %v3925_v37 = vrot.slane %v3879_v6, 4  ;;  %7580 = vmatpush2.bf16.msra.mxu0 %v13149_v3  ;;  %v4497_v3 = vld [vmem:[#allocation2 + $0x1848] sm:$0xff]  ;;  %v13357_v7 = vcombine.low %v4505_v39, %v4509_v49 }
 0x2e9   :  { %v3881_v45 = vpop.f32.mrf.mxu1  ;;  %7631 = vmatprep.subr.bf16.mxu0 %v13398_v52  ;;  %v4489_v2 = vld [vmem:[#allocation2 + $0x1808] sm:$0xff] }
 0x2ea   :  { %v3921_v12 = vrot.slane %v3920_v62, 2  ;;  %v3926_v5 = vadd.f32 %v3925_v37, %v3879_v6  ;;  %v4605_v32 = vld [vmem:[#allocation2 + $0x1ba8] sm:$0xff] }
 0x2eb   :  { %7582 = vmatmul.mubr.bf16.vlgmr.msra.gmra.mxu0 %v14504_v21  ;;  %v4585_v9 = vld [vmem:[#allocation2 + $0x1b08] sm:$0xff] }
 0x2ec   :  { %v3922_v18 = vadd.f32 %v3921_v12, %v3920_v62  ;;  %v3927_v27 = vrot.slane %v3926_v5, 2  ;;  %7632 = vmatpush1.bf16.msra.mxu0 %v13397_v10  ;;  %7663 = vmatprep.mubr.bf16.mxu0 %v14552_v13  ;;  %v4493_v62 = vld [vmem:[#allocation2 + $0x1828] sm:$0xff]  ;;  %v13349_v10 = vcombine.low %v4497_v3, %v4501_v63 }
 0x2ed   :  { %7633 = vmatprep.subr.bf16.mxu0 %v13390_v11  ;;  %v13342_v11 = vcombine.high %v4489_v2, %v4493_v62 }
 0x2ee   :  { %v3923_v29 = vrot.slane %v3922_v18, 1  ;;  %v3928_v31 = vadd.f32 %v3927_v27, %v3926_v5 }
 0x2f0   :  { %v3924_v38 = vadd.f32 %v3923_v29, %v3922_v18  ;;  %v3929_v22 = vrot.slane %v3928_v31, 1  ;;  %7634 = vmatpush1.bf16.msra.mxu0 %v13389_v26  ;;  %v13341_v26 = vcombine.low %v4489_v2, %v4493_v62 }
 0x2f1   :  { %7635 = vmatprep.subr.bf16.mxu0 %v13382_v58  ;;  %v13462_v58 = vcombine.high %v4609_v55, %v4613_v15 }
 0x2f2   :  { %v3937_v40 = vmul.f32 0.125, %v3924_v38  ;;  %v3930_v43 = vadd.f32 %v3929_v22, %v3928_v31  ;;  %v13461_v22 = vcombine.low %v4609_v55, %v4613_v15  ;;  %v4557_v55 = vld [vmem:[#allocation2 + $0x1a28] sm:$0xff] }
 0x2f4   :  { %v14583_v19 = vsub.f32 %v3877_v46, %v3937_v40  ;;  %v3938_v0 = vmul.f32 0.125, %v3930_v43  ;;  %7636 = vmatpush1.bf16.msra.mxu0 %v13381_v41  ;;  %v13358_v46 = vcombine.high %v4505_v39, %v4509_v49  ;;  %v13454_v41 = vcombine.high %v4601_v53, %v4605_v32  ;;  %v4597_v40 = vld [vmem:[#allocation2 + $0x1b68] sm:$0xff] }
 0x2f5   :  { %7637 = vmatprep.subr.bf16.mxu0 %v13374_v42  ;;  %v4593_v42 = vld [vmem:[#allocation2 + $0x1b48] sm:$0xff]  ;;  %v13453_v43 = vcombine.low %v4601_v53, %v4605_v32 }
 0x2f6   :  { %v3953_v47 = vmul.f32 %v14583_v19, %v14583_v19  ;;  %v14587_v50 = vsub.f32 %v3879_v6, %v3938_v0  ;;  %v13350_v6 = vcombine.high %v4497_v3, %v4501_v63  ;;  %v13446_v44 = vcombine.high %v4593_v42, %v4597_v40  ;;  %v4589_v0 = vld [vmem:[#allocation2 + $0x1b28] sm:$0xff] }
 0x2f7   :  { %v4581_v39 = vld [vmem:[#allocation2 + $0x1ae8] sm:$0xff]  ;;  %v13437_v49 = vcombine.low %v4585_v9, %v4589_v0 }
 0x2f8   :  { %v3991_v34 = vrot.slane %v3953_v47, 4  ;;  %v3954_v48 = vmul.f32 %v14587_v50, %v14587_v50  ;;  %7638 = vmatpush1.bf16.msra.mxu0 %v13373_v20  ;;  %v13445_v20 = vcombine.low %v4593_v42, %v4597_v40  ;;  %v4294_v42 = vld [vmem:[#allocation2 + $0x11f0] sm:$0xff] }
 0x2f9   :  { %7639 = vmatprep.subr.bf16.mxu0 %v13366_v36  ;;  %v13438_v36 = vcombine.high %v4585_v9, %v4589_v0 }
 0x2fa   :  { %v3992_v60 = vadd.f32 %v3991_v34, %v3953_v47  ;;  %v3997_v57 = vrot.slane %v3954_v48, 4  ;;  %v4577_v47 = vld [vmem:[#allocation2 + $0x1ac8] sm:$0xff] }
 0x2fb   :  { %v13430_v34 = vcombine.high %v4577_v47, %v4581_v39  ;;  %v13429_v63 = vcombine.low %v4577_v47, %v4581_v39 }
 0x2fc   :  { %v3993_v52 = vrot.slane %v3992_v60, 2  ;;  %v3998_v56 = vadd.f32 %v3997_v57, %v3954_v48  ;;  %7640 = vmatpush1.bf16.msra.mxu0 %v13365_v51  ;;  %v4569_v51 = vld [vmem:[#allocation2 + $0x1a88] sm:$0xff]  ;;  %v4745_v57 = vld [vmem:[#allocation5 + $0x20] sm:$0x77] }
 0x2fd   :  { %7641 = vmatprep.subr.bf16.mxu0 %v13358_v46  ;;  %v4573_v46 = vld [vmem:[#allocation2 + $0x1aa8] sm:$0xff] }
 0x2fe   :  { %v3994_v16 = vadd.f32 %v3993_v52, %v3992_v60  ;;  %v3999_v8 = vrot.slane %v3998_v56, 2  ;;  %v13422_v52 = vcombine.high %v4569_v51, %v4573_v46  ;;  %v13421_v62 = vcombine.low %v4569_v51, %v4573_v46  ;;  %v4409_v46 = vld [vmem:[#allocation2 + $0x1588] sm:$0xff] }
 0x300   :  { %v3995_v37 = vrot.slane %v3994_v16, 1  ;;  %v4000_v45 = vadd.f32 %v3999_v8, %v3998_v56  ;;  %7642 = vmatpush1.bf16.msra.mxu0 %v13357_v7  ;;  %v4756_v7 = vrot.slane %v4745_v57, %v14337_v61  ;;  %v4760_v8 = vrot.slane %v4745_v57, %v14342_v4  ;;  %v4282_v57 = vld [vmem:[#allocation2 + $0x1190] sm:$0xff] }
 0x301   :  { %7643 = vmatprep.subr.bf16.mxu0 %v13350_v6  ;;  %v4561_v6 = vld [vmem:[#allocation2 + $0x1a48] sm:$0xff] }
 0x302   :  { %v3996_v12 = vadd.f32 %v3995_v37, %v3994_v16  ;;  %v4001_v5 = vrot.slane %v4000_v45, 1  ;;  %v4565_v16 = vld [vmem:[#allocation2 + $0x1a68] sm:$0xff]  ;;  %v4166_v37 = vrot.slane %v14569_v33, %v14446_v59 }
 0x304   :  { %v4009_v18 = vmul.f32 0.125, %v3996_v12  ;;  %v4002_v27 = vadd.f32 %v4001_v5, %v4000_v45  ;;  %7644 = vmatpush1.bf16.msra.mxu0 %v13349_v10  ;;  %v4162_v45 = vrot.slane %v14569_v33, %v14453_v25  ;;  %v13414_v10 = vcombine.high %v4561_v6, %v4565_v16  ;;  %v4553_v5 = vld [vmem:[#allocation2 + $0x1a08] sm:$0xff] }
 0x305   :  { %7645 = vmatprep.subr.bf16.mxu0 %v13342_v11  ;;  %v4796_v12 = vrot.slane %v4756_v7, %v14337_v61  ;;  %v13406_v53 = vcombine.high %v4553_v5, %v4557_v55 }
 0x306   :  { %v4017_v29 = vadd.f32 1e-05, %v4009_v18  ;;  %v4010_v31 = vmul.f32 0.125, %v4002_v27  ;;  %v13413_v18 = vcombine.low %v4561_v6, %v4565_v16  ;;  %v4800_v27 = vrot.slane %v4760_v8, %v14337_v61  ;;  %v4401_v6 = vld [vmem:[#allocation2 + $0x1548] sm:$0xff] }
 0x308   :  { %v4018_v38 = vadd.f32 1e-05, %v4010_v31  ;;  %7646 = vmatpush1.bf16.msra.mxu0 %v13341_v26  ;;  %14132 = vrsqrt.f32 %v4017_v29  ;;  %v4202_v29 = vrot.slane %v4162_v45, %v14453_v25 }
 0x309   :  { %7647 = vmatprep.subr.bf16.mxu0 %v13462_v58  ;;  %v4206_v58 = vrot.slane %v4166_v37, %v14453_v25  ;;  %v4278_v37 = vld [vmem:[#allocation2 + $0x1170] sm:$0xff] }
 0x30a   :  { %14134 = vrsqrt.f32 %v4018_v38 }
 0x30c   :  { %7648 = vmatpush2.bf16.msra.mxu0 %v13461_v22 }
 0x30d   :  { %7649 = vmatprep.subr.bf16.mxu0 %v13454_v41  ;;  %v4290_v41 = vld [vmem:[#allocation2 + $0x11d0] sm:$0xff] }
 0x310   :  { %7650 = vmatpush2.bf16.msra.mxu0 %v13453_v43 }
 0x311   :  { %7651 = vmatprep.subr.bf16.mxu0 %v13446_v44  ;;  %v13405_v44 = vcombine.low %v4553_v5, %v4557_v55  ;;  %v4393_v5 = vld [vmem:[#allocation2 + $0x1508] sm:$0xff] }
 0x312   :  { %v4397_v55 = vld [vmem:[#allocation2 + $0x1528] sm:$0xff] }
 0x313   :  { %v13246_v17 = vcombine.high %v4393_v5, %v4397_v55 }
 0x314   :  { %7652 = vmatpush2.bf16.msra.mxu0 %v13445_v20 }
 0x315   :  { %7653 = vmatprep.subr.bf16.mxu0 %v13438_v36  ;;  %v14133_v48 = vpop.eup %14132 }
 0x317   :  { %v14135_v60 = vpop.eup %14134 }
 0x318   :  { %v4038_v3 = vcombine.low %v14133_v48, %v14135_v60  ;;  %7654 = vmatpush2.bf16.msra.mxu0 %v13437_v49  ;;  %v13144_v49 = vcombine.high %v4290_v41, %v4294_v42 }
 0x319   :  { %7655 = vmatprep.subr.bf16.mxu0 %v13430_v34 }
 0x31a   :  { %v4042_v56 = vrot.slane %v4038_v3, 7  ;;  %v4286_v3 = vld [vmem:[#allocation2 + $0x11b0] sm:$0xff] }
 0x31b   :  { %v13136_v8 = vcombine.high %v4282_v57, %v4286_v3 }
 0x31c   :  { %v4050_v2 = vmul.f32 %v4042_v56, %v14569_v33  ;;  %7656 = vmatpush2.bf16.msra.mxu0 %v13429_v63  ;;  %v13143_v56 = vcombine.low %v4290_v41, %v4294_v42  ;;  %v4381_v41 = vld [vmem:[#allocation2 + $0x14a8] sm:$0xff]  ;;  %v4250_v42 = vld [vmem:[#allocation2 + $0x1090] sm:$0xff] }
 0x31d   :  { %7657 = vmatprep.subr.bf16.mxu0 %v13422_v52 }
 0x31e   :  { %v4086_v11 = vrot.slane %v4050_v2, %v14386_v30  ;;  %v4082_v15 = vrot.slane %v4050_v2, %v14383_v28  ;;  %v4405_v2 = vld [vmem:[#allocation2 + $0x1568] sm:$0xff] }
 0x320   :  { %v4126_v26 = vrot.slane %v4086_v11, %v14383_v28  ;;  %7658 = vmatpush2.bf16.msra.mxu0 %v13421_v62  ;;  %v4122_v33 = vrot.slane %v4082_v15, %v14383_v28  ;;  %v4274_v62 = vld [vmem:[#allocation2 + $0x1150] sm:$0xff]  ;;  %v13254_v11 = vcombine.high %v4401_v6, %v4405_v2 }
 0x321   :  { %v7419_v31 = vpop.f32.mrf.mxu0  ;;  %7659 = vmatprep.subr.bf16.mxu0 %v13414_v10  ;;  %v13135_v10 = vcombine.low %v4282_v57, %v4286_v3  ;;  %v4266_v15 = vld [vmem:[#allocation2 + $0x1110] sm:$0xff]  ;;  %v13127_v1 = vcombine.low %v4274_v62, %v4278_v37 }
 0x322   :  { %v4134_v32 = vmul.f32 %v4126_v26, %v14587_v50  ;;  %v7420_v38 = vadd.f32 %v7419_v31, %v4796_v12  ;;  %v4133_v40 = vmul.f32 %v4122_v33, %v14583_v19  ;;  %v4413_v19 = vld [vmem:[#allocation2 + $0x15a8] sm:$0xff]  ;;  %v13128_v12 = vcombine.high %v4274_v62, %v4278_v37  ;;  %v4258_v33 = vld [vmem:[#allocation2 + $0x10d0] sm:$0xff] }
 0x323   :  { %v7460_v22 = vpop.f32.mrf.mxu1  ;;  %v7421_v43 = vpop.f32.mrf.mxu0  ;;  %v13262_v16 = vcombine.high %v4409_v46, %v4413_v19  ;;  %v13261_v45 = vcombine.low %v4409_v46, %v4413_v19  ;;  %v4385_v26 = vld [vmem:[#allocation2 + $0x14c8] sm:$0xff]  ;;  %v13245_v31 = vcombine.low %v4393_v5, %v4397_v55  ;;  %v4234_v57 = vld [vmem:[#allocation2 + $0x1010] sm:$0xff] }
 0x324   :  { %v14608_v9 = vadd.f32 %v7460_v22, %v7420_v38  ;;  %v7422_v0 = vadd.f32 %v7421_v43, %v4800_v27  ;;  %7660 = vmatpush2.bf16.msra.mxu0 %v13413_v18  ;;  %v4214_v36 = vadd.f32 %v4206_v58, %v4134_v32  ;;  %v4213_v47 = vadd.f32 %v4202_v29, %v4133_v40  ;;  %v4270_v18 = vld [vmem:[#allocation2 + $0x1130] sm:$0xff]  ;;  %v4389_v58 = vld [vmem:[#allocation2 + $0x14e8] sm:$0xff] }
 0x325   :  { %v7462_v20 = vpop.f32.mrf.mxu1  ;;  %v7423_v39 = vpop.f32.mrf.mxu0  ;;  %7661 = vmatprep.subr.bf16.mxu0 %v13406_v53  ;;  %v13253_v27 = vcombine.low %v4401_v6, %v4405_v2  ;;  %v4262_v29 = vld [vmem:[#allocation2 + $0x10f0] sm:$0xff]  ;;  %v13119_v53 = vcombine.low %v4266_v15, %v4270_v18  ;;  %v13238_v32 = vcombine.high %v4385_v26, %v4389_v58  ;;  %v4377_v22 = vld [vmem:[#allocation2 + $0x1488] sm:$0xff]  ;;  %v13237_v43 = vcombine.low %v4385_v26, %v4389_v58 }
 0x326   :  { %v14610_v34 = vadd.f32 %v7462_v20, %v7422_v0  ;;  %v4222_v48 = vmax.f32 %v4214_v36, 0.0  ;;  %v4221_v51 = vmax.f32 %v4213_v47, 0.0  ;;  %v13112_v38 = vcombine.high %v4258_v33, %v4262_v29  ;;  %v4254_v40 = vld [vmem:[#allocation2 + $0x10b0] sm:$0xff]  ;;  %v4369_v36 = vld [vmem:[#allocation2 + $0x1448] sm:$0xff] }
 0x327   :  { %v7464_v50 = vpop.f32.mrf.mxu1  ;;  %v7424_v60 = vpop.f32.mrf.mxu0  ;;  %v13230_v0 = vcombine.high %v4377_v22, %v4381_v41  ;;  %v13104_v20 = vcombine.high %v4250_v42, %v4254_v40  ;;  %v4373_v47 = vld [vmem:[#allocation2 + $0x1468] sm:$0xff]  ;;  %v4242_v39 = vld [vmem:[#allocation2 + $0x1050] sm:$0xff] }
 0x328   :  { %7662 = vmatpush2.bf16.msra.mxu0 %v13405_v44  ;;  %v14612_v52 = vpack.c.bf16 %v4222_v48, %v4222_v48  ;;  %v14614_v7 = vpack.c.bf16 %v4221_v51, %v4221_v51  ;;  %v13111_v44 = vcombine.low %v4258_v33, %v4262_v29  ;;  %v13229_v50 = vcombine.low %v4377_v22, %v4381_v41  ;;  %v4361_v60 = vld [vmem:[#allocation2 + $0x1408] sm:$0xff]  ;;  %v4238_v3 = vld [vmem:[#allocation2 + $0x1030] sm:$0xff] }
 0x329   :  { %v7465_v63 = vpop.f32.mrf.mxu1  ;;  %7713 = vmatprep.subr.bf16.mxu0 %v13144_v49  ;;  %v4246_v49 = vld [vmem:[#allocation2 + $0x1070] sm:$0xff]  ;;  %v13103_v48 = vcombine.low %v4250_v42, %v4254_v40  ;;  %v13222_v51 = vcombine.high %v4369_v36, %v4373_v47  ;;  %v4365_v19 = vld [vmem:[#allocation2 + $0x1428] sm:$0xff] }
 0x32a   :  { %7540 = vmatprep.mubr.bf16.mxu1 %v14612_v52  ;;  %v13096_v46 = vcombine.high %v4242_v39, %v4246_v49  ;;  %v13221_v63 = vcombine.low %v4369_v36, %v4373_v47  ;;  %v13214_v6 = vcombine.high %v4361_v60, %v4365_v19  ;;  %v4485_v2 = vld [vmem:[#allocation2 + $0x17e8] sm:$0xff]  ;;  %v4354_v62 = vld [vmem:[#allocation2 + $0x13d0] sm:$0xff] }
 0x32b   :  { %7664 = vmatmul.mubr.bf16.vlgmr.msra.gmra.mxu0 %v14556_v14  ;;  %7541 = vmatmul.mubr.bf16.vlgmr.msra.gmra.mxu1 %v14614_v7  ;;  %v4358_v37 = vld [vmem:[#allocation2 + $0x13f0] sm:$0xff]  ;;  %v4473_v5 = vld [vmem:[#allocation2 + $0x1788] sm:$0xff] }
 0x32c   :  { %7591 = vmatpush1.bf16.msra.mxu1 %v13269_v54  ;;  %7714 = vmatpush1.bf16.msra.mxu0 %v13143_v56  ;;  %v13120_v54 = vcombine.high %v4266_v15, %v4270_v18  ;;  %v13095_v56 = vcombine.low %v4242_v39, %v4246_v49  ;;  %v4477_v55 = vld [vmem:[#allocation2 + $0x17a8] sm:$0xff]  ;;  %v4346_v15 = vld [vmem:[#allocation2 + $0x1390] sm:$0xff] }
 0x32d   :  { %7745 = vmatprep.mubr.bf16.mxu0 %v14469_v23  ;;  %7622 = vmatprep.mubr.bf16.mxu1 %v14480_v35  ;;  %v4350_v18 = vld [vmem:[#allocation2 + $0x13b0] sm:$0xff]  ;;  %v4465_v26 = vld [vmem:[#allocation2 + $0x1748] sm:$0xff] }
 0x32e   :  { %7592 = vmatprep.subr.bf16.mxu1 %v13262_v16  ;;  %7715 = vmatprep.subr.bf16.mxu0 %v13136_v8  ;;  %v13088_v16 = vcombine.high %v4234_v57, %v4238_v3  ;;  %v4481_v8 = vld [vmem:[#allocation2 + $0x17c8] sm:$0xff]  ;;  %v4338_v33 = vld [vmem:[#allocation2 + $0x1350] sm:$0xff] }
 0x32f   :  { %v4469_v58 = vld [vmem:[#allocation2 + $0x1768] sm:$0xff]  ;;  %v4342_v29 = vld [vmem:[#allocation2 + $0x1370] sm:$0xff] }
 0x330   :  { %7593 = vmatpush1.bf16.msra.mxu1 %v13261_v45  ;;  %7716 = vmatpush1.bf16.msra.mxu0 %v13135_v10  ;;  %v13213_v45 = vcombine.low %v4361_v60, %v4365_v19  ;;  %v13087_v10 = vcombine.low %v4234_v57, %v4238_v3  ;;  %v4457_v22 = vld [vmem:[#allocation2 + $0x1708] sm:$0xff]  ;;  %v4330_v42 = vld [vmem:[#allocation2 + $0x1310] sm:$0xff] }
 0x331   :  { %7594 = vmatprep.subr.bf16.mxu1 %v13254_v11  ;;  %7717 = vmatprep.subr.bf16.mxu0 %v13128_v12  ;;  %v13334_v11 = vcombine.high %v4481_v8, %v4485_v2  ;;  %v13208_v12 = vcombine.high %v4354_v62, %v4358_v37  ;;  %v4461_v41 = vld [vmem:[#allocation2 + $0x1728] sm:$0xff]  ;;  %v4334_v40 = vld [vmem:[#allocation2 + $0x1330] sm:$0xff] }
 0x332   :  { %v4449_v36 = vld [vmem:[#allocation2 + $0x16c8] sm:$0xff]  ;;  %v4322_v39 = vld [vmem:[#allocation2 + $0x12d0] sm:$0xff] }
 0x333   :  { %v4453_v47 = vld [vmem:[#allocation2 + $0x16e8] sm:$0xff]  ;;  %v4326_v49 = vld [vmem:[#allocation2 + $0x12f0] sm:$0xff] }
 0x334   :  { %7595 = vmatpush1.bf16.msra.mxu1 %v13253_v27  ;;  %7718 = vmatpush1.bf16.msra.mxu0 %v13127_v1  ;;  %v13333_v27 = vcombine.low %v4481_v8, %v4485_v2  ;;  %v13207_v1 = vcombine.low %v4354_v62, %v4358_v37  ;;  %v4441_v60 = vld [vmem:[#allocation2 + $0x1688] sm:$0xff]  ;;  %v4314_v57 = vld [vmem:[#allocation2 + $0x1290] sm:$0xff] }
 0x335   :  { %7596 = vmatprep.subr.bf16.mxu1 %v13246_v17  ;;  %7719 = vmatprep.subr.bf16.mxu0 %v13120_v54  ;;  %v13326_v17 = vcombine.high %v4473_v5, %v4477_v55  ;;  %v13200_v54 = vcombine.high %v4346_v15, %v4350_v18  ;;  %v4445_v19 = vld [vmem:[#allocation2 + $0x16a8] sm:$0xff]  ;;  %v4318_v3 = vld [vmem:[#allocation2 + $0x12b0] sm:$0xff] }
 0x336   :  { %v4433_v8 = vld [vmem:[#allocation2 + $0x1648] sm:$0xff]  ;;  %v4306_v62 = vld [vmem:[#allocation2 + $0x1250] sm:$0xff] }
 0x337   :  { %v4437_v2 = vld [vmem:[#allocation2 + $0x1668] sm:$0xff]  ;;  %v4310_v37 = vld [vmem:[#allocation2 + $0x1270] sm:$0xff] }
 0x338   :  { %7597 = vmatpush1.bf16.msra.mxu1 %v13245_v31  ;;  %7720 = vmatpush1.bf16.msra.mxu0 %v13119_v53  ;;  %v13325_v31 = vcombine.low %v4473_v5, %v4477_v55  ;;  %v13199_v53 = vcombine.low %v4346_v15, %v4350_v18  ;;  %v4425_v5 = vld [vmem:[#allocation2 + $0x1608] sm:$0xff]  ;;  %v4298_v15 = vld [vmem:[#allocation2 + $0x1210] sm:$0xff] }
 0x339   :  { %7598 = vmatprep.subr.bf16.mxu1 %v13238_v32  ;;  %7721 = vmatprep.subr.bf16.mxu0 %v13112_v38  ;;  %v13318_v32 = vcombine.high %v4465_v26, %v4469_v58  ;;  %v13192_v38 = vcombine.high %v4338_v33, %v4342_v29  ;;  %v4429_v55 = vld [vmem:[#allocation2 + $0x1628] sm:$0xff]  ;;  %v4302_v18 = vld [vmem:[#allocation2 + $0x1230] sm:$0xff] }
 0x33c   :  { %7599 = vmatpush1.bf16.msra.mxu1 %v13237_v43  ;;  %7722 = vmatpush1.bf16.msra.mxu0 %v13111_v44  ;;  %v13317_v43 = vcombine.low %v4465_v26, %v4469_v58  ;;  %v13191_v44 = vcombine.low %v4338_v33, %v4342_v29  ;;  %v4673_v26 = vld [vmem:[#allocation2 + $0x1dc8] sm:$0xff]  ;;  %v4546_v33 = vld [vmem:[#allocation2 + $0x19d0] sm:$0xff] }
 0x33d   :  { %7600 = vmatprep.subr.bf16.mxu1 %v13230_v0  ;;  %7723 = vmatprep.subr.bf16.mxu0 %v13104_v20  ;;  %v13310_v0 = vcombine.high %v4457_v22, %v4461_v41  ;;  %v13184_v20 = vcombine.high %v4330_v42, %v4334_v40  ;;  %v4677_v58 = vld [vmem:[#allocation2 + $0x1de8] sm:$0xff]  ;;  %v4550_v29 = vld [vmem:[#allocation2 + $0x19f0] sm:$0xff] }
 0x340   :  { %7601 = vmatpush1.bf16.msra.mxu1 %v13229_v50  ;;  %7724 = vmatpush1.bf16.msra.mxu0 %v13103_v48  ;;  %v13309_v50 = vcombine.low %v4457_v22, %v4461_v41  ;;  %v13183_v48 = vcombine.low %v4330_v42, %v4334_v40  ;;  %v4665_v22 = vld [vmem:[#allocation2 + $0x1d88] sm:$0xff]  ;;  %v4538_v42 = vld [vmem:[#allocation2 + $0x1990] sm:$0xff] }
 0x341   :  { %7602 = vmatprep.subr.bf16.mxu1 %v13222_v51  ;;  %7725 = vmatprep.subr.bf16.mxu0 %v13096_v46  ;;  %v13302_v51 = vcombine.high %v4449_v36, %v4453_v47  ;;  %v13176_v46 = vcombine.high %v4322_v39, %v4326_v49  ;;  %v4669_v41 = vld [vmem:[#allocation2 + $0x1da8] sm:$0xff]  ;;  %v4542_v40 = vld [vmem:[#allocation2 + $0x19b0] sm:$0xff] }
 0x344   :  { %7603 = vmatpush1.bf16.msra.mxu1 %v13221_v63  ;;  %7726 = vmatpush1.bf16.msra.mxu0 %v13095_v56  ;;  %v13301_v63 = vcombine.low %v4449_v36, %v4453_v47  ;;  %v13175_v56 = vcombine.low %v4322_v39, %v4326_v49  ;;  %v4657_v36 = vld [vmem:[#allocation2 + $0x1d48] sm:$0xff]  ;;  %v4530_v49 = vld [vmem:[#allocation2 + $0x1950] sm:$0xff] }
 0x345   :  { %7604 = vmatprep.subr.bf16.mxu1 %v13214_v6  ;;  %7727 = vmatprep.subr.bf16.mxu0 %v13088_v16  ;;  %v13294_v6 = vcombine.high %v4441_v60, %v4445_v19  ;;  %v13168_v16 = vcombine.high %v4314_v57, %v4318_v3  ;;  %v4661_v47 = vld [vmem:[#allocation2 + $0x1d68] sm:$0xff] }
 0x348   :  { %7605 = vmatpush1.bf16.msra.mxu1 %v13213_v45  ;;  %7728 = vmatpush1.bf16.msra.mxu0 %v13087_v10  ;;  %v13293_v45 = vcombine.low %v4441_v60, %v4445_v19  ;;  %v13167_v10 = vcombine.low %v4314_v57, %v4318_v3  ;;  %v13391_v60 = vcombine.low %v4538_v42, %v4542_v40 }
 0x349   :  { %7606 = vmatprep.subr.bf16.mxu1 %v13334_v11  ;;  %7729 = vmatprep.subr.bf16.mxu0 %v13208_v12  ;;  %v13286_v11 = vcombine.high %v4433_v8, %v4437_v2  ;;  %v13160_v12 = vcombine.high %v4306_v62, %v4310_v37  ;;  %v13510_v19 = vcombine.high %v4657_v36, %v4661_v47 }
 0x34c   :  { %7607 = vmatpush2.bf16.msra.mxu1 %v13333_v27  ;;  %7730 = vmatpush2.bf16.msra.mxu0 %v13207_v1  ;;  %v13285_v27 = vcombine.low %v4433_v8, %v4437_v2  ;;  %v13159_v1 = vcombine.low %v4306_v62, %v4310_v37  ;;  %v13509_v8 = vcombine.low %v4657_v36, %v4661_v47 }
 0x34d   :  { %7608 = vmatprep.subr.bf16.mxu1 %v13326_v17  ;;  %7731 = vmatprep.subr.bf16.mxu0 %v13200_v54  ;;  %v13278_v17 = vcombine.high %v4425_v5, %v4429_v55  ;;  %v13152_v54 = vcombine.high %v4298_v15, %v4302_v18 }
 0x350   :  { %7609 = vmatpush2.bf16.msra.mxu1 %v13325_v31  ;;  %7732 = vmatpush2.bf16.msra.mxu0 %v13199_v53  ;;  %v13277_v31 = vcombine.low %v4425_v5, %v4429_v55  ;;  %v13151_v53 = vcombine.low %v4298_v15, %v4302_v18 }
 0x351   :  { %7610 = vmatprep.subr.bf16.mxu1 %v13318_v32  ;;  %7733 = vmatprep.subr.bf16.mxu0 %v13192_v38  ;;  %v13526_v32 = vcombine.high %v4673_v26, %v4677_v58  ;;  %v13400_v38 = vcombine.high %v4546_v33, %v4550_v29 }
 0x354   :  { %7611 = vmatpush2.bf16.msra.mxu1 %v13317_v43  ;;  %7734 = vmatpush2.bf16.msra.mxu0 %v13191_v44  ;;  %v13525_v43 = vcombine.low %v4673_v26, %v4677_v58  ;;  %v13399_v44 = vcombine.low %v4546_v33, %v4550_v29 }
 0x355   :  { %7612 = vmatprep.subr.bf16.mxu1 %v13310_v0  ;;  %7735 = vmatprep.subr.bf16.mxu0 %v13184_v20  ;;  %v13518_v0 = vcombine.high %v4665_v22, %v4669_v41  ;;  %v13392_v20 = vcombine.high %v4538_v42, %v4542_v40 }
 0x358   :  { %7613 = vmatpush2.bf16.msra.mxu1 %v13309_v50  ;;  %7736 = vmatpush2.bf16.msra.mxu0 %v13183_v48  ;;  %v4534_v50 = vld [vmem:[#allocation2 + $0x1970] sm:$0xff] }
 0x359   :  { %7614 = vmatprep.subr.bf16.mxu1 %v13302_v51  ;;  %7737 = vmatprep.subr.bf16.mxu0 %v13176_v46  ;;  %v13517_v51 = vcombine.low %v4665_v22, %v4669_v41  ;;  %v13384_v3 = vcombine.high %v4530_v49, %v4534_v50  ;;  %v13383_v62 = vcombine.low %v4530_v49, %v4534_v50  ;;  %v4737_v50 = vld [vmem:[#allocation2 + $0x1fc8] sm:$0xff] }
 0x35c   :  { %7615 = vmatpush2.bf16.msra.mxu1 %v13301_v63  ;;  %7738 = vmatpush2.bf16.msra.mxu0 %v13175_v56  ;;  %v4649_v63 = vld [vmem:[#allocation2 + $0x1d08] sm:$0xff] }
 0x35d   :  { %7616 = vmatprep.subr.bf16.mxu1 %v13294_v6  ;;  %7739 = vmatprep.subr.bf16.mxu0 %v13168_v16  ;;  %v4653_v56 = vld [vmem:[#allocation2 + $0x1d28] sm:$0xff]  ;;  %v4522_v6 = vld [vmem:[#allocation2 + $0x1910] sm:$0xff] }
 0x35e   :  { %v4526_v16 = vld [vmem:[#allocation2 + $0x1930] sm:$0xff]  ;;  %v13502_v37 = vcombine.high %v4649_v63, %v4653_v56  ;;  %v13501_v5 = vcombine.low %v4649_v63, %v4653_v56 }
 0x35f   :  { %v13375_v55 = vcombine.low %v4522_v6, %v4526_v16 }
 0x360   :  { %7617 = vmatpush2.bf16.msra.mxu1 %v13293_v45  ;;  %7740 = vmatpush2.bf16.msra.mxu0 %v13167_v10  ;;  %v13376_v45 = vcombine.high %v4522_v6, %v4526_v16  ;;  %v4641_v10 = vld [vmem:[#allocation2 + $0x1cc8] sm:$0xff]  ;;  %v4602_v16 = vld [vmem:[#allocation2 + $0x1b90] sm:$0xff] }
 0x361   :  { %7618 = vmatprep.subr.bf16.mxu1 %v13286_v11  ;;  %7741 = vmatprep.subr.bf16.mxu0 %v13160_v12  ;;  %v4514_v11 = vld [vmem:[#allocation2 + $0x18d0] sm:$0xff]  ;;  %v4733_v6 = vld [vmem:[#allocation2 + $0x1fa8] sm:$0xff] }
 0x362   :  { %v4518_v12 = vld [vmem:[#allocation2 + $0x18f0] sm:$0xff] }
 0x363   :  { %v13368_v18 = vcombine.high %v4514_v11, %v4518_v12  ;;  %v13367_v58 = vcombine.low %v4514_v11, %v4518_v12  ;;  %v4594_v11 = vld [vmem:[#allocation2 + $0x1b50] sm:$0xff] }
 0x364   :  { %7619 = vmatpush2.bf16.msra.mxu1 %v13285_v27  ;;  %7742 = vmatpush2.bf16.msra.mxu0 %v13159_v1  ;;  %v4633_v27 = vld [vmem:[#allocation2 + $0x1c88] sm:$0xff]  ;;  %v4598_v12 = vld [vmem:[#allocation2 + $0x1b70] sm:$0xff] }
 0x365   :  { %7620 = vmatprep.subr.bf16.mxu1 %v13278_v17  ;;  %7743 = vmatprep.subr.bf16.mxu0 %v13152_v54  ;;  %v4637_v1 = vld [vmem:[#allocation2 + $0x1ca8] sm:$0xff]  ;;  %v4506_v17 = vld [vmem:[#allocation2 + $0x1890] sm:$0xff] }
 0x366   :  { %v4510_v54 = vld [vmem:[#allocation2 + $0x18b0] sm:$0xff]  ;;  %v13486_v33 = vcombine.high %v4633_v27, %v4637_v1  ;;  %v13485_v22 = vcombine.low %v4633_v27, %v4637_v1  ;;  %v4713_v27 = vld [vmem:[#allocation2 + $0x1f08] sm:$0xff] }
 0x367   :  { %v13360_v29 = vcombine.high %v4506_v17, %v4510_v54  ;;  %v13359_v41 = vcombine.low %v4506_v17, %v4510_v54  ;;  %v4717_v1 = vld [vmem:[#allocation2 + $0x1f28] sm:$0xff]  ;;  %v4586_v17 = vld [vmem:[#allocation2 + $0x1b10] sm:$0xff] }
 0x368   :  { %7621 = vmatpush2.bf16.msra.mxu1 %v13277_v31  ;;  %7744 = vmatpush2.bf16.msra.mxu0 %v13151_v53  ;;  %v4625_v31 = vld [vmem:[#allocation2 + $0x1c48] sm:$0xff]  ;;  %v4590_v54 = vld [vmem:[#allocation2 + $0x1b30] sm:$0xff] }
 0x369   :  { %7672 = vmatprep.subr.bf16.mxu1 %v13526_v32  ;;  %7795 = vmatprep.subr.bf16.mxu0 %v13400_v38  ;;  %v4629_v53 = vld [vmem:[#allocation2 + $0x1c68] sm:$0xff]  ;;  %v4498_v32 = vld [vmem:[#allocation2 + $0x1850] sm:$0xff] }
 0x36a   :  { %v4502_v38 = vld [vmem:[#allocation2 + $0x1870] sm:$0xff]  ;;  %v13478_v42 = vcombine.high %v4625_v31, %v4629_v53  ;;  %v13477_v36 = vcombine.low %v4625_v31, %v4629_v53  ;;  %v4705_v31 = vld [vmem:[#allocation2 + $0x1ec8] sm:$0xff] }
 0x36b   :  { %7623 = vmatmul.mubr.bf16.vlgmr.msra.gmra.mxu1 %v14507_v24  ;;  %7746 = vmatmul.mubr.bf16.vlgmr.msra.gmra.mxu0 %v14504_v21  ;;  %v7501_v39 = vpop.f32.mrf.mxu0  ;;  %v13352_v40 = vcombine.high %v4498_v32, %v4502_v38  ;;  %v13351_v47 = vcombine.low %v4498_v32, %v4502_v38  ;;  %v4709_v53 = vld [vmem:[#allocation2 + $0x1ee8] sm:$0xff]  ;;  %v4578_v32 = vld [vmem:[#allocation2 + $0x1ad0] sm:$0xff] }
 0x36c   :  { %v14627_v48 = vadd.f32 %v7501_v39, %v14608_v9  ;;  %7673 = vmatpush1.bf16.msra.mxu1 %v13525_v43  ;;  %7704 = vmatprep.mubr.bf16.mxu1 %v14612_v52  ;;  %v4617_v43 = vld [vmem:[#allocation2 + $0x1c08] sm:$0xff]  ;;  %v4582_v38 = vld [vmem:[#allocation2 + $0x1af0] sm:$0xff] }
 0x36d   :  { %7796 = vmatpush1.bf16.msra.mxu0 %v13399_v44  ;;  %7827 = vmatprep.mubr.bf16.mxu0 %v14552_v13  ;;  %v7503_v46 = vpop.f32.mrf.mxu0  ;;  %v4621_v44 = vld [vmem:[#allocation2 + $0x1c28] sm:$0xff] }
 0x36e   :  { %v14632_v57 = vadd.f32 %v7503_v46, %v14610_v34  ;;  %7674 = vmatprep.subr.bf16.mxu1 %v13518_v0  ;;  %7797 = vmatprep.subr.bf16.mxu0 %v13392_v20  ;;  %v4645_v34 = vld [vmem:[#allocation2 + $0x1ce8] sm:$0xff]  ;;  %v4490_v0 = vld [vmem:[#allocation2 + $0x1810] sm:$0xff]  ;;  %v13470_v39 = vcombine.high %v4617_v43, %v4621_v44 }
 0x36f   :  { %v7505_v9 = vpop.f32.mrf.mxu0  ;;  %v13494_v15 = vcombine.high %v4641_v10, %v4645_v34  ;;  %v13493_v26 = vcombine.low %v4641_v10, %v4645_v34  ;;  %v4494_v20 = vld [vmem:[#allocation2 + $0x1830] sm:$0xff]  ;;  %v4721_v10 = vld [vmem:[#allocation2 + $0x1f48] sm:$0xff] }
 0x370   :  { %7675 = vmatpush1.bf16.msra.mxu1 %v13517_v51  ;;  %v13344_v49 = vcombine.high %v4490_v0, %v4494_v20  ;;  %v4741_v51 = vld [vmem:[#allocation2 + $0x1fe8] sm:$0xff]  ;;  %v4610_v46 = vld [vmem:[#allocation2 + $0x1bd0] sm:$0xff] }
 0x371   :  { %7798 = vmatpush1.bf16.msra.mxu0 %v13391_v60  ;;  %v7506_v2 = vpop.f32.mrf.mxu0  ;;  %7676 = vmatprep.subr.bf16.mxu1 %v13510_v19  ;;  %v4614_v60 = vld [vmem:[#allocation2 + $0x1bf0] sm:$0xff]  ;;  %v13469_v19 = vcombine.low %v4617_v43, %v4621_v44  ;;  %v13590_v63 = vcombine.high %v4737_v50, %v4741_v51  ;;  %v4729_v9 = vld [vmem:[#allocation2 + $0x1f88] sm:$0xff] }
 0x372   :  { %7799 = vmatprep.subr.bf16.mxu0 %v13384_v3  ;;  %v13343_v3 = vcombine.low %v4490_v0, %v4494_v20  ;;  %v13464_v56 = vcombine.high %v4610_v46, %v4614_v60  ;;  %v13589_v2 = vcombine.low %v4737_v50, %v4741_v51  ;;  %v4725_v34 = vld [vmem:[#allocation2 + $0x1f68] sm:$0xff]  ;;  %v4570_v0 = vld [vmem:[#allocation2 + $0x1a90] sm:$0xff] }
 0x373   :  { %v4697_v43 = vld [vmem:[#allocation2 + $0x1e88] sm:$0xff]  ;;  %v4574_v20 = vld [vmem:[#allocation2 + $0x1ab0] sm:$0xff] }
 0x374   :  { %7677 = vmatpush1.bf16.msra.mxu1 %v13509_v8  ;;  %v4606_v8 = vld [vmem:[#allocation2 + $0x1bb0] sm:$0xff]  ;;  %v4701_v44 = vld [vmem:[#allocation2 + $0x1ea8] sm:$0xff] }
 0x375   :  { %7800 = vmatpush1.bf16.msra.mxu0 %v13383_v62  ;;  %7678 = vmatprep.subr.bf16.mxu1 %v13502_v37  ;;  %v13463_v62 = vcombine.low %v4610_v46, %v4614_v60  ;;  %v13582_v37 = vcombine.high %v4729_v9, %v4733_v6  ;;  %v4689_v50 = vld [vmem:[#allocation2 + $0x1e48] sm:$0xff]  ;;  %v4562_v46 = vld [vmem:[#allocation2 + $0x1a50] sm:$0xff] }
 0x376   :  { %7801 = vmatprep.subr.bf16.mxu0 %v13376_v45  ;;  %v13456_v45 = vcombine.high %v4602_v16, %v4606_v8  ;;  %v4693_v51 = vld [vmem:[#allocation2 + $0x1e68] sm:$0xff]  ;;  %v4566_v60 = vld [vmem:[#allocation2 + $0x1a70] sm:$0xff] }
 0x378   :  { %7679 = vmatpush1.bf16.msra.mxu1 %v13501_v5  ;;  %v13581_v5 = vcombine.low %v4729_v9, %v4733_v6  ;;  %v4681_v9 = vld [vmem:[#allocation2 + $0x1e08] sm:$0xff] }
 0x379   :  { %7802 = vmatpush1.bf16.msra.mxu0 %v13375_v55  ;;  %7680 = vmatprep.subr.bf16.mxu1 %v13494_v15  ;;  %v13455_v55 = vcombine.low %v4602_v16, %v4606_v8  ;;  %v13574_v15 = vcombine.high %v4721_v10, %v4725_v34  ;;  %v4685_v6 = vld [vmem:[#allocation2 + $0x1e28] sm:$0xff]  ;;  %v4554_v16 = vld [vmem:[#allocation2 + $0x1a10] sm:$0xff] }
 0x37a   :  { %7803 = vmatprep.subr.bf16.mxu0 %v13368_v18  ;;  %v13448_v18 = vcombine.high %v4594_v11, %v4598_v12  ;;  %v4558_v8 = vld [vmem:[#allocation2 + $0x1a30] sm:$0xff] }
 0x37c   :  { %7681 = vmatpush1.bf16.msra.mxu1 %v13493_v26  ;;  %v13573_v26 = vcombine.low %v4721_v10, %v4725_v34  ;;  %v4418_v10 = vld [vmem:[#allocation2 + $0x15d0] sm:$0xff] }
 0x37d   :  { %7804 = vmatpush1.bf16.msra.mxu0 %v13367_v58  ;;  %7682 = vmatprep.subr.bf16.mxu1 %v13486_v33  ;;  %v13447_v58 = vcombine.low %v4594_v11, %v4598_v12  ;;  %v13566_v33 = vcombine.high %v4713_v27, %v4717_v1  ;;  %v4422_v34 = vld [vmem:[#allocation2 + $0x15f0] sm:$0xff]  ;;  %v4291_v11 = vld [vmem:[#allocation2 + $0x11d8] sm:$0xff] }
 0x37e   :  { %7805 = vmatprep.subr.bf16.mxu0 %v13360_v29  ;;  %v13440_v29 = vcombine.high %v4586_v17, %v4590_v54  ;;  %v4295_v12 = vld [vmem:[#allocation2 + $0x11f8] sm:$0xff] }
 0x380   :  { %7683 = vmatpush1.bf16.msra.mxu1 %v13485_v22  ;;  %v13565_v22 = vcombine.low %v4713_v27, %v4717_v1  ;;  %v4410_v27 = vld [vmem:[#allocation2 + $0x1590] sm:$0xff] }
 0x381   :  { %7806 = vmatpush1.bf16.msra.mxu0 %v13359_v41  ;;  %7684 = vmatprep.subr.bf16.mxu1 %v13478_v42  ;;  %v13439_v41 = vcombine.low %v4586_v17, %v4590_v54  ;;  %v13558_v42 = vcombine.high %v4705_v31, %v4709_v53  ;;  %v4414_v1 = vld [vmem:[#allocation2 + $0x15b0] sm:$0xff]  ;;  %v13271_v17 = vcombine.low %v4418_v10, %v4422_v34  ;;  %v4283_v54 = vld [vmem:[#allocation2 + $0x1198] sm:$0xff] }
 0x382   :  { %7807 = vmatprep.subr.bf16.mxu0 %v13352_v40  ;;  %v13432_v40 = vcombine.high %v4578_v32, %v4582_v38 }
 0x384   :  { %7685 = vmatpush1.bf16.msra.mxu1 %v13477_v36  ;;  %v13557_v36 = vcombine.low %v4705_v31, %v4709_v53  ;;  %v4406_v31 = vld [vmem:[#allocation2 + $0x1570] sm:$0xff] }
 0x385   :  { %7808 = vmatpush1.bf16.msra.mxu0 %v13351_v47  ;;  %7686 = vmatprep.subr.bf16.mxu1 %v13470_v39  ;;  %v13431_v47 = vcombine.low %v4578_v32, %v4582_v38  ;;  %v13550_v39 = vcombine.high %v4697_v43, %v4701_v44  ;;  %v4275_v38 = vld [vmem:[#allocation2 + $0x1158] sm:$0xff] }
 0x386   :  { %7809 = vmatprep.subr.bf16.mxu0 %v13344_v49  ;;  %v13424_v49 = vcombine.high %v4570_v0, %v4574_v20 }
 0x388   :  { %7687 = vmatpush1.bf16.msra.mxu1 %v13469_v19  ;;  %v13549_v19 = vcombine.low %v4697_v43, %v4701_v44 }
 0x389   :  { %7810 = vmatpush1.bf16.msra.mxu0 %v13343_v3  ;;  %7688 = vmatprep.subr.bf16.mxu1 %v13590_v63  ;;  %v13423_v3 = vcombine.low %v4570_v0, %v4574_v20  ;;  %v13542_v63 = vcombine.high %v4689_v50, %v4693_v51  ;;  %v4394_v0 = vld [vmem:[#allocation2 + $0x1510] sm:$0xff] }
 0x38a   :  { %7811 = vmatprep.subr.bf16.mxu0 %v13464_v56  ;;  %v13416_v56 = vcombine.high %v4562_v46, %v4566_v60  ;;  %v4398_v20 = vld [vmem:[#allocation2 + $0x1530] sm:$0xff] }
 0x38c   :  { %7689 = vmatpush2.bf16.msra.mxu1 %v13589_v2  ;;  %v13541_v2 = vcombine.low %v4689_v50, %v4693_v51 }
 0x38d   :  { %7812 = vmatpush2.bf16.msra.mxu0 %v13463_v62  ;;  %7690 = vmatprep.subr.bf16.mxu1 %v13582_v37  ;;  %v13415_v62 = vcombine.low %v4562_v46, %v4566_v60  ;;  %v13534_v37 = vcombine.high %v4681_v9, %v4685_v6  ;;  %v13248_v46 = vcombine.high %v4394_v0, %v4398_v20 }
 0x38e   :  { %7813 = vmatprep.subr.bf16.mxu0 %v13456_v45  ;;  %v13408_v45 = vcombine.high %v4554_v16, %v4558_v8 }
 0x390   :  { %7691 = vmatpush2.bf16.msra.mxu1 %v13581_v5  ;;  %v13533_v5 = vcombine.low %v4681_v9, %v4685_v6 }
 0x391   :  { %7814 = vmatpush2.bf16.msra.mxu0 %v13455_v55  ;;  %7692 = vmatprep.subr.bf16.mxu1 %v13574_v15  ;;  %v13407_v55 = vcombine.low %v4554_v16, %v4558_v8  ;;  %v13272_v15 = vcombine.high %v4418_v10, %v4422_v34  ;;  %v4378_v8 = vld [vmem:[#allocation2 + $0x1490] sm:$0xff] }
 0x392   :  { %7815 = vmatprep.subr.bf16.mxu0 %v13448_v18  ;;  %v13146_v18 = vcombine.high %v4291_v11, %v4295_v12 }
 0x394   :  { %7693 = vmatpush2.bf16.msra.mxu1 %v13573_v26  ;;  %v4287_v26 = vld [vmem:[#allocation2 + $0x11b8] sm:$0xff] }
 0x395   :  { %7816 = vmatpush2.bf16.msra.mxu0 %v13447_v58  ;;  %7694 = vmatprep.subr.bf16.mxu1 %v13566_v33  ;;  %v13145_v58 = vcombine.low %v4291_v11, %v4295_v12  ;;  %v13264_v33 = vcombine.high %v4410_v27, %v4414_v1  ;;  %v13138_v32 = vcombine.high %v4283_v54, %v4287_v26  ;;  %v4370_v12 = vld [vmem:[#allocation2 + $0x1450] sm:$0xff] }
 0x396   :  { %7817 = vmatprep.subr.bf16.mxu0 %v13440_v29  ;;  %v4402_v29 = vld [vmem:[#allocation2 + $0x1550] sm:$0xff] }
 0x397   :  { %v13256_v43 = vcombine.high %v4402_v29, %v4406_v31 }
 0x398   :  { %7695 = vmatpush2.bf16.msra.mxu1 %v13565_v22  ;;  %v4279_v22 = vld [vmem:[#allocation2 + $0x1178] sm:$0xff] }
 0x399   :  { %7818 = vmatpush2.bf16.msra.mxu0 %v13439_v41  ;;  %7696 = vmatprep.subr.bf16.mxu1 %v13558_v42  ;;  %v13263_v41 = vcombine.low %v4410_v27, %v4414_v1  ;;  %v13130_v44 = vcombine.high %v4275_v38, %v4279_v22  ;;  %v13129_v51 = vcombine.low %v4275_v38, %v4279_v22  ;;  %v4482_v22 = vld [vmem:[#allocation2 + $0x17d0] sm:$0xff] }
 0x39a   :  { %7819 = vmatprep.subr.bf16.mxu0 %v13432_v40  ;;  %v13137_v40 = vcombine.low %v4283_v54, %v4287_v26  ;;  %v4362_v54 = vld [vmem:[#allocation2 + $0x1410] sm:$0xff] }
 0x39b   :  { %v4366_v26 = vld [vmem:[#allocation2 + $0x1430] sm:$0xff] }
 0x39c   :  { %7697 = vmatpush2.bf16.msra.mxu1 %v13557_v36 }
 0x39d   :  { %7820 = vmatpush2.bf16.msra.mxu0 %v13431_v47  ;;  %7698 = vmatprep.subr.bf16.mxu1 %v13550_v39  ;;  %v4267_v47 = vld [vmem:[#allocation2 + $0x1118] sm:$0xff] }
 0x39e   :  { %7821 = vmatprep.subr.bf16.mxu0 %v13424_v49  ;;  %v4271_v39 = vld [vmem:[#allocation2 + $0x1138] sm:$0xff]  ;;  %v13255_v49 = vcombine.low %v4402_v29, %v4406_v31 }
 0x39f   :  { %v13122_v60 = vcombine.high %v4267_v47, %v4271_v39  ;;  %v13121_v9 = vcombine.low %v4267_v47, %v4271_v39  ;;  %v4474_v47 = vld [vmem:[#allocation2 + $0x1790] sm:$0xff] }
 0x3a0   :  { %7699 = vmatpush2.bf16.msra.mxu1 %v13549_v19  ;;  %v4386_v19 = vld [vmem:[#allocation2 + $0x14d0] sm:$0xff] }
 0x3a1   :  { %7822 = vmatpush2.bf16.msra.mxu0 %v13423_v3  ;;  %7700 = vmatprep.subr.bf16.mxu1 %v13542_v63  ;;  %v4390_v3 = vld [vmem:[#allocation2 + $0x14f0] sm:$0xff]  ;;  %v4263_v63 = vld [vmem:[#allocation2 + $0x10f8] sm:$0xff] }
 0x3a2   :  { %7823 = vmatprep.subr.bf16.mxu0 %v13416_v56  ;;  %v13247_v56 = vcombine.low %v4394_v0, %v4398_v20  ;;  %v13240_v6 = vcombine.high %v4386_v19, %v4390_v3  ;;  %v4478_v39 = vld [vmem:[#allocation2 + $0x17b0] sm:$0xff] }
 0x3a4   :  { %7701 = vmatpush2.bf16.msra.mxu1 %v13541_v2  ;;  %v4382_v2 = vld [vmem:[#allocation2 + $0x14b0] sm:$0xff] }
 0x3a5   :  { %7824 = vmatpush2.bf16.msra.mxu0 %v13415_v62  ;;  %7702 = vmatprep.subr.bf16.mxu1 %v13534_v37  ;;  %v4251_v62 = vld [vmem:[#allocation2 + $0x1098] sm:$0xff]  ;;  %v13232_v34 = vcombine.high %v4378_v8, %v4382_v2 }
 0x3a6   :  { %7825 = vmatprep.subr.bf16.mxu0 %v13408_v45  ;;  %v4255_v37 = vld [vmem:[#allocation2 + $0x10b8] sm:$0xff]  ;;  %v13239_v45 = vcombine.low %v4386_v19, %v4390_v3  ;;  %v4466_v3 = vld [vmem:[#allocation2 + $0x1750] sm:$0xff] }
 0x3a7   :  { %v13106_v11 = vcombine.high %v4251_v62, %v4255_v37  ;;  %v13105_v27 = vcombine.low %v4251_v62, %v4255_v37  ;;  %v4462_v62 = vld [vmem:[#allocation2 + $0x1730] sm:$0xff]  ;;  %v4331_v37 = vld [vmem:[#allocation2 + $0x1318] sm:$0xff] }
 0x3a8   :  { %7703 = vmatpush2.bf16.msra.mxu1 %v13533_v5  ;;  %v4374_v5 = vld [vmem:[#allocation2 + $0x1470] sm:$0xff] }
 0x3a9   :  { %7826 = vmatpush2.bf16.msra.mxu0 %v13407_v55  ;;  %7754 = vmatprep.subr.bf16.mxu1 %v13272_v15  ;;  %v4243_v55 = vld [vmem:[#allocation2 + $0x1058] sm:$0xff]  ;;  %v13224_v1 = vcombine.high %v4370_v12, %v4374_v5  ;;  %v13223_v29 = vcombine.low %v4370_v12, %v4374_v5  ;;  %v4450_v5 = vld [vmem:[#allocation2 + $0x16d0] sm:$0xff] }
 0x3aa   :  { %7877 = vmatprep.subr.bf16.mxu0 %v13146_v18  ;;  %v4247_v15 = vld [vmem:[#allocation2 + $0x1078] sm:$0xff]  ;;  %v13231_v18 = vcombine.low %v4378_v8, %v4382_v2  ;;  %v4458_v2 = vld [vmem:[#allocation2 + $0x1710] sm:$0xff] }
 0x3ab   :  { %v14634_v53 = vpop.f32.mrf.mxu0  ;;  %7705 = vmatmul.mubr.bf16.vlgmr.msra.gmra.mxu1 %v14614_v7  ;;  %v13097_v31 = vcombine.low %v4243_v55, %v4247_v15 }
 0x3ac   :  { %7828 = vmatmul.mubr.bf16.vlgmr.msra.gmra.mxu0 %v14556_v14  ;;  %7755 = vmatpush1.bf16.msra.mxu1 %v13271_v17  ;;  %v13098_v17 = vcombine.high %v4243_v55, %v4247_v15  ;;  %v4454_v55 = vld [vmem:[#allocation2 + $0x16f0] sm:$0xff]  ;;  %v4323_v15 = vld [vmem:[#allocation2 + $0x12d8] sm:$0xff] }
 0x3ad   :  { %7786 = vmatprep.mubr.bf16.mxu1 %v14480_v35  ;;  %7878 = vmatpush1.bf16.msra.mxu0 %v13145_v58  ;;  %v14639_v42 = vpop.f32.mrf.mxu0  ;;  %v4235_v58 = vld [vmem:[#allocation2 + $0x1018] sm:$0xff] }
 0x3ae   :  { %7909 = vmatprep.mubr.bf16.mxu0 %v14469_v23  ;;  %7756 = vmatprep.subr.bf16.mxu1 %v13264_v33  ;;  %v4259_v23 = vld [vmem:[#allocation2 + $0x10d8] sm:$0xff] }
 0x3af   :  { %v7587_v36 = vpop.f32.mrf.mxu0  ;;  %7879 = vmatprep.subr.bf16.mxu0 %v13138_v32  ;;  %v13114_v16 = vcombine.high %v4259_v23, %v4263_v63  ;;  %v13113_v10 = vcombine.low %v4259_v23, %v4263_v63  ;;  %v4239_v33 = vld [vmem:[#allocation2 + $0x1038] sm:$0xff]  ;;  %v13216_v32 = vcombine.high %v4362_v54, %v4366_v26  ;;  %v4470_v23 = vld [vmem:[#allocation2 + $0x1770] sm:$0xff] }
 0x3b0   :  { %7757 = vmatpush1.bf16.msra.mxu1 %v13263_v41  ;;  %v13090_v38 = vcombine.high %v4235_v58, %v4239_v33  ;;  %v4486_v41 = vld [vmem:[#allocation2 + $0x17f0] sm:$0xff]  ;;  %v13089_v0 = vcombine.low %v4235_v58, %v4239_v33  ;;  %v4339_v63 = vld [vmem:[#allocation2 + $0x1358] sm:$0xff] }
 0x3b1   :  { %7880 = vmatpush1.bf16.msra.mxu0 %v13137_v40  ;;  %v7588_v50 = vpop.f32.mrf.mxu0  ;;  %7758 = vmatprep.subr.bf16.mxu1 %v13256_v43  ;;  %v4355_v40 = vld [vmem:[#allocation2 + $0x13d8] sm:$0xff]  ;;  %v13336_v20 = vcombine.high %v4482_v22, %v4486_v41  ;;  %v4446_v58 = vld [vmem:[#allocation2 + $0x16b0] sm:$0xff] }
 0x3b2   :  { %7881 = vmatprep.subr.bf16.mxu0 %v13130_v44  ;;  %v4359_v43 = vld [vmem:[#allocation2 + $0x13f8] sm:$0xff]  ;;  %v13215_v44 = vcombine.low %v4362_v54, %v4366_v26  ;;  %v4442_v26 = vld [vmem:[#allocation2 + $0x1690] sm:$0xff] }
 0x3b3   :  { %v13210_v36 = vcombine.high %v4355_v40, %v4359_v43  ;;  %v4351_v50 = vld [vmem:[#allocation2 + $0x13b8] sm:$0xff] }
 0x3b4   :  { %7759 = vmatpush1.bf16.msra.mxu1 %v13255_v49  ;;  %v4347_v49 = vld [vmem:[#allocation2 + $0x1398] sm:$0xff] }
 0x3b5   :  { %7882 = vmatpush1.bf16.msra.mxu0 %v13129_v51  ;;  %7760 = vmatprep.subr.bf16.mxu1 %v13248_v46  ;;  %v13335_v51 = vcombine.low %v4482_v22, %v4486_v41  ;;  %v13209_v46 = vcombine.low %v4355_v40, %v4359_v43  ;;  %v13202_v19 = vcombine.high %v4347_v49, %v4351_v50  ;;  %v4315_v33 = vld [vmem:[#allocation2 + $0x1298] sm:$0xff]  ;;  %v4434_v41 = vld [vmem:[#allocation2 + $0x1650] sm:$0xff] }
 0x3b6   :  { %7883 = vmatprep.subr.bf16.mxu0 %v13122_v60  ;;  %v13328_v60 = vcombine.high %v4474_v47, %v4478_v39  ;;  %v4438_v40 = vld [vmem:[#allocation2 + $0x1670] sm:$0xff]  ;;  %v4307_v43 = vld [vmem:[#allocation2 + $0x1258] sm:$0xff] }
 0x3b8   :  { %7761 = vmatpush1.bf16.msra.mxu1 %v13247_v56  ;;  %v4343_v56 = vld [vmem:[#allocation2 + $0x1378] sm:$0xff] }
 0x3b9   :  { %7884 = vmatpush1.bf16.msra.mxu0 %v13121_v9  ;;  %7762 = vmatprep.subr.bf16.mxu1 %v13240_v6  ;;  %v13327_v9 = vcombine.low %v4474_v47, %v4478_v39  ;;  %v13201_v6 = vcombine.low %v4347_v49, %v4351_v50  ;;  %v13194_v8 = vcombine.high %v4339_v63, %v4343_v56  ;;  %v4426_v39 = vld [vmem:[#allocation2 + $0x1610] sm:$0xff]  ;;  %v4299_v50 = vld [vmem:[#allocation2 + $0x1218] sm:$0xff] }
 0x3ba   :  { %7885 = vmatprep.subr.bf16.mxu0 %v13114_v16  ;;  %v13320_v16 = vcombine.high %v4466_v3, %v4470_v23  ;;  %v4430_v49 = vld [vmem:[#allocation2 + $0x1630] sm:$0xff] }
 0x3bc   :  { %7763 = vmatpush1.bf16.msra.mxu1 %v13239_v45  ;;  %v4335_v45 = vld [vmem:[#allocation2 + $0x1338] sm:$0xff] }
 0x3bd   :  { %7886 = vmatpush1.bf16.msra.mxu0 %v13113_v10  ;;  %7764 = vmatprep.subr.bf16.mxu1 %v13232_v34  ;;  %v13319_v10 = vcombine.low %v4466_v3, %v4470_v23  ;;  %v13193_v34 = vcombine.low %v4339_v63, %v4343_v56  ;;  %v13186_v12 = vcombine.high %v4331_v37, %v4335_v45  ;;  %v4674_v23 = vld [vmem:[#allocation2 + $0x1dd0] sm:$0xff]  ;;  %v4547_v56 = vld [vmem:[#allocation2 + $0x19d8] sm:$0xff] }
 0x3be   :  { %7887 = vmatprep.subr.bf16.mxu0 %v13106_v11  ;;  %v13312_v11 = vcombine.high %v4458_v2, %v4462_v62  ;;  %v4678_v63 = vld [vmem:[#allocation2 + $0x1df0] sm:$0xff] }
 0x3c0   :  { %7765 = vmatpush1.bf16.msra.mxu1 %v13231_v18  ;;  %v4327_v18 = vld [vmem:[#allocation2 + $0x12f8] sm:$0xff] }
 0x3c1   :  { %7888 = vmatpush1.bf16.msra.mxu0 %v13105_v27  ;;  %7766 = vmatprep.subr.bf16.mxu1 %v13224_v1  ;;  %v13311_v27 = vcombine.low %v4458_v2, %v4462_v62  ;;  %v13185_v1 = vcombine.low %v4331_v37, %v4335_v45  ;;  %v13178_v54 = vcombine.high %v4323_v15, %v4327_v18  ;;  %v4666_v62 = vld [vmem:[#allocation2 + $0x1d90] sm:$0xff] }
 0x3c2   :  { %7889 = vmatprep.subr.bf16.mxu0 %v13098_v17  ;;  %v13304_v17 = vcombine.high %v4450_v5, %v4454_v55  ;;  %v4670_v37 = vld [vmem:[#allocation2 + $0x1db0] sm:$0xff]  ;;  %v13527_v45 = vcombine.low %v4674_v23, %v4678_v63 }
 0x3c4   :  { %7767 = vmatpush1.bf16.msra.mxu1 %v13223_v29  ;;  %v4319_v29 = vld [vmem:[#allocation2 + $0x12b8] sm:$0xff] }
 0x3c5   :  { %7890 = vmatpush1.bf16.msra.mxu0 %v13097_v31  ;;  %7768 = vmatprep.subr.bf16.mxu1 %v13216_v32  ;;  %v13303_v31 = vcombine.low %v4450_v5, %v4454_v55  ;;  %v13177_v32 = vcombine.low %v4323_v15, %v4327_v18  ;;  %v13170_v22 = vcombine.high %v4315_v33, %v4319_v29  ;;  %v4658_v5 = vld [vmem:[#allocation2 + $0x1d50] sm:$0xff] }
 0x3c6   :  { %7891 = vmatprep.subr.bf16.mxu0 %v13090_v38  ;;  %v13296_v38 = vcombine.high %v4442_v26, %v4446_v58  ;;  %v4662_v55 = vld [vmem:[#allocation2 + $0x1d70] sm:$0xff] }
 0x3c8   :  { %7769 = vmatpush1.bf16.msra.mxu1 %v13215_v44  ;;  %v4311_v44 = vld [vmem:[#allocation2 + $0x1278] sm:$0xff] }
 0x3c9   :  { %7892 = vmatpush1.bf16.msra.mxu0 %v13089_v0  ;;  %7770 = vmatprep.subr.bf16.mxu1 %v13336_v20  ;;  %v13295_v0 = vcombine.low %v4442_v26, %v4446_v58  ;;  %v13169_v20 = vcombine.low %v4315_v33, %v4319_v29  ;;  %v13162_v47 = vcombine.high %v4307_v43, %v4311_v44 }
 0x3ca   :  { %7893 = vmatprep.subr.bf16.mxu0 %v13210_v36  ;;  %v13288_v36 = vcombine.high %v4434_v41, %v4438_v40  ;;  %v13519_v26 = vcombine.low %v4666_v62, %v4670_v37 }
 0x3cc   :  { %7771 = vmatpush2.bf16.msra.mxu1 %v13335_v51  ;;  %v4303_v51 = vld [vmem:[#allocation2 + $0x1238] sm:$0xff] }
 0x3cd   :  { %7894 = vmatpush2.bf16.msra.mxu0 %v13209_v46  ;;  %7772 = vmatprep.subr.bf16.mxu1 %v13328_v60  ;;  %v13287_v46 = vcombine.low %v4434_v41, %v4438_v40  ;;  %v13161_v60 = vcombine.low %v4307_v43, %v4311_v44  ;;  %v13154_v3 = vcombine.high %v4299_v50, %v4303_v51  ;;  %v4523_v43 = vld [vmem:[#allocation2 + $0x1918] sm:$0xff] }
 0x3ce   :  { %7895 = vmatprep.subr.bf16.mxu0 %v13202_v19  ;;  %v13280_v19 = vcombine.high %v4426_v39, %v4430_v49  ;;  %v4527_v44 = vld [vmem:[#allocation2 + $0x1938] sm:$0xff] }
 0x3d0   :  { %7773 = vmatpush2.bf16.msra.mxu1 %v13327_v9  ;;  %v4551_v9 = vld [vmem:[#allocation2 + $0x19f8] sm:$0xff] }
 0x3d1   :  { %7896 = vmatpush2.bf16.msra.mxu0 %v13201_v6  ;;  %7774 = vmatprep.subr.bf16.mxu1 %v13320_v16  ;;  %v13279_v6 = vcombine.low %v4426_v39, %v4430_v49  ;;  %v13153_v16 = vcombine.low %v4299_v50, %v4303_v51  ;;  %v13402_v2 = vcombine.high %v4547_v56, %v4551_v9 }
 0x3d2   :  { %7897 = vmatprep.subr.bf16.mxu0 %v13194_v8  ;;  %v13528_v8 = vcombine.high %v4674_v23, %v4678_v63  ;;  %v13378_v51 = vcombine.high %v4523_v43, %v4527_v44 }
 0x3d4   :  { %7775 = vmatpush2.bf16.msra.mxu1 %v13319_v10  ;;  %v4539_v10 = vld [vmem:[#allocation2 + $0x1998] sm:$0xff] }
 0x3d5   :  { %7898 = vmatpush2.bf16.msra.mxu0 %v13193_v34  ;;  %7776 = vmatprep.subr.bf16.mxu1 %v13312_v11  ;;  %v4543_v34 = vld [vmem:[#allocation2 + $0x19b8] sm:$0xff]  ;;  %v13401_v11 = vcombine.low %v4547_v56, %v4551_v9  ;;  %v13377_v9 = vcombine.low %v4523_v43, %v4527_v44  ;;  %v4618_v44 = vld [vmem:[#allocation2 + $0x1c10] sm:$0xff] }
 0x3d6   :  { %7899 = vmatprep.subr.bf16.mxu0 %v13186_v12  ;;  %v13520_v12 = vcombine.high %v4666_v62, %v4670_v37  ;;  %v13393_v29 = vcombine.low %v4539_v10, %v4543_v34  ;;  %v4634_v62 = vld [vmem:[#allocation2 + $0x1c90] sm:$0xff] }
 0x3d7   :  { %v4638_v37 = vld [vmem:[#allocation2 + $0x1cb0] sm:$0xff] }
 0x3d8   :  { %7777 = vmatpush2.bf16.msra.mxu1 %v13311_v27  ;;  %v13394_v27 = vcombine.high %v4539_v10, %v4543_v34  ;;  %v4511_v10 = vld [vmem:[#allocation2 + $0x18b8] sm:$0xff] }
 0x3d9   :  { %7900 = vmatpush2.bf16.msra.mxu0 %v13185_v1  ;;  %7778 = vmatprep.subr.bf16.mxu1 %v13304_v17  ;;  %v4531_v1 = vld [vmem:[#allocation2 + $0x1958] sm:$0xff] }
 0x3da   :  { %7901 = vmatprep.subr.bf16.mxu0 %v13178_v54  ;;  %v4535_v17 = vld [vmem:[#allocation2 + $0x1978] sm:$0xff] }
 0x3dc   :  { %7779 = vmatpush2.bf16.msra.mxu1 %v13303_v31  ;;  %v13512_v31 = vcombine.high %v4658_v5, %v4662_v55 }
 0x3dd   :  { %7902 = vmatpush2.bf16.msra.mxu0 %v13177_v32  ;;  %7780 = vmatprep.subr.bf16.mxu1 %v13296_v38 }
 0x3de   :  { %7903 = vmatprep.subr.bf16.mxu0 %v13170_v22  ;;  %v4654_v22 = vld [vmem:[#allocation2 + $0x1d30] sm:$0xff] }
 0x3e0   :  { %7781 = vmatpush2.bf16.msra.mxu1 %v13295_v0 }
 0x3e1   :  { %7904 = vmatpush2.bf16.msra.mxu0 %v13169_v20  ;;  %7782 = vmatprep.subr.bf16.mxu1 %v13288_v36  ;;  %v13511_v36 = vcombine.low %v4658_v5, %v4662_v55  ;;  %v13488_v55 = vcombine.high %v4634_v62, %v4638_v37 }
 0x3e2   :  { %7905 = vmatprep.subr.bf16.mxu0 %v13162_v47 }
 0x3e4   :  { %7783 = vmatpush2.bf16.msra.mxu1 %v13287_v46  ;;  %v4642_v46 = vld [vmem:[#allocation2 + $0x1cd0] sm:$0xff] }
 0x3e5   :  { %7906 = vmatpush2.bf16.msra.mxu0 %v13161_v60  ;;  %7784 = vmatprep.subr.bf16.mxu1 %v13280_v19  ;;  %v4646_v60 = vld [vmem:[#allocation2 + $0x1cf0] sm:$0xff]  ;;  %v4515_v19 = vld [vmem:[#allocation2 + $0x18d8] sm:$0xff] }
 0x3e6   :  { %7907 = vmatprep.subr.bf16.mxu0 %v13154_v3  ;;  %v4519_v3 = vld [vmem:[#allocation2 + $0x18f8] sm:$0xff] }
 0x3e7   :  { %v13369_v5 = vcombine.low %v4515_v19, %v4519_v3 }
 0x3e8   :  { %7785 = vmatpush2.bf16.msra.mxu1 %v13279_v6  ;;  %v13496_v6 = vcombine.high %v4642_v46, %v4646_v60 }
 0x3e9   :  { %7908 = vmatpush2.bf16.msra.mxu0 %v13153_v16  ;;  %7836 = vmatprep.subr.bf16.mxu1 %v13528_v8 }
 0x3ea   :  { %7959 = vmatprep.subr.bf16.mxu0 %v13402_v2  ;;  %v13370_v2 = vcombine.high %v4515_v19, %v4519_v3  ;;  %v4615_v19 = vld [vmem:[#allocation2 + $0x1bf8] sm:$0xff] }
 0x3eb   :  { %v14642_v15 = vpop.f32.mrf.mxu0  ;;  %7787 = vmatmul.mubr.bf16.vlgmr.msra.gmra.mxu1 %v14507_v24  ;;  %v7542_v18 = vpop.f32.mrf.mxu1 }
 0x3ec   :  { %7910 = vmatmul.mubr.bf16.vlgmr.msra.gmra.mxu0 %v14504_v21  ;;  %v14647_v54 = vadd.f32 %v7542_v18, %v14627_v48  ;;  %7837 = vmatpush1.bf16.msra.mxu1 %v13527_v45  ;;  %v13386_v21 = vcombine.high %v4531_v1, %v4535_v17  ;;  %v4650_v48 = vld [vmem:[#allocation2 + $0x1d10] sm:$0xff]  ;;  %v4507_v45 = vld [vmem:[#allocation2 + $0x1898] sm:$0xff] }
 0x3ed   :  { %7868 = vmatprep.mubr.bf16.mxu1 %v14612_v52  ;;  %7960 = vmatpush1.bf16.msra.mxu0 %v13401_v11  ;;  %v14650_v58 = vpop.f32.mrf.mxu0  ;;  %v7544_v33 = vpop.f32.mrf.mxu1  ;;  %v13504_v39 = vcombine.high %v4650_v48, %v4654_v22  ;;  %v13503_v56 = vcombine.low %v4650_v48, %v4654_v22  ;;  %v13361_v48 = vcombine.low %v4507_v45, %v4511_v10 }
 0x3ee   :  { %v8041_v32 = vrot.slane %v14647_v54, 4  ;;  %7991 = vmatprep.mubr.bf16.mxu0 %v14552_v13  ;;  %v14655_v38 = vadd.f32 %v7544_v33, %v14632_v57  ;;  %7838 = vmatprep.subr.bf16.mxu1 %v13520_v12  ;;  %v13385_v57 = vcombine.low %v4531_v1, %v4535_v17  ;;  %v13495_v12 = vcombine.low %v4642_v46, %v4646_v60  ;;  %v4626_v17 = vld [vmem:[#allocation2 + $0x1c50] sm:$0xff]  ;;  %v4499_v33 = vld [vmem:[#allocation2 + $0x1858] sm:$0xff] }
 0x3ef   :  { %v7669_v41 = vpop.f32.mrf.mxu0  ;;  %7961 = vmatprep.subr.bf16.mxu0 %v13394_v27  ;;  %v7546_v40 = vpop.f32.mrf.mxu1  ;;  %v13362_v1 = vcombine.high %v4507_v45, %v4511_v10  ;;  %v4742_v46 = vld [vmem:[#allocation2 + $0x1ff0] sm:$0xff]  ;;  %v4611_v60 = vld [vmem:[#allocation2 + $0x1bd8] sm:$0xff] }
 0x3f0   :  { %v8042_v0 = vadd.f32 %v8041_v32, %v14647_v54  ;;  %v8047_v20 = vrot.slane %v14655_v38, 4  ;;  %7839 = vmatpush1.bf16.msra.mxu1 %v13519_v26  ;;  %v4630_v26 = vld [vmem:[#allocation2 + $0x1c70] sm:$0xff]  ;;  %v4607_v45 = vld [vmem:[#allocation2 + $0x1bb8] sm:$0xff] }
 0x3f1   :  { %7962 = vmatpush1.bf16.msra.mxu0 %v13393_v29  ;;  %v7670_v13 = vpop.f32.mrf.mxu0  ;;  %v7547_v47 = vpop.f32.mrf.mxu1  ;;  %7840 = vmatprep.subr.bf16.mxu1 %v13512_v31  ;;  %v4503_v29 = vld [vmem:[#allocation2 + $0x1878] sm:$0xff]  ;;  %v13480_v22 = vcombine.high %v4626_v17, %v4630_v26 }
 0x3f2   :  { %v8043_v49 = vrot.slane %v8042_v0, 2  ;;  %v8048_v50 = vadd.f32 %v8047_v20, %v14655_v38  ;;  %7963 = vmatprep.subr.bf16.mxu0 %v13386_v21  ;;  %v13487_v21 = vcombine.low %v4634_v62, %v4638_v37  ;;  %v13354_v43 = vcombine.high %v4499_v33, %v4503_v29  ;;  %v4491_v20 = vld [vmem:[#allocation2 + $0x1818] sm:$0xff]  ;;  %v4734_v62 = vld [vmem:[#allocation2 + $0x1fb0] sm:$0xff] }
 0x3f3   :  { %v13479_v47 = vcombine.low %v4626_v17, %v4630_v26  ;;  %v4603_v37 = vld [vmem:[#allocation2 + $0x1b98] sm:$0xff]  ;;  %v4726_v17 = vld [vmem:[#allocation2 + $0x1f70] sm:$0xff] }
 0x3f4   :  { %v8044_v23 = vadd.f32 %v8043_v49, %v8042_v0  ;;  %v8049_v63 = vrot.slane %v8048_v50, 2  ;;  %7841 = vmatpush1.bf16.msra.mxu1 %v13511_v36  ;;  %v4622_v0 = vld [vmem:[#allocation2 + $0x1c30] sm:$0xff]  ;;  %v4595_v26 = vld [vmem:[#allocation2 + $0x1b58] sm:$0xff] }
 0x3f5   :  { %7964 = vmatpush1.bf16.msra.mxu0 %v13385_v57  ;;  %7842 = vmatprep.subr.bf16.mxu1 %v13504_v39  ;;  %v13353_v57 = vcombine.low %v4499_v33, %v4503_v29  ;;  %v13472_v39 = vcombine.high %v4618_v44, %v4622_v0  ;;  %v4599_v33 = vld [vmem:[#allocation2 + $0x1b78] sm:$0xff] }
 0x3f6   :  { %v8045_v16 = vrot.slane %v8044_v23, 1  ;;  %v8050_v8 = vadd.f32 %v8049_v63, %v8048_v50  ;;  %7965 = vmatprep.subr.bf16.mxu0 %v13378_v51  ;;  %v4738_v51 = vld [vmem:[#allocation2 + $0x1fd0] sm:$0xff]  ;;  %v13471_v63 = vcombine.low %v4618_v44, %v4622_v0  ;;  %v13450_v44 = vcombine.high %v4595_v26, %v4599_v33 }
 0x3f7   :  { %v4714_v0 = vld [vmem:[#allocation2 + $0x1f10] sm:$0xff] }
 0x3f8   :  { %v8046_v34 = vadd.f32 %v8045_v16, %v8044_v23  ;;  %v8051_v11 = vrot.slane %v8050_v8, 1  ;;  %7843 = vmatpush1.bf16.msra.mxu1 %v13503_v56 }
 0x3f9   :  { %7966 = vmatpush1.bf16.msra.mxu0 %v13377_v9  ;;  %7844 = vmatprep.subr.bf16.mxu1 %v13496_v6  ;;  %v13592_v9 = vcombine.high %v4738_v51, %v4742_v46 }
 0x3fa   :  { %v8089_v18 = vmul.f32 0.125, %v8046_v34  ;;  %v8052_v27 = vadd.f32 %v8051_v11, %v8050_v8  ;;  %7967 = vmatprep.subr.bf16.mxu0 %v13370_v2  ;;  %v13466_v8 = vcombine.high %v4611_v60, %v4615_v19  ;;  %v4730_v2 = vld [vmem:[#allocation2 + $0x1f90] sm:$0xff]  ;;  %v13591_v11 = vcombine.low %v4738_v51, %v4742_v46  ;;  %v4579_v51 = vld [vmem:[#allocation2 + $0x1ad8] sm:$0xff] }
 0x3fb   :  { %v4583_v46 = vld [vmem:[#allocation2 + $0x1af8] sm:$0xff] }
 0x3fc   :  { %v14661_v31 = vsub.f32 %v14647_v54, %v8089_v18  ;;  %v8090_v32 = vmul.f32 0.125, %v8052_v27  ;;  %7845 = vmatpush1.bf16.msra.mxu1 %v13495_v12  ;;  %v4495_v54 = vld [vmem:[#allocation2 + $0x1838] sm:$0xff]  ;;  %v13465_v12 = vcombine.low %v4611_v60, %v4615_v19  ;;  %v13458_v27 = vcombine.high %v4603_v37, %v4607_v45 }
 0x3fd   :  { %7968 = vmatpush1.bf16.msra.mxu0 %v13369_v5  ;;  %7846 = vmatprep.subr.bf16.mxu1 %v13488_v55  ;;  %v13345_v56 = vcombine.low %v4491_v20, %v4495_v54  ;;  %v13584_v5 = vcombine.high %v4730_v2, %v4734_v62 }
 0x3fe   :  { %v8105_v41 = vmul.f32 %v14661_v31, %v14661_v31  ;;  %v14666_v40 = vsub.f32 %v14655_v38, %v8090_v32  ;;  %7969 = vmatprep.subr.bf16.mxu0 %v13362_v1  ;;  %v13346_v38 = vcombine.high %v4491_v20, %v4495_v54  ;;  %v4722_v1 = vld [vmem:[#allocation2 + $0x1f50] sm:$0xff]  ;;  %v4587_v54 = vld [vmem:[#allocation2 + $0x1b18] sm:$0xff] }
 0x3ff   :  { %v4718_v20 = vld [vmem:[#allocation2 + $0x1f30] sm:$0xff] }
 0x400   :  { %v8113_v36 = vrot.slane %v8105_v41, 4  ;;  %v8106_v13 = vmul.f32 %v14666_v40, %v14666_v40  ;;  %7847 = vmatpush1.bf16.msra.mxu1 %v13487_v21  ;;  %v13583_v21 = vcombine.low %v4730_v2, %v4734_v62  ;;  %v13567_v60 = vcombine.low %v4714_v0, %v4718_v20 }
 0x401   :  { %7970 = vmatpush1.bf16.msra.mxu0 %v13361_v48  ;;  %7848 = vmatprep.subr.bf16.mxu1 %v13480_v22  ;;  %v13457_v48 = vcombine.low %v4603_v37, %v4607_v45  ;;  %v13576_v22 = vcombine.high %v4722_v1, %v4726_v17  ;;  %v4690_v37 = vld [vmem:[#allocation2 + $0x1e50] sm:$0xff] }
 0x402   :  { %v8114_v49 = vadd.f32 %v8113_v36, %v8105_v41  ;;  %v8119_v50 = vrot.slane %v8106_v13, 4  ;;  %7971 = vmatprep.subr.bf16.mxu0 %v13354_v43  ;;  %v4591_v36 = vld [vmem:[#allocation2 + $0x1b38] sm:$0xff]  ;;  %v4694_v45 = vld [vmem:[#allocation2 + $0x1e70] sm:$0xff] }
 0x403   :  { %v13441_v19 = vcombine.low %v4587_v54, %v4591_v36 }
 0x404   :  { %v8115_v3 = vrot.slane %v8114_v49, 2  ;;  %v8120_v23 = vadd.f32 %v8119_v50, %v8106_v13  ;;  %7849 = vmatpush1.bf16.msra.mxu1 %v13479_v47  ;;  %v13575_v47 = vcombine.low %v4722_v1, %v4726_v17  ;;  %v4706_v50 = vld [vmem:[#allocation2 + $0x1ed0] sm:$0xff] }
 0x405   :  { %7972 = vmatpush1.bf16.msra.mxu0 %v13353_v57  ;;  %7850 = vmatprep.subr.bf16.mxu1 %v13472_v39  ;;  %v13449_v57 = vcombine.low %v4595_v26, %v4599_v33  ;;  %v13568_v39 = vcombine.high %v4714_v0, %v4718_v20  ;;  %v4686_v1 = vld [vmem:[#allocation2 + $0x1e30] sm:$0xff]  ;;  %v4555_v26 = vld [vmem:[#allocation2 + $0x1a18] sm:$0xff]  ;;  %v8446_v0 = vld [vmem:[#allocation2 + $0x21c0] sm:$0xff] }
 0x406   :  { %v8116_v6 = vadd.f32 %v8115_v3, %v8114_v49  ;;  %v8121_v16 = vrot.slane %v8120_v23, 2  ;;  %7973 = vmatprep.subr.bf16.mxu0 %v13346_v38  ;;  %v13442_v49 = vcombine.high %v4587_v54, %v4591_v36  ;;  %v4710_v38 = vld [vmem:[#allocation2 + $0x1ef0] sm:$0xff]  ;;  %v4559_v33 = vld [vmem:[#allocation2 + $0x1a38] sm:$0xff]  ;;  %v8450_v20 = vld [vmem:[#allocation2 + $0x21e0] sm:$0xff] }
 0x407   :  { %v13560_v3 = vcombine.high %v4706_v50, %v4710_v38  ;;  %v14670_v54 = vld [vmem:[#allocation5 + $0x20] sm:$0x77] }
 0x408   :  { %v8117_v10 = vrot.slane %v8116_v6, 1  ;;  %v8122_v34 = vadd.f32 %v8121_v16, %v8120_v23  ;;  %7851 = vmatpush1.bf16.msra.mxu1 %v13471_v63  ;;  %v13434_v23 = vcombine.high %v4579_v51, %v4583_v46  ;;  %v4698_v63 = vld [vmem:[#allocation2 + $0x1e90] sm:$0xff]  ;;  %v13559_v16 = vcombine.low %v4706_v50, %v4710_v38  ;;  %v4411_v38 = vld [vmem:[#allocation2 + $0x1598] sm:$0xff] }
 0x409   :  { %7974 = vmatpush1.bf16.msra.mxu0 %v13345_v56  ;;  %7852 = vmatprep.subr.bf16.mxu1 %v13592_v9  ;;  %v4702_v56 = vld [vmem:[#allocation2 + $0x1eb0] sm:$0xff]  ;;  %v4571_v9 = vld [vmem:[#allocation2 + $0x1a98] sm:$0xff]  ;;  %v13652_v50 = vcombine.high %v8446_v0, %v8450_v20 }
 0x40a   :  { %v8118_v55 = vadd.f32 %v8117_v10, %v8116_v6  ;;  %v8123_v18 = vrot.slane %v8122_v34, 1  ;;  %7975 = vmatprep.subr.bf16.mxu0 %v13466_v8  ;;  %v4575_v6 = vld [vmem:[#allocation2 + $0x1ab8] sm:$0xff]  ;;  %v13433_v8 = vcombine.low %v4579_v51, %v4583_v46  ;;  %v13552_v2 = vcombine.high %v4698_v63, %v4702_v56 }
 0x40b   :  { %v13426_v62 = vcombine.high %v4571_v9, %v4575_v6  ;;  %v4563_v10 = vld [vmem:[#allocation2 + $0x1a58] sm:$0xff] }
 0x40c   :  { %v8161_v29 = vmul.f32 0.125, %v8118_v55  ;;  %v8124_v32 = vadd.f32 %v8123_v18, %v8122_v34  ;;  %7853 = vmatpush2.bf16.msra.mxu1 %v13591_v11  ;;  %v4567_v34 = vld [vmem:[#allocation2 + $0x1a78] sm:$0xff]  ;;  %v13551_v11 = vcombine.low %v4698_v63, %v4702_v56 }
 0x40d   :  { %7976 = vmatpush2.bf16.msra.mxu0 %v13465_v12  ;;  %7854 = vmatprep.subr.bf16.mxu1 %v13584_v5  ;;  %v13425_v12 = vcombine.low %v4571_v9, %v4575_v6  ;;  %v13544_v5 = vcombine.high %v4690_v37, %v4694_v45  ;;  %v13418_v18 = vcombine.high %v4563_v10, %v4567_v34  ;;  %v4415_v46 = vld [vmem:[#allocation2 + $0x15b8] sm:$0xff] }
 0x40e   :  { %v8169_v41 = vadd.f32 1e-05, %v8161_v29  ;;  %v8162_v43 = vmul.f32 0.125, %v8124_v32  ;;  %7977 = vmatprep.subr.bf16.mxu0 %v13458_v27  ;;  %v4682_v27 = vld [vmem:[#allocation2 + $0x1e10] sm:$0xff]  ;;  %v13543_v32 = vcombine.low %v4690_v37, %v4694_v45  ;;  %v13651_v9 = vcombine.low %v8446_v0, %v8450_v20  ;;  %v4387_v0 = vld [vmem:[#allocation2 + $0x14d8] sm:$0xff] }
 0x40f   :  { %v4391_v20 = vld [vmem:[#allocation2 + $0x14f8] sm:$0xff] }
 0x410   :  { %v8170_v13 = vadd.f32 1e-05, %v8162_v43  ;;  %7855 = vmatpush2.bf16.msra.mxu1 %v13583_v21  ;;  %14136 = vrsqrt.f32 %v8169_v41  ;;  %v13417_v21 = vcombine.low %v4563_v10, %v4567_v34  ;;  %v13410_v41 = vcombine.high %v4555_v26, %v4559_v33  ;;  %v4419_v43 = vld [vmem:[#allocation2 + $0x15d8] sm:$0xff]  ;;  %v8430_v34 = vld [vmem:[#allocation2 + $0x2140] sm:$0xff] }
 0x411   :  { %7978 = vmatpush2.bf16.msra.mxu0 %v13457_v48  ;;  %7856 = vmatprep.subr.bf16.mxu1 %v13576_v22  ;;  %v13536_v48 = vcombine.high %v4682_v27, %v4686_v1 }
 0x412   :  { %14138 = vrsqrt.f32 %v8170_v13  ;;  %7979 = vmatprep.subr.bf16.mxu0 %v13450_v44  ;;  %v4423_v44 = vld [vmem:[#allocation2 + $0x15f8] sm:$0xff]  ;;  %v13535_v13 = vcombine.low %v4682_v27, %v4686_v1 }
 0x414   :  { %7857 = vmatpush2.bf16.msra.mxu1 %v13575_v47  ;;  %v8300_v47 = vrot.slane %v14670_v54, %v14446_v59 }
 0x415   :  { %7980 = vmatpush2.bf16.msra.mxu0 %v13449_v57  ;;  %7858 = vmatprep.subr.bf16.mxu1 %v13568_v39  ;;  %v13409_v57 = vcombine.low %v4555_v26, %v4559_v33  ;;  %v13274_v39 = vcombine.high %v4419_v43, %v4423_v44  ;;  %v4399_v26 = vld [vmem:[#allocation2 + $0x1538] sm:$0xff] }
 0x416   :  { %7981 = vmatprep.subr.bf16.mxu0 %v13442_v49  ;;  %v8340_v63 = vrot.slane %v8300_v47, %v14453_v25 }
 0x418   :  { %7859 = vmatpush2.bf16.msra.mxu1 %v13567_v60  ;;  %v8438_v60 = vld [vmem:[#allocation2 + $0x2180] sm:$0xff] }
 0x419   :  { %7982 = vmatpush2.bf16.msra.mxu0 %v13441_v19  ;;  %7860 = vmatprep.subr.bf16.mxu1 %v13560_v3  ;;  %v8442_v19 = vld [vmem:[#allocation2 + $0x21a0] sm:$0xff] }
 0x41a   :  { %7983 = vmatprep.subr.bf16.mxu0 %v13434_v23  ;;  %v13273_v23 = vcombine.low %v4419_v43, %v4423_v44 }
 0x41c   :  { %7861 = vmatpush2.bf16.msra.mxu1 %v13559_v16  ;;  %v13266_v16 = vcombine.high %v4411_v38, %v4415_v46 }
 0x41d   :  { %7984 = vmatpush2.bf16.msra.mxu0 %v13433_v8  ;;  %7862 = vmatprep.subr.bf16.mxu1 %v13552_v2  ;;  %v14137_v55 = vpop.eup %14136  ;;  %v13644_v8 = vcombine.high %v8438_v60, %v8442_v19  ;;  %v4403_v2 = vld [vmem:[#allocation2 + $0x1558] sm:$0xff] }
 0x41e   :  { %7985 = vmatprep.subr.bf16.mxu0 %v13426_v62  ;;  %v4407_v62 = vld [vmem:[#allocation2 + $0x1578] sm:$0xff] }
 0x41f   :  { %v14139_v17 = vpop.eup %14138 }
 0x420   :  { %v8193_v29 = vcombine.low %v14137_v55, %v14139_v17  ;;  %7863 = vmatpush2.bf16.msra.mxu1 %v13551_v11  ;;  %v8434_v11 = vld [vmem:[#allocation2 + $0x2160] sm:$0xff]  ;;  %v13643_v55 = vcombine.low %v8438_v60, %v8442_v19  ;;  %v4395_v17 = vld [vmem:[#allocation2 + $0x1518] sm:$0xff]  ;;  %v13241_v60 = vcombine.low %v4387_v0, %v4391_v20 }
 0x421   :  { %7986 = vmatpush2.bf16.msra.mxu0 %v13425_v12  ;;  %7864 = vmatprep.subr.bf16.mxu1 %v13544_v5  ;;  %v13636_v27 = vcombine.high %v8430_v34, %v8434_v11  ;;  %v13250_v43 = vcombine.high %v4395_v17, %v4399_v26  ;;  %v13249_v47 = vcombine.low %v4395_v17, %v4399_v26  ;;  %v4483_v17 = vld [vmem:[#allocation2 + $0x17d8] sm:$0xff] }
 0x422   :  { %v8197_v22 = vrot.slane %v8193_v29, 7  ;;  %7987 = vmatprep.subr.bf16.mxu0 %v13418_v18  ;;  %v13258_v18 = vcombine.high %v4403_v2, %v4407_v62  ;;  %v8422_v29 = vld [vmem:[#allocation2 + $0x2100] sm:$0xff]  ;;  %v4487_v26 = vld [vmem:[#allocation2 + $0x17f8] sm:$0xff] }
 0x424   :  { %v8205_v36 = vmul.f32 %v14670_v54, %v8197_v22  ;;  %7865 = vmatpush2.bf16.msra.mxu1 %v13543_v32  ;;  %v8426_v32 = vld [vmem:[#allocation2 + $0x2120] sm:$0xff] }
 0x425   :  { %7988 = vmatpush2.bf16.msra.mxu0 %v13417_v21  ;;  %7866 = vmatprep.subr.bf16.mxu1 %v13536_v48  ;;  %v13257_v21 = vcombine.low %v4403_v2, %v4407_v62  ;;  %v13628_v44 = vcombine.high %v8422_v29, %v8426_v32 }
 0x426   :  { %v8220_v49 = vrot.slane %v8205_v36, %v14386_v30  ;;  %7989 = vmatprep.subr.bf16.mxu0 %v13410_v41  ;;  %v8216_v51 = vrot.slane %v8205_v36, %v14383_v28  ;;  %v13635_v41 = vcombine.low %v8430_v34, %v8434_v11  ;;  %v8414_v36 = vld [vmem:[#allocation2 + $0x20c0] sm:$0xff]  ;;  %v4363_v34 = vld [vmem:[#allocation2 + $0x1418] sm:$0xff] }
 0x427   :  { %v4367_v11 = vld [vmem:[#allocation2 + $0x1438] sm:$0xff] }
 0x428   :  { %v8260_v3 = vrot.slane %v8220_v49, %v14383_v28  ;;  %7867 = vmatpush2.bf16.msra.mxu1 %v13535_v13  ;;  %v8256_v56 = vrot.slane %v8216_v51, %v14383_v28  ;;  %v8418_v13 = vld [vmem:[#allocation2 + $0x20e0] sm:$0xff] }
 0x429   :  { %7990 = vmatpush2.bf16.msra.mxu0 %v13409_v57  ;;  %7918 = vmatprep.subr.bf16.mxu1 %v13274_v39  ;;  %v13627_v57 = vcombine.low %v8422_v29, %v8426_v32  ;;  %v13242_v39 = vcombine.high %v4387_v0, %v4391_v20  ;;  %v13620_v49 = vcombine.high %v8414_v36, %v8418_v13  ;;  %v8406_v51 = vld [vmem:[#allocation2 + $0x2080] sm:$0xff] }
 0x42a   :  { %v8286_v6 = vmul.f32 %v8260_v3, %v14666_v40  ;;  %11543 = vmatprep.subr.bf16.mxu0 %v13652_v50  ;;  %v14682_v37 = vmul.f32 %v8256_v56, %v14661_v31  ;;  %v13265_v40 = vcombine.low %v4411_v38, %v4415_v46  ;;  %v4379_v50 = vld [vmem:[#allocation2 + $0x1498] sm:$0xff]  ;;  %v8410_v46 = vld [vmem:[#allocation2 + $0x20a0] sm:$0xff]  ;;  %v13619_v19 = vcombine.low %v8414_v36, %v8418_v13 }
 0x42b   :  { %v14684_v45 = vpop.f32.mrf.mxu1  ;;  %v14686_v10 = vpop.f32.mrf.mxu0  ;;  %7869 = vmatmul.mubr.bf16.vlgmr.msra.gmra.mxu1 %v14614_v7  ;;  %v4383_v38 = vld [vmem:[#allocation2 + $0x14b8] sm:$0xff]  ;;  %v13217_v29 = vcombine.low %v4363_v34, %v4367_v11  ;;  %v13337_v0 = vcombine.low %v4483_v17, %v4487_v26 }
 0x42c   :  { %7992 = vmatmul.mubr.bf16.vlgmr.msra.gmra.mxu0 %v14556_v14  ;;  %7919 = vmatpush1.bf16.msra.mxu1 %v13273_v23  ;;  %v8366_v12 = vadd.f32 %v8340_v63, %v8286_v6  ;;  %v13234_v3 = vcombine.high %v4379_v50, %v4383_v38  ;;  %v13612_v23 = vcombine.high %v8406_v51, %v8410_v46  ;;  %v4371_v63 = vld [vmem:[#allocation2 + $0x1458] sm:$0xff]  ;;  %v8402_v6 = vld [vmem:[#allocation2 + $0x2060] sm:$0xff] }
 0x42d   :  { %7950 = vmatprep.mubr.bf16.mxu1 %v14480_v35  ;;  %11544 = vmatpush1.bf16.msra.mxu0 %v13651_v9  ;;  %v14691_v5 = vpop.f32.mrf.mxu1  ;;  %v14693_v31 = vpop.f32.mrf.mxu0  ;;  %v4375_v56 = vld [vmem:[#allocation2 + $0x1478] sm:$0xff]  ;;  %v8398_v9 = vld [vmem:[#allocation2 + $0x2040] sm:$0xff] }
 0x42e   :  { %7920 = vmatprep.subr.bf16.mxu1 %v13266_v16  ;;  %11545 = vmatprep.subr.bf16.mxu0 %v13644_v8  ;;  %v8374_v1 = vmax.f32 %v8366_v12, 0.0  ;;  %v13233_v16 = vcombine.low %v4379_v50, %v4383_v38  ;;  %v13611_v8 = vcombine.low %v8406_v51, %v8410_v46  ;;  %v13226_v2 = vcombine.high %v4371_v63, %v4375_v56  ;;  %v8394_v12 = vld [vmem:[#allocation2 + $0x2020] sm:$0xff] }
 0x42f   :  { %v7628_v33 = vpop.f32.mrf.mxu1  ;;  %v7751_v14 = vpop.f32.mrf.mxu0  ;;  %v13604_v62 = vcombine.high %v8398_v9, %v8402_v6 }
 0x430   :  { %7921 = vmatpush1.bf16.msra.mxu1 %v13265_v40  ;;  %v14695_v35 = vpack.c.bf16 %v8374_v1, %v8374_v1  ;;  %v8390_v40 = vld [vmem:[#allocation2 + $0x2000] sm:$0xff] }
 0x431   :  { %11546 = vmatpush1.bf16.msra.mxu0 %v13643_v55  ;;  %v7629_v48 = vpop.f32.mrf.mxu1  ;;  %v7752_v22 = vpop.f32.mrf.mxu0  ;;  %7922 = vmatprep.subr.bf16.mxu1 %v13258_v18  ;;  %v13225_v55 = vcombine.low %v4371_v63, %v4375_v56  ;;  %v13603_v18 = vcombine.low %v8398_v9, %v8402_v6  ;;  %v13596_v1 = vcombine.high %v8390_v40, %v8394_v12  ;;  %v8510_v33 = vld [vmem:[#allocation2 + $0x23c0] sm:$0xff] }
 0x432   :  { %11547 = vmatprep.subr.bf16.mxu0 %v13636_v27  ;;  %11575 = vmatprep.mubr.bf16.mxu0 %v14695_v35  ;;  %v13218_v27 = vcombine.high %v4363_v34, %v4367_v11  ;;  %v8514_v14 = vld [vmem:[#allocation2 + $0x23e0] sm:$0xff]  ;;  %v13595_v32 = vcombine.low %v8390_v40, %v8394_v12  ;;  %v4475_v22 = vld [vmem:[#allocation2 + $0x1798] sm:$0xff] }
 0x433   :  { %v13716_v48 = vcombine.high %v8510_v33, %v8514_v14  ;;  %v13715_v20 = vcombine.low %v8510_v33, %v8514_v14 }
 0x434   :  { %7923 = vmatpush1.bf16.msra.mxu1 %v13257_v21  ;;  %v13338_v21 = vcombine.high %v4483_v17, %v4487_v26  ;;  %v14698_v26 = vld [vmem:[#allocation5 + $0x28] sm:$0x77] }
 0x435   :  { %11548 = vmatpush1.bf16.msra.mxu0 %v13635_v41  ;;  %7924 = vmatprep.subr.bf16.mxu1 %v13250_v43  ;;  %v4479_v41 = vld [vmem:[#allocation2 + $0x17b8] sm:$0xff]  ;;  %v8502_v43 = vld [vmem:[#allocation2 + $0x2380] sm:$0xff] }
 0x436   :  { %11549 = vmatprep.subr.bf16.mxu0 %v13628_v44  ;;  %v8506_v44 = vld [vmem:[#allocation2 + $0x23a0] sm:$0xff]  ;;  %v13330_v36 = vcombine.high %v4475_v22, %v4479_v41  ;;  %v13329_v50 = vcombine.low %v4475_v22, %v4479_v41 }
 0x437   :  { %v13708_v13 = vcombine.high %v8502_v43, %v8506_v44  ;;  %v13707_v38 = vcombine.low %v8502_v43, %v8506_v44  ;;  %v8462_v22 = vld [vmem:[#allocation2 + $0x2240] sm:$0xff]  ;;  %v4764_v43 = vrot.slane %v14698_v26, %v14337_v61 }
 0x438   :  { %7925 = vmatpush1.bf16.msra.mxu1 %v13249_v47  ;;  %v4467_v47 = vld [vmem:[#allocation2 + $0x1758] sm:$0xff]  ;;  %v8466_v41 = vld [vmem:[#allocation2 + $0x2260] sm:$0xff] }
 0x439   :  { %11550 = vmatpush1.bf16.msra.mxu0 %v13627_v57  ;;  %7926 = vmatprep.subr.bf16.mxu1 %v13242_v39  ;;  %v4471_v57 = vld [vmem:[#allocation2 + $0x1778] sm:$0xff]  ;;  %v8494_v39 = vld [vmem:[#allocation2 + $0x2340] sm:$0xff] }
 0x43a   :  { %11551 = vmatprep.subr.bf16.mxu0 %v13620_v49  ;;  %v8498_v49 = vld [vmem:[#allocation2 + $0x2360] sm:$0xff]  ;;  %v13322_v51 = vcombine.high %v4467_v47, %v4471_v57  ;;  %v13321_v63 = vcombine.low %v4467_v47, %v4471_v57  ;;  %v4427_v47 = vld [vmem:[#allocation2 + $0x1618] sm:$0xff] }
 0x43b   :  { %v13700_v46 = vcombine.high %v8494_v39, %v8498_v49  ;;  %v13699_v56 = vcombine.low %v8494_v39, %v8498_v49  ;;  %v4431_v57 = vld [vmem:[#allocation2 + $0x1638] sm:$0xff]  ;;  %v8454_v39 = vld [vmem:[#allocation2 + $0x2200] sm:$0xff] }
 0x43c   :  { %7927 = vmatpush1.bf16.msra.mxu1 %v13241_v60  ;;  %v4459_v60 = vld [vmem:[#allocation2 + $0x1718] sm:$0xff]  ;;  %v8458_v49 = vld [vmem:[#allocation2 + $0x2220] sm:$0xff] }
 0x43d   :  { %11552 = vmatpush1.bf16.msra.mxu0 %v13619_v19  ;;  %7928 = vmatprep.subr.bf16.mxu1 %v13234_v3  ;;  %v4463_v19 = vld [vmem:[#allocation2 + $0x1738] sm:$0xff]  ;;  %v8486_v3 = vld [vmem:[#allocation2 + $0x2300] sm:$0xff] }
 0x43e   :  { %11553 = vmatprep.subr.bf16.mxu0 %v13612_v23  ;;  %v8490_v23 = vld [vmem:[#allocation2 + $0x2320] sm:$0xff]  ;;  %v13314_v9 = vcombine.high %v4459_v60, %v4463_v19  ;;  %v13313_v34 = vcombine.low %v4459_v60, %v4463_v19  ;;  %v13660_v19 = vcombine.high %v8454_v39, %v8458_v49 }
 0x43f   :  { %v13692_v6 = vcombine.high %v8486_v3, %v8490_v23  ;;  %v13691_v11 = vcombine.low %v8486_v3, %v8490_v23  ;;  %v4675_v3 = vld [vmem:[#allocation2 + $0x1dd8] sm:$0xff] }
 0x440   :  { %7929 = vmatpush1.bf16.msra.mxu1 %v13233_v16  ;;  %v4451_v16 = vld [vmem:[#allocation2 + $0x16d8] sm:$0xff] }
 0x441   :  { %11554 = vmatpush1.bf16.msra.mxu0 %v13611_v8  ;;  %7930 = vmatprep.subr.bf16.mxu1 %v13226_v2  ;;  %v4455_v8 = vld [vmem:[#allocation2 + $0x16f8] sm:$0xff]  ;;  %v8478_v2 = vld [vmem:[#allocation2 + $0x22c0] sm:$0xff] }
 0x442   :  { %11555 = vmatprep.subr.bf16.mxu0 %v13604_v62  ;;  %v8482_v62 = vld [vmem:[#allocation2 + $0x22e0] sm:$0xff]  ;;  %v13306_v40 = vcombine.high %v4451_v16, %v4455_v8  ;;  %v13305_v17 = vcombine.low %v4451_v16, %v4455_v8  ;;  %v4679_v23 = vld [vmem:[#allocation2 + $0x1df8] sm:$0xff] }
 0x443   :  { %v13684_v12 = vcombine.high %v8478_v2, %v8482_v62  ;;  %v13683_v33 = vcombine.low %v8478_v2, %v8482_v62  ;;  %v13530_v16 = vcombine.high %v4675_v3, %v4679_v23 }
 0x444   :  { %7931 = vmatpush1.bf16.msra.mxu1 %v13225_v55  ;;  %v4443_v55 = vld [vmem:[#allocation2 + $0x1698] sm:$0xff] }
 0x445   :  { %11556 = vmatpush1.bf16.msra.mxu0 %v13603_v18  ;;  %7932 = vmatprep.subr.bf16.mxu1 %v13218_v27  ;;  %v4447_v18 = vld [vmem:[#allocation2 + $0x16b8] sm:$0xff]  ;;  %v8470_v27 = vld [vmem:[#allocation2 + $0x2280] sm:$0xff] }
 0x446   :  { %11557 = vmatprep.subr.bf16.mxu0 %v13596_v1  ;;  %v8474_v1 = vld [vmem:[#allocation2 + $0x22a0] sm:$0xff]  ;;  %v13298_v14 = vcombine.high %v4443_v55, %v4447_v18  ;;  %v13297_v44 = vcombine.low %v4443_v55, %v4447_v18  ;;  %v4659_v18 = vld [vmem:[#allocation2 + $0x1d58] sm:$0xff] }
 0x448   :  { %7933 = vmatpush1.bf16.msra.mxu1 %v13217_v29  ;;  %v13676_v29 = vcombine.high %v8470_v27, %v8474_v1 }
 0x449   :  { %11558 = vmatpush1.bf16.msra.mxu0 %v13595_v32  ;;  %7934 = vmatprep.subr.bf16.mxu1 %v13338_v21  ;;  %v4435_v32 = vld [vmem:[#allocation2 + $0x1658] sm:$0xff] }
 0x44a   :  { %11559 = vmatprep.subr.bf16.mxu0 %v13716_v48  ;;  %v4439_v21 = vld [vmem:[#allocation2 + $0x1678] sm:$0xff]  ;;  %v8296_v48 = vrot.slane %v14670_v54, %v14453_v25 }
 0x44c   :  { %7935 = vmatpush2.bf16.msra.mxu1 %v13337_v0  ;;  %v13675_v0 = vcombine.low %v8470_v27, %v8474_v1  ;;  %v8336_v54 = vrot.slane %v8296_v48, %v14453_v25  ;;  %v4663_v27 = vld [vmem:[#allocation2 + $0x1d78] sm:$0xff] }
 0x44d   :  { %11560 = vmatpush2.bf16.msra.mxu0 %v13715_v20  ;;  %7936 = vmatprep.subr.bf16.mxu1 %v13330_v36  ;;  %v13290_v20 = vcombine.high %v4435_v32, %v4439_v21  ;;  %v4768_v36 = vrot.slane %v14698_v26, %v14342_v4 }
 0x44e   :  { %11561 = vmatprep.subr.bf16.mxu0 %v13708_v13  ;;  %v13668_v13 = vcombine.high %v8462_v22, %v8466_v41 }
 0x44f   :  { %v4808_v60 = vrot.slane %v4768_v36, %v14337_v61 }
 0x450   :  { %7937 = vmatpush2.bf16.msra.mxu1 %v13329_v50  ;;  %v4804_v50 = vrot.slane %v4764_v43, %v14337_v61  ;;  %v13513_v43 = vcombine.low %v4659_v18, %v4663_v27 }
 0x451   :  { %11562 = vmatpush2.bf16.msra.mxu0 %v13707_v38  ;;  %7938 = vmatprep.subr.bf16.mxu1 %v13322_v51  ;;  %v13289_v38 = vcombine.low %v4435_v32, %v4439_v21  ;;  %v13667_v51 = vcombine.low %v8462_v22, %v8466_v41  ;;  %v7586_v8 = vadd.f32 %v14639_v42, %v4808_v60  ;;  %v4651_v32 = vld [vmem:[#allocation2 + $0x1d18] sm:$0xff]  ;;  %v8694_v60 = vld [vmem:[#allocation2 + $0x2980] sm:$0xff] }
 0x452   :  { %11563 = vmatprep.subr.bf16.mxu0 %v13700_v46  ;;  %v13282_v46 = vcombine.high %v4427_v47, %v4431_v57  ;;  %v4655_v21 = vld [vmem:[#allocation2 + $0x1d38] sm:$0xff] }
 0x454   :  { %7939 = vmatpush2.bf16.msra.mxu1 %v13321_v63  ;;  %v8365_v63 = vadd.f32 %v8336_v54, %v14682_v37  ;;  %v13529_v37 = vcombine.low %v4675_v3, %v4679_v23  ;;  %v4647_v54 = vld [vmem:[#allocation2 + $0x1cf8] sm:$0xff] }
 0x455   :  { %11564 = vmatpush2.bf16.msra.mxu0 %v13699_v56  ;;  %7940 = vmatprep.subr.bf16.mxu1 %v13314_v9  ;;  %v7584_v56 = vadd.f32 %v14634_v53, %v4804_v50  ;;  %v13281_v9 = vcombine.low %v4427_v47, %v4431_v57  ;;  %v4643_v57 = vld [vmem:[#allocation2 + $0x1cd8] sm:$0xff] }
 0x456   :  { %11565 = vmatprep.subr.bf16.mxu0 %v13692_v6  ;;  %v13659_v6 = vcombine.low %v8454_v39, %v8458_v49  ;;  %v8373_v62 = vmax.f32 %v8365_v63, 0.0  ;;  %v4635_v63 = vld [vmem:[#allocation2 + $0x1c98] sm:$0xff] }
 0x457   :  { %v7625_v2 = vadd.f32 %v14684_v45, %v7584_v56  ;;  %v4639_v56 = vld [vmem:[#allocation2 + $0x1cb8] sm:$0xff] }
 0x458   :  { %7941 = vmatpush2.bf16.msra.mxu1 %v13313_v34  ;;  %v4667_v34 = vld [vmem:[#allocation2 + $0x1d98] sm:$0xff]  ;;  %v14715_v55 = vpack.c.bf16 %v8373_v62, %v8373_v62  ;;  %v13490_v62 = vcombine.high %v4635_v63, %v4639_v56 }
 0x459   :  { %11566 = vmatpush2.bf16.msra.mxu0 %v13691_v11  ;;  %7942 = vmatprep.subr.bf16.mxu1 %v13306_v40  ;;  %v4671_v11 = vld [vmem:[#allocation2 + $0x1db8] sm:$0xff]  ;;  %v7627_v40 = vadd.f32 %v14691_v5, %v7586_v8 }
 0x45a   :  { %11567 = vmatprep.subr.bf16.mxu0 %v13684_v12  ;;  %v13522_v53 = vcombine.high %v4667_v34, %v4671_v11  ;;  %v7666_v12 = vadd.f32 %v14642_v15, %v7625_v2  ;;  %v13497_v2 = vcombine.low %v4643_v57, %v4647_v54 }
 0x45b   :  { %v7668_v5 = vadd.f32 %v14650_v58, %v7627_v40 }
 0x45c   :  { %7943 = vmatpush2.bf16.msra.mxu1 %v13305_v17  ;;  %v13521_v17 = vcombine.low %v4667_v34, %v4671_v11  ;;  %v8686_v34 = vld [vmem:[#allocation2 + $0x2940] sm:$0xff] }
 0x45d   :  { %11568 = vmatpush2.bf16.msra.mxu0 %v13683_v33  ;;  %7944 = vmatprep.subr.bf16.mxu1 %v13298_v14  ;;  %v13514_v33 = vcombine.high %v4659_v18, %v4663_v27  ;;  %v8690_v11 = vld [vmem:[#allocation2 + $0x2960] sm:$0xff] }
 0x45e   :  { %11569 = vmatprep.subr.bf16.mxu0 %v13676_v29  ;;  %v13892_v18 = vcombine.high %v8686_v34, %v8690_v11  ;;  %v13891_v27 = vcombine.low %v8686_v34, %v8690_v11 }
 0x460   :  { %7945 = vmatpush2.bf16.msra.mxu1 %v13297_v44  ;;  %v13506_v44 = vcombine.high %v4651_v32, %v4655_v21 }
 0x461   :  { %11570 = vmatpush2.bf16.msra.mxu0 %v13675_v0  ;;  %7946 = vmatprep.subr.bf16.mxu1 %v13290_v20  ;;  %v8702_v0 = vld [vmem:[#allocation2 + $0x29c0] sm:$0xff] }
 0x462   :  { %11571 = vmatprep.subr.bf16.mxu0 %v13668_v13  ;;  %v8706_v20 = vld [vmem:[#allocation2 + $0x29e0] sm:$0xff] }
 0x463   :  { %v13908_v39 = vcombine.high %v8702_v0, %v8706_v20  ;;  %v13907_v49 = vcombine.low %v8702_v0, %v8706_v20  ;;  %v8670_v0 = vld [vmem:[#allocation2 + $0x28c0] sm:$0xff] }
 0x464   :  { %7947 = vmatpush2.bf16.msra.mxu1 %v13289_v38  ;;  %v8674_v20 = vld [vmem:[#allocation2 + $0x28e0] sm:$0xff] }
 0x465   :  { %11572 = vmatpush2.bf16.msra.mxu0 %v13667_v51  ;;  %7948 = vmatprep.subr.bf16.mxu1 %v13282_v46  ;;  %v13505_v51 = vcombine.low %v4651_v32, %v4655_v21  ;;  %v13498_v46 = vcombine.high %v4643_v57, %v4647_v54  ;;  %v13876_v57 = vcombine.high %v8670_v0, %v8674_v20 }
 0x466   :  { %11573 = vmatprep.subr.bf16.mxu0 %v13660_v19  ;;  %v8698_v19 = vld [vmem:[#allocation2 + $0x29a0] sm:$0xff]  ;;  %v13875_v54 = vcombine.low %v8670_v0, %v8674_v20  ;;  %v4707_v20 = vld [vmem:[#allocation2 + $0x1ed8] sm:$0xff] }
 0x467   :  { %v8770_v0 = vld [vmem:[#allocation2 + $0x2be0] sm:$0xff] }
 0x468   :  { %7949 = vmatpush2.bf16.msra.mxu1 %v13281_v9  ;;  %v13900_v9 = vcombine.high %v8694_v60, %v8698_v19 }
 0x469   :  { %11574 = vmatpush2.bf16.msra.mxu0 %v13659_v6  ;;  %8000 = vmatprep.subr.bf16.mxu1 %v13530_v16  ;;  %v13899_v6 = vcombine.low %v8694_v60, %v8698_v19 }
 0x46a   :  { %11625 = vmatprep.subr.bf16.mxu0 %v13908_v39 }
 0x46b   :  { %v7706_v42 = vpop.f32.mrf.mxu1  ;;  %7951 = vmatmul.mubr.bf16.vlgmr.msra.gmra.mxu1 %v14507_v24 }
 0x46c   :  { %v14718_v45 = vadd.f32 %v7706_v42, %v7666_v12  ;;  %v14720_v1 = vpop.f32.mrf.mxu0  ;;  %11576 = vmatmul.mubr.bf16.vlgmr.msra.gmra.mxu0 %v14715_v55  ;;  %8001 = vmatpush1.bf16.msra.mxu1 %v13529_v37  ;;  %v4631_v12 = vld [vmem:[#allocation2 + $0x1c78] sm:$0xff] }
 0x46d   :  { %8032 = vmatprep.mubr.bf16.mxu1 %v14612_v52  ;;  %v7708_v15 = vpop.f32.mrf.mxu1  ;;  %8002 = vmatprep.subr.bf16.mxu1 %v13522_v53  ;;  %v4627_v53 = vld [vmem:[#allocation2 + $0x1c58] sm:$0xff] }
 0x46e   :  { %v8053_v14 = vrot.slane %v14718_v45, 4  ;;  %v14726_v29 = vadd.f32 %v7708_v15, %v7668_v5  ;;  %v14728_v24 = vpop.f32.mrf.mxu0  ;;  %11626 = vmatpush1.bf16.msra.mxu0 %v13907_v49  ;;  %v13482_v15 = vcombine.high %v4627_v53, %v4631_v12 }
 0x46f   :  { %v7710_v48 = vpop.f32.mrf.mxu1  ;;  %11627 = vmatprep.subr.bf16.mxu0 %v13900_v9 }
 0x470   :  { %v8054_v22 = vadd.f32 %v8053_v14, %v14718_v45  ;;  %v8059_v41 = vrot.slane %v14726_v29, 4  ;;  %v7833_v58 = vpop.f32.mrf.mxu0  ;;  %8003 = vmatpush1.bf16.msra.mxu1 %v13521_v17  ;;  %v13489_v17 = vcombine.low %v4635_v63, %v4639_v56  ;;  %v8682_v14 = vld [vmem:[#allocation2 + $0x2920] sm:$0xff]  ;;  %v4619_v48 = vld [vmem:[#allocation2 + $0x1c18] sm:$0xff] }
 0x471   :  { %v7711_v52 = vpop.f32.mrf.mxu1  ;;  %8004 = vmatprep.subr.bf16.mxu1 %v13514_v33  ;;  %v8678_v33 = vld [vmem:[#allocation2 + $0x2900] sm:$0xff] }
 0x472   :  { %v8055_v36 = vrot.slane %v8054_v22, 2  ;;  %v8060_v13 = vadd.f32 %v8059_v41, %v14726_v29  ;;  %v7834_v47 = vpop.f32.mrf.mxu0  ;;  %11628 = vmatpush1.bf16.msra.mxu0 %v13899_v6  ;;  %v13884_v41 = vcombine.high %v8678_v33, %v8682_v14  ;;  %v13481_v52 = vcombine.low %v4627_v53, %v4631_v12 }
 0x473   :  { %11629 = vmatprep.subr.bf16.mxu0 %v13892_v18  ;;  %v4743_v47 = vld [vmem:[#allocation2 + $0x1ff8] sm:$0xff] }
 0x474   :  { %v8056_v50 = vadd.f32 %v8055_v36, %v8054_v22  ;;  %v8061_v38 = vrot.slane %v8060_v13, 2  ;;  %8005 = vmatpush1.bf16.msra.mxu1 %v13513_v43  ;;  %v4623_v22 = vld [vmem:[#allocation2 + $0x1c38] sm:$0xff] }
 0x475   :  { %8006 = vmatprep.subr.bf16.mxu1 %v13506_v44  ;;  %v13474_v44 = vcombine.high %v4619_v48, %v4623_v22 }
 0x476   :  { %v8057_v3 = vrot.slane %v8056_v50, 1  ;;  %v8062_v23 = vadd.f32 %v8061_v38, %v8060_v13  ;;  %11630 = vmatpush1.bf16.msra.mxu0 %v13891_v27 }
 0x477   :  { %11631 = vmatprep.subr.bf16.mxu0 %v13884_v41 }
 0x478   :  { %v8058_v16 = vadd.f32 %v8057_v3, %v8056_v50  ;;  %v8063_v8 = vrot.slane %v8062_v23, 1  ;;  %8007 = vmatpush1.bf16.msra.mxu1 %v13505_v51  ;;  %v13473_v50 = vcombine.low %v4619_v48, %v4623_v22  ;;  %v8662_v51 = vld [vmem:[#allocation2 + $0x2880] sm:$0xff]  ;;  %v4731_v3 = vld [vmem:[#allocation2 + $0x1f98] sm:$0xff] }
 0x479   :  { %8008 = vmatprep.subr.bf16.mxu1 %v13498_v46  ;;  %v8666_v46 = vld [vmem:[#allocation2 + $0x28a0] sm:$0xff]  ;;  %v4715_v48 = vld [vmem:[#allocation2 + $0x1f18] sm:$0xff] }
 0x47a   :  { %v8091_v40 = vmul.f32 0.125, %v8058_v16  ;;  %v8064_v37 = vadd.f32 %v8063_v8, %v8062_v23  ;;  %v4735_v23 = vld [vmem:[#allocation2 + $0x1fb8] sm:$0xff]  ;;  %v13868_v63 = vcombine.high %v8662_v51, %v8666_v46  ;;  %v13867_v56 = vcombine.low %v8662_v51, %v8666_v46 }
 0x47b   :  { %v13586_v8 = vcombine.high %v4731_v3, %v4735_v23  ;;  %v4719_v22 = vld [vmem:[#allocation2 + $0x1f38] sm:$0xff] }
 0x47c   :  { %v14734_v42 = vsub.f32 %v14718_v45, %v8091_v40  ;;  %v8092_v5 = vmul.f32 0.125, %v8064_v37  ;;  %8009 = vmatpush1.bf16.msra.mxu1 %v13497_v2  ;;  %v13883_v45 = vcombine.low %v8678_v33, %v8682_v14  ;;  %v8654_v2 = vld [vmem:[#allocation2 + $0x2840] sm:$0xff]  ;;  %v4723_v40 = vld [vmem:[#allocation2 + $0x1f58] sm:$0xff] }
 0x47d   :  { %8010 = vmatprep.subr.bf16.mxu1 %v13490_v62  ;;  %v8658_v62 = vld [vmem:[#allocation2 + $0x2860] sm:$0xff]  ;;  %v4727_v37 = vld [vmem:[#allocation2 + $0x1f78] sm:$0xff] }
 0x47e   :  { %v8107_v32 = vmul.f32 %v14734_v42, %v14734_v42  ;;  %v14739_v21 = vsub.f32 %v14726_v29, %v8092_v5  ;;  %11632 = vmatpush1.bf16.msra.mxu0 %v13883_v45  ;;  %v4739_v29 = vld [vmem:[#allocation2 + $0x1fd8] sm:$0xff]  ;;  %v13860_v53 = vcombine.high %v8654_v2, %v8658_v62  ;;  %v13859_v12 = vcombine.low %v8654_v2, %v8658_v62  ;;  %v8650_v33 = vld [vmem:[#allocation2 + $0x2820] sm:$0xff] }
 0x47f   :  { %11633 = vmatprep.subr.bf16.mxu0 %v13876_v57  ;;  %v13594_v38 = vcombine.high %v4739_v29, %v4743_v47  ;;  %v13593_v16 = vcombine.low %v4739_v29, %v4743_v47  ;;  %v13585_v5 = vcombine.low %v4731_v3, %v4735_v23  ;;  %v13569_v47 = vcombine.low %v4715_v48, %v4719_v22  ;;  %v8754_v3 = vld [vmem:[#allocation2 + $0x2b60] sm:$0xff]  ;;  %v4691_v23 = vld [vmem:[#allocation2 + $0x1e58] sm:$0xff] }
 0x480   :  { %v8125_v58 = vrot.slane %v8107_v32, 4  ;;  %v8108_v43 = vmul.f32 %v14739_v21, %v14739_v21  ;;  %8011 = vmatpush1.bf16.msra.mxu1 %v13489_v17  ;;  %v13578_v17 = vcombine.high %v4723_v40, %v4727_v37  ;;  %v8746_v2 = vld [vmem:[#allocation2 + $0x2b20] sm:$0xff] }
 0x481   :  { %8012 = vmatprep.subr.bf16.mxu1 %v13482_v15  ;;  %v8646_v15 = vld [vmem:[#allocation2 + $0x2800] sm:$0xff] }
 0x482   :  { %v8126_v36 = vadd.f32 %v8125_v58, %v8107_v32  ;;  %v8131_v13 = vrot.slane %v8108_v43, 4  ;;  %11634 = vmatpush1.bf16.msra.mxu0 %v13875_v54  ;;  %v13852_v41 = vcombine.high %v8646_v15, %v8650_v33  ;;  %v13851_v45 = vcombine.low %v8646_v15, %v8650_v33  ;;  %v8758_v54 = vld [vmem:[#allocation2 + $0x2b80] sm:$0xff] }
 0x483   :  { %11635 = vmatprep.subr.bf16.mxu0 %v13868_v63  ;;  %v4695_v63 = vld [vmem:[#allocation2 + $0x1e78] sm:$0xff]  ;;  %v8734_v15 = vld [vmem:[#allocation2 + $0x2ac0] sm:$0xff] }
 0x484   :  { %v8127_v39 = vrot.slane %v8126_v36, 2  ;;  %v8132_v49 = vadd.f32 %v8131_v13, %v8108_v43  ;;  %8013 = vmatpush1.bf16.msra.mxu1 %v13481_v52  ;;  %v13577_v43 = vcombine.low %v4723_v40, %v4727_v37  ;;  %v13570_v52 = vcombine.high %v4715_v48, %v4719_v22  ;;  %v4687_v40 = vld [vmem:[#allocation2 + $0x1e38] sm:$0xff]  ;;  %v8738_v33 = vld [vmem:[#allocation2 + $0x2ae0] sm:$0xff] }
 0x485   :  { %8014 = vmatprep.subr.bf16.mxu1 %v13474_v44  ;;  %v8766_v44 = vld [vmem:[#allocation2 + $0x2bc0] sm:$0xff]  ;;  %v13940_v22 = vcombine.high %v8734_v15, %v8738_v33 }
 0x486   :  { %v8128_v60 = vadd.f32 %v8127_v39, %v8126_v36  ;;  %v8133_v19 = vrot.slane %v8132_v49, 2  ;;  %11636 = vmatpush1.bf16.msra.mxu0 %v13867_v56  ;;  %v4711_v36 = vld [vmem:[#allocation2 + $0x1ef8] sm:$0xff]  ;;  %v13972_v13 = vcombine.high %v8766_v44, %v8770_v0  ;;  %v13971_v29 = vcombine.low %v8766_v44, %v8770_v0  ;;  %v8762_v39 = vld [vmem:[#allocation2 + $0x2ba0] sm:$0xff] }
 0x487   :  { %11637 = vmatprep.subr.bf16.mxu0 %v13860_v53  ;;  %v13562_v57 = vcombine.high %v4707_v20, %v4711_v36  ;;  %v13963_v51 = vcombine.low %v8758_v54, %v8762_v39  ;;  %v13561_v46 = vcombine.low %v4707_v20, %v4711_v36  ;;  %v8578_v48 = vld [vmem:[#allocation2 + $0x25e0] sm:$0xff] }
 0x488   :  { %v8129_v9 = vrot.slane %v8128_v60, 1  ;;  %v8134_v6 = vadd.f32 %v8133_v19, %v8132_v49  ;;  %8015 = vmatpush1.bf16.msra.mxu1 %v13473_v50  ;;  %v4699_v49 = vld [vmem:[#allocation2 + $0x1e98] sm:$0xff]  ;;  %v8750_v19 = vld [vmem:[#allocation2 + $0x2b40] sm:$0xff] }
 0x489   :  { %8016 = vmatprep.subr.bf16.mxu1 %v13594_v38  ;;  %v4703_v50 = vld [vmem:[#allocation2 + $0x1eb8] sm:$0xff]  ;;  %v13964_v38 = vcombine.high %v8758_v54, %v8762_v39  ;;  %v13956_v56 = vcombine.high %v8750_v19, %v8754_v3  ;;  %v8726_v20 = vld [vmem:[#allocation2 + $0x2a80] sm:$0xff] }
 0x48a   :  { %v8130_v34 = vadd.f32 %v8129_v9, %v8128_v60  ;;  %v8135_v11 = vrot.slane %v8134_v6, 1  ;;  %11638 = vmatpush1.bf16.msra.mxu0 %v13859_v12  ;;  %v13554_v60 = vcombine.high %v4699_v49, %v4703_v50  ;;  %v13955_v9 = vcombine.low %v8750_v19, %v8754_v3  ;;  %v8730_v36 = vld [vmem:[#allocation2 + $0x2aa0] sm:$0xff] }
 0x48b   :  { %11639 = vmatprep.subr.bf16.mxu0 %v13852_v41  ;;  %v13932_v54 = vcombine.high %v8726_v20, %v8730_v36  ;;  %v8718_v3 = vld [vmem:[#allocation2 + $0x2a40] sm:$0xff] }
 0x48c   :  { %v8163_v18 = vmul.f32 0.125, %v8130_v34  ;;  %v8136_v27 = vadd.f32 %v8135_v11, %v8134_v6  ;;  %8017 = vmatpush2.bf16.msra.mxu1 %v13593_v16  ;;  %v13553_v6 = vcombine.low %v4699_v49, %v4703_v50  ;;  %v13546_v16 = vcombine.high %v4691_v23, %v4695_v63  ;;  %v14743_v34 = vld [vmem:[#allocation5 + $0x30] sm:$0x77]  ;;  %v4683_v11 = vld [vmem:[#allocation2 + $0x1e18] sm:$0xff] }
 0x48d   :  { %8018 = vmatprep.subr.bf16.mxu1 %v13586_v8  ;;  %v8742_v8 = vld [vmem:[#allocation2 + $0x2b00] sm:$0xff]  ;;  %v4776_v41 = vrot.slane %v14743_v34, %v14342_v4  ;;  %v13931_v50 = vcombine.low %v8726_v20, %v8730_v36 }
 0x48e   :  { %v8171_v14 = vadd.f32 1e-05, %v8163_v18  ;;  %v8164_v32 = vmul.f32 0.125, %v8136_v27  ;;  %11640 = vmatpush1.bf16.msra.mxu0 %v13851_v45  ;;  %v13948_v37 = vcombine.high %v8742_v8, %v8746_v2  ;;  %v13947_v12 = vcombine.low %v8742_v8, %v8746_v2 }
 0x48f   :  { %11641 = vmatprep.subr.bf16.mxu0 %v13972_v13  ;;  %v13545_v27 = vcombine.low %v4691_v23, %v4695_v63  ;;  %v13939_v45 = vcombine.low %v8734_v15, %v8738_v33  ;;  %v4816_v39 = vrot.slane %v4776_v41, %v14337_v61  ;;  %v8722_v23 = vld [vmem:[#allocation2 + $0x2a60] sm:$0xff] }
 0x490   :  { %v8172_v58 = vadd.f32 1e-05, %v8164_v32  ;;  %8019 = vmatpush2.bf16.msra.mxu1 %v13585_v5  ;;  %14140 = vrsqrt.f32 %v8171_v14  ;;  %v4772_v5 = vrot.slane %v14743_v34, %v14337_v61  ;;  %v8574_v32 = vld [vmem:[#allocation2 + $0x25c0] sm:$0xff]  ;;  %v13924_v8 = vcombine.high %v8718_v3, %v8722_v23 }
 0x491   :  { %8020 = vmatprep.subr.bf16.mxu1 %v13578_v17  ;;  %v13538_v17 = vcombine.high %v4683_v11, %v4687_v40  ;;  %v13780_v0 = vcombine.high %v8574_v32, %v8578_v48  ;;  %v13779_v49 = vcombine.low %v8574_v32, %v8578_v48  ;;  %v7750_v2 = vadd.f32 %v14693_v31, %v4816_v39  ;;  %v8526_v39 = vld [vmem:[#allocation2 + $0x2440] sm:$0xff] }
 0x492   :  { %14142 = vrsqrt.f32 %v8172_v58  ;;  %11642 = vmatpush2.bf16.msra.mxu0 %v13971_v29  ;;  %v4812_v44 = vrot.slane %v4772_v5, %v14337_v61  ;;  %v8566_v29 = vld [vmem:[#allocation2 + $0x2580] sm:$0xff] }
 0x493   :  { %11643 = vmatprep.subr.bf16.mxu0 %v13964_v38  ;;  %v8550_v5 = vld [vmem:[#allocation2 + $0x2500] sm:$0xff] }
 0x494   :  { %8021 = vmatpush2.bf16.msra.mxu1 %v13577_v43  ;;  %v13537_v43 = vcombine.low %v4683_v11, %v4687_v40 }
 0x495   :  { %8022 = vmatprep.subr.bf16.mxu1 %v13570_v52  ;;  %v8308_v52 = vrot.slane %v14698_v26, %v14446_v59 }
 0x496   :  { %11644 = vmatpush2.bf16.msra.mxu0 %v13963_v51 }
 0x497   :  { %11645 = vmatprep.subr.bf16.mxu0 %v13956_v56  ;;  %v8348_v51 = vrot.slane %v8308_v52, %v14453_v25  ;;  %v8558_v56 = vld [vmem:[#allocation2 + $0x2540] sm:$0xff]  ;;  %v14780_v52 = vld [vmem:[#allocation2 + $0x21e8] sm:$0xff] }
 0x498   :  { %8023 = vmatpush2.bf16.msra.mxu1 %v13569_v47  ;;  %v8570_v47 = vld [vmem:[#allocation2 + $0x25a0] sm:$0xff] }
 0x499   :  { %8024 = vmatprep.subr.bf16.mxu1 %v13562_v57  ;;  %v13772_v19 = vcombine.high %v8566_v29, %v8570_v47  ;;  %v13771_v40 = vcombine.low %v8566_v29, %v8570_v47  ;;  %v8534_v29 = vld [vmem:[#allocation2 + $0x2480] sm:$0xff] }
 0x49a   :  { %11646 = vmatpush2.bf16.msra.mxu0 %v13955_v9  ;;  %v8562_v9 = vld [vmem:[#allocation2 + $0x2560] sm:$0xff] }
 0x49b   :  { %11647 = vmatprep.subr.bf16.mxu0 %v13948_v37  ;;  %v13763_v48 = vcombine.low %v8558_v56, %v8562_v9  ;;  %v8538_v47 = vld [vmem:[#allocation2 + $0x24a0] sm:$0xff] }
 0x49c   :  { %8025 = vmatpush2.bf16.msra.mxu1 %v13561_v46 }
 0x49d   :  { %8026 = vmatprep.subr.bf16.mxu1 %v13554_v60  ;;  %v14141_v62 = vpop.eup %14140  ;;  %v7748_v60 = vadd.f32 %v14686_v10, %v4812_v44  ;;  %v8542_v44 = vld [vmem:[#allocation2 + $0x24c0] sm:$0xff] }
 0x49e   :  { %11648 = vmatpush2.bf16.msra.mxu0 %v13947_v12  ;;  %v8714_v12 = vld [vmem:[#allocation2 + $0x2a20] sm:$0xff] }
 0x49f   :  { %v14143_v53 = vpop.eup %14142  ;;  %11649 = vmatprep.subr.bf16.mxu0 %v13940_v22 }
 0x4a0   :  { %v8194_v18 = vcombine.low %v14141_v62, %v14143_v53  ;;  %8027 = vmatpush2.bf16.msra.mxu1 %v13553_v6  ;;  %v13764_v53 = vcombine.high %v8558_v56, %v8562_v9  ;;  %v8630_v9 = vld [vmem:[#allocation2 + $0x2780] sm:$0xff] }
 0x4a1   :  { %8028 = vmatprep.subr.bf16.mxu1 %v13546_v16  ;;  %v13923_v16 = vcombine.low %v8718_v3, %v8722_v23  ;;  %v8638_v3 = vld [vmem:[#allocation2 + $0x27c0] sm:$0xff] }
 0x4a2   :  { %v8198_v14 = vrot.slane %v8194_v18, 7  ;;  %11650 = vmatpush2.bf16.msra.mxu0 %v13939_v45  ;;  %v8642_v23 = vld [vmem:[#allocation2 + $0x27e0] sm:$0xff] }
 0x4a3   :  { %11651 = vmatprep.subr.bf16.mxu0 %v13932_v54  ;;  %v13740_v54 = vcombine.high %v8534_v29, %v8538_v47  ;;  %v13844_v56 = vcombine.high %v8638_v3, %v8642_v23 }
 0x4a4   :  { %v8206_v58 = vmul.f32 %v8198_v14, %v14698_v26  ;;  %8029 = vmatpush2.bf16.msra.mxu1 %v13545_v27 }
 0x4a5   :  { %8030 = vmatprep.subr.bf16.mxu1 %v13538_v17  ;;  %v8554_v17 = vld [vmem:[#allocation2 + $0x2520] sm:$0xff] }
 0x4a6   :  { %v8228_v13 = vrot.slane %v8206_v58, %v14386_v30  ;;  %v8224_v57 = vrot.slane %v8206_v58, %v14383_v28  ;;  %11652 = vmatpush2.bf16.msra.mxu0 %v13931_v50  ;;  %v13756_v58 = vcombine.high %v8550_v5, %v8554_v17  ;;  %v13755_v36 = vcombine.low %v8550_v5, %v8554_v17 }
 0x4a7   :  { %11653 = vmatprep.subr.bf16.mxu0 %v13924_v8  ;;  %v13739_v50 = vcombine.low %v8534_v29, %v8538_v47  ;;  %v13843_v8 = vcombine.low %v8638_v3, %v8642_v23 }
 0x4a8   :  { %v8268_v38 = vrot.slane %v8228_v13, %v14383_v28  ;;  %8031 = vmatpush2.bf16.msra.mxu1 %v13537_v43  ;;  %v8264_v46 = vrot.slane %v8224_v57, %v14383_v28  ;;  %v14778_v43 = vld [vmem:[#allocation2 + $0x21c8] sm:$0xff] }
 0x4a9   :  { %11584 = vmatprep.subr.bf16.mxu1 %v13780_v0  ;;  %v8546_v0 = vld [vmem:[#allocation2 + $0x24e0] sm:$0xff]  ;;  %v13653_v20 = vcombine.low %v14778_v43, %v14780_v52 }
 0x4aa   :  { %v8288_v63 = vmul.f32 %v8268_v38, %v14739_v21  ;;  %v14762_v6 = vmul.f32 %v8264_v46, %v14734_v42  ;;  %11654 = vmatpush2.bf16.msra.mxu0 %v13923_v16  ;;  %v8710_v42 = vld [vmem:[#allocation2 + $0x2a00] sm:$0xff]  ;;  %v13748_v13 = vcombine.high %v8542_v44, %v8546_v0  ;;  %v13747_v57 = vcombine.low %v8542_v44, %v8546_v0 }
 0x4ab   :  { %v7788_v62 = vpop.f32.mrf.mxu1  ;;  %8033 = vmatmul.mubr.bf16.vlgmr.msra.gmra.mxu1 %v14614_v7  ;;  %v13915_v33 = vcombine.low %v8710_v42, %v8714_v12  ;;  %v13916_v41 = vcombine.high %v8710_v42, %v8714_v12  ;;  %v8522_v46 = vld [vmem:[#allocation2 + $0x2420] sm:$0xff] }
 0x4ac   :  { %v7789_v10 = vadd.f32 %v7788_v62, %v7748_v60  ;;  %v14766_v11 = vpop.f32.mrf.mxu0  ;;  %11585 = vmatpush1.bf16.msra.mxu1 %v13779_v49  ;;  %v8368_v37 = vadd.f32 %v8348_v51, %v8288_v63  ;;  %v8530_v49 = vld [vmem:[#allocation2 + $0x2460] sm:$0xff] }
 0x4ad   :  { %v7790_v21 = vpop.f32.mrf.mxu1  ;;  %11586 = vmatprep.subr.bf16.mxu1 %v13772_v19  ;;  %11655 = vmatprep.subr.bf16.mxu0 %v13916_v41  ;;  %v13732_v38 = vcombine.high %v8526_v39, %v8530_v49  ;;  %v8518_v51 = vld [vmem:[#allocation2 + $0x2400] sm:$0xff]  ;;  %v13731_v60 = vcombine.low %v8526_v39, %v8530_v49  ;;  %v8304_v41 = vrot.slane %v14698_v26, %v14453_v25 }
 0x4ae   :  { %v7791_v18 = vadd.f32 %v7790_v21, %v7750_v2  ;;  %v14768_v27 = vpop.f32.mrf.mxu0  ;;  %v8376_v31 = vmax.f32 %v8368_v37, 0.0  ;;  %v14771_v7 = vadd.f32 %v14720_v1, %v7789_v10  ;;  %11656 = vmatpush2.bf16.msra.mxu0 %v13915_v33  ;;  %v13724_v19 = vcombine.high %v8518_v51, %v8522_v46  ;;  %v8634_v16 = vld [vmem:[#allocation2 + $0x27a0] sm:$0xff] }
 0x4af   :  { %v7792_v15 = vpop.f32.mrf.mxu1  ;;  %v13723_v63 = vcombine.low %v8518_v51, %v8522_v46  ;;  %v13836_v2 = vcombine.high %v8630_v9, %v8634_v16  ;;  %v8622_v62 = vld [vmem:[#allocation2 + $0x2740] sm:$0xff]  ;;  %v8344_v0 = vrot.slane %v8304_v41, %v14453_v25 }
 0x4b0   :  { %v7915_v14 = vpop.f32.mrf.mxu0  ;;  %11587 = vmatpush1.bf16.msra.mxu1 %v13771_v40  ;;  %v14773_v32 = vpack.c.bf16 %v8376_v31, %v8376_v31  ;;  %v14776_v22 = vadd.f32 %v14728_v24, %v7791_v18  ;;  %v13654_v24 = vcombine.high %v14778_v43, %v14780_v52  ;;  %v8626_v10 = vld [vmem:[#allocation2 + $0x2760] sm:$0xff]  ;;  %v13835_v40 = vcombine.low %v8630_v9, %v8634_v16  ;;  %v8407_v43 = vld [vmem:[#allocation2 + $0x2088] sm:$0xff] }
 0x4b1   :  { %v7793_v45 = vpop.f32.mrf.mxu1  ;;  %11588 = vmatprep.subr.bf16.mxu1 %v13764_v53  ;;  %v13828_v37 = vcombine.high %v8622_v62, %v8626_v10  ;;  %v8614_v21 = vld [vmem:[#allocation2 + $0x2700] sm:$0xff]  ;;  %v13827_v42 = vcombine.low %v8622_v62, %v8626_v10  ;;  %v8367_v47 = vadd.f32 %v8344_v0, %v14762_v6  ;;  %v8411_v52 = vld [vmem:[#allocation2 + $0x20a8] sm:$0xff] }
 0x4b2   :  { %v7916_v1 = vpop.f32.mrf.mxu0  ;;  %11616 = vmatprep.mubr.bf16.mxu1 %v14773_v32  ;;  %11707 = vmatprep.subr.bf16.mxu0 %v13654_v24  ;;  %v8618_v53 = vld [vmem:[#allocation2 + $0x2720] sm:$0xff] }
 0x4b3   :  { %v13820_v12 = vcombine.high %v8614_v21, %v8618_v53  ;;  %v8606_v18 = vld [vmem:[#allocation2 + $0x26c0] sm:$0xff]  ;;  %v13819_v5 = vcombine.low %v8614_v21, %v8618_v53  ;;  %v8375_v26 = vmax.f32 %v8367_v47, 0.0 }
 0x4b4   :  { %11589 = vmatpush1.bf16.msra.mxu1 %v13763_v48  ;;  %v8610_v31 = vld [vmem:[#allocation2 + $0x26e0] sm:$0xff] }
 0x4b5   :  { %11590 = vmatprep.subr.bf16.mxu1 %v13756_v58  ;;  %v13812_v17 = vcombine.high %v8606_v18, %v8610_v31  ;;  %v8598_v15 = vld [vmem:[#allocation2 + $0x2680] sm:$0xff]  ;;  %v13811_v14 = vcombine.low %v8606_v18, %v8610_v31 }
 0x4b6   :  { %v8602_v33 = vld [vmem:[#allocation2 + $0x26a0] sm:$0xff] }
 0x4b7   :  { %v13804_v48 = vcombine.high %v8598_v15, %v8602_v33  ;;  %v8590_v45 = vld [vmem:[#allocation2 + $0x2640] sm:$0xff]  ;;  %v13803_v1 = vcombine.low %v8598_v15, %v8602_v33 }
 0x4b8   :  { %11591 = vmatpush1.bf16.msra.mxu1 %v13755_v36  ;;  %v8594_v58 = vld [vmem:[#allocation2 + $0x2660] sm:$0xff] }
 0x4b9   :  { %11592 = vmatprep.subr.bf16.mxu1 %v13748_v13  ;;  %v13796_v44 = vcombine.high %v8590_v45, %v8594_v58  ;;  %v8582_v24 = vld [vmem:[#allocation2 + $0x2600] sm:$0xff]  ;;  %v13795_v13 = vcombine.low %v8590_v45, %v8594_v58 }
 0x4ba   :  { %v8586_v36 = vld [vmem:[#allocation2 + $0x2620] sm:$0xff] }
 0x4bb   :  { %v13788_v29 = vcombine.high %v8582_v24, %v8586_v36  ;;  %v8834_v9 = vld [vmem:[#allocation2 + $0x2de0] sm:$0xff] }
 0x4bc   :  { %11593 = vmatpush1.bf16.msra.mxu1 %v13747_v57  ;;  %v13787_v57 = vcombine.low %v8582_v24, %v8586_v36  ;;  %v8806_v58 = vld [vmem:[#allocation2 + $0x2d00] sm:$0xff] }
 0x4bd   :  { %11594 = vmatprep.subr.bf16.mxu1 %v13740_v54  ;;  %v14791_v54 = vpack.c.bf16 %v8375_v26, %v8375_v26  ;;  %v8798_v47 = vld [vmem:[#allocation2 + $0x2cc0] sm:$0xff] }
 0x4c0   :  { %11595 = vmatpush1.bf16.msra.mxu1 %v13739_v50 }
 0x4c1   :  { %11596 = vmatprep.subr.bf16.mxu1 %v13732_v38 }
 0x4c4   :  { %11597 = vmatpush1.bf16.msra.mxu1 %v13731_v60 }
 0x4c5   :  { %11598 = vmatprep.subr.bf16.mxu1 %v13724_v19 }
 0x4c8   :  { %11599 = vmatpush1.bf16.msra.mxu1 %v13723_v63 }
 0x4c9   :  { %11600 = vmatprep.subr.bf16.mxu1 %v13844_v56  ;;  %v8830_v56 = vld [vmem:[#allocation2 + $0x2dc0] sm:$0xff] }
 0x4ca   :  { %v14036_v62 = vcombine.high %v8830_v56, %v8834_v9 }
 0x4cc   :  { %11601 = vmatpush2.bf16.msra.mxu1 %v13843_v8 }
 0x4cd   :  { %11602 = vmatprep.subr.bf16.mxu1 %v13836_v2 }
 0x4d0   :  { %11603 = vmatpush2.bf16.msra.mxu1 %v13835_v40 }
 0x4d1   :  { %11604 = vmatprep.subr.bf16.mxu1 %v13828_v37  ;;  %v8822_v37 = vld [vmem:[#allocation2 + $0x2d80] sm:$0xff] }
 0x4d4   :  { %11605 = vmatpush2.bf16.msra.mxu1 %v13827_v42 }
 0x4d5   :  { %11606 = vmatprep.subr.bf16.mxu1 %v13820_v12 }
 0x4d8   :  { %11607 = vmatpush2.bf16.msra.mxu1 %v13819_v5  ;;  %v8814_v5 = vld [vmem:[#allocation2 + $0x2d40] sm:$0xff] }
 0x4d9   :  { %11608 = vmatprep.subr.bf16.mxu1 %v13812_v17  ;;  %v8818_v17 = vld [vmem:[#allocation2 + $0x2d60] sm:$0xff] }
 0x4dc   :  { %11609 = vmatpush2.bf16.msra.mxu1 %v13811_v14  ;;  %v14020_v14 = vcombine.high %v8814_v5, %v8818_v17 }
 0x4dd   :  { %11610 = vmatprep.subr.bf16.mxu1 %v13804_v48  ;;  %v14019_v48 = vcombine.low %v8814_v5, %v8818_v17  ;;  %v8894_v17 = vld [vmem:[#allocation2 + $0x2fc0] sm:$0xff] }
 0x4e0   :  { %11611 = vmatpush2.bf16.msra.mxu1 %v13803_v1  ;;  %v8810_v1 = vld [vmem:[#allocation2 + $0x2d20] sm:$0xff] }
 0x4e1   :  { %11612 = vmatprep.subr.bf16.mxu1 %v13796_v44  ;;  %v14012_v24 = vcombine.high %v8806_v58, %v8810_v1  ;;  %v14011_v36 = vcombine.low %v8806_v58, %v8810_v1 }
 0x4e4   :  { %11613 = vmatpush2.bf16.msra.mxu1 %v13795_v13 }
 0x4e5   :  { %11614 = vmatprep.subr.bf16.mxu1 %v13788_v29 }
 0x4e8   :  { %11615 = vmatpush2.bf16.msra.mxu1 %v13787_v57  ;;  %v8802_v57 = vld [vmem:[#allocation2 + $0x2ce0] sm:$0xff] }
 0x4e9   :  { %11666 = vmatprep.subr.bf16.mxu1 %v14036_v62 }
 0x4eb   :  { %v7870_v39 = vpop.f32.mrf.mxu1  ;;  %11617 = vmatmul.mubr.bf16.vlgmr.msra.gmra.mxu1 %v14791_v54 }
 0x4ec   :  { %v7871_v49 = vadd.f32 %v7870_v39, %v14771_v7  ;;  %v14795_v50 = vpop.f32.mrf.mxu0  ;;  %v14035_v7 = vcombine.low %v8830_v56, %v8834_v9 }
 0x4ed   :  { %v7872_v38 = vpop.f32.mrf.mxu1 }
 0x4ee   :  { %v8065_v51 = vrot.slane %v7871_v49, 4  ;;  %v7873_v46 = vadd.f32 %v7872_v38, %v14776_v22  ;;  %v14798_v60 = vpop.f32.mrf.mxu0  ;;  %11667 = vmatpush1.bf16.msra.mxu1 %v14035_v7  ;;  %v8826_v22 = vld [vmem:[#allocation2 + $0x2da0] sm:$0xff]  ;;  %v14003_v38 = vcombine.low %v8798_v47, %v8802_v57 }
 0x4ef   :  { %v7874_v6 = vpop.f32.mrf.mxu1  ;;  %v14028_v42 = vcombine.high %v8822_v37, %v8826_v22  ;;  %v14027_v12 = vcombine.low %v8822_v37, %v8826_v22 }
 0x4f0   :  { %v8066_v19 = vadd.f32 %v8065_v51, %v7871_v49  ;;  %v8071_v3 = vrot.slane %v7873_v46, 4  ;;  %v7997_v23 = vpop.f32.mrf.mxu0 }
 0x4f1   :  { %v7875_v63 = vpop.f32.mrf.mxu1  ;;  %11668 = vmatprep.subr.bf16.mxu1 %v14028_v42 }
 0x4f2   :  { %v8067_v16 = vrot.slane %v8066_v19, 2  ;;  %v8072_v8 = vadd.f32 %v8071_v3, %v7873_v46  ;;  %v7998_v2 = vpop.f32.mrf.mxu0  ;;  %11669 = vmatpush1.bf16.msra.mxu1 %v14027_v12 }
 0x4f3   :  { %11670 = vmatprep.subr.bf16.mxu1 %v14020_v14  ;;  %v8786_v2 = vld [vmem:[#allocation2 + $0x2c60] sm:$0xff] }
 0x4f4   :  { %v8068_v10 = vadd.f32 %v8067_v16, %v8066_v19  ;;  %v8073_v40 = vrot.slane %v8072_v8, 2  ;;  %v8794_v19 = vld [vmem:[#allocation2 + $0x2ca0] sm:$0xff] }
 0x4f6   :  { %v8069_v21 = vrot.slane %v8068_v10, 1  ;;  %v8074_v53 = vadd.f32 %v8073_v40, %v8072_v8  ;;  %11671 = vmatpush1.bf16.msra.mxu1 %v14019_v48  ;;  %v8782_v8 = vld [vmem:[#allocation2 + $0x2c40] sm:$0xff] }
 0x4f7   :  { %11672 = vmatprep.subr.bf16.mxu1 %v14012_v24  ;;  %v13987_v40 = vcombine.low %v8782_v8, %v8786_v2  ;;  %v8886_v48 = vld [vmem:[#allocation2 + $0x2f80] sm:$0xff] }
 0x4f8   :  { %v8070_v18 = vadd.f32 %v8069_v21, %v8068_v10  ;;  %v8075_v31 = vrot.slane %v8074_v53, 1  ;;  %v13988_v10 = vcombine.high %v8782_v8, %v8786_v2  ;;  %v8774_v21 = vld [vmem:[#allocation2 + $0x2c00] sm:$0xff]  ;;  %v8312_v8 = vrot.slane %v14743_v34, %v14453_v25 }
 0x4f9   :  { %v8882_v24 = vld [vmem:[#allocation2 + $0x2f60] sm:$0xff] }
 0x4fa   :  { %v8093_v15 = vmul.f32 0.125, %v8070_v18  ;;  %v8076_v33 = vadd.f32 %v8075_v31, %v8074_v53  ;;  %11673 = vmatpush1.bf16.msra.mxu1 %v14011_v36  ;;  %v8778_v53 = vld [vmem:[#allocation2 + $0x2c20] sm:$0xff] }
 0x4fb   :  { %v13980_v18 = vcombine.high %v8774_v21, %v8778_v53  ;;  %v13979_v31 = vcombine.low %v8774_v21, %v8778_v53 }
 0x4fc   :  { %v14800_v41 = vsub.f32 %v7871_v49, %v8093_v15  ;;  %v8094_v45 = vmul.f32 0.125, %v8076_v33  ;;  %v14004_v49 = vcombine.high %v8798_v47, %v8802_v57  ;;  %v8898_v15 = vld [vmem:[#allocation2 + $0x2fe0] sm:$0xff] }
 0x4fd   :  { %v14100_v33 = vcombine.high %v8894_v17, %v8898_v15  ;;  %v14099_v14 = vcombine.low %v8894_v17, %v8898_v15  ;;  %v8874_v47 = vld [vmem:[#allocation2 + $0x2f20] sm:$0xff] }
 0x4fe   :  { %v8109_v44 = vmul.f32 %v14800_v41, %v14800_v41  ;;  %v14804_v0 = vsub.f32 %v7873_v46, %v8094_v45  ;;  %11674 = vmatprep.subr.bf16.mxu1 %v14004_v49  ;;  %v8790_v46 = vld [vmem:[#allocation2 + $0x2c80] sm:$0xff] }
 0x4ff   :  { %11675 = vmatpush1.bf16.msra.mxu1 %v14003_v38  ;;  %v13996_v63 = vcombine.high %v8790_v46, %v8794_v19  ;;  %v13995_v56 = vcombine.low %v8790_v46, %v8794_v19  ;;  %v8890_v45 = vld [vmem:[#allocation2 + $0x2fa0] sm:$0xff] }
 0x500   :  { %v8137_v13 = vrot.slane %v8109_v44, 4  ;;  %v8110_v29 = vmul.f32 %v14804_v0, %v14804_v0  ;;  %v14092_v58 = vcombine.high %v8886_v48, %v8890_v45  ;;  %v14091_v1 = vcombine.low %v8886_v48, %v8890_v45  ;;  %v8862_v46 = vld [vmem:[#allocation2 + $0x2ec0] sm:$0xff] }
 0x501   :  { %11676 = vmatprep.subr.bf16.mxu1 %v13996_v63  ;;  %v8866_v19 = vld [vmem:[#allocation2 + $0x2ee0] sm:$0xff] }
 0x502   :  { %v8138_v26 = vadd.f32 %v8137_v13, %v8109_v44  ;;  %v8143_v39 = vrot.slane %v8110_v29, 4  ;;  %v8878_v44 = vld [vmem:[#allocation2 + $0x2f40] sm:$0xff] }
 0x503   :  { %11677 = vmatpush1.bf16.msra.mxu1 %v13995_v56  ;;  %v14084_v36 = vcombine.high %v8878_v44, %v8882_v24  ;;  %v14083_v13 = vcombine.low %v8878_v44, %v8882_v24  ;;  %v14067_v56 = vcombine.low %v8862_v46, %v8866_v19 }
 0x504   :  { %v8139_v51 = vrot.slane %v8138_v26, 2  ;;  %v8144_v6 = vadd.f32 %v8143_v39, %v8110_v29  ;;  %11678 = vmatprep.subr.bf16.mxu1 %v13988_v10  ;;  %v8870_v29 = vld [vmem:[#allocation2 + $0x2f00] sm:$0xff] }
 0x505   :  { %v14076_v39 = vcombine.high %v8870_v29, %v8874_v47  ;;  %v14075_v38 = vcombine.low %v8870_v29, %v8874_v47 }
 0x506   :  { %v8140_v3 = vadd.f32 %v8139_v51, %v8138_v26  ;;  %v8145_v23 = vrot.slane %v8144_v6, 2  ;;  %v14808_v26 = vld [vmem:[#allocation5 + $0x38] sm:$0x77] }
 0x507   :  { %11679 = vmatpush1.bf16.msra.mxu1 %v13987_v40  ;;  %v4784_v63 = vrot.slane %v14808_v26, %v14342_v4 }
 0x508   :  { %v8141_v9 = vrot.slane %v8140_v3, 1  ;;  %v8146_v16 = vadd.f32 %v8145_v23, %v8144_v6  ;;  %11680 = vmatprep.subr.bf16.mxu1 %v13980_v18  ;;  %v4780_v6 = vrot.slane %v14808_v26, %v14337_v61  ;;  %v14068_v23 = vcombine.high %v8862_v46, %v8866_v19 }
 0x50a   :  { %v8142_v62 = vadd.f32 %v8141_v9, %v8140_v3  ;;  %v8147_v7 = vrot.slane %v8146_v16, 1  ;;  %v4820_v2 = vrot.slane %v4780_v6, %v14337_v61 }
 0x50b   :  { %11681 = vmatpush1.bf16.msra.mxu1 %v13979_v31  ;;  %v8846_v31 = vld [vmem:[#allocation2 + $0x2e40] sm:$0xff] }
 0x50c   :  { %v8165_v37 = vmul.f32 0.125, %v8142_v62  ;;  %v8148_v22 = vadd.f32 %v8147_v7, %v8146_v16  ;;  %11682 = vmatprep.subr.bf16.mxu1 %v14100_v33  ;;  %v8316_v16 = vrot.slane %v14743_v34, %v14446_v59  ;;  %v8854_v62 = vld [vmem:[#allocation2 + $0x2e80] sm:$0xff]  ;;  %v7912_v18 = vadd.f32 %v14766_v11, %v4820_v2 }
 0x50d   :  { %v8858_v7 = vld [vmem:[#allocation2 + $0x2ea0] sm:$0xff] }
 0x50e   :  { %v8173_v42 = vadd.f32 1e-05, %v8165_v37  ;;  %v8166_v12 = vmul.f32 0.125, %v8148_v22  ;;  %v14060_v37 = vcombine.high %v8854_v62, %v8858_v7  ;;  %v4824_v22 = vrot.slane %v4784_v63, %v14337_v61  ;;  %v8838_v11 = vld [vmem:[#allocation2 + $0x2e00] sm:$0xff] }
 0x50f   :  { %11683 = vmatpush2.bf16.msra.mxu1 %v14099_v14  ;;  %v14059_v21 = vcombine.low %v8854_v62, %v8858_v7 }
 0x510   :  { %v8174_v5 = vadd.f32 1e-05, %v8166_v12  ;;  %14144 = vrsqrt.f32 %v8173_v42  ;;  %11684 = vmatprep.subr.bf16.mxu1 %v14092_v58  ;;  %v8356_v42 = vrot.slane %v8316_v16, %v14453_v25  ;;  %v8352_v12 = vrot.slane %v8312_v8, %v14453_v25  ;;  %v8431_v16 = vld [vmem:[#allocation2 + $0x2148] sm:$0xff] }
 0x511   :  { %v7914_v45 = vadd.f32 %v14768_v27, %v4824_v22  ;;  %v8435_v8 = vld [vmem:[#allocation2 + $0x2168] sm:$0xff] }
 0x512   :  { %14146 = vrsqrt.f32 %v8174_v5  ;;  %v8850_v5 = vld [vmem:[#allocation2 + $0x2e60] sm:$0xff]  ;;  %v13638_v7 = vcombine.high %v8431_v16, %v8435_v8 }
 0x513   :  { %11685 = vmatpush2.bf16.msra.mxu1 %v14091_v1  ;;  %v14051_v33 = vcombine.low %v8846_v31, %v8850_v5  ;;  %v14052_v14 = vcombine.high %v8846_v31, %v8850_v5  ;;  %v8403_v31 = vld [vmem:[#allocation2 + $0x2068] sm:$0xff]  ;;  %v13613_v5 = vcombine.low %v8407_v43, %v8411_v52 }
 0x514   :  { %11686 = vmatprep.subr.bf16.mxu1 %v14084_v36 }
 0x517   :  { %11687 = vmatpush2.bf16.msra.mxu1 %v14083_v13  ;;  %v8842_v13 = vld [vmem:[#allocation2 + $0x2e20] sm:$0xff] }
 0x518   :  { %11688 = vmatprep.subr.bf16.mxu1 %v14076_v39  ;;  %v8443_v39 = vld [vmem:[#allocation2 + $0x21a8] sm:$0xff] }
 0x51b   :  { %11689 = vmatpush2.bf16.msra.mxu1 %v14075_v38  ;;  %v14043_v38 = vcombine.low %v8838_v11, %v8842_v13 }
 0x51c   :  { %11690 = vmatprep.subr.bf16.mxu1 %v14068_v23 }
 0x51d   :  { %v14145_v57 = vpop.eup %14144 }
 0x51f   :  { %v14147_v49 = vpop.eup %14146  ;;  %11691 = vmatpush2.bf16.msra.mxu1 %v14067_v56  ;;  %v14845_v56 = vld [vmem:[#allocation2 + $0x25c8] sm:$0xff] }
 0x520   :  { %v8195_v51 = vcombine.low %v14145_v57, %v14147_v49  ;;  %11692 = vmatprep.subr.bf16.mxu1 %v14060_v37  ;;  %v8439_v57 = vld [vmem:[#allocation2 + $0x2188] sm:$0xff]  ;;  %v13637_v37 = vcombine.low %v8431_v16, %v8435_v8 }
 0x521   :  { %v13646_v63 = vcombine.high %v8439_v57, %v8443_v39  ;;  %v13645_v62 = vcombine.low %v8439_v57, %v8443_v39  ;;  %v8471_v8 = vld [vmem:[#allocation2 + $0x2288] sm:$0xff] }
 0x522   :  { %v8199_v3 = vrot.slane %v8195_v51, 7  ;;  %v14044_v51 = vcombine.high %v8838_v11, %v8842_v13  ;;  %v8507_v11 = vld [vmem:[#allocation2 + $0x23a8] sm:$0xff] }
 0x523   :  { %11693 = vmatpush2.bf16.msra.mxu1 %v14059_v21  ;;  %v8415_v21 = vld [vmem:[#allocation2 + $0x20c8] sm:$0xff] }
 0x524   :  { %v8207_v9 = vmul.f32 %v8199_v3, %v14743_v34  ;;  %11694 = vmatprep.subr.bf16.mxu1 %v14052_v14 }
 0x526   :  { %v8236_v10 = vrot.slane %v8207_v9, %v14386_v30  ;;  %v8232_v40 = vrot.slane %v8207_v9, %v14383_v28  ;;  %v14847_v9 = vld [vmem:[#allocation2 + $0x25e8] sm:$0xff] }
 0x527   :  { %11695 = vmatpush2.bf16.msra.mxu1 %v14051_v33  ;;  %v13781_v2 = vcombine.low %v14845_v56, %v14847_v9  ;;  %v8395_v33 = vld [vmem:[#allocation2 + $0x2028] sm:$0xff] }
 0x528   :  { %v8276_v53 = vrot.slane %v8236_v10, %v14383_v28  ;;  %v8272_v34 = vrot.slane %v8232_v40, %v14383_v28  ;;  %11696 = vmatprep.subr.bf16.mxu1 %v14044_v51  ;;  %v8423_v10 = vld [vmem:[#allocation2 + $0x2108] sm:$0xff] }
 0x529   :  { %v8427_v40 = vld [vmem:[#allocation2 + $0x2128] sm:$0xff] }
 0x52a   :  { %v8290_v17 = vmul.f32 %v8276_v53, %v14804_v0  ;;  %v8289_v15 = vmul.f32 %v8272_v34, %v14800_v41  ;;  %v13630_v22 = vcombine.high %v8423_v10, %v8427_v40  ;;  %v8419_v53 = vld [vmem:[#allocation2 + $0x20e8] sm:$0xff] }
 0x52b   :  { %v7952_v48 = vpop.f32.mrf.mxu1  ;;  %11697 = vmatpush2.bf16.msra.mxu1 %v14043_v38  ;;  %v13622_v34 = vcombine.high %v8415_v21, %v8419_v53  ;;  %v8491_v38 = vld [vmem:[#allocation2 + $0x2328] sm:$0xff] }
 0x52c   :  { %v7953_v58 = vadd.f32 %v7952_v48, %v7912_v18  ;;  %v14831_v1 = vpop.f32.mrf.mxu0  ;;  %v8370_v44 = vadd.f32 %v8356_v42, %v8290_v17  ;;  %v8369_v24 = vadd.f32 %v8352_v12, %v8289_v15  ;;  %v13629_v42 = vcombine.low %v8423_v10, %v8427_v40  ;;  %v8399_v18 = vld [vmem:[#allocation2 + $0x2048] sm:$0xff] }
 0x52d   :  { %v7954_v36 = vpop.f32.mrf.mxu1  ;;  %v13614_v12 = vcombine.high %v8407_v43, %v8411_v52  ;;  %v13606_v17 = vcombine.high %v8399_v18, %v8403_v31  ;;  %v8391_v15 = vld [vmem:[#allocation2 + $0x2008] sm:$0xff]  ;;  %v13605_v14 = vcombine.low %v8399_v18, %v8403_v31 }
 0x52e   :  { %v7955_v29 = vadd.f32 %v7954_v36, %v7914_v45  ;;  %v14833_v47 = vpop.f32.mrf.mxu0  ;;  %v8378_v0 = vmax.f32 %v8370_v44, 0.0  ;;  %v8377_v41 = vmax.f32 %v8369_v24, 0.0  ;;  %v14836_v49 = vadd.f32 %v14795_v50, %v7953_v58  ;;  %v8511_v45 = vld [vmem:[#allocation2 + $0x23c8] sm:$0xff] }
 0x52f   :  { %v7956_v27 = vpop.f32.mrf.mxu1  ;;  %v13598_v48 = vcombine.high %v8391_v15, %v8395_v33  ;;  %v8515_v58 = vld [vmem:[#allocation2 + $0x23e8] sm:$0xff]  ;;  %v13597_v44 = vcombine.low %v8391_v15, %v8395_v33 }
 0x530   :  { %v11581_v6 = vpop.f32.mrf.mxu0  ;;  %v14838_v46 = vpack.c.bf16 %v8378_v0, %v8378_v0  ;;  %v14840_v19 = vpack.c.bf16 %v8377_v41, %v8377_v41  ;;  %v14843_v3 = vadd.f32 %v14798_v60, %v7955_v29  ;;  %v13782_v60 = vcombine.high %v14845_v56, %v14847_v9  ;;  %v8503_v36 = vld [vmem:[#allocation2 + $0x2388] sm:$0xff] }
 0x531   :  { %v7957_v23 = vpop.f32.mrf.mxu1  ;;  %v13718_v24 = vcombine.high %v8511_v45, %v8515_v58  ;;  %v13717_v13 = vcombine.low %v8511_v45, %v8515_v58  ;;  %v13710_v29 = vcombine.high %v8503_v36, %v8507_v11  ;;  %v8495_v0 = vld [vmem:[#allocation2 + $0x2348] sm:$0xff]  ;;  %v13709_v57 = vcombine.low %v8503_v36, %v8507_v11 }
 0x532   :  { %v11582_v50 = vpop.f32.mrf.mxu0  ;;  %11657 = vmatprep.mubr.bf16.mxu0 %v14838_v46  ;;  %11748 = vmatprep.subr.bf16.mxu1 %v13782_v60  ;;  %v8499_v41 = vld [vmem:[#allocation2 + $0x2368] sm:$0xff] }
 0x533   :  { %11658 = vmatmul.mubr.bf16.vlgmr.msra.gmra.mxu0 %v14840_v19  ;;  %v13702_v39 = vcombine.high %v8495_v0, %v8499_v41  ;;  %v8487_v27 = vld [vmem:[#allocation2 + $0x2308] sm:$0xff]  ;;  %v13701_v51 = vcombine.low %v8495_v0, %v8499_v41 }
 0x534   :  { %11708 = vmatpush1.bf16.msra.mxu0 %v13653_v20  ;;  %11739 = vmatprep.mubr.bf16.mxu0 %v14695_v35  ;;  %v13621_v20 = vcombine.low %v8415_v21, %v8419_v53  ;;  %v13694_v6 = vcombine.high %v8487_v27, %v8491_v38  ;;  %v8479_v23 = vld [vmem:[#allocation2 + $0x22c8] sm:$0xff]  ;;  %v13693_v50 = vcombine.low %v8487_v27, %v8491_v38 }
 0x535   :  { %11709 = vmatprep.subr.bf16.mxu0 %v13646_v63  ;;  %v8483_v63 = vld [vmem:[#allocation2 + $0x22e8] sm:$0xff] }
 0x536   :  { %v13686_v16 = vcombine.high %v8479_v23, %v8483_v63  ;;  %v8475_v60 = vld [vmem:[#allocation2 + $0x22a8] sm:$0xff] }
 0x537   :  { %v8463_v10 = vld [vmem:[#allocation2 + $0x2248] sm:$0xff] }
 0x538   :  { %11710 = vmatpush1.bf16.msra.mxu0 %v13645_v62  ;;  %v13685_v62 = vcombine.low %v8479_v23, %v8483_v63  ;;  %v8467_v40 = vld [vmem:[#allocation2 + $0x2268] sm:$0xff] }
 0x539   :  { %11711 = vmatprep.subr.bf16.mxu0 %v13638_v7  ;;  %v13678_v7 = vcombine.high %v8471_v8, %v8475_v60  ;;  %v8455_v21 = vld [vmem:[#allocation2 + $0x2208] sm:$0xff] }
 0x53a   :  { %v8459_v53 = vld [vmem:[#allocation2 + $0x2228] sm:$0xff] }
 0x53b   :  { %v8703_v43 = vld [vmem:[#allocation2 + $0x29c8] sm:$0xff]  ;;  %v13661_v18 = vcombine.low %v8455_v21, %v8459_v53 }
 0x53c   :  { %11712 = vmatpush1.bf16.msra.mxu0 %v13637_v37  ;;  %v13677_v37 = vcombine.low %v8471_v8, %v8475_v60  ;;  %v8707_v52 = vld [vmem:[#allocation2 + $0x29e8] sm:$0xff] }
 0x53d   :  { %11713 = vmatprep.subr.bf16.mxu0 %v13630_v22  ;;  %v13670_v22 = vcombine.high %v8463_v10, %v8467_v40  ;;  %v8695_v33 = vld [vmem:[#allocation2 + $0x2988] sm:$0xff] }
 0x53e   :  { %v8679_v38 = vld [vmem:[#allocation2 + $0x2908] sm:$0xff] }
 0x53f   :  { %v8671_v60 = vld [vmem:[#allocation2 + $0x28c8] sm:$0xff] }
 0x540   :  { %11714 = vmatpush1.bf16.msra.mxu0 %v13629_v42  ;;  %v13669_v42 = vcombine.low %v8463_v10, %v8467_v40 }
 0x541   :  { %11715 = vmatprep.subr.bf16.mxu0 %v13622_v34  ;;  %v13662_v34 = vcombine.high %v8455_v21, %v8459_v53  ;;  %v8663_v53 = vld [vmem:[#allocation2 + $0x2888] sm:$0xff] }
 0x544   :  { %11716 = vmatpush1.bf16.msra.mxu0 %v13621_v20 }
 0x545   :  { %11717 = vmatprep.subr.bf16.mxu0 %v13614_v12 }
 0x548   :  { %11718 = vmatpush1.bf16.msra.mxu0 %v13613_v5  ;;  %v13910_v5 = vcombine.high %v8703_v43, %v8707_v52 }
 0x549   :  { %11719 = vmatprep.subr.bf16.mxu0 %v13606_v17 }
 0x54c   :  { %11720 = vmatpush1.bf16.msra.mxu0 %v13605_v14  ;;  %v8699_v14 = vld [vmem:[#allocation2 + $0x29a8] sm:$0xff] }
 0x54d   :  { %11721 = vmatprep.subr.bf16.mxu0 %v13598_v48  ;;  %v13902_v36 = vcombine.high %v8695_v33, %v8699_v14 }
 0x550   :  { %11722 = vmatpush1.bf16.msra.mxu0 %v13597_v44  ;;  %v13909_v44 = vcombine.low %v8703_v43, %v8707_v52 }
 0x551   :  { %11723 = vmatprep.subr.bf16.mxu0 %v13718_v24 }
 0x554   :  { %11724 = vmatpush2.bf16.msra.mxu0 %v13717_v13  ;;  %v8687_v13 = vld [vmem:[#allocation2 + $0x2948] sm:$0xff] }
 0x555   :  { %11725 = vmatprep.subr.bf16.mxu0 %v13710_v29  ;;  %v8691_v29 = vld [vmem:[#allocation2 + $0x2968] sm:$0xff] }
 0x556   :  { %v13893_v63 = vcombine.low %v8687_v13, %v8691_v29 }
 0x558   :  { %11726 = vmatpush2.bf16.msra.mxu0 %v13709_v57  ;;  %v13894_v57 = vcombine.high %v8687_v13, %v8691_v29 }
 0x559   :  { %11727 = vmatprep.subr.bf16.mxu0 %v13702_v39 }
 0x55c   :  { %11728 = vmatpush2.bf16.msra.mxu0 %v13701_v51  ;;  %v8683_v51 = vld [vmem:[#allocation2 + $0x2928] sm:$0xff] }
 0x55d   :  { %11729 = vmatprep.subr.bf16.mxu0 %v13694_v6  ;;  %v13885_v40 = vcombine.low %v8679_v38, %v8683_v51 }
 0x560   :  { %11730 = vmatpush2.bf16.msra.mxu0 %v13693_v50  ;;  %v13886_v50 = vcombine.high %v8679_v38, %v8683_v51 }
 0x561   :  { %11731 = vmatprep.subr.bf16.mxu0 %v13686_v16 }
 0x564   :  { %11732 = vmatpush2.bf16.msra.mxu0 %v13685_v62  ;;  %v8675_v62 = vld [vmem:[#allocation2 + $0x28e8] sm:$0xff] }
 0x565   :  { %11733 = vmatprep.subr.bf16.mxu0 %v13678_v7  ;;  %v13877_v52 = vcombine.low %v8671_v60, %v8675_v62 }
 0x568   :  { %11734 = vmatpush2.bf16.msra.mxu0 %v13677_v37  ;;  %v13878_v37 = vcombine.high %v8671_v60, %v8675_v62  ;;  %v8755_v60 = vld [vmem:[#allocation2 + $0x2b68] sm:$0xff] }
 0x569   :  { %11735 = vmatprep.subr.bf16.mxu0 %v13670_v22 }
 0x56b   :  { %v8034_v20 = vpop.f32.mrf.mxu1 }
 0x56c   :  { %v8035_v12 = vadd.f32 %v8034_v20, %v14836_v49  ;;  %11736 = vmatpush2.bf16.msra.mxu0 %v13669_v42  ;;  %v8667_v42 = vld [vmem:[#allocation2 + $0x28a8] sm:$0xff] }
 0x56d   :  { %v8036_v31 = vpop.f32.mrf.mxu1  ;;  %11737 = vmatprep.subr.bf16.mxu0 %v13662_v34  ;;  %v13870_v20 = vcombine.high %v8663_v53, %v8667_v42 }
 0x56e   :  { %v8077_v17 = vrot.slane %v8035_v12, 4  ;;  %v8037_v15 = vadd.f32 %v8036_v31, %v14843_v3  ;;  %v13901_v3 = vcombine.low %v8695_v33, %v8699_v14  ;;  %v8655_v31 = vld [vmem:[#allocation2 + $0x2848] sm:$0xff]  ;;  %v13869_v14 = vcombine.low %v8663_v53, %v8667_v42 }
 0x56f   :  { %v8038_v48 = vpop.f32.mrf.mxu1  ;;  %v8735_v42 = vld [vmem:[#allocation2 + $0x2ac8] sm:$0xff] }
 0x570   :  { %v8078_v45 = vadd.f32 %v8077_v17, %v8035_v12  ;;  %v8083_v58 = vrot.slane %v8037_v15, 4  ;;  %11738 = vmatpush2.bf16.msra.mxu0 %v13661_v18 }
 0x571   :  { %v8039_v24 = vpop.f32.mrf.mxu1  ;;  %11789 = vmatprep.subr.bf16.mxu0 %v13910_v5  ;;  %v8659_v5 = vld [vmem:[#allocation2 + $0x2868] sm:$0xff] }
 0x572   :  { %v8079_v11 = vrot.slane %v8078_v45, 2  ;;  %v8084_v49 = vadd.f32 %v8083_v58, %v8037_v15  ;;  %v8647_v58 = vld [vmem:[#allocation2 + $0x2808] sm:$0xff] }
 0x573   :  { %11740 = vmatmul.mubr.bf16.vlgmr.msra.gmra.mxu0 %v14715_v55 }
 0x574   :  { %v8080_v0 = vadd.f32 %v8079_v11, %v8078_v45  ;;  %v8085_v41 = vrot.slane %v8084_v49, 2  ;;  %11790 = vmatpush1.bf16.msra.mxu0 %v13909_v44  ;;  %11821 = vmatprep.mubr.bf16.mxu0 %v14838_v46  ;;  %v8651_v44 = vld [vmem:[#allocation2 + $0x2828] sm:$0xff]  ;;  %v13861_v11 = vcombine.low %v8655_v31, %v8659_v5 }
 0x575   :  { %11791 = vmatprep.subr.bf16.mxu0 %v13902_v36 }
 0x576   :  { %v8081_v39 = vrot.slane %v8080_v0, 1  ;;  %v8086_v27 = vadd.f32 %v8085_v41, %v8084_v49  ;;  %v13854_v49 = vcombine.high %v8647_v58, %v8651_v44  ;;  %v8771_v41 = vld [vmem:[#allocation2 + $0x2be8] sm:$0xff] }
 0x578   :  { %v8082_v6 = vadd.f32 %v8081_v39, %v8080_v0  ;;  %v8087_v23 = vrot.slane %v8086_v27, 1  ;;  %11792 = vmatpush1.bf16.msra.mxu0 %v13901_v3  ;;  %v8767_v0 = vld [vmem:[#allocation2 + $0x2bc8] sm:$0xff]  ;;  %v13853_v39 = vcombine.low %v8647_v58, %v8651_v44 }
 0x579   :  { %11793 = vmatprep.subr.bf16.mxu0 %v13894_v57  ;;  %v8723_v58 = vld [vmem:[#allocation2 + $0x2a68] sm:$0xff] }
 0x57a   :  { %v8095_v16 = vmul.f32 0.125, %v8082_v6  ;;  %v8088_v8 = vadd.f32 %v8087_v23, %v8086_v27  ;;  %v13974_v27 = vcombine.high %v8767_v0, %v8771_v41  ;;  %v8759_v6 = vld [vmem:[#allocation2 + $0x2b88] sm:$0xff] }
 0x57b   :  { %v8763_v23 = vld [vmem:[#allocation2 + $0x2ba8] sm:$0xff] }
 0x57c   :  { %v14863_v7 = vsub.f32 %v8035_v12, %v8095_v16  ;;  %v8096_v10 = vmul.f32 0.125, %v8088_v8  ;;  %11794 = vmatpush1.bf16.msra.mxu0 %v13893_v63  ;;  %v13966_v16 = vcombine.high %v8759_v6, %v8763_v23  ;;  %v8751_v8 = vld [vmem:[#allocation2 + $0x2b48] sm:$0xff]  ;;  %v13965_v62 = vcombine.low %v8759_v6, %v8763_v23 }
 0x57d   :  { %11795 = vmatprep.subr.bf16.mxu0 %v13886_v50  ;;  %v13973_v50 = vcombine.low %v8767_v0, %v8771_v41  ;;  %v8711_v41 = vld [vmem:[#allocation2 + $0x2a08] sm:$0xff] }
 0x57e   :  { %v8111_v22 = vmul.f32 %v14863_v7, %v14863_v7  ;;  %v14867_v21 = vsub.f32 %v8037_v15, %v8096_v10  ;;  %v13862_v15 = vcombine.high %v8655_v31, %v8659_v5  ;;  %v13958_v10 = vcombine.high %v8751_v8, %v8755_v60  ;;  %v8903_v5 = vld [vmem:[#allocation5 + $0x40] sm:$0x77] }
 0x57f   :  { %v8918_v44 = vrot.slane %v8903_v5, %v14342_v4 }
 0x580   :  { %v8149_v34 = vrot.slane %v8111_v22, 4  ;;  %v8112_v43 = vmul.f32 %v14867_v21, %v14867_v21  ;;  %11796 = vmatpush1.bf16.msra.mxu0 %v13885_v40  ;;  %v8743_v40 = vld [vmem:[#allocation2 + $0x2b08] sm:$0xff] }
 0x581   :  { %11797 = vmatprep.subr.bf16.mxu0 %v13878_v37  ;;  %v8747_v37 = vld [vmem:[#allocation2 + $0x2b28] sm:$0xff] }
 0x582   :  { %v8150_v12 = vadd.f32 %v8149_v34, %v8111_v22  ;;  %v8155_v18 = vrot.slane %v8112_v43, 4  ;;  %v13957_v22 = vcombine.low %v8751_v8, %v8755_v60  ;;  %v13950_v53 = vcombine.high %v8743_v40, %v8747_v37  ;;  %v8739_v34 = vld [vmem:[#allocation2 + $0x2ae8] sm:$0xff]  ;;  %v8452_v8 = vld [vmem:[#allocation2 + $0x21f0] sm:$0xff] }
 0x584   :  { %v8151_v17 = vrot.slane %v8150_v12, 2  ;;  %v8156_v33 = vadd.f32 %v8155_v18, %v8112_v43  ;;  %11798 = vmatpush1.bf16.msra.mxu0 %v13877_v52  ;;  %v13949_v43 = vcombine.low %v8743_v40, %v8747_v37  ;;  %v13942_v52 = vcombine.high %v8735_v42, %v8739_v34  ;;  %v8731_v18 = vld [vmem:[#allocation2 + $0x2aa8] sm:$0xff] }
 0x585   :  { %11799 = vmatprep.subr.bf16.mxu0 %v13870_v20 }
 0x586   :  { %v8152_v48 = vadd.f32 %v8151_v17, %v8150_v12  ;;  %v8157_v45 = vrot.slane %v8156_v33, 2  ;;  %v8727_v12 = vld [vmem:[#allocation2 + $0x2a88] sm:$0xff] }
 0x588   :  { %v8153_v24 = vrot.slane %v8152_v48, 1  ;;  %v8158_v36 = vadd.f32 %v8157_v45, %v8156_v33  ;;  %11800 = vmatpush1.bf16.msra.mxu0 %v13869_v14  ;;  %v13941_v33 = vcombine.low %v8735_v42, %v8739_v34  ;;  %v13934_v14 = vcombine.high %v8727_v12, %v8731_v18  ;;  %v8719_v45 = vld [vmem:[#allocation2 + $0x2a48] sm:$0xff] }
 0x589   :  { %11801 = vmatprep.subr.bf16.mxu0 %v13862_v15  ;;  %v8914_v15 = vrot.slane %v8903_v5, %v14337_v61 }
 0x58a   :  { %v8154_v13 = vadd.f32 %v8153_v24, %v8152_v48  ;;  %v8159_v29 = vrot.slane %v8158_v36, 1 }
 0x58c   :  { %v8167_v3 = vmul.f32 0.125, %v8154_v13  ;;  %v8160_v57 = vadd.f32 %v8159_v29, %v8158_v36  ;;  %11802 = vmatpush1.bf16.msra.mxu0 %v13861_v11  ;;  %v13933_v36 = vcombine.low %v8727_v12, %v8731_v18  ;;  %v8324_v11 = vrot.slane %v14808_v26, %v14446_v59  ;;  %v8571_v12 = vld [vmem:[#allocation2 + $0x25a8] sm:$0xff]  ;;  %v8444_v18 = vld [vmem:[#allocation2 + $0x21b0] sm:$0xff] }
 0x58d   :  { %11803 = vmatprep.subr.bf16.mxu0 %v13854_v49  ;;  %v8320_v49 = vrot.slane %v14808_v26, %v14453_v25  ;;  %v13926_v13 = vcombine.high %v8719_v45, %v8723_v58  ;;  %v8954_v29 = vrot.slane %v8914_v15, %v14337_v61 }
 0x58e   :  { %v8175_v38 = vadd.f32 1e-05, %v8167_v3  ;;  %v8168_v51 = vmul.f32 0.125, %v8160_v57  ;;  %v8715_v3 = vld [vmem:[#allocation2 + $0x2a28] sm:$0xff] }
 0x58f   :  { %v8360_v6 = vrot.slane %v8320_v49, %v14453_v25  ;;  %v13918_v23 = vcombine.high %v8711_v41, %v8715_v3  ;;  %v13917_v37 = vcombine.low %v8711_v41, %v8715_v3  ;;  %v8551_v49 = vld [vmem:[#allocation2 + $0x2508] sm:$0xff] }
 0x590   :  { %v8176_v63 = vadd.f32 1e-05, %v8168_v51  ;;  %11804 = vmatpush1.bf16.msra.mxu0 %v13853_v39  ;;  %14148 = vrsqrt.f32 %v8175_v38  ;;  %v8958_v39 = vrot.slane %v8918_v44, %v14337_v61  ;;  %v8364_v51 = vrot.slane %v8324_v11, %v14453_v25  ;;  %v8543_v3 = vld [vmem:[#allocation2 + $0x24c8] sm:$0xff] }
 0x591   :  { %11805 = vmatprep.subr.bf16.mxu0 %v13974_v27  ;;  %v13925_v27 = vcombine.low %v8719_v45, %v8723_v58  ;;  %v8432_v45 = vld [vmem:[#allocation2 + $0x2150] sm:$0xff] }
 0x592   :  { %14150 = vrsqrt.f32 %v8176_v63  ;;  %v11578_v63 = vadd.f32 %v14831_v1, %v8954_v29  ;;  %v8436_v58 = vld [vmem:[#allocation2 + $0x2170] sm:$0xff] }
 0x593   :  { %v13640_v11 = vcombine.high %v8432_v45, %v8436_v58  ;;  %v8424_v29 = vld [vmem:[#allocation2 + $0x2110] sm:$0xff]  ;;  %v13639_v56 = vcombine.low %v8432_v45, %v8436_v58 }
 0x594   :  { %11806 = vmatpush2.bf16.msra.mxu0 %v13973_v50  ;;  %v8512_v45 = vld [vmem:[#allocation2 + $0x23d0] sm:$0xff] }
 0x595   :  { %11807 = vmatprep.subr.bf16.mxu0 %v13966_v16  ;;  %v8448_v16 = vld [vmem:[#allocation2 + $0x21d0] sm:$0xff] }
 0x596   :  { %v13656_v34 = vcombine.high %v8448_v16, %v8452_v8  ;;  %v8516_v58 = vld [vmem:[#allocation2 + $0x23f0] sm:$0xff] }
 0x598   :  { %11808 = vmatpush2.bf16.msra.mxu0 %v13965_v62  ;;  %v11580_v62 = vadd.f32 %v14833_v47, %v8958_v39  ;;  %v8416_v39 = vld [vmem:[#allocation2 + $0x20d0] sm:$0xff] }
 0x599   :  { %11809 = vmatprep.subr.bf16.mxu0 %v13958_v10 }
 0x59c   :  { %11810 = vmatpush2.bf16.msra.mxu0 %v13957_v22 }
 0x59d   :  { %11811 = vmatprep.subr.bf16.mxu0 %v13950_v53  ;;  %v14149_v20 = vpop.eup %14148 }
 0x59f   :  { %v14151_v31 = vpop.eup %14150 }
 0x5a0   :  { %v8196_v17 = vcombine.low %v14149_v20, %v14151_v31  ;;  %11812 = vmatpush2.bf16.msra.mxu0 %v13949_v43  ;;  %v13655_v31 = vcombine.low %v8448_v16, %v8452_v8  ;;  %v8412_v16 = vld [vmem:[#allocation2 + $0x20b0] sm:$0xff] }
 0x5a1   :  { %11813 = vmatprep.subr.bf16.mxu0 %v13942_v52  ;;  %v8567_v52 = vld [vmem:[#allocation2 + $0x2588] sm:$0xff] }
 0x5a2   :  { %v8200_v48 = vrot.slane %v8196_v17, 7  ;;  %v13773_v44 = vcombine.low %v8567_v52, %v8571_v12 }
 0x5a4   :  { %v8208_v24 = vmul.f32 %v8200_v48, %v14808_v26  ;;  %11814 = vmatpush2.bf16.msra.mxu0 %v13941_v33  ;;  %v8559_v33 = vld [vmem:[#allocation2 + $0x2548] sm:$0xff] }
 0x5a5   :  { %11815 = vmatprep.subr.bf16.mxu0 %v13934_v14  ;;  %v13774_v14 = vcombine.high %v8567_v52, %v8571_v12  ;;  %v8563_v48 = vld [vmem:[#allocation2 + $0x2568] sm:$0xff] }
 0x5a6   :  { %v8244_v0 = vrot.slane %v8208_v24, %v14386_v30  ;;  %v8240_v57 = vrot.slane %v8208_v24, %v14383_v28  ;;  %v13765_v41 = vcombine.low %v8559_v33, %v8563_v48  ;;  %v8523_v12 = vld [vmem:[#allocation2 + $0x2428] sm:$0xff] }
 0x5a8   :  { %v8284_v38 = vrot.slane %v8244_v0, %v14383_v28  ;;  %11816 = vmatpush2.bf16.msra.mxu0 %v13933_v36  ;;  %v8280_v26 = vrot.slane %v8240_v57, %v14383_v28  ;;  %v13766_v36 = vcombine.high %v8559_v33, %v8563_v48  ;;  %v8428_v0 = vld [vmem:[#allocation2 + $0x2130] sm:$0xff]  ;;  %v8547_v57 = vld [vmem:[#allocation2 + $0x24e8] sm:$0xff] }
 0x5a9   :  { %11817 = vmatprep.subr.bf16.mxu0 %v13926_v13  ;;  %v8555_v13 = vld [vmem:[#allocation2 + $0x2528] sm:$0xff]  ;;  %v13749_v8 = vcombine.low %v8543_v3, %v8547_v57 }
 0x5aa   :  { %v8292_v50 = vmul.f32 %v8284_v38, %v14867_v21  ;;  %v8291_v60 = vmul.f32 %v8280_v26, %v14863_v7  ;;  %v8440_v7 = vld [vmem:[#allocation2 + $0x2190] sm:$0xff]  ;;  %v13758_v9 = vcombine.high %v8551_v49, %v8555_v13  ;;  %v13757_v38 = vcombine.low %v8551_v49, %v8555_v13  ;;  %v8643_v48 = vld [vmem:[#allocation2 + $0x27e8] sm:$0xff] }
 0x5ab   :  { %v11618_v10 = vpop.f32.mrf.mxu1  ;;  %v13648_v15 = vcombine.high %v8440_v7, %v8444_v18  ;;  %v13647_v24 = vcombine.low %v8440_v7, %v8444_v18  ;;  %v13750_v26 = vcombine.high %v8543_v3, %v8547_v57  ;;  %v8392_v7 = vld [vmem:[#allocation2 + $0x2010] sm:$0xff]  ;;  %v8631_v49 = vld [vmem:[#allocation2 + $0x2788] sm:$0xff] }
 0x5ac   :  { %v14890_v40 = vadd.f32 %v11618_v10, %v11578_v63  ;;  %11818 = vmatpush2.bf16.msra.mxu0 %v13925_v27  ;;  %v8372_v22 = vadd.f32 %v8364_v51, %v8292_v50  ;;  %v8371_v53 = vadd.f32 %v8360_v6, %v8291_v60  ;;  %v8420_v27 = vld [vmem:[#allocation2 + $0x20f0] sm:$0xff]  ;;  %v13631_v51 = vcombine.low %v8424_v29, %v8428_v0  ;;  %v8539_v63 = vld [vmem:[#allocation2 + $0x24a8] sm:$0xff] }
 0x5ad   :  { %v11620_v42 = vpop.f32.mrf.mxu1  ;;  %11819 = vmatprep.subr.bf16.mxu0 %v13918_v23  ;;  %v13624_v6 = vcombine.high %v8416_v39, %v8420_v27  ;;  %v8535_v23 = vld [vmem:[#allocation2 + $0x2488] sm:$0xff]  ;;  %v8408_v50 = vld [vmem:[#allocation2 + $0x2090] sm:$0xff]  ;;  %v13623_v60 = vcombine.low %v8416_v39, %v8420_v27 }
 0x5ae   :  { %v14892_v43 = vadd.f32 %v11620_v42, %v11580_v62  ;;  %v8380_v1 = vmax.f32 %v8372_v22, 0.0  ;;  %v8379_v21 = vmax.f32 %v8371_v53, 0.0  ;;  %v13742_v62 = vcombine.high %v8535_v23, %v8539_v63  ;;  %v8531_v22 = vld [vmem:[#allocation2 + $0x2468] sm:$0xff]  ;;  %v8400_v53 = vld [vmem:[#allocation2 + $0x2050] sm:$0xff] }
 0x5af   :  { %v11622_v20 = vpop.f32.mrf.mxu1  ;;  %v13616_v10 = vcombine.high %v8408_v50, %v8412_v16  ;;  %v8404_v42 = vld [vmem:[#allocation2 + $0x2070] sm:$0xff]  ;;  %v8635_v13 = vld [vmem:[#allocation2 + $0x27a8] sm:$0xff] }
 0x5b0   :  { %11820 = vmatpush2.bf16.msra.mxu0 %v13917_v37  ;;  %v14894_v47 = vpack.c.bf16 %v8380_v1, %v8380_v1  ;;  %v14896_v5 = vpack.c.bf16 %v8379_v21, %v8379_v21  ;;  %v8527_v37 = vld [vmem:[#allocation2 + $0x2448] sm:$0xff]  ;;  %v13615_v1 = vcombine.low %v8408_v50, %v8412_v16  ;;  %v13608_v52 = vcombine.high %v8400_v53, %v8404_v42  ;;  %v8396_v18 = vld [vmem:[#allocation2 + $0x2030] sm:$0xff] }
 0x5b1   :  { %v11623_v17 = vpop.f32.mrf.mxu1  ;;  %11871 = vmatprep.subr.bf16.mxu0 %v13656_v34  ;;  %v13741_v34 = vcombine.low %v8535_v23, %v8539_v63  ;;  %v13734_v21 = vcombine.high %v8527_v37, %v8531_v22  ;;  %v8519_v20 = vld [vmem:[#allocation2 + $0x2408] sm:$0xff]  ;;  %v8496_v39 = vld [vmem:[#allocation2 + $0x2350] sm:$0xff] }
 0x5b2   :  { %11698 = vmatprep.mubr.bf16.mxu1 %v14894_v47  ;;  %v13607_v17 = vcombine.low %v8400_v53, %v8404_v42  ;;  %v13726_v33 = vcombine.high %v8519_v20, %v8523_v12  ;;  %v8623_v3 = vld [vmem:[#allocation2 + $0x2748] sm:$0xff]  ;;  %v8500_v27 = vld [vmem:[#allocation2 + $0x2370] sm:$0xff] }
 0x5b3   :  { %11822 = vmatmul.mubr.bf16.vlgmr.msra.gmra.mxu0 %v14840_v19  ;;  %11699 = vmatmul.mubr.bf16.vlgmr.msra.gmra.mxu1 %v14896_v5  ;;  %v8627_v57 = vld [vmem:[#allocation2 + $0x2768] sm:$0xff]  ;;  %v8488_v50 = vld [vmem:[#allocation2 + $0x2310] sm:$0xff] }
 0x5b4   :  { %11749 = vmatpush1.bf16.msra.mxu1 %v13781_v2  ;;  %11872 = vmatpush1.bf16.msra.mxu0 %v13655_v31  ;;  %v13632_v2 = vcombine.high %v8424_v29, %v8428_v0  ;;  %v13733_v31 = vcombine.low %v8527_v37, %v8531_v22  ;;  %v8504_v29 = vld [vmem:[#allocation2 + $0x2390] sm:$0xff]  ;;  %v8615_v23 = vld [vmem:[#allocation2 + $0x2708] sm:$0xff] }
 0x5b5   :  { %11903 = vmatprep.mubr.bf16.mxu0 %v14695_v35  ;;  %11780 = vmatprep.mubr.bf16.mxu1 %v14773_v32  ;;  %v8508_v0 = vld [vmem:[#allocation2 + $0x23b0] sm:$0xff]  ;;  %v8619_v63 = vld [vmem:[#allocation2 + $0x2728] sm:$0xff] }
 0x5b6   :  { %11750 = vmatprep.subr.bf16.mxu1 %v13774_v14  ;;  %11873 = vmatprep.subr.bf16.mxu0 %v13648_v15  ;;  %v13600_v14 = vcombine.high %v8392_v7, %v8396_v18  ;;  %v8639_v15 = vld [vmem:[#allocation2 + $0x27c8] sm:$0xff]  ;;  %v8492_v16 = vld [vmem:[#allocation2 + $0x2330] sm:$0xff] }
 0x5b7   :  { %v8607_v37 = vld [vmem:[#allocation2 + $0x26c8] sm:$0xff]  ;;  %v8480_v53 = vld [vmem:[#allocation2 + $0x22d0] sm:$0xff] }
 0x5b8   :  { %11751 = vmatpush1.bf16.msra.mxu1 %v13773_v44  ;;  %11874 = vmatpush1.bf16.msra.mxu0 %v13647_v24  ;;  %v13725_v44 = vcombine.low %v8519_v20, %v8523_v12  ;;  %v13599_v24 = vcombine.low %v8392_v7, %v8396_v18  ;;  %v8611_v22 = vld [vmem:[#allocation2 + $0x26e8] sm:$0xff]  ;;  %v8484_v42 = vld [vmem:[#allocation2 + $0x22f0] sm:$0xff] }
 0x5b9   :  { %11752 = vmatprep.subr.bf16.mxu1 %v13766_v36  ;;  %11875 = vmatprep.subr.bf16.mxu0 %v13640_v11  ;;  %v13846_v36 = vcombine.high %v8639_v15, %v8643_v48  ;;  %v13720_v11 = vcombine.high %v8512_v45, %v8516_v58  ;;  %v8599_v20 = vld [vmem:[#allocation2 + $0x2688] sm:$0xff]  ;;  %v8472_v7 = vld [vmem:[#allocation2 + $0x2290] sm:$0xff] }
 0x5ba   :  { %v8603_v12 = vld [vmem:[#allocation2 + $0x26a8] sm:$0xff]  ;;  %v8476_v18 = vld [vmem:[#allocation2 + $0x22b0] sm:$0xff] }
 0x5bc   :  { %11753 = vmatpush1.bf16.msra.mxu1 %v13765_v41  ;;  %11876 = vmatpush1.bf16.msra.mxu0 %v13639_v56  ;;  %v13845_v41 = vcombine.low %v8639_v15, %v8643_v48  ;;  %v13719_v56 = vcombine.low %v8512_v45, %v8516_v58  ;;  %v8591_v15 = vld [vmem:[#allocation2 + $0x2648] sm:$0xff]  ;;  %v8464_v45 = vld [vmem:[#allocation2 + $0x2250] sm:$0xff] }
 0x5bd   :  { %11754 = vmatprep.subr.bf16.mxu1 %v13758_v9  ;;  %11877 = vmatprep.subr.bf16.mxu0 %v13632_v2  ;;  %v13838_v9 = vcombine.high %v8631_v49, %v8635_v13  ;;  %v13712_v2 = vcombine.high %v8504_v29, %v8508_v0  ;;  %v8595_v48 = vld [vmem:[#allocation2 + $0x2668] sm:$0xff]  ;;  %v8468_v58 = vld [vmem:[#allocation2 + $0x2270] sm:$0xff] }
 0x5c0   :  { %11755 = vmatpush1.bf16.msra.mxu1 %v13757_v38  ;;  %11878 = vmatpush1.bf16.msra.mxu0 %v13631_v51  ;;  %v13837_v38 = vcombine.low %v8631_v49, %v8635_v13  ;;  %v13711_v51 = vcombine.low %v8504_v29, %v8508_v0  ;;  %v8583_v49 = vld [vmem:[#allocation2 + $0x2608] sm:$0xff]  ;;  %v8456_v29 = vld [vmem:[#allocation2 + $0x2210] sm:$0xff] }
 0x5c1   :  { %11756 = vmatprep.subr.bf16.mxu1 %v13750_v26  ;;  %11879 = vmatprep.subr.bf16.mxu0 %v13624_v6  ;;  %v13830_v26 = vcombine.high %v8623_v3, %v8627_v57  ;;  %v13704_v6 = vcombine.high %v8496_v39, %v8500_v27  ;;  %v8587_v13 = vld [vmem:[#allocation2 + $0x2628] sm:$0xff]  ;;  %v8460_v0 = vld [vmem:[#allocation2 + $0x2230] sm:$0xff] }
 0x5c4   :  { %11757 = vmatpush1.bf16.msra.mxu1 %v13749_v8  ;;  %11880 = vmatpush1.bf16.msra.mxu0 %v13623_v60  ;;  %v13829_v8 = vcombine.low %v8623_v3, %v8627_v57  ;;  %v13703_v60 = vcombine.low %v8496_v39, %v8500_v27  ;;  %v8831_v3 = vld [vmem:[#allocation2 + $0x2dc8] sm:$0xff]  ;;  %v8704_v39 = vld [vmem:[#allocation2 + $0x29d0] sm:$0xff] }
 0x5c5   :  { %11758 = vmatprep.subr.bf16.mxu1 %v13742_v62  ;;  %11881 = vmatprep.subr.bf16.mxu0 %v13616_v10  ;;  %v13822_v62 = vcombine.high %v8615_v23, %v8619_v63  ;;  %v13696_v10 = vcombine.high %v8488_v50, %v8492_v16  ;;  %v8835_v57 = vld [vmem:[#allocation2 + $0x2de8] sm:$0xff]  ;;  %v8708_v27 = vld [vmem:[#allocation2 + $0x29f0] sm:$0xff] }
 0x5c8   :  { %11759 = vmatpush1.bf16.msra.mxu1 %v13741_v34  ;;  %11882 = vmatpush1.bf16.msra.mxu0 %v13615_v1  ;;  %v13821_v34 = vcombine.low %v8615_v23, %v8619_v63  ;;  %v13695_v1 = vcombine.low %v8488_v50, %v8492_v16  ;;  %v8823_v23 = vld [vmem:[#allocation2 + $0x2d88] sm:$0xff]  ;;  %v8696_v50 = vld [vmem:[#allocation2 + $0x2990] sm:$0xff] }
 0x5c9   :  { %11760 = vmatprep.subr.bf16.mxu1 %v13734_v21  ;;  %11883 = vmatprep.subr.bf16.mxu0 %v13608_v52  ;;  %v13814_v21 = vcombine.high %v8607_v37, %v8611_v22  ;;  %v13688_v52 = vcombine.high %v8480_v53, %v8484_v42  ;;  %v8827_v63 = vld [vmem:[#allocation2 + $0x2da8] sm:$0xff]  ;;  %v8700_v16 = vld [vmem:[#allocation2 + $0x29b0] sm:$0xff] }
 0x5cc   :  { %11761 = vmatpush1.bf16.msra.mxu1 %v13733_v31  ;;  %11884 = vmatpush1.bf16.msra.mxu0 %v13607_v17  ;;  %v13813_v31 = vcombine.low %v8607_v37, %v8611_v22  ;;  %v13687_v17 = vcombine.low %v8480_v53, %v8484_v42  ;;  %v8815_v37 = vld [vmem:[#allocation2 + $0x2d48] sm:$0xff]  ;;  %v8688_v42 = vld [vmem:[#allocation2 + $0x2950] sm:$0xff] }
 0x5cd   :  { %11762 = vmatprep.subr.bf16.mxu1 %v13726_v33  ;;  %11885 = vmatprep.subr.bf16.mxu0 %v13600_v14  ;;  %v13806_v33 = vcombine.high %v8599_v20, %v8603_v12  ;;  %v13680_v14 = vcombine.high %v8472_v7, %v8476_v18  ;;  %v8819_v22 = vld [vmem:[#allocation2 + $0x2d68] sm:$0xff] }
 0x5d0   :  { %11763 = vmatpush1.bf16.msra.mxu1 %v13725_v44  ;;  %11886 = vmatpush1.bf16.msra.mxu0 %v13599_v24  ;;  %v13805_v44 = vcombine.low %v8599_v20, %v8603_v12  ;;  %v13679_v24 = vcombine.low %v8472_v7, %v8476_v18  ;;  %v13903_v20 = vcombine.low %v8696_v50, %v8700_v16 }
 0x5d1   :  { %11764 = vmatprep.subr.bf16.mxu1 %v13846_v36  ;;  %11887 = vmatprep.subr.bf16.mxu0 %v13720_v11  ;;  %v13798_v36 = vcombine.high %v8591_v15, %v8595_v48  ;;  %v13672_v11 = vcombine.high %v8464_v45, %v8468_v58  ;;  %v14022_v12 = vcombine.high %v8815_v37, %v8819_v22 }
 0x5d4   :  { %11765 = vmatpush2.bf16.msra.mxu1 %v13845_v41  ;;  %11888 = vmatpush2.bf16.msra.mxu0 %v13719_v56  ;;  %v13797_v41 = vcombine.low %v8591_v15, %v8595_v48  ;;  %v13671_v56 = vcombine.low %v8464_v45, %v8468_v58  ;;  %v14021_v15 = vcombine.low %v8815_v37, %v8819_v22 }
 0x5d5   :  { %11766 = vmatprep.subr.bf16.mxu1 %v13838_v9  ;;  %11889 = vmatprep.subr.bf16.mxu0 %v13712_v2  ;;  %v13790_v9 = vcombine.high %v8583_v49, %v8587_v13  ;;  %v13664_v2 = vcombine.high %v8456_v29, %v8460_v0 }
 0x5d8   :  { %11767 = vmatpush2.bf16.msra.mxu1 %v13837_v38  ;;  %11890 = vmatpush2.bf16.msra.mxu0 %v13711_v51  ;;  %v13789_v38 = vcombine.low %v8583_v49, %v8587_v13  ;;  %v13663_v51 = vcombine.low %v8456_v29, %v8460_v0 }
 0x5d9   :  { %11768 = vmatprep.subr.bf16.mxu1 %v13830_v26  ;;  %11891 = vmatprep.subr.bf16.mxu0 %v13704_v6  ;;  %v14038_v26 = vcombine.high %v8831_v3, %v8835_v57  ;;  %v13912_v6 = vcombine.high %v8704_v39, %v8708_v27 }
 0x5dc   :  { %11769 = vmatpush2.bf16.msra.mxu1 %v13829_v8  ;;  %11892 = vmatpush2.bf16.msra.mxu0 %v13703_v60  ;;  %v14037_v8 = vcombine.low %v8831_v3, %v8835_v57  ;;  %v13911_v60 = vcombine.low %v8704_v39, %v8708_v27 }
 0x5dd   :  { %11770 = vmatprep.subr.bf16.mxu1 %v13822_v62  ;;  %11893 = vmatprep.subr.bf16.mxu0 %v13696_v10  ;;  %v14030_v62 = vcombine.high %v8823_v23, %v8827_v63  ;;  %v13904_v10 = vcombine.high %v8696_v50, %v8700_v16 }
 0x5e0   :  { %11771 = vmatpush2.bf16.msra.mxu1 %v13821_v34  ;;  %11894 = vmatpush2.bf16.msra.mxu0 %v13695_v1  ;;  %v8692_v34 = vld [vmem:[#allocation2 + $0x2970] sm:$0xff] }
 0x5e1   :  { %11772 = vmatprep.subr.bf16.mxu1 %v13814_v21  ;;  %11895 = vmatprep.subr.bf16.mxu0 %v13688_v52  ;;  %v14029_v21 = vcombine.low %v8823_v23, %v8827_v63  ;;  %v13896_v18 = vcombine.high %v8688_v42, %v8692_v34  ;;  %v13895_v45 = vcombine.low %v8688_v42, %v8692_v34  ;;  %v8895_v34 = vld [vmem:[#allocation2 + $0x2fc8] sm:$0xff] }
 0x5e4   :  { %11773 = vmatpush2.bf16.msra.mxu1 %v13813_v31  ;;  %11896 = vmatpush2.bf16.msra.mxu0 %v13687_v17  ;;  %v8807_v31 = vld [vmem:[#allocation2 + $0x2d08] sm:$0xff] }
 0x5e5   :  { %11774 = vmatprep.subr.bf16.mxu1 %v13806_v33  ;;  %11897 = vmatprep.subr.bf16.mxu0 %v13680_v14  ;;  %v8811_v17 = vld [vmem:[#allocation2 + $0x2d28] sm:$0xff]  ;;  %v8680_v33 = vld [vmem:[#allocation2 + $0x2910] sm:$0xff] }
 0x5e6   :  { %v8684_v14 = vld [vmem:[#allocation2 + $0x2930] sm:$0xff]  ;;  %v14014_v58 = vcombine.high %v8807_v31, %v8811_v17  ;;  %v14013_v49 = vcombine.low %v8807_v31, %v8811_v17 }
 0x5e7   :  { %v13887_v13 = vcombine.low %v8680_v33, %v8684_v14 }
 0x5e8   :  { %11775 = vmatpush2.bf16.msra.mxu1 %v13805_v44  ;;  %11898 = vmatpush2.bf16.msra.mxu0 %v13679_v24  ;;  %v13888_v44 = vcombine.high %v8680_v33, %v8684_v14  ;;  %v8799_v24 = vld [vmem:[#allocation2 + $0x2cc8] sm:$0xff]  ;;  %v8760_v14 = vld [vmem:[#allocation2 + $0x2b90] sm:$0xff] }
 0x5e9   :  { %11776 = vmatprep.subr.bf16.mxu1 %v13798_v36  ;;  %11899 = vmatprep.subr.bf16.mxu0 %v13672_v11  ;;  %v8672_v36 = vld [vmem:[#allocation2 + $0x28d0] sm:$0xff]  ;;  %v8891_v33 = vld [vmem:[#allocation2 + $0x2fa8] sm:$0xff] }
 0x5ea   :  { %v8676_v11 = vld [vmem:[#allocation2 + $0x28f0] sm:$0xff] }
 0x5eb   :  { %v13880_v0 = vcombine.high %v8672_v36, %v8676_v11  ;;  %v13879_v57 = vcombine.low %v8672_v36, %v8676_v11  ;;  %v8752_v36 = vld [vmem:[#allocation2 + $0x2b50] sm:$0xff] }
 0x5ec   :  { %11777 = vmatpush2.bf16.msra.mxu1 %v13797_v41  ;;  %11900 = vmatpush2.bf16.msra.mxu0 %v13671_v56  ;;  %v8791_v41 = vld [vmem:[#allocation2 + $0x2c88] sm:$0xff]  ;;  %v8756_v11 = vld [vmem:[#allocation2 + $0x2b70] sm:$0xff] }
 0x5ed   :  { %11778 = vmatprep.subr.bf16.mxu1 %v13790_v9  ;;  %11901 = vmatprep.subr.bf16.mxu0 %v13664_v2  ;;  %v8795_v56 = vld [vmem:[#allocation2 + $0x2ca8] sm:$0xff]  ;;  %v8664_v9 = vld [vmem:[#allocation2 + $0x2890] sm:$0xff] }
 0x5ee   :  { %v8668_v2 = vld [vmem:[#allocation2 + $0x28b0] sm:$0xff]  ;;  %v13998_v39 = vcombine.high %v8791_v41, %v8795_v56  ;;  %v13997_v23 = vcombine.low %v8791_v41, %v8795_v56  ;;  %v8871_v41 = vld [vmem:[#allocation2 + $0x2f08] sm:$0xff] }
 0x5ef   :  { %v13872_v27 = vcombine.high %v8664_v9, %v8668_v2  ;;  %v13871_v63 = vcombine.low %v8664_v9, %v8668_v2  ;;  %v8875_v56 = vld [vmem:[#allocation2 + $0x2f28] sm:$0xff]  ;;  %v8744_v9 = vld [vmem:[#allocation2 + $0x2b10] sm:$0xff] }
 0x5f0   :  { %11779 = vmatpush2.bf16.msra.mxu1 %v13789_v38  ;;  %11902 = vmatpush2.bf16.msra.mxu0 %v13663_v51  ;;  %v8783_v38 = vld [vmem:[#allocation2 + $0x2c48] sm:$0xff]  ;;  %v8748_v2 = vld [vmem:[#allocation2 + $0x2b30] sm:$0xff] }
 0x5f1   :  { %11830 = vmatprep.subr.bf16.mxu1 %v14038_v26  ;;  %11953 = vmatprep.subr.bf16.mxu0 %v13912_v6  ;;  %v8787_v51 = vld [vmem:[#allocation2 + $0x2c68] sm:$0xff]  ;;  %v8656_v26 = vld [vmem:[#allocation2 + $0x2850] sm:$0xff] }
 0x5f2   :  { %v8660_v6 = vld [vmem:[#allocation2 + $0x2870] sm:$0xff]  ;;  %v13990_v50 = vcombine.high %v8783_v38, %v8787_v51  ;;  %v13989_v37 = vcombine.low %v8783_v38, %v8787_v51  ;;  %v8863_v38 = vld [vmem:[#allocation2 + $0x2ec8] sm:$0xff] }
 0x5f3   :  { %11781 = vmatmul.mubr.bf16.vlgmr.msra.gmra.mxu1 %v14791_v54  ;;  %11904 = vmatmul.mubr.bf16.vlgmr.msra.gmra.mxu0 %v14715_v55  ;;  %v11659_v53 = vpop.f32.mrf.mxu0  ;;  %v13864_v16 = vcombine.high %v8656_v26, %v8660_v6  ;;  %v13863_v22 = vcombine.low %v8656_v26, %v8660_v6  ;;  %v8867_v51 = vld [vmem:[#allocation2 + $0x2ee8] sm:$0xff]  ;;  %v8736_v26 = vld [vmem:[#allocation2 + $0x2ad0] sm:$0xff] }
 0x5f4   :  { %v14909_v1 = vadd.f32 %v11659_v53, %v14890_v40  ;;  %11831 = vmatpush1.bf16.msra.mxu1 %v14037_v8  ;;  %11862 = vmatprep.mubr.bf16.mxu1 %v14894_v47  ;;  %v8775_v8 = vld [vmem:[#allocation2 + $0x2c08] sm:$0xff]  ;;  %v8740_v6 = vld [vmem:[#allocation2 + $0x2af0] sm:$0xff] }
 0x5f5   :  { %11954 = vmatpush1.bf16.msra.mxu0 %v13911_v60  ;;  %11985 = vmatprep.mubr.bf16.mxu0 %v14838_v46  ;;  %v11661_v52 = vpop.f32.mrf.mxu0  ;;  %v8779_v60 = vld [vmem:[#allocation2 + $0x2c28] sm:$0xff] }
 0x5f6   :  { %v14914_v7 = vadd.f32 %v11661_v52, %v14892_v43  ;;  %11832 = vmatprep.subr.bf16.mxu1 %v14030_v62  ;;  %11955 = vmatprep.subr.bf16.mxu0 %v13904_v10  ;;  %v8803_v43 = vld [vmem:[#allocation2 + $0x2ce8] sm:$0xff]  ;;  %v8648_v62 = vld [vmem:[#allocation2 + $0x2810] sm:$0xff]  ;;  %v13982_v53 = vcombine.high %v8775_v8, %v8779_v60 }
 0x5f7   :  { %v11663_v40 = vpop.f32.mrf.mxu0  ;;  %v14006_v29 = vcombine.high %v8799_v24, %v8803_v43  ;;  %v14005_v3 = vcombine.low %v8799_v24, %v8803_v43  ;;  %v8652_v10 = vld [vmem:[#allocation2 + $0x2830] sm:$0xff]  ;;  %v8879_v24 = vld [vmem:[#allocation2 + $0x2f48] sm:$0xff] }
 0x5f8   :  { %11833 = vmatpush1.bf16.msra.mxu1 %v14029_v21  ;;  %v13856_v42 = vcombine.high %v8648_v62, %v8652_v10  ;;  %v8899_v21 = vld [vmem:[#allocation2 + $0x2fe8] sm:$0xff]  ;;  %v8768_v52 = vld [vmem:[#allocation2 + $0x2bd0] sm:$0xff] }
 0x5f9   :  { %11956 = vmatpush1.bf16.msra.mxu0 %v13903_v20  ;;  %v11664_v48 = vpop.f32.mrf.mxu0  ;;  %11834 = vmatprep.subr.bf16.mxu1 %v14022_v12  ;;  %v8772_v20 = vld [vmem:[#allocation2 + $0x2bf0] sm:$0xff]  ;;  %v13981_v12 = vcombine.low %v8775_v8, %v8779_v60  ;;  %v14102_v31 = vcombine.high %v8895_v34, %v8899_v21  ;;  %v8887_v40 = vld [vmem:[#allocation2 + $0x2f88] sm:$0xff] }
 0x5fa   :  { %11957 = vmatprep.subr.bf16.mxu0 %v13896_v18  ;;  %v13855_v18 = vcombine.low %v8648_v62, %v8652_v10  ;;  %v13976_v17 = vcombine.high %v8768_v52, %v8772_v20  ;;  %v14101_v48 = vcombine.low %v8895_v34, %v8899_v21  ;;  %v8883_v43 = vld [vmem:[#allocation2 + $0x2f68] sm:$0xff]  ;;  %v8728_v62 = vld [vmem:[#allocation2 + $0x2a90] sm:$0xff] }
 0x5fb   :  { %v8855_v8 = vld [vmem:[#allocation2 + $0x2e88] sm:$0xff]  ;;  %v8732_v10 = vld [vmem:[#allocation2 + $0x2ab0] sm:$0xff] }
 0x5fc   :  { %11835 = vmatpush1.bf16.msra.mxu1 %v14021_v15  ;;  %v8764_v15 = vld [vmem:[#allocation2 + $0x2bb0] sm:$0xff]  ;;  %v8859_v60 = vld [vmem:[#allocation2 + $0x2ea8] sm:$0xff] }
 0x5fd   :  { %11958 = vmatpush1.bf16.msra.mxu0 %v13895_v45  ;;  %11836 = vmatprep.subr.bf16.mxu1 %v14014_v58  ;;  %v13975_v45 = vcombine.low %v8768_v52, %v8772_v20  ;;  %v14094_v58 = vcombine.high %v8887_v40, %v8891_v33  ;;  %v8847_v34 = vld [vmem:[#allocation2 + $0x2e48] sm:$0xff]  ;;  %v8720_v52 = vld [vmem:[#allocation2 + $0x2a50] sm:$0xff] }
 0x5fe   :  { %11959 = vmatprep.subr.bf16.mxu0 %v13888_v44  ;;  %v13968_v44 = vcombine.high %v8760_v14, %v8764_v15  ;;  %v8851_v21 = vld [vmem:[#allocation2 + $0x2e68] sm:$0xff]  ;;  %v8724_v20 = vld [vmem:[#allocation2 + $0x2a70] sm:$0xff] }
 0x600   :  { %11837 = vmatpush1.bf16.msra.mxu1 %v14013_v49  ;;  %v14093_v49 = vcombine.low %v8887_v40, %v8891_v33  ;;  %v8839_v40 = vld [vmem:[#allocation2 + $0x2e08] sm:$0xff] }
 0x601   :  { %11960 = vmatpush1.bf16.msra.mxu0 %v13887_v13  ;;  %11838 = vmatprep.subr.bf16.mxu1 %v14006_v29  ;;  %v13967_v13 = vcombine.low %v8760_v14, %v8764_v15  ;;  %v14086_v29 = vcombine.high %v8879_v24, %v8883_v43  ;;  %v8843_v33 = vld [vmem:[#allocation2 + $0x2e28] sm:$0xff]  ;;  %v8712_v14 = vld [vmem:[#allocation2 + $0x2a10] sm:$0xff] }
 0x602   :  { %11961 = vmatprep.subr.bf16.mxu0 %v13880_v0  ;;  %v13960_v0 = vcombine.high %v8752_v36, %v8756_v11  ;;  %v8716_v15 = vld [vmem:[#allocation2 + $0x2a30] sm:$0xff] }
 0x604   :  { %11839 = vmatpush1.bf16.msra.mxu1 %v14005_v3  ;;  %v14085_v3 = vcombine.low %v8879_v24, %v8883_v43  ;;  %v8576_v24 = vld [vmem:[#allocation2 + $0x25d0] sm:$0xff] }
 0x605   :  { %11962 = vmatpush1.bf16.msra.mxu0 %v13879_v57  ;;  %11840 = vmatprep.subr.bf16.mxu1 %v13998_v39  ;;  %v13959_v57 = vcombine.low %v8752_v36, %v8756_v11  ;;  %v14078_v39 = vcombine.high %v8871_v41, %v8875_v56  ;;  %v8580_v43 = vld [vmem:[#allocation2 + $0x25f0] sm:$0xff]  ;;  %v8449_v36 = vld [vmem:[#allocation2 + $0x21d8] sm:$0xff] }
 0x606   :  { %11963 = vmatprep.subr.bf16.mxu0 %v13872_v27  ;;  %v13952_v27 = vcombine.high %v8744_v9, %v8748_v2  ;;  %v8453_v11 = vld [vmem:[#allocation2 + $0x21f8] sm:$0xff] }
 0x608   :  { %11841 = vmatpush1.bf16.msra.mxu1 %v13997_v23  ;;  %v14077_v23 = vcombine.low %v8871_v41, %v8875_v56  ;;  %v8568_v41 = vld [vmem:[#allocation2 + $0x2590] sm:$0xff] }
 0x609   :  { %11964 = vmatpush1.bf16.msra.mxu0 %v13871_v63  ;;  %11842 = vmatprep.subr.bf16.mxu1 %v13990_v50  ;;  %v13951_v63 = vcombine.low %v8744_v9, %v8748_v2  ;;  %v14070_v50 = vcombine.high %v8863_v38, %v8867_v51  ;;  %v8572_v56 = vld [vmem:[#allocation2 + $0x25b0] sm:$0xff]  ;;  %v13783_v9 = vcombine.low %v8576_v24, %v8580_v43  ;;  %v8441_v2 = vld [vmem:[#allocation2 + $0x2198] sm:$0xff] }
 0x60a   :  { %11965 = vmatprep.subr.bf16.mxu0 %v13864_v16  ;;  %v13944_v16 = vcombine.high %v8736_v26, %v8740_v6 }
 0x60c   :  { %11843 = vmatpush1.bf16.msra.mxu1 %v13989_v37  ;;  %v14069_v37 = vcombine.low %v8863_v38, %v8867_v51  ;;  %v8564_v38 = vld [vmem:[#allocation2 + $0x2570] sm:$0xff] }
 0x60d   :  { %11966 = vmatpush1.bf16.msra.mxu0 %v13863_v22  ;;  %11844 = vmatprep.subr.bf16.mxu1 %v13982_v53  ;;  %v13943_v22 = vcombine.low %v8736_v26, %v8740_v6  ;;  %v14062_v53 = vcombine.high %v8855_v8, %v8859_v60  ;;  %v8433_v6 = vld [vmem:[#allocation2 + $0x2158] sm:$0xff] }
 0x60e   :  { %11967 = vmatprep.subr.bf16.mxu0 %v13856_v42  ;;  %v13936_v42 = vcombine.high %v8728_v62, %v8732_v10 }
 0x610   :  { %11845 = vmatpush1.bf16.msra.mxu1 %v13981_v12  ;;  %v14061_v12 = vcombine.low %v8855_v8, %v8859_v60 }
 0x611   :  { %11968 = vmatpush1.bf16.msra.mxu0 %v13855_v18  ;;  %11846 = vmatprep.subr.bf16.mxu1 %v14102_v31  ;;  %v13935_v18 = vcombine.low %v8728_v62, %v8732_v10  ;;  %v14054_v31 = vcombine.high %v8847_v34, %v8851_v21  ;;  %v8552_v62 = vld [vmem:[#allocation2 + $0x2510] sm:$0xff] }
 0x612   :  { %11969 = vmatprep.subr.bf16.mxu0 %v13976_v17  ;;  %v13928_v17 = vcombine.high %v8720_v52, %v8724_v20  ;;  %v8556_v10 = vld [vmem:[#allocation2 + $0x2530] sm:$0xff] }
 0x614   :  { %11847 = vmatpush2.bf16.msra.mxu1 %v14101_v48  ;;  %v14053_v48 = vcombine.low %v8847_v34, %v8851_v21 }
 0x615   :  { %11970 = vmatpush2.bf16.msra.mxu0 %v13975_v45  ;;  %11848 = vmatprep.subr.bf16.mxu1 %v14094_v58  ;;  %v13927_v45 = vcombine.low %v8720_v52, %v8724_v20  ;;  %v14046_v58 = vcombine.high %v8839_v40, %v8843_v33  ;;  %v13760_v52 = vcombine.high %v8552_v62, %v8556_v10 }
 0x616   :  { %11971 = vmatprep.subr.bf16.mxu0 %v13968_v44  ;;  %v13920_v44 = vcombine.high %v8712_v14, %v8716_v15 }
 0x618   :  { %11849 = vmatpush2.bf16.msra.mxu1 %v14093_v49  ;;  %v14045_v49 = vcombine.low %v8839_v40, %v8843_v33 }
 0x619   :  { %11972 = vmatpush2.bf16.msra.mxu0 %v13967_v13  ;;  %11850 = vmatprep.subr.bf16.mxu1 %v14086_v29  ;;  %v13919_v13 = vcombine.low %v8712_v14, %v8716_v15  ;;  %v13784_v29 = vcombine.high %v8576_v24, %v8580_v43  ;;  %v8536_v15 = vld [vmem:[#allocation2 + $0x2490] sm:$0xff] }
 0x61a   :  { %11973 = vmatprep.subr.bf16.mxu0 %v13960_v0  ;;  %v13658_v0 = vcombine.high %v8449_v36, %v8453_v11 }
 0x61c   :  { %11851 = vmatpush2.bf16.msra.mxu1 %v14085_v3  ;;  %v8445_v3 = vld [vmem:[#allocation2 + $0x21b8] sm:$0xff] }
 0x61d   :  { %11974 = vmatpush2.bf16.msra.mxu0 %v13959_v57  ;;  %11852 = vmatprep.subr.bf16.mxu1 %v14078_v39  ;;  %v13657_v57 = vcombine.low %v8449_v36, %v8453_v11  ;;  %v13776_v39 = vcombine.high %v8568_v41, %v8572_v56  ;;  %v13650_v26 = vcombine.high %v8441_v2, %v8445_v3  ;;  %v8528_v11 = vld [vmem:[#allocation2 + $0x2450] sm:$0xff] }
 0x61e   :  { %11975 = vmatprep.subr.bf16.mxu0 %v13952_v27  ;;  %v8560_v27 = vld [vmem:[#allocation2 + $0x2550] sm:$0xff] }
 0x61f   :  { %v13768_v8 = vcombine.high %v8560_v27, %v8564_v38 }
 0x620   :  { %11853 = vmatpush2.bf16.msra.mxu1 %v14077_v23  ;;  %v8437_v23 = vld [vmem:[#allocation2 + $0x2178] sm:$0xff] }
 0x621   :  { %11976 = vmatpush2.bf16.msra.mxu0 %v13951_v63  ;;  %11854 = vmatprep.subr.bf16.mxu1 %v14070_v50  ;;  %v13775_v63 = vcombine.low %v8568_v41, %v8572_v56  ;;  %v13642_v60 = vcombine.high %v8433_v6, %v8437_v23  ;;  %v13641_v21 = vcombine.low %v8433_v6, %v8437_v23  ;;  %v8640_v23 = vld [vmem:[#allocation2 + $0x27d0] sm:$0xff] }
 0x622   :  { %11977 = vmatprep.subr.bf16.mxu0 %v13944_v16  ;;  %v13649_v16 = vcombine.low %v8441_v2, %v8445_v3  ;;  %v8520_v2 = vld [vmem:[#allocation2 + $0x2410] sm:$0xff] }
 0x623   :  { %v8524_v3 = vld [vmem:[#allocation2 + $0x2430] sm:$0xff] }
 0x624   :  { %11855 = vmatpush2.bf16.msra.mxu1 %v14069_v37 }
 0x625   :  { %11978 = vmatpush2.bf16.msra.mxu0 %v13943_v22  ;;  %11856 = vmatprep.subr.bf16.mxu1 %v14062_v53  ;;  %v8425_v22 = vld [vmem:[#allocation2 + $0x2118] sm:$0xff] }
 0x626   :  { %11979 = vmatprep.subr.bf16.mxu0 %v13936_v42  ;;  %v8429_v53 = vld [vmem:[#allocation2 + $0x2138] sm:$0xff]  ;;  %v13767_v42 = vcombine.low %v8560_v27, %v8564_v38 }
 0x627   :  { %v13634_v20 = vcombine.high %v8425_v22, %v8429_v53  ;;  %v13633_v40 = vcombine.low %v8425_v22, %v8429_v53  ;;  %v8632_v22 = vld [vmem:[#allocation2 + $0x2790] sm:$0xff] }
 0x628   :  { %11857 = vmatpush2.bf16.msra.mxu1 %v14061_v12  ;;  %v8544_v12 = vld [vmem:[#allocation2 + $0x24d0] sm:$0xff] }
 0x629   :  { %11980 = vmatpush2.bf16.msra.mxu0 %v13935_v18  ;;  %11858 = vmatprep.subr.bf16.mxu1 %v14054_v31  ;;  %v8548_v18 = vld [vmem:[#allocation2 + $0x24f0] sm:$0xff]  ;;  %v8421_v31 = vld [vmem:[#allocation2 + $0x20f8] sm:$0xff] }
 0x62a   :  { %11981 = vmatprep.subr.bf16.mxu0 %v13928_v17  ;;  %v13759_v17 = vcombine.low %v8552_v62, %v8556_v10  ;;  %v13752_v33 = vcombine.high %v8544_v12, %v8548_v18  ;;  %v8636_v53 = vld [vmem:[#allocation2 + $0x27b0] sm:$0xff] }
 0x62c   :  { %11859 = vmatpush2.bf16.msra.mxu1 %v14053_v48  ;;  %v8540_v48 = vld [vmem:[#allocation2 + $0x24b0] sm:$0xff] }
 0x62d   :  { %11982 = vmatpush2.bf16.msra.mxu0 %v13927_v45  ;;  %11860 = vmatprep.subr.bf16.mxu1 %v14046_v58  ;;  %v8409_v45 = vld [vmem:[#allocation2 + $0x2098] sm:$0xff]  ;;  %v13744_v43 = vcombine.high %v8536_v15, %v8540_v48 }
 0x62e   :  { %11983 = vmatprep.subr.bf16.mxu0 %v13920_v44  ;;  %v8413_v58 = vld [vmem:[#allocation2 + $0x20b8] sm:$0xff]  ;;  %v13751_v44 = vcombine.low %v8544_v12, %v8548_v18  ;;  %v8624_v18 = vld [vmem:[#allocation2 + $0x2750] sm:$0xff] }
 0x62f   :  { %v13618_v36 = vcombine.high %v8409_v45, %v8413_v58  ;;  %v13617_v41 = vcombine.low %v8409_v45, %v8413_v58  ;;  %v8620_v45 = vld [vmem:[#allocation2 + $0x2730] sm:$0xff]  ;;  %v8489_v58 = vld [vmem:[#allocation2 + $0x2318] sm:$0xff] }
 0x630   :  { %11861 = vmatpush2.bf16.msra.mxu1 %v14045_v49  ;;  %v8532_v49 = vld [vmem:[#allocation2 + $0x2470] sm:$0xff] }
 0x631   :  { %11984 = vmatpush2.bf16.msra.mxu0 %v13919_v13  ;;  %11912 = vmatprep.subr.bf16.mxu1 %v13784_v29  ;;  %v8401_v13 = vld [vmem:[#allocation2 + $0x2058] sm:$0xff]  ;;  %v13736_v56 = vcombine.high %v8528_v11, %v8532_v49  ;;  %v13735_v27 = vcombine.low %v8528_v11, %v8532_v49  ;;  %v8608_v49 = vld [vmem:[#allocation2 + $0x26d0] sm:$0xff] }
 0x632   :  { %12035 = vmatprep.subr.bf16.mxu0 %v13658_v0  ;;  %v8405_v29 = vld [vmem:[#allocation2 + $0x2078] sm:$0xff]  ;;  %v13743_v0 = vcombine.low %v8536_v15, %v8540_v48  ;;  %v8616_v48 = vld [vmem:[#allocation2 + $0x2710] sm:$0xff] }
 0x633   :  { %v14916_v51 = vpop.f32.mrf.mxu0  ;;  %11863 = vmatmul.mubr.bf16.vlgmr.msra.gmra.mxu1 %v14896_v5  ;;  %v13609_v38 = vcombine.low %v8401_v13, %v8405_v29 }
 0x634   :  { %11986 = vmatmul.mubr.bf16.vlgmr.msra.gmra.mxu0 %v14840_v19  ;;  %11913 = vmatpush1.bf16.msra.mxu1 %v13783_v9  ;;  %v13610_v9 = vcombine.high %v8401_v13, %v8405_v29  ;;  %v8612_v13 = vld [vmem:[#allocation2 + $0x26f0] sm:$0xff]  ;;  %v8481_v29 = vld [vmem:[#allocation2 + $0x22d8] sm:$0xff] }
 0x635   :  { %11944 = vmatprep.mubr.bf16.mxu1 %v14773_v32  ;;  %12036 = vmatpush1.bf16.msra.mxu0 %v13657_v57  ;;  %v14921_v50 = vpop.f32.mrf.mxu0  ;;  %v8393_v57 = vld [vmem:[#allocation2 + $0x2018] sm:$0xff] }
 0x636   :  { %12067 = vmatprep.mubr.bf16.mxu0 %v14695_v35  ;;  %11914 = vmatprep.subr.bf16.mxu1 %v13776_v39  ;;  %v8417_v35 = vld [vmem:[#allocation2 + $0x20d8] sm:$0xff] }
 0x637   :  { %v11745_v37 = vpop.f32.mrf.mxu0  ;;  %12037 = vmatprep.subr.bf16.mxu0 %v13650_v26  ;;  %v13626_v14 = vcombine.high %v8417_v35, %v8421_v31  ;;  %v13625_v24 = vcombine.low %v8417_v35, %v8421_v31  ;;  %v8397_v39 = vld [vmem:[#allocation2 + $0x2038] sm:$0xff]  ;;  %v13728_v26 = vcombine.high %v8520_v2, %v8524_v3  ;;  %v8628_v35 = vld [vmem:[#allocation2 + $0x2770] sm:$0xff] }
 0x638   :  { %11915 = vmatpush1.bf16.msra.mxu1 %v13775_v63  ;;  %v13602_v6 = vcombine.high %v8393_v57, %v8397_v39  ;;  %v8644_v63 = vld [vmem:[#allocation2 + $0x27f0] sm:$0xff]  ;;  %v13601_v62 = vcombine.low %v8393_v57, %v8397_v39  ;;  %v8497_v31 = vld [vmem:[#allocation2 + $0x2358] sm:$0xff] }
 0x639   :  { %12038 = vmatpush1.bf16.msra.mxu0 %v13649_v16  ;;  %v11746_v34 = vpop.f32.mrf.mxu0  ;;  %11916 = vmatprep.subr.bf16.mxu1 %v13768_v8  ;;  %v8513_v16 = vld [vmem:[#allocation2 + $0x23d8] sm:$0xff]  ;;  %v13848_v10 = vcombine.high %v8640_v23, %v8644_v63  ;;  %v8604_v57 = vld [vmem:[#allocation2 + $0x26b0] sm:$0xff] }
 0x63a   :  { %12039 = vmatprep.subr.bf16.mxu0 %v13642_v60  ;;  %v8517_v8 = vld [vmem:[#allocation2 + $0x23f8] sm:$0xff]  ;;  %v13727_v60 = vcombine.low %v8520_v2, %v8524_v3  ;;  %v8600_v3 = vld [vmem:[#allocation2 + $0x2690] sm:$0xff] }
 0x63b   :  { %v13722_v37 = vcombine.high %v8513_v16, %v8517_v8  ;;  %v8509_v34 = vld [vmem:[#allocation2 + $0x23b8] sm:$0xff] }
 0x63c   :  { %11917 = vmatpush1.bf16.msra.mxu1 %v13767_v42  ;;  %v8505_v42 = vld [vmem:[#allocation2 + $0x2398] sm:$0xff] }
 0x63d   :  { %12040 = vmatpush1.bf16.msra.mxu0 %v13641_v21  ;;  %11918 = vmatprep.subr.bf16.mxu1 %v13760_v52  ;;  %v13847_v21 = vcombine.low %v8640_v23, %v8644_v63  ;;  %v13721_v52 = vcombine.low %v8513_v16, %v8517_v8  ;;  %v13714_v12 = vcombine.high %v8505_v42, %v8509_v34  ;;  %v8473_v39 = vld [vmem:[#allocation2 + $0x2298] sm:$0xff]  ;;  %v8592_v63 = vld [vmem:[#allocation2 + $0x2650] sm:$0xff] }
 0x63e   :  { %12041 = vmatprep.subr.bf16.mxu0 %v13634_v20  ;;  %v13840_v20 = vcombine.high %v8632_v22, %v8636_v53  ;;  %v8596_v16 = vld [vmem:[#allocation2 + $0x2670] sm:$0xff]  ;;  %v8465_v8 = vld [vmem:[#allocation2 + $0x2258] sm:$0xff] }
 0x640   :  { %11919 = vmatpush1.bf16.msra.mxu1 %v13759_v17  ;;  %v8501_v17 = vld [vmem:[#allocation2 + $0x2378] sm:$0xff] }
 0x641   :  { %12042 = vmatpush1.bf16.msra.mxu0 %v13633_v40  ;;  %11920 = vmatprep.subr.bf16.mxu1 %v13752_v33  ;;  %v13839_v40 = vcombine.low %v8632_v22, %v8636_v53  ;;  %v13713_v33 = vcombine.low %v8505_v42, %v8509_v34  ;;  %v13706_v15 = vcombine.high %v8497_v31, %v8501_v17  ;;  %v8584_v53 = vld [vmem:[#allocation2 + $0x2610] sm:$0xff]  ;;  %v8457_v34 = vld [vmem:[#allocation2 + $0x2218] sm:$0xff] }
 0x642   :  { %12043 = vmatprep.subr.bf16.mxu0 %v13626_v14  ;;  %v13832_v14 = vcombine.high %v8624_v18, %v8628_v35  ;;  %v8588_v42 = vld [vmem:[#allocation2 + $0x2630] sm:$0xff] }
 0x644   :  { %11921 = vmatpush1.bf16.msra.mxu1 %v13751_v44  ;;  %v8493_v44 = vld [vmem:[#allocation2 + $0x2338] sm:$0xff] }
 0x645   :  { %12044 = vmatpush1.bf16.msra.mxu0 %v13625_v24  ;;  %11922 = vmatprep.subr.bf16.mxu1 %v13744_v43  ;;  %v13831_v24 = vcombine.low %v8624_v18, %v8628_v35  ;;  %v13705_v43 = vcombine.low %v8497_v31, %v8501_v17  ;;  %v13698_v11 = vcombine.high %v8489_v58, %v8493_v44  ;;  %v8832_v35 = vld [vmem:[#allocation2 + $0x2dd0] sm:$0xff]  ;;  %v8705_v17 = vld [vmem:[#allocation2 + $0x29d8] sm:$0xff] }
 0x646   :  { %12045 = vmatprep.subr.bf16.mxu0 %v13618_v36  ;;  %v13824_v36 = vcombine.high %v8616_v48, %v8620_v45  ;;  %v8836_v31 = vld [vmem:[#allocation2 + $0x2df0] sm:$0xff] }
 0x648   :  { %11923 = vmatpush1.bf16.msra.mxu1 %v13743_v0  ;;  %v8485_v0 = vld [vmem:[#allocation2 + $0x22f8] sm:$0xff] }
 0x649   :  { %12046 = vmatpush1.bf16.msra.mxu0 %v13617_v41  ;;  %11924 = vmatprep.subr.bf16.mxu1 %v13736_v56  ;;  %v13823_v41 = vcombine.low %v8616_v48, %v8620_v45  ;;  %v13697_v56 = vcombine.low %v8489_v58, %v8493_v44  ;;  %v13690_v2 = vcombine.high %v8481_v29, %v8485_v0  ;;  %v8824_v45 = vld [vmem:[#allocation2 + $0x2d90] sm:$0xff] }
 0x64a   :  { %12047 = vmatprep.subr.bf16.mxu0 %v13610_v9  ;;  %v13816_v9 = vcombine.high %v8608_v49, %v8612_v13  ;;  %v8828_v58 = vld [vmem:[#allocation2 + $0x2db0] sm:$0xff]  ;;  %v14039_v44 = vcombine.low %v8832_v35, %v8836_v31 }
 0x64c   :  { %11925 = vmatpush1.bf16.msra.mxu1 %v13735_v27  ;;  %v8477_v27 = vld [vmem:[#allocation2 + $0x22b8] sm:$0xff] }
 0x64d   :  { %12048 = vmatpush1.bf16.msra.mxu0 %v13609_v38  ;;  %11926 = vmatprep.subr.bf16.mxu1 %v13728_v26  ;;  %v13815_v38 = vcombine.low %v8608_v49, %v8612_v13  ;;  %v13689_v26 = vcombine.low %v8481_v29, %v8485_v0  ;;  %v13682_v23 = vcombine.high %v8473_v39, %v8477_v27  ;;  %v8816_v49 = vld [vmem:[#allocation2 + $0x2d50] sm:$0xff] }
 0x64e   :  { %12049 = vmatprep.subr.bf16.mxu0 %v13602_v6  ;;  %v13808_v6 = vcombine.high %v8600_v3, %v8604_v57  ;;  %v8820_v13 = vld [vmem:[#allocation2 + $0x2d70] sm:$0xff] }
 0x650   :  { %11927 = vmatpush1.bf16.msra.mxu1 %v13727_v60  ;;  %v8469_v60 = vld [vmem:[#allocation2 + $0x2278] sm:$0xff] }
 0x651   :  { %12050 = vmatpush1.bf16.msra.mxu0 %v13601_v62  ;;  %11928 = vmatprep.subr.bf16.mxu1 %v13848_v10  ;;  %v13807_v62 = vcombine.low %v8600_v3, %v8604_v57  ;;  %v13681_v10 = vcombine.low %v8473_v39, %v8477_v27  ;;  %v13674_v22 = vcombine.high %v8465_v8, %v8469_v60 }
 0x652   :  { %12051 = vmatprep.subr.bf16.mxu0 %v13722_v37  ;;  %v13800_v37 = vcombine.high %v8592_v63, %v8596_v16  ;;  %v14031_v3 = vcombine.low %v8824_v45, %v8828_v58 }
 0x654   :  { %11929 = vmatpush2.bf16.msra.mxu1 %v13847_v21  ;;  %v8461_v21 = vld [vmem:[#allocation2 + $0x2238] sm:$0xff] }
 0x655   :  { %12052 = vmatpush2.bf16.msra.mxu0 %v13721_v52  ;;  %11930 = vmatprep.subr.bf16.mxu1 %v13840_v20  ;;  %v13799_v52 = vcombine.low %v8592_v63, %v8596_v16  ;;  %v13673_v20 = vcombine.low %v8465_v8, %v8469_v60  ;;  %v13666_v18 = vcombine.high %v8457_v34, %v8461_v21  ;;  %v8681_v8 = vld [vmem:[#allocation2 + $0x2918] sm:$0xff] }
 0x656   :  { %12053 = vmatprep.subr.bf16.mxu0 %v13714_v12  ;;  %v13792_v12 = vcombine.high %v8584_v53, %v8588_v42  ;;  %v8685_v60 = vld [vmem:[#allocation2 + $0x2938] sm:$0xff] }
 0x658   :  { %11931 = vmatpush2.bf16.msra.mxu1 %v13839_v40  ;;  %v8709_v40 = vld [vmem:[#allocation2 + $0x29f8] sm:$0xff] }
 0x659   :  { %12054 = vmatpush2.bf16.msra.mxu0 %v13713_v33  ;;  %11932 = vmatprep.subr.bf16.mxu1 %v13832_v14  ;;  %v13791_v33 = vcombine.low %v8584_v53, %v8588_v42  ;;  %v13665_v14 = vcombine.low %v8457_v34, %v8461_v21  ;;  %v13914_v48 = vcombine.high %v8705_v17, %v8709_v40 }
 0x65a   :  { %12055 = vmatprep.subr.bf16.mxu0 %v13706_v15  ;;  %v14040_v15 = vcombine.high %v8832_v35, %v8836_v31  ;;  %v13890_v21 = vcombine.high %v8681_v8, %v8685_v60 }
 0x65c   :  { %11933 = vmatpush2.bf16.msra.mxu1 %v13831_v24  ;;  %v8697_v24 = vld [vmem:[#allocation2 + $0x2998] sm:$0xff] }
 0x65d   :  { %12056 = vmatpush2.bf16.msra.mxu0 %v13705_v43  ;;  %11934 = vmatprep.subr.bf16.mxu1 %v13824_v36  ;;  %v8701_v43 = vld [vmem:[#allocation2 + $0x29b8] sm:$0xff]  ;;  %v13913_v36 = vcombine.low %v8705_v17, %v8709_v40  ;;  %v13889_v40 = vcombine.low %v8681_v8, %v8685_v60  ;;  %v8776_v60 = vld [vmem:[#allocation2 + $0x2c10] sm:$0xff] }
 0x65e   :  { %12057 = vmatprep.subr.bf16.mxu0 %v13698_v11  ;;  %v14032_v11 = vcombine.high %v8824_v45, %v8828_v58  ;;  %v13905_v27 = vcombine.low %v8697_v24, %v8701_v43  ;;  %v8792_v45 = vld [vmem:[#allocation2 + $0x2c90] sm:$0xff] }
 0x65f   :  { %v8796_v58 = vld [vmem:[#allocation2 + $0x2cb0] sm:$0xff] }
 0x660   :  { %11935 = vmatpush2.bf16.msra.mxu1 %v13823_v41  ;;  %v13906_v41 = vcombine.high %v8697_v24, %v8701_v43  ;;  %v8669_v24 = vld [vmem:[#allocation2 + $0x28b8] sm:$0xff] }
 0x661   :  { %12058 = vmatpush2.bf16.msra.mxu0 %v13697_v56  ;;  %11936 = vmatprep.subr.bf16.mxu1 %v13816_v9  ;;  %v8689_v56 = vld [vmem:[#allocation2 + $0x2958] sm:$0xff] }
 0x662   :  { %12059 = vmatprep.subr.bf16.mxu0 %v13690_v2  ;;  %v8693_v9 = vld [vmem:[#allocation2 + $0x2978] sm:$0xff] }
 0x664   :  { %11937 = vmatpush2.bf16.msra.mxu1 %v13815_v38  ;;  %v14024_v38 = vcombine.high %v8816_v49, %v8820_v13 }
 0x665   :  { %12060 = vmatpush2.bf16.msra.mxu0 %v13689_v26  ;;  %11938 = vmatprep.subr.bf16.mxu1 %v13808_v6 }
 0x666   :  { %12061 = vmatprep.subr.bf16.mxu0 %v13682_v23  ;;  %v8812_v23 = vld [vmem:[#allocation2 + $0x2d30] sm:$0xff] }
 0x668   :  { %11939 = vmatpush2.bf16.msra.mxu1 %v13807_v62 }
 0x669   :  { %12062 = vmatpush2.bf16.msra.mxu0 %v13681_v10  ;;  %11940 = vmatprep.subr.bf16.mxu1 %v13800_v37  ;;  %v14023_v37 = vcombine.low %v8816_v49, %v8820_v13  ;;  %v14000_v13 = vcombine.high %v8792_v45, %v8796_v58 }
 0x66a   :  { %12063 = vmatprep.subr.bf16.mxu0 %v13674_v22 }
 0x66c   :  { %11941 = vmatpush2.bf16.msra.mxu1 %v13799_v52  ;;  %v8800_v52 = vld [vmem:[#allocation2 + $0x2cd0] sm:$0xff] }
 0x66d   :  { %12064 = vmatpush2.bf16.msra.mxu0 %v13673_v20  ;;  %11942 = vmatprep.subr.bf16.mxu1 %v13792_v12  ;;  %v8804_v20 = vld [vmem:[#allocation2 + $0x2cf0] sm:$0xff]  ;;  %v8673_v12 = vld [vmem:[#allocation2 + $0x28d8] sm:$0xff] }
 0x66e   :  { %12065 = vmatprep.subr.bf16.mxu0 %v13666_v18  ;;  %v8677_v18 = vld [vmem:[#allocation2 + $0x28f8] sm:$0xff] }
 0x66f   :  { %v13881_v49 = vcombine.low %v8673_v12, %v8677_v18 }
 0x670   :  { %11943 = vmatpush2.bf16.msra.mxu1 %v13791_v33  ;;  %v14008_v33 = vcombine.high %v8800_v52, %v8804_v20 }
 0x671   :  { %12066 = vmatpush2.bf16.msra.mxu0 %v13665_v14  ;;  %11994 = vmatprep.subr.bf16.mxu1 %v14040_v15 }
 0x672   :  { %12117 = vmatprep.subr.bf16.mxu0 %v13914_v48  ;;  %v13882_v48 = vcombine.high %v8673_v12, %v8677_v18  ;;  %v8773_v12 = vld [vmem:[#allocation2 + $0x2bf8] sm:$0xff] }
 0x673   :  { %v14924_v29 = vpop.f32.mrf.mxu0  ;;  %11945 = vmatmul.mubr.bf16.vlgmr.msra.gmra.mxu1 %v14791_v54  ;;  %v11700_v0 = vpop.f32.mrf.mxu1 }
 0x674   :  { %12068 = vmatmul.mubr.bf16.vlgmr.msra.gmra.mxu0 %v14715_v55  ;;  %v14929_v2 = vadd.f32 %v11700_v0, %v14909_v1  ;;  %11995 = vmatpush1.bf16.msra.mxu1 %v14039_v44  ;;  %v13898_v55 = vcombine.high %v8689_v56, %v8693_v9  ;;  %v8808_v1 = vld [vmem:[#allocation2 + $0x2d10] sm:$0xff]  ;;  %v8665_v44 = vld [vmem:[#allocation2 + $0x2898] sm:$0xff] }
 0x675   :  { %12026 = vmatprep.mubr.bf16.mxu1 %v14894_v47  ;;  %12118 = vmatpush1.bf16.msra.mxu0 %v13913_v36  ;;  %v14932_v57 = vpop.f32.mrf.mxu0  ;;  %v11702_v39 = vpop.f32.mrf.mxu1  ;;  %v14016_v53 = vcombine.high %v8808_v1, %v8812_v23  ;;  %v14015_v17 = vcombine.low %v8808_v1, %v8812_v23  ;;  %v13873_v1 = vcombine.low %v8665_v44, %v8669_v24 }
 0x676   :  { %v12199_v26 = vrot.slane %v14929_v2, 4  ;;  %12149 = vmatprep.mubr.bf16.mxu0 %v14838_v46  ;;  %v14937_v6 = vadd.f32 %v11702_v39, %v14914_v7  ;;  %11996 = vmatprep.subr.bf16.mxu1 %v14032_v11  ;;  %v13897_v7 = vcombine.low %v8689_v56, %v8693_v9  ;;  %v14007_v11 = vcombine.low %v8800_v52, %v8804_v20  ;;  %v8784_v9 = vld [vmem:[#allocation2 + $0x2c50] sm:$0xff]  ;;  %v8657_v39 = vld [vmem:[#allocation2 + $0x2858] sm:$0xff] }
 0x677   :  { %v11827_v63 = vpop.f32.mrf.mxu0  ;;  %12119 = vmatprep.subr.bf16.mxu0 %v13906_v41  ;;  %v11704_v16 = vpop.f32.mrf.mxu1  ;;  %v13874_v56 = vcombine.high %v8665_v44, %v8669_v24  ;;  %v8900_v52 = vld [vmem:[#allocation2 + $0x2ff0] sm:$0xff]  ;;  %v8769_v20 = vld [vmem:[#allocation2 + $0x2bd8] sm:$0xff] }
 0x678   :  { %v12200_v62 = vadd.f32 %v12199_v26, %v14929_v2  ;;  %v12205_v10 = vrot.slane %v14937_v6, 4  ;;  %11997 = vmatpush1.bf16.msra.mxu1 %v14031_v3  ;;  %v8788_v3 = vld [vmem:[#allocation2 + $0x2c70] sm:$0xff]  ;;  %v8765_v44 = vld [vmem:[#allocation2 + $0x2bb8] sm:$0xff] }
 0x679   :  { %12120 = vmatpush1.bf16.msra.mxu0 %v13905_v27  ;;  %v11828_v46 = vpop.f32.mrf.mxu0  ;;  %v11705_v22 = vpop.f32.mrf.mxu1  ;;  %11998 = vmatprep.subr.bf16.mxu1 %v14024_v38  ;;  %v8661_v27 = vld [vmem:[#allocation2 + $0x2878] sm:$0xff]  ;;  %v13992_v23 = vcombine.high %v8784_v9, %v8788_v3 }
 0x67a   :  { %v12201_v42 = vrot.slane %v12200_v62, 2  ;;  %v12206_v34 = vadd.f32 %v12205_v10, %v14937_v6  ;;  %12121 = vmatprep.subr.bf16.mxu0 %v13898_v55  ;;  %v13999_v55 = vcombine.low %v8792_v45, %v8796_v58  ;;  %v13866_v8 = vcombine.high %v8657_v39, %v8661_v27  ;;  %v8649_v10 = vld [vmem:[#allocation2 + $0x2818] sm:$0xff]  ;;  %v8892_v45 = vld [vmem:[#allocation2 + $0x2fb0] sm:$0xff] }
 0x67b   :  { %v13991_v22 = vcombine.low %v8784_v9, %v8788_v3  ;;  %v8761_v58 = vld [vmem:[#allocation2 + $0x2b98] sm:$0xff]  ;;  %v8884_v9 = vld [vmem:[#allocation2 + $0x2f70] sm:$0xff] }
 0x67c   :  { %v12202_v35 = vadd.f32 %v12201_v42, %v12200_v62  ;;  %v12207_v31 = vrot.slane %v12206_v34, 2  ;;  %11999 = vmatpush1.bf16.msra.mxu1 %v14023_v37  ;;  %v8780_v62 = vld [vmem:[#allocation2 + $0x2c30] sm:$0xff]  ;;  %v8753_v3 = vld [vmem:[#allocation2 + $0x2b58] sm:$0xff] }
 0x67d   :  { %12122 = vmatpush1.bf16.msra.mxu0 %v13897_v7  ;;  %12000 = vmatprep.subr.bf16.mxu1 %v14016_v53  ;;  %v13865_v7 = vcombine.low %v8657_v39, %v8661_v27  ;;  %v13984_v53 = vcombine.high %v8776_v60, %v8780_v62  ;;  %v8757_v39 = vld [vmem:[#allocation2 + $0x2b78] sm:$0xff] }
 0x67e   :  { %v12203_v14 = vrot.slane %v12202_v35, 1  ;;  %v12208_v15 = vadd.f32 %v12207_v31, %v12206_v34  ;;  %12123 = vmatprep.subr.bf16.mxu0 %v13890_v21  ;;  %v8896_v21 = vld [vmem:[#allocation2 + $0x2fd0] sm:$0xff]  ;;  %v13983_v31 = vcombine.low %v8776_v60, %v8780_v62  ;;  %v13962_v60 = vcombine.high %v8753_v3, %v8757_v39 }
 0x67f   :  { %v8872_v62 = vld [vmem:[#allocation2 + $0x2f10] sm:$0xff] }
 0x680   :  { %v12204_v43 = vadd.f32 %v12203_v14, %v12202_v35  ;;  %v12209_v36 = vrot.slane %v12208_v15, 1  ;;  %12001 = vmatpush1.bf16.msra.mxu1 %v14015_v17 }
 0x681   :  { %12124 = vmatpush1.bf16.msra.mxu0 %v13889_v40  ;;  %12002 = vmatprep.subr.bf16.mxu1 %v14008_v33  ;;  %v14104_v40 = vcombine.high %v8896_v21, %v8900_v52 }
 0x682   :  { %v12247_v0 = vmul.f32 0.125, %v12204_v43  ;;  %v12210_v41 = vadd.f32 %v12209_v36, %v12208_v15  ;;  %12125 = vmatprep.subr.bf16.mxu0 %v13882_v48  ;;  %v13978_v15 = vcombine.high %v8769_v20, %v8773_v12  ;;  %v8888_v48 = vld [vmem:[#allocation2 + $0x2f90] sm:$0xff]  ;;  %v14103_v36 = vcombine.low %v8896_v21, %v8900_v52  ;;  %v8737_v21 = vld [vmem:[#allocation2 + $0x2ad8] sm:$0xff] }
 0x683   :  { %v8741_v52 = vld [vmem:[#allocation2 + $0x2af8] sm:$0xff] }
 0x684   :  { %v14943_v38 = vsub.f32 %v14929_v2, %v12247_v0  ;;  %v12248_v26 = vmul.f32 0.125, %v12210_v41  ;;  %12003 = vmatpush1.bf16.msra.mxu1 %v14007_v11  ;;  %v8653_v2 = vld [vmem:[#allocation2 + $0x2838] sm:$0xff]  ;;  %v13977_v11 = vcombine.low %v8769_v20, %v8773_v12  ;;  %v13970_v41 = vcombine.high %v8761_v58, %v8765_v44 }
 0x685   :  { %12126 = vmatpush1.bf16.msra.mxu0 %v13881_v49  ;;  %12004 = vmatprep.subr.bf16.mxu1 %v14000_v13  ;;  %v13857_v17 = vcombine.low %v8649_v10, %v8653_v2  ;;  %v14096_v49 = vcombine.high %v8888_v48, %v8892_v45 }
 0x686   :  { %v12263_v63 = vmul.f32 %v14943_v38, %v14943_v38  ;;  %v14948_v16 = vsub.f32 %v14937_v6, %v12248_v26  ;;  %12127 = vmatprep.subr.bf16.mxu0 %v13874_v56  ;;  %v13858_v6 = vcombine.high %v8649_v10, %v8653_v2  ;;  %v8880_v56 = vld [vmem:[#allocation2 + $0x2f50] sm:$0xff]  ;;  %v8745_v2 = vld [vmem:[#allocation2 + $0x2b18] sm:$0xff] }
 0x687   :  { %v8876_v10 = vld [vmem:[#allocation2 + $0x2f30] sm:$0xff] }
 0x688   :  { %v12271_v37 = vrot.slane %v12263_v63, 4  ;;  %v12264_v46 = vmul.f32 %v14948_v16, %v14948_v16  ;;  %12005 = vmatpush1.bf16.msra.mxu1 %v13999_v55  ;;  %v14095_v55 = vcombine.low %v8888_v48, %v8892_v45  ;;  %v14079_v20 = vcombine.low %v8872_v62, %v8876_v10 }
 0x689   :  { %12128 = vmatpush1.bf16.msra.mxu0 %v13873_v1  ;;  %12006 = vmatprep.subr.bf16.mxu1 %v13992_v23  ;;  %v13969_v1 = vcombine.low %v8761_v58, %v8765_v44  ;;  %v14088_v23 = vcombine.high %v8880_v56, %v8884_v9  ;;  %v8848_v58 = vld [vmem:[#allocation2 + $0x2e50] sm:$0xff] }
 0x68a   :  { %v12272_v42 = vadd.f32 %v12271_v37, %v12263_v63  ;;  %v12277_v34 = vrot.slane %v12264_v46, 4  ;;  %12129 = vmatprep.subr.bf16.mxu0 %v13866_v8  ;;  %v8749_v37 = vld [vmem:[#allocation2 + $0x2b38] sm:$0xff]  ;;  %v8852_v44 = vld [vmem:[#allocation2 + $0x2e70] sm:$0xff] }
 0x68b   :  { %v13953_v12 = vcombine.low %v8745_v2, %v8749_v37 }
 0x68c   :  { %v12273_v18 = vrot.slane %v12272_v42, 2  ;;  %v12278_v35 = vadd.f32 %v12277_v34, %v12264_v46  ;;  %12007 = vmatpush1.bf16.msra.mxu1 %v13991_v22  ;;  %v14087_v22 = vcombine.low %v8880_v56, %v8884_v9  ;;  %v8864_v34 = vld [vmem:[#allocation2 + $0x2ed0] sm:$0xff] }
 0x68d   :  { %12130 = vmatpush1.bf16.msra.mxu0 %v13865_v7  ;;  %12008 = vmatprep.subr.bf16.mxu1 %v13984_v53  ;;  %v13961_v7 = vcombine.low %v8753_v3, %v8757_v39  ;;  %v14080_v53 = vcombine.high %v8872_v62, %v8876_v10  ;;  %v8844_v56 = vld [vmem:[#allocation2 + $0x2e30] sm:$0xff]  ;;  %v8713_v3 = vld [vmem:[#allocation2 + $0x2a18] sm:$0xff]  ;;  %v14170_v62 = vld [vmem:[#allocation5 + $0x40] sm:$0x77] }
 0x68e   :  { %v12274_v33 = vadd.f32 %v12273_v18, %v12272_v42  ;;  %v12279_v14 = vrot.slane %v12278_v35, 2  ;;  %12131 = vmatprep.subr.bf16.mxu0 %v13858_v6  ;;  %v13954_v42 = vcombine.high %v8745_v2, %v8749_v37  ;;  %v8868_v6 = vld [vmem:[#allocation2 + $0x2ef0] sm:$0xff]  ;;  %v8717_v39 = vld [vmem:[#allocation2 + $0x2a38] sm:$0xff]  ;;  %v12454_v10 = vrot.slane %v14170_v62, %v14453_v25 }
 0x68f   :  { %v14072_v18 = vcombine.high %v8864_v34, %v8868_v6  ;;  %v12458_v37 = vrot.slane %v14170_v62, %v14446_v59 }
 0x690   :  { %v12275_v24 = vrot.slane %v12274_v33, 1  ;;  %v12280_v43 = vadd.f32 %v12279_v14, %v12278_v35  ;;  %12009 = vmatpush1.bf16.msra.mxu1 %v13983_v31  ;;  %v13946_v35 = vcombine.high %v8737_v21, %v8741_v52  ;;  %v8856_v31 = vld [vmem:[#allocation2 + $0x2e90] sm:$0xff]  ;;  %v14071_v14 = vcombine.low %v8864_v34, %v8868_v6  ;;  %v8569_v34 = vld [vmem:[#allocation2 + $0x2598] sm:$0xff] }
 0x691   :  { %12132 = vmatpush1.bf16.msra.mxu0 %v13857_v17  ;;  %12010 = vmatprep.subr.bf16.mxu1 %v14104_v40  ;;  %v8860_v17 = vld [vmem:[#allocation2 + $0x2eb0] sm:$0xff]  ;;  %v8729_v40 = vld [vmem:[#allocation2 + $0x2a98] sm:$0xff] }
 0x692   :  { %v12276_v13 = vadd.f32 %v12275_v24, %v12274_v33  ;;  %v12281_v0 = vrot.slane %v12280_v43, 1  ;;  %12133 = vmatprep.subr.bf16.mxu0 %v13978_v15  ;;  %v8733_v33 = vld [vmem:[#allocation2 + $0x2ab8] sm:$0xff]  ;;  %v13945_v15 = vcombine.low %v8737_v21, %v8741_v52  ;;  %v14064_v48 = vcombine.high %v8856_v31, %v8860_v17 }
 0x693   :  { %v13938_v45 = vcombine.high %v8729_v40, %v8733_v33  ;;  %v8721_v24 = vld [vmem:[#allocation2 + $0x2a58] sm:$0xff]  ;;  %v12494_v21 = vrot.slane %v12454_v10, %v14453_v25 }
 0x694   :  { %v12319_v27 = vmul.f32 0.125, %v12276_v13  ;;  %v12282_v26 = vadd.f32 %v12281_v0, %v12280_v43  ;;  %12011 = vmatpush2.bf16.msra.mxu1 %v14103_v36  ;;  %v8725_v43 = vld [vmem:[#allocation2 + $0x2a78] sm:$0xff]  ;;  %v14063_v36 = vcombine.low %v8856_v31, %v8860_v17 }
 0x695   :  { %12134 = vmatpush2.bf16.msra.mxu0 %v13977_v11  ;;  %12012 = vmatprep.subr.bf16.mxu1 %v14096_v49  ;;  %v13937_v11 = vcombine.low %v8729_v40, %v8733_v33  ;;  %v14056_v49 = vcombine.high %v8848_v58, %v8852_v44  ;;  %v13930_v0 = vcombine.high %v8721_v24, %v8725_v43  ;;  %v8573_v6 = vld [vmem:[#allocation2 + $0x25b8] sm:$0xff] }
 0x696   :  { %v12327_v63 = vadd.f32 1e-05, %v12319_v27  ;;  %v12320_v8 = vmul.f32 0.125, %v12282_v26  ;;  %12135 = vmatprep.subr.bf16.mxu0 %v13970_v41  ;;  %v8840_v41 = vld [vmem:[#allocation2 + $0x2e10] sm:$0xff]  ;;  %v14055_v26 = vcombine.low %v8848_v58, %v8852_v44  ;;  %v13778_v17 = vcombine.high %v8569_v34, %v8573_v6  ;;  %v8525_v10 = vld [vmem:[#allocation2 + $0x2438] sm:$0xff] }
 0x698   :  { %v12328_v46 = vadd.f32 1e-05, %v12320_v8  ;;  %12013 = vmatpush2.bf16.msra.mxu1 %v14095_v55  ;;  %14152 = vrsqrt.f32 %v12327_v63  ;;  %v13929_v55 = vcombine.low %v8721_v24, %v8725_v43  ;;  %v13922_v63 = vcombine.high %v8713_v3, %v8717_v39  ;;  %v8577_v8 = vld [vmem:[#allocation2 + $0x25d8] sm:$0xff] }
 0x699   :  { %12136 = vmatpush2.bf16.msra.mxu0 %v13969_v1  ;;  %12014 = vmatprep.subr.bf16.mxu1 %v14088_v23  ;;  %v14048_v1 = vcombine.high %v8840_v41, %v8844_v56 }
 0x69a   :  { %14154 = vrsqrt.f32 %v12328_v46  ;;  %12137 = vmatprep.subr.bf16.mxu0 %v13962_v60  ;;  %v8581_v60 = vld [vmem:[#allocation2 + $0x25f8] sm:$0xff]  ;;  %v14047_v46 = vcombine.low %v8840_v41, %v8844_v56 }
 0x69b   :  { %v8545_v56 = vld [vmem:[#allocation2 + $0x24d8] sm:$0xff] }
 0x69c   :  { %12015 = vmatpush2.bf16.msra.mxu1 %v14087_v22  ;;  %v13921_v22 = vcombine.low %v8713_v3, %v8717_v39 }
 0x69d   :  { %12138 = vmatpush2.bf16.msra.mxu0 %v13961_v7  ;;  %12016 = vmatprep.subr.bf16.mxu1 %v14080_v53  ;;  %v13786_v7 = vcombine.high %v8577_v8, %v8581_v60 }
 0x69e   :  { %12139 = vmatprep.subr.bf16.mxu0 %v13954_v42 }
 0x6a0   :  { %12017 = vmatpush2.bf16.msra.mxu1 %v14079_v20 }
 0x6a1   :  { %12140 = vmatpush2.bf16.msra.mxu0 %v13953_v12  ;;  %12018 = vmatprep.subr.bf16.mxu1 %v14072_v18  ;;  %v12498_v12 = vrot.slane %v12458_v37, %v14453_v25  ;;  %v13785_v18 = vcombine.low %v8577_v8, %v8581_v60 }
 0x6a2   :  { %12141 = vmatprep.subr.bf16.mxu0 %v13946_v35 }
 0x6a4   :  { %12019 = vmatpush2.bf16.msra.mxu1 %v14071_v14  ;;  %v8561_v14 = vld [vmem:[#allocation2 + $0x2558] sm:$0xff] }
 0x6a5   :  { %12142 = vmatpush2.bf16.msra.mxu0 %v13945_v15  ;;  %12020 = vmatprep.subr.bf16.mxu1 %v14064_v48  ;;  %v14153_v13 = vpop.eup %14152  ;;  %v8565_v15 = vld [vmem:[#allocation2 + $0x2578] sm:$0xff] }
 0x6a6   :  { %12143 = vmatprep.subr.bf16.mxu0 %v13938_v45  ;;  %v13770_v43 = vcombine.high %v8561_v14, %v8565_v15  ;;  %v13769_v41 = vcombine.low %v8561_v14, %v8565_v15  ;;  %v8609_v15 = vld [vmem:[#allocation2 + $0x26d8] sm:$0xff] }
 0x6a7   :  { %v14155_v9 = vpop.eup %14154 }
 0x6a8   :  { %v12351_v27 = vcombine.low %v14153_v13, %v14155_v9  ;;  %12021 = vmatpush2.bf16.msra.mxu1 %v14063_v36  ;;  %v8557_v13 = vld [vmem:[#allocation2 + $0x2538] sm:$0xff] }
 0x6a9   :  { %12144 = vmatpush2.bf16.msra.mxu0 %v13937_v11  ;;  %12022 = vmatprep.subr.bf16.mxu1 %v14056_v49  ;;  %v8553_v49 = vld [vmem:[#allocation2 + $0x2518] sm:$0xff] }
 0x6aa   :  { %v12355_v23 = vrot.slane %v12351_v27, 7  ;;  %12145 = vmatprep.subr.bf16.mxu0 %v13930_v0  ;;  %v8549_v9 = vld [vmem:[#allocation2 + $0x24f8] sm:$0xff]  ;;  %v13761_v3 = vcombine.low %v8553_v49, %v8557_v13 }
 0x6ab   :  { %v13754_v39 = vcombine.high %v8545_v56, %v8549_v9  ;;  %v8537_v27 = vld [vmem:[#allocation2 + $0x2498] sm:$0xff] }
 0x6ac   :  { %v12363_v2 = vmul.f32 %v14170_v62, %v12355_v23  ;;  %12023 = vmatpush2.bf16.msra.mxu1 %v14055_v26  ;;  %v8541_v26 = vld [vmem:[#allocation2 + $0x24b8] sm:$0xff] }
 0x6ad   :  { %12146 = vmatpush2.bf16.msra.mxu0 %v13929_v55  ;;  %12024 = vmatprep.subr.bf16.mxu1 %v14048_v1  ;;  %v13753_v55 = vcombine.low %v8545_v56, %v8549_v9  ;;  %v13746_v1 = vcombine.high %v8537_v27, %v8541_v26  ;;  %v8529_v23 = vld [vmem:[#allocation2 + $0x2458] sm:$0xff]  ;;  %v13745_v8 = vcombine.low %v8537_v27, %v8541_v26 }
 0x6ae   :  { %v12374_v53 = vrot.slane %v12363_v2, %v14383_v28  ;;  %v12378_v42 = vrot.slane %v12363_v2, %v14386_v30  ;;  %12147 = vmatprep.subr.bf16.mxu0 %v13922_v63  ;;  %v8533_v63 = vld [vmem:[#allocation2 + $0x2478] sm:$0xff] }
 0x6af   :  { %v13738_v60 = vcombine.high %v8529_v23, %v8533_v63  ;;  %v8521_v62 = vld [vmem:[#allocation2 + $0x2418] sm:$0xff]  ;;  %v13737_v2 = vcombine.low %v8529_v23, %v8533_v63 }
 0x6b0   :  { %v12414_v52 = vrot.slane %v12374_v53, %v14383_v28  ;;  %v12418_v20 = vrot.slane %v12378_v42, %v14383_v28  ;;  %12025 = vmatpush2.bf16.msra.mxu1 %v14047_v46  ;;  %v13730_v37 = vcombine.high %v8521_v62, %v8525_v10  ;;  %v8641_v46 = vld [vmem:[#allocation2 + $0x27d8] sm:$0xff] }
 0x6b1   :  { %12148 = vmatpush2.bf16.msra.mxu0 %v13921_v22  ;;  %12076 = vmatprep.subr.bf16.mxu1 %v13786_v7  ;;  %v8645_v22 = vld [vmem:[#allocation2 + $0x27f8] sm:$0xff]  ;;  %v13729_v7 = vcombine.low %v8521_v62, %v8525_v10 }
 0x6b2   :  { %v12443_v35 = vmul.f32 %v12414_v52, %v14943_v38  ;;  %v12444_v31 = vmul.f32 %v12418_v20, %v14948_v16  ;;  %v13777_v16 = vcombine.low %v8569_v34, %v8573_v6  ;;  %v13850_v53 = vcombine.high %v8641_v46, %v8645_v22  ;;  %v8633_v42 = vld [vmem:[#allocation2 + $0x2798] sm:$0xff] }
 0x6b3   :  { %v14962_v40 = vpop.f32.mrf.mxu1  ;;  %v14964_v33 = vpop.f32.mrf.mxu0  ;;  %12027 = vmatmul.mubr.bf16.vlgmr.msra.gmra.mxu1 %v14896_v5  ;;  %v8637_v34 = vld [vmem:[#allocation2 + $0x27b8] sm:$0xff]  ;;  %v13849_v6 = vcombine.low %v8641_v46, %v8645_v22 }
 0x6b4   :  { %v12523_v48 = vadd.f32 %v12494_v21, %v12443_v35  ;;  %v12524_v45 = vadd.f32 %v12498_v12, %v12444_v31  ;;  %12150 = vmatmul.mubr.bf16.vlgmr.msra.gmra.mxu0 %v14840_v19  ;;  %12077 = vmatpush1.bf16.msra.mxu1 %v13785_v18  ;;  %v13842_v21 = vcombine.high %v8633_v42, %v8637_v34  ;;  %v8625_v52 = vld [vmem:[#allocation2 + $0x2758] sm:$0xff] }
 0x6b5   :  { %12108 = vmatprep.mubr.bf16.mxu1 %v14773_v32  ;;  %v14969_v58 = vpop.f32.mrf.mxu1  ;;  %v14971_v38 = vpop.f32.mrf.mxu0  ;;  %12078 = vmatprep.subr.bf16.mxu1 %v13778_v17  ;;  %v13762_v32 = vcombine.high %v8553_v49, %v8557_v13  ;;  %v8629_v20 = vld [vmem:[#allocation2 + $0x2778] sm:$0xff]  ;;  %v13841_v12 = vcombine.low %v8633_v42, %v8637_v34 }
 0x6b6   :  { %v12531_v44 = vmax.f32 %v12523_v48, 0.0  ;;  %v12532_v24 = vmax.f32 %v12524_v45, 0.0  ;;  %v13834_v18 = vcombine.high %v8625_v52, %v8629_v20  ;;  %v8617_v35 = vld [vmem:[#allocation2 + $0x2718] sm:$0xff]  ;;  %v13833_v17 = vcombine.low %v8625_v52, %v8629_v20 }
 0x6b7   :  { %v11786_v36 = vpop.f32.mrf.mxu1  ;;  %v11909_v11 = vpop.f32.mrf.mxu0  ;;  %v8621_v31 = vld [vmem:[#allocation2 + $0x2738] sm:$0xff] }
 0x6b8   :  { %12539 = vst [vmem:[#allocation7] sm:$0xff] %v12531_v44  ;;  %12540 = vst [vmem:[#allocation7 + $0x8] sm:$0xff] %v12532_v24  ;;  %12079 = vmatpush1.bf16.msra.mxu1 %v13777_v16  ;;  %v13826_v14 = vcombine.high %v8617_v35, %v8621_v31  ;;  %v8613_v48 = vld [vmem:[#allocation2 + $0x26f8] sm:$0xff]  ;;  %v13825_v45 = vcombine.low %v8617_v35, %v8621_v31 }
 0x6b9   :  { %v11787_v19 = vpop.f32.mrf.mxu1  ;;  %v11910_v0 = vpop.f32.mrf.mxu0  ;;  %12080 = vmatprep.subr.bf16.mxu1 %v13770_v43  ;;  %v13818_v16 = vcombine.high %v8609_v15, %v8613_v48  ;;  %v8601_v44 = vld [vmem:[#allocation2 + $0x2698] sm:$0xff]  ;;  %v14973_v43 = vld [vmem:[#allocation5 + $0x48] sm:$0x77]  ;;  %v13817_v36 = vcombine.low %v8609_v15, %v8613_v48 }
 0x6ba   :  { %v8605_v24 = vld [vmem:[#allocation2 + $0x26b8] sm:$0xff]  ;;  %v8922_v19 = vrot.slane %v14973_v43, %v14337_v61 }
 0x6bb   :  { %v13810_v11 = vcombine.high %v8601_v44, %v8605_v24  ;;  %v8593_v49 = vld [vmem:[#allocation2 + $0x2658] sm:$0xff]  ;;  %v13809_v0 = vcombine.low %v8601_v44, %v8605_v24 }
 0x6bc   :  { %12081 = vmatpush1.bf16.msra.mxu1 %v13769_v41  ;;  %v8597_v13 = vld [vmem:[#allocation2 + $0x2678] sm:$0xff]  ;;  %v8926_v41 = vrot.slane %v14973_v43, %v14342_v4 }
 0x6bd   :  { %12082 = vmatprep.subr.bf16.mxu1 %v13762_v32  ;;  %v13802_v32 = vcombine.high %v8593_v49, %v8597_v13  ;;  %v8585_v56 = vld [vmem:[#allocation2 + $0x2618] sm:$0xff] }
 0x6be   :  { %v8589_v9 = vld [vmem:[#allocation2 + $0x2638] sm:$0xff]  ;;  %v8966_v27 = vrot.slane %v8926_v41, %v14337_v61 }
 0x6bf   :  { %v13794_v26 = vcombine.high %v8585_v56, %v8589_v9  ;;  %v13793_v63 = vcombine.low %v8585_v56, %v8589_v9  ;;  %v8825_v10 = vld [vmem:[#allocation2 + $0x2d98] sm:$0xff] }
 0x6c0   :  { %12083 = vmatpush1.bf16.msra.mxu1 %v13761_v3  ;;  %v8962_v3 = vrot.slane %v8922_v19, %v14337_v61  ;;  %v8821_v42 = vld [vmem:[#allocation2 + $0x2d78] sm:$0xff] }
 0x6c1   :  { %12084 = vmatprep.subr.bf16.mxu1 %v13754_v39  ;;  %v13801_v39 = vcombine.low %v8593_v49, %v8597_v13  ;;  %v8813_v35 = vld [vmem:[#allocation2 + $0x2d38] sm:$0xff] }
 0x6c2   :  { %v11742_v23 = vadd.f32 %v14916_v51, %v8962_v3  ;;  %v8817_v51 = vld [vmem:[#allocation2 + $0x2d58] sm:$0xff] }
 0x6c3   :  { %v14026_v20 = vcombine.high %v8817_v51, %v8821_v42  ;;  %v8805_v44 = vld [vmem:[#allocation2 + $0x2cf8] sm:$0xff] }
 0x6c4   :  { %12085 = vmatpush1.bf16.msra.mxu1 %v13753_v55  ;;  %v8833_v55 = vld [vmem:[#allocation2 + $0x2dd8] sm:$0xff] }
 0x6c5   :  { %12086 = vmatprep.subr.bf16.mxu1 %v13746_v1  ;;  %v8837_v1 = vld [vmem:[#allocation2 + $0x2df8] sm:$0xff] }
 0x6c6   :  { %v14042_v62 = vcombine.high %v8833_v55, %v8837_v1  ;;  %v14041_v46 = vcombine.low %v8833_v55, %v8837_v1  ;;  %v8797_v41 = vld [vmem:[#allocation2 + $0x2cb8] sm:$0xff] }
 0x6c7   :  { %v8789_v55 = vld [vmem:[#allocation2 + $0x2c78] sm:$0xff] }
 0x6c8   :  { %12087 = vmatpush1.bf16.msra.mxu1 %v13745_v8  ;;  %v11744_v8 = vadd.f32 %v14921_v50, %v8966_v27 }
 0x6c9   :  { %12088 = vmatprep.subr.bf16.mxu1 %v13738_v60  ;;  %v11783_v60 = vadd.f32 %v14962_v40, %v11742_v23 }
 0x6cb   :  { %v11824_v22 = vadd.f32 %v14924_v29, %v11783_v60 }
 0x6cc   :  { %12089 = vmatpush1.bf16.msra.mxu1 %v13737_v2  ;;  %v8829_v2 = vld [vmem:[#allocation2 + $0x2db8] sm:$0xff] }
 0x6cd   :  { %12090 = vmatprep.subr.bf16.mxu1 %v13730_v37  ;;  %v11785_v37 = vadd.f32 %v14969_v58, %v11744_v8  ;;  %v14033_v58 = vcombine.low %v8825_v10, %v8829_v2 }
 0x6cf   :  { %v11826_v50 = vadd.f32 %v14932_v57, %v11785_v37  ;;  %v14025_v57 = vcombine.low %v8817_v51, %v8821_v42  ;;  %v8897_v42 = vld [vmem:[#allocation2 + $0x2fd8] sm:$0xff] }
 0x6d0   :  { %12091 = vmatpush1.bf16.msra.mxu1 %v13729_v7  ;;  %v14034_v7 = vcombine.high %v8825_v10, %v8829_v2  ;;  %v8777_v10 = vld [vmem:[#allocation2 + $0x2c18] sm:$0xff] }
 0x6d1   :  { %12092 = vmatprep.subr.bf16.mxu1 %v13850_v53  ;;  %v8781_v2 = vld [vmem:[#allocation2 + $0x2c38] sm:$0xff] }
 0x6d2   :  { %v13986_v51 = vcombine.high %v8777_v10, %v8781_v2 }
 0x6d4   :  { %12093 = vmatpush2.bf16.msra.mxu1 %v13849_v6 }
 0x6d5   :  { %12094 = vmatprep.subr.bf16.mxu1 %v13842_v21 }
 0x6d8   :  { %12095 = vmatpush2.bf16.msra.mxu1 %v13841_v12 }
 0x6d9   :  { %12096 = vmatprep.subr.bf16.mxu1 %v13834_v18  ;;  %v8809_v18 = vld [vmem:[#allocation2 + $0x2d18] sm:$0xff] }
 0x6dc   :  { %12097 = vmatpush2.bf16.msra.mxu1 %v13833_v17 }
 0x6dd   :  { %12098 = vmatprep.subr.bf16.mxu1 %v13826_v14 }
 0x6e0   :  { %12099 = vmatpush2.bf16.msra.mxu1 %v13825_v45  ;;  %v14018_v45 = vcombine.high %v8809_v18, %v8813_v35 }
 0x6e1   :  { %12100 = vmatprep.subr.bf16.mxu1 %v13818_v16  ;;  %v8801_v16 = vld [vmem:[#allocation2 + $0x2cd8] sm:$0xff] }
 0x6e2   :  { %v14010_v19 = vcombine.high %v8801_v16, %v8805_v44  ;;  %v14009_v9 = vcombine.low %v8801_v16, %v8805_v44 }
 0x6e4   :  { %12101 = vmatpush2.bf16.msra.mxu1 %v13817_v36 }
 0x6e5   :  { %12102 = vmatprep.subr.bf16.mxu1 %v13810_v11  ;;  %v14017_v11 = vcombine.low %v8809_v18, %v8813_v35  ;;  %v8893_v18 = vld [vmem:[#allocation2 + $0x2fb8] sm:$0xff] }
 0x6e8   :  { %12103 = vmatpush2.bf16.msra.mxu1 %v13809_v0  ;;  %v8793_v0 = vld [vmem:[#allocation2 + $0x2c98] sm:$0xff] }
 0x6e9   :  { %12104 = vmatprep.subr.bf16.mxu1 %v13802_v32  ;;  %v14002_v27 = vcombine.high %v8793_v0, %v8797_v41 }
 0x6ec   :  { %12105 = vmatpush2.bf16.msra.mxu1 %v13801_v39 }
 0x6ed   :  { %12106 = vmatprep.subr.bf16.mxu1 %v13794_v26  ;;  %v8785_v26 = vld [vmem:[#allocation2 + $0x2c58] sm:$0xff] }
 0x6f0   :  { %12107 = vmatpush2.bf16.msra.mxu1 %v13793_v63  ;;  %v14001_v63 = vcombine.low %v8793_v0, %v8797_v41  ;;  %v8865_v41 = vld [vmem:[#allocation2 + $0x2ed8] sm:$0xff] }
 0x6f1   :  { %12158 = vmatprep.subr.bf16.mxu1 %v14042_v62  ;;  %v13994_v62 = vcombine.high %v8785_v26, %v8789_v55 }
 0x6f3   :  { %v11864_v53 = vpop.f32.mrf.mxu1  ;;  %12109 = vmatmul.mubr.bf16.vlgmr.msra.gmra.mxu1 %v14791_v54 }
 0x6f4   :  { %v11865_v34 = vadd.f32 %v11864_v53, %v11824_v22  ;;  %v14986_v6 = vpop.f32.mrf.mxu0  ;;  %12159 = vmatpush1.bf16.msra.mxu1 %v14041_v46  ;;  %12190 = vmatprep.mubr.bf16.mxu1 %v14894_v47  ;;  %v13993_v22 = vcombine.low %v8785_v26, %v8789_v55  ;;  %v8849_v55 = vld [vmem:[#allocation2 + $0x2e58] sm:$0xff] }
 0x6f5   :  { %v11866_v40 = vpop.f32.mrf.mxu1  ;;  %12160 = vmatprep.subr.bf16.mxu1 %v14034_v7 }
 0x6f6   :  { %v12211_v21 = vrot.slane %v11865_v34, 4  ;;  %v11867_v52 = vadd.f32 %v11866_v40, %v11826_v50  ;;  %v14991_v29 = vpop.f32.mrf.mxu0 }
 0x6f7   :  { %v11868_v12 = vpop.f32.mrf.mxu1 }
 0x6f8   :  { %v12212_v31 = vadd.f32 %v12211_v21, %v11865_v34  ;;  %v12217_v17 = vrot.slane %v11867_v52, 4  ;;  %v11991_v14 = vpop.f32.mrf.mxu0  ;;  %12161 = vmatpush1.bf16.msra.mxu1 %v14033_v58  ;;  %v13985_v58 = vcombine.low %v8777_v10, %v8781_v2  ;;  %v8889_v12 = vld [vmem:[#allocation2 + $0x2f98] sm:$0xff]  ;;  %v15001_v2 = vld [vmem:[#allocation5 + $0x50] sm:$0x77] }
 0x6f9   :  { %v11869_v54 = vpop.f32.mrf.mxu1  ;;  %12162 = vmatprep.subr.bf16.mxu1 %v14026_v20  ;;  %v14097_v16 = vcombine.low %v8889_v12, %v8893_v18 }
 0x6fa   :  { %v12213_v15 = vrot.slane %v12212_v31, 2  ;;  %v12218_v48 = vadd.f32 %v12217_v17, %v11867_v52  ;;  %v11992_v47 = vpop.f32.mrf.mxu0 }
 0x6fc   :  { %v12214_v24 = vadd.f32 %v12213_v15, %v12212_v31  ;;  %v12219_v36 = vrot.slane %v12218_v48, 2  ;;  %12163 = vmatpush1.bf16.msra.mxu1 %v14025_v57  ;;  %v14098_v57 = vcombine.high %v8889_v12, %v8893_v18  ;;  %v8881_v15 = vld [vmem:[#allocation2 + $0x2f58] sm:$0xff] }
 0x6fd   :  { %12164 = vmatprep.subr.bf16.mxu1 %v14018_v45 }
 0x6fe   :  { %v12215_v49 = vrot.slane %v12214_v24, 1  ;;  %v12220_v13 = vadd.f32 %v12219_v36, %v12218_v48  ;;  %v8885_v48 = vld [vmem:[#allocation2 + $0x2f78] sm:$0xff] }
 0x6ff   :  { %v14090_v36 = vcombine.high %v8881_v15, %v8885_v48 }
 0x700   :  { %v12216_v32 = vadd.f32 %v12215_v49, %v12214_v24  ;;  %v12221_v56 = vrot.slane %v12220_v13, 1  ;;  %12165 = vmatpush1.bf16.msra.mxu1 %v14017_v11  ;;  %v8873_v11 = vld [vmem:[#allocation2 + $0x2f18] sm:$0xff] }
 0x701   :  { %12166 = vmatprep.subr.bf16.mxu1 %v14010_v19  ;;  %v8877_v49 = vld [vmem:[#allocation2 + $0x2f38] sm:$0xff]  ;;  %v14089_v19 = vcombine.low %v8881_v15, %v8885_v48 }
 0x702   :  { %v12249_v3 = vmul.f32 0.125, %v12216_v32  ;;  %v12222_v39 = vadd.f32 %v12221_v56, %v12220_v13  ;;  %v14082_v0 = vcombine.high %v8873_v11, %v8877_v49  ;;  %v8869_v32 = vld [vmem:[#allocation2 + $0x2ef8] sm:$0xff]  ;;  %v14081_v56 = vcombine.low %v8873_v11, %v8877_v49 }
 0x704   :  { %v14993_v1 = vsub.f32 %v11865_v34, %v12249_v3  ;;  %v12250_v23 = vmul.f32 0.125, %v12222_v39  ;;  %12167 = vmatpush1.bf16.msra.mxu1 %v14009_v9  ;;  %v8901_v34 = vld [vmem:[#allocation2 + $0x2ff8] sm:$0xff]  ;;  %v14074_v9 = vcombine.high %v8865_v41, %v8869_v32 }
 0x705   :  { %12168 = vmatprep.subr.bf16.mxu1 %v14002_v27  ;;  %v14106_v20 = vcombine.high %v8897_v42, %v8901_v34  ;;  %v14105_v17 = vcombine.low %v8897_v42, %v8901_v34  ;;  %v8857_v3 = vld [vmem:[#allocation2 + $0x2e98] sm:$0xff]  ;;  %v14073_v27 = vcombine.low %v8865_v41, %v8869_v32  ;;  %v12462_v34 = vrot.slane %v14973_v43, %v14453_v25 }
 0x706   :  { %v12265_v8 = vmul.f32 %v14993_v1, %v14993_v1  ;;  %v14997_v60 = vsub.f32 %v11867_v52, %v12250_v23  ;;  %v8861_v39 = vld [vmem:[#allocation2 + $0x2eb8] sm:$0xff] }
 0x707   :  { %v14066_v26 = vcombine.high %v8857_v3, %v8861_v39  ;;  %v8853_v23 = vld [vmem:[#allocation2 + $0x2e78] sm:$0xff]  ;;  %v12502_v18 = vrot.slane %v12462_v34, %v14453_v25 }
 0x708   :  { %v12283_v37 = vrot.slane %v12265_v8, 4  ;;  %v12266_v46 = vmul.f32 %v14997_v60, %v14997_v60  ;;  %12169 = vmatpush1.bf16.msra.mxu1 %v14001_v63  ;;  %v14065_v63 = vcombine.low %v8857_v3, %v8861_v39 }
 0x709   :  { %12170 = vmatprep.subr.bf16.mxu1 %v13994_v62  ;;  %v14058_v62 = vcombine.high %v8849_v55, %v8853_v23 }
 0x70a   :  { %v12284_v7 = vadd.f32 %v12283_v37, %v12265_v8  ;;  %v12289_v53 = vrot.slane %v12266_v46, 4  ;;  %v8841_v37 = vld [vmem:[#allocation2 + $0x2e18] sm:$0xff] }
 0x70c   :  { %v12285_v50 = vrot.slane %v12284_v7, 2  ;;  %v12290_v40 = vadd.f32 %v12289_v53, %v12266_v46  ;;  %12171 = vmatpush1.bf16.msra.mxu1 %v13993_v22  ;;  %v8845_v46 = vld [vmem:[#allocation2 + $0x2e38] sm:$0xff]  ;;  %v8930_v53 = vrot.slane %v15001_v2, %v14337_v61 }
 0x70d   :  { %12172 = vmatprep.subr.bf16.mxu1 %v13986_v51  ;;  %v14050_v42 = vcombine.high %v8841_v37, %v8845_v46 }
 0x70e   :  { %v12286_v21 = vadd.f32 %v12285_v50, %v12284_v7  ;;  %v12291_v52 = vrot.slane %v12290_v40, 2  ;;  %v14057_v7 = vcombine.low %v8849_v55, %v8853_v23  ;;  %v8934_v50 = vrot.slane %v15001_v2, %v14342_v4 }
 0x710   :  { %v12287_v35 = vrot.slane %v12286_v21, 1  ;;  %v12292_v31 = vadd.f32 %v12291_v52, %v12290_v40  ;;  %12173 = vmatpush1.bf16.msra.mxu1 %v13985_v58  ;;  %v12466_v58 = vrot.slane %v14973_v43, %v14446_v59  ;;  %v8970_v52 = vrot.slane %v8930_v53, %v14337_v61 }
 0x711   :  { %12174 = vmatprep.subr.bf16.mxu1 %v14106_v20 }
 0x712   :  { %v12288_v14 = vadd.f32 %v12287_v35, %v12286_v21  ;;  %v12293_v54 = vrot.slane %v12292_v31, 1  ;;  %v14049_v21 = vcombine.low %v8841_v37, %v8845_v46  ;;  %v8974_v35 = vrot.slane %v8934_v50, %v14337_v61 }
 0x714   :  { %v12321_v47 = vmul.f32 0.125, %v12288_v14  ;;  %v12294_v45 = vadd.f32 %v12293_v54, %v12292_v31  ;;  %12175 = vmatpush2.bf16.msra.mxu1 %v14105_v17  ;;  %v12506_v14 = vrot.slane %v12466_v58, %v14453_v25  ;;  %v11908_v48 = vadd.f32 %v14971_v38, %v8974_v35 }
 0x715   :  { %12176 = vmatprep.subr.bf16.mxu1 %v14098_v57 }
 0x716   :  { %v12329_v44 = vadd.f32 1e-05, %v12321_v47  ;;  %v12322_v24 = vmul.f32 0.125, %v12294_v45 }
 0x718   :  { %v12330_v13 = vadd.f32 1e-05, %v12322_v24  ;;  %14156 = vrsqrt.f32 %v12329_v44  ;;  %12177 = vmatpush2.bf16.msra.mxu1 %v14097_v16 }
 0x719   :  { %12178 = vmatprep.subr.bf16.mxu1 %v14090_v36 }
 0x71a   :  { %14158 = vrsqrt.f32 %v12330_v13 }
 0x71c   :  { %12179 = vmatpush2.bf16.msra.mxu1 %v14089_v19 }
 0x71d   :  { %12180 = vmatprep.subr.bf16.mxu1 %v14082_v0 }
 0x720   :  { %12181 = vmatpush2.bf16.msra.mxu1 %v14081_v56 }
 0x721   :  { %12182 = vmatprep.subr.bf16.mxu1 %v14074_v9 }
 0x724   :  { %12183 = vmatpush2.bf16.msra.mxu1 %v14073_v27 }
 0x725   :  { %v14157_v8 = vpop.eup %14156  ;;  %12184 = vmatprep.subr.bf16.mxu1 %v14066_v26 }
 0x727   :  { %v14159_v10 = vpop.eup %14158 }
 0x728   :  { %v12352_v22 = vcombine.low %v14157_v8, %v14159_v10  ;;  %12185 = vmatpush2.bf16.msra.mxu1 %v14065_v63 }
 0x729   :  { %12186 = vmatprep.subr.bf16.mxu1 %v14058_v62 }
 0x72a   :  { %v12356_v51 = vrot.slane %v12352_v22, 7 }
 0x72c   :  { %v12364_v40 = vmul.f32 %v12356_v51, %v14973_v43  ;;  %12187 = vmatpush2.bf16.msra.mxu1 %v14057_v7  ;;  %v11906_v43 = vadd.f32 %v14964_v33, %v8970_v52 }
 0x72d   :  { %12188 = vmatprep.subr.bf16.mxu1 %v14050_v42 }
 0x72e   :  { %v12382_v20 = vrot.slane %v12364_v40, %v14383_v28  ;;  %v12386_v12 = vrot.slane %v12364_v40, %v14386_v30 }
 0x730   :  { %v12422_v31 = vrot.slane %v12382_v20, %v14383_v28  ;;  %v12426_v17 = vrot.slane %v12386_v12, %v14383_v28  ;;  %12189 = vmatpush2.bf16.msra.mxu1 %v14049_v21 }
 0x732   :  { %v12445_v54 = vmul.f32 %v12422_v31, %v14993_v1  ;;  %v12446_v57 = vmul.f32 %v12426_v17, %v14997_v60 }
 0x733   :  { %v11946_v15 = vpop.f32.mrf.mxu1  ;;  %12191 = vmatmul.mubr.bf16.vlgmr.msra.gmra.mxu1 %v14896_v5 }
 0x734   :  { %v12525_v47 = vadd.f32 %v12502_v18, %v12445_v54  ;;  %v12526_v45 = vadd.f32 %v12506_v14, %v12446_v57  ;;  %v11947_v16 = vadd.f32 %v11946_v15, %v11906_v43  ;;  %v15024_v44 = vpop.f32.mrf.mxu0 }
 0x735   :  { %v11948_v24 = vpop.f32.mrf.mxu1 }
 0x736   :  { %v12533_v36 = vmax.f32 %v12525_v47, 0.0  ;;  %v12534_v11 = vmax.f32 %v12526_v45, 0.0  ;;  %v11949_v49 = vadd.f32 %v11948_v24, %v11908_v48  ;;  %v15027_v13 = vpop.f32.mrf.mxu0  ;;  %v11988_v33 = vadd.f32 %v14986_v6, %v11947_v16 }
 0x737   :  { %v11950_v1 = vpop.f32.mrf.mxu1 }
 0x738   :  { %12541 = vst [vmem:[#allocation7 + $0x10] sm:$0xff] %v12533_v36  ;;  %12542 = vst [vmem:[#allocation7 + $0x18] sm:$0xff] %v12534_v11  ;;  %v12073_v60 = vpop.f32.mrf.mxu0  ;;  %v11990_v38 = vadd.f32 %v14991_v29, %v11949_v49  ;;  %v12470_v49 = vrot.slane %v15001_v2, %v14453_v25  ;;  %v12474_v1 = vrot.slane %v15001_v2, %v14446_v59 }
 0x739   :  { %v11951_v19 = vpop.f32.mrf.mxu1 }
 0x73a   :  { %v12074_v0 = vpop.f32.mrf.mxu0  ;;  %v12510_v19 = vrot.slane %v12470_v49, %v14453_v25 }
 0x773   :  { %v12028_v41 = vpop.f32.mrf.mxu1 }
 0x774   :  { %v12029_v32 = vadd.f32 %v12028_v41, %v11988_v33  ;;  %v15031_v56 = vpop.f32.mrf.mxu0 }
 0x775   :  { %v12030_v5 = vpop.f32.mrf.mxu1 }
 0x776   :  { %v12223_v9 = vrot.slane %v12029_v32, 4  ;;  %v12031_v3 = vadd.f32 %v12030_v5, %v11990_v38  ;;  %v15033_v39 = vpop.f32.mrf.mxu0 }
 0x777   :  { %v12032_v27 = vpop.f32.mrf.mxu1 }
 0x778   :  { %v12224_v26 = vadd.f32 %v12223_v9, %v12029_v32  ;;  %v12229_v6 = vrot.slane %v12031_v3, 4  ;;  %v12155_v55 = vpop.f32.mrf.mxu0 }
 0x779   :  { %v12033_v23 = vpop.f32.mrf.mxu1 }
 0x77a   :  { %v12225_v63 = vrot.slane %v12224_v26, 2  ;;  %v12230_v8 = vadd.f32 %v12229_v6, %v12031_v3  ;;  %v12156_v62 = vpop.f32.mrf.mxu0 }
 0x77c   :  { %v12226_v29 = vadd.f32 %v12225_v63, %v12224_v26  ;;  %v12231_v10 = vrot.slane %v12230_v8, 2 }
 0x77e   :  { %v12227_v37 = vrot.slane %v12226_v29, 1  ;;  %v12232_v46 = vadd.f32 %v12231_v10, %v12230_v8  ;;  %v15046_v8 = vld [vmem:[#allocation5 + $0x58] sm:$0x77] }
 0x77f   :  { %v8938_v62 = vrot.slane %v15046_v8, %v14337_v61 }
 0x780   :  { %v12228_v22 = vadd.f32 %v12227_v37, %v12226_v29  ;;  %v12233_v7 = vrot.slane %v12232_v46, 1  ;;  %v8942_v29 = vrot.slane %v15046_v8, %v14342_v4 }
 0x781   :  { %v8978_v10 = vrot.slane %v8938_v62, %v14337_v61 }
 0x782   :  { %v12251_v53 = vmul.f32 0.125, %v12228_v22  ;;  %v12234_v51 = vadd.f32 %v12233_v7, %v12232_v46  ;;  %v8982_v37 = vrot.slane %v8942_v29, %v14337_v61 }
 0x783   :  { %v12070_v46 = vadd.f32 %v15024_v44, %v8978_v10 }
 0x784   :  { %v12259_v42 = vsub.f32 %v12029_v32, %v12251_v53  ;;  %v12252_v34 = vmul.f32 0.125, %v12234_v51  ;;  %v12514_v32 = vrot.slane %v12474_v1, %v14453_v25  ;;  %v12072_v22 = vadd.f32 %v15027_v13, %v8982_v37 }
 0x786   :  { %v12267_v50 = vmul.f32 %v12259_v42, %v12259_v42  ;;  %v12260_v40 = vsub.f32 %v12031_v3, %v12252_v34 }
 0x788   :  { %v12295_v58 = vrot.slane %v12267_v50, 4  ;;  %v12268_v21 = vmul.f32 %v12260_v40, %v12260_v40 }
 0x78a   :  { %v12296_v52 = vadd.f32 %v12295_v58, %v12267_v50  ;;  %v12301_v20 = vrot.slane %v12268_v21, 4 }
 0x78c   :  { %v12297_v12 = vrot.slane %v12296_v52, 2  ;;  %v12302_v18 = vadd.f32 %v12301_v20, %v12268_v21 }
 0x78e   :  { %v12298_v35 = vadd.f32 %v12297_v12, %v12296_v52  ;;  %v12303_v31 = vrot.slane %v12302_v18, 2 }
 0x790   :  { %v12299_v17 = vrot.slane %v12298_v35, 1  ;;  %v12304_v14 = vadd.f32 %v12303_v31, %v12302_v18 }
 0x792   :  { %v12300_v43 = vadd.f32 %v12299_v17, %v12298_v35  ;;  %v12305_v54 = vrot.slane %v12304_v14, 1 }
 0x794   :  { %v12323_v57 = vmul.f32 0.125, %v12300_v43  ;;  %v12306_v15 = vadd.f32 %v12305_v54, %v12304_v14 }
 0x796   :  { %v12331_v48 = vadd.f32 1e-05, %v12323_v57  ;;  %v12324_v47 = vmul.f32 0.125, %v12306_v15 }
 0x798   :  { %v12332_v45 = vadd.f32 1e-05, %v12324_v47  ;;  %14160 = vrsqrt.f32 %v12331_v48 }
 0x79a   :  { %14162 = vrsqrt.f32 %v12332_v45 }
 0x7a5   :  { %v14161_v16 = vpop.eup %14160 }
 0x7a7   :  { %v14163_v24 = vpop.eup %14162 }
 0x7a8   :  { %v12353_v36 = vcombine.low %v14161_v16, %v14163_v24 }
 0x7aa   :  { %v12357_v11 = vrot.slane %v12353_v36, 7 }
 0x7ac   :  { %v12365_v33 = vmul.f32 %v12357_v11, %v15001_v2 }
 0x7ae   :  { %v12390_v60 = vrot.slane %v12365_v33, %v14383_v28  ;;  %v12394_v38 = vrot.slane %v12365_v33, %v14386_v30 }
 0x7b0   :  { %v12430_v0 = vrot.slane %v12390_v60, %v14383_v28  ;;  %v12434_v41 = vrot.slane %v12394_v38, %v14383_v28 }
 0x7b2   :  { %v12447_v5 = vmul.f32 %v12430_v0, %v12259_v42  ;;  %v12448_v9 = vmul.f32 %v12434_v41, %v12260_v40 }
 0x7b3   :  { %v12110_v26 = vpop.f32.mrf.mxu1 }
 0x7b4   :  { %v12527_v3 = vadd.f32 %v12510_v19, %v12447_v5  ;;  %v12528_v27 = vadd.f32 %v12514_v32, %v12448_v9  ;;  %v12111_v7 = vadd.f32 %v12110_v26, %v12070_v46 }
 0x7b5   :  { %v12112_v2 = vpop.f32.mrf.mxu1 }
 0x7b6   :  { %v12535_v6 = vmax.f32 %v12527_v3, 0.0  ;;  %v12536_v55 = vmax.f32 %v12528_v27, 0.0  ;;  %v12113_v53 = vadd.f32 %v12112_v2, %v12072_v22  ;;  %v12152_v51 = vadd.f32 %v15031_v56, %v12111_v7 }
 0x7b7   :  { %v12114_v23 = vpop.f32.mrf.mxu1  ;;  %v12482_v2 = vrot.slane %v15046_v8, %v14446_v59 }
 0x7b8   :  { %12543 = vst [vmem:[#allocation7 + $0x20] sm:$0xff] %v12535_v6  ;;  %12544 = vst [vmem:[#allocation7 + $0x28] sm:$0xff] %v12536_v55  ;;  %v12154_v50 = vadd.f32 %v15033_v39, %v12113_v53  ;;  %v12478_v6 = vrot.slane %v15046_v8, %v14453_v25 }
 0x7b9   :  { %v12115_v63 = vpop.f32.mrf.mxu1  ;;  %v12522_v37 = vrot.slane %v12482_v2, %v14453_v25 }
 0x7ba   :  { %v12518_v62 = vrot.slane %v12478_v6, %v14453_v25 }
 0x7f3   :  { %v12192_v42 = vpop.f32.mrf.mxu1 }
 0x7f4   :  { %v12193_v34 = vadd.f32 %v12192_v42, %v12152_v51 }
 0x7f5   :  { %v12194_v40 = vpop.f32.mrf.mxu1 }
 0x7f6   :  { %v12235_v58 = vrot.slane %v12193_v34, 4  ;;  %v12195_v21 = vadd.f32 %v12194_v40, %v12154_v50 }
 0x7f7   :  { %v12196_v4 = vpop.f32.mrf.mxu1 }
 0x7f8   :  { %v12236_v52 = vadd.f32 %v12235_v58, %v12193_v34  ;;  %v12241_v20 = vrot.slane %v12195_v21, 4 }
 0x7f9   :  { %v12197_v12 = vpop.f32.mrf.mxu1 }
 0x7fa   :  { %v12237_v61 = vrot.slane %v12236_v52, 2  ;;  %v12242_v18 = vadd.f32 %v12241_v20, %v12195_v21 }
 0x7fc   :  { %v12238_v44 = vadd.f32 %v12237_v61, %v12236_v52  ;;  %v12243_v35 = vrot.slane %v12242_v18, 2 }
 0x7fe   :  { %v12239_v13 = vrot.slane %v12238_v44, 1  ;;  %v12244_v31 = vadd.f32 %v12243_v35, %v12242_v18 }
 0x800   :  { %v12240_v17 = vadd.f32 %v12239_v13, %v12238_v44  ;;  %v12245_v14 = vrot.slane %v12244_v31, 1 }
 0x802   :  { %v12253_v56 = vmul.f32 0.125, %v12240_v17  ;;  %v12246_v43 = vadd.f32 %v12245_v14, %v12244_v31 }
 0x804   :  { %v12261_v54 = vsub.f32 %v12193_v34, %v12253_v56  ;;  %v12254_v57 = vmul.f32 0.125, %v12246_v43 }
 0x806   :  { %v12269_v39 = vmul.f32 %v12261_v54, %v12261_v54  ;;  %v12262_v15 = vsub.f32 %v12195_v21, %v12254_v57 }
 0x808   :  { %v12307_v48 = vrot.slane %v12269_v39, 4  ;;  %v12270_v47 = vmul.f32 %v12262_v15, %v12262_v15 }
 0x80a   :  { %v12308_v45 = vadd.f32 %v12307_v48, %v12269_v39  ;;  %v12313_v16 = vrot.slane %v12270_v47, 4 }
 0x80c   :  { %v12309_v24 = vrot.slane %v12308_v45, 2  ;;  %v12314_v36 = vadd.f32 %v12313_v16, %v12270_v47 }
 0x80e   :  { %v12310_v11 = vadd.f32 %v12309_v24, %v12308_v45  ;;  %v12315_v49 = vrot.slane %v12314_v36, 2 }
 0x810   :  { %v12311_v33 = vrot.slane %v12310_v11, 1  ;;  %v12316_v1 = vadd.f32 %v12315_v49, %v12314_v36 }
 0x812   :  { %v12312_v60 = vadd.f32 %v12311_v33, %v12310_v11  ;;  %v12317_v38 = vrot.slane %v12316_v1, 1 }
 0x814   :  { %v12325_v19 = vmul.f32 0.125, %v12312_v60  ;;  %v12318_v0 = vadd.f32 %v12317_v38, %v12316_v1 }
 0x816   :  { %v12333_v41 = vadd.f32 1e-05, %v12325_v19  ;;  %v12326_v32 = vmul.f32 0.125, %v12318_v0 }
 0x818   :  { %v12334_v5 = vadd.f32 1e-05, %v12326_v32  ;;  %14164 = vrsqrt.f32 %v12333_v41 }
 0x81a   :  { %14166 = vrsqrt.f32 %v12334_v5 }
 0x825   :  { %v14165_v9 = vpop.eup %14164 }
 0x827   :  { %v14167_v3 = vpop.eup %14166 }
 0x828   :  { %v12354_v27 = vcombine.low %v14165_v9, %v14167_v3 }
 0x82a   :  { %v12358_v26 = vrot.slane %v12354_v27, 7 }
 0x82c   :  { %v12366_v55 = vmul.f32 %v12358_v26, %v15046_v8 }
 0x82e   :  { %v12398_v23 = vrot.slane %v12366_v55, %v14383_v28  ;;  %v12402_v63 = vrot.slane %v12366_v55, %v14386_v30 }
 0x830   :  { %v12438_v29 = vrot.slane %v12398_v23, %v14383_v28  ;;  %v12442_v10 = vrot.slane %v12402_v63, %v14383_v28 }
 0x832   :  { %v12449_v46 = vmul.f32 %v12438_v29, %v12261_v54  ;;  %v12450_v22 = vmul.f32 %v12442_v10, %v12262_v15 }
 0x834   :  { %v12529_v7 = vadd.f32 %v12518_v62, %v12449_v46  ;;  %v12530_v53 = vadd.f32 %v12522_v37, %v12450_v22 }
 0x836   :  { %v12537_v51 = vmax.f32 %v12529_v7, 0.0  ;;  %v12538_v59 = vmax.f32 %v12530_v53, 0.0 }
 0x838   :  { %12545 = vst [vmem:[#allocation7 + $0x30] sm:$0xff] %v12537_v51  ;;  %12546 = vst [vmem:[#allocation7 + $0x38] sm:$0xff] %v12538_v59 }
 0x839   :  { %14222 = shalt.err (!%p14219_p0)
}
 0x83a   :  { %12556 = dma.vmem_to_hbm [thread:$0]  %s12554_s30, 1024, %s15075_s3, [#allocation4]  }
 0x83b   :  { %14235 = dma.done.wait [#allocation4], 1024  }
 0x83c   :  { %14236 = vsyncadd [#allocation4], 4294966272 }
 0x83d   :  { %12560 = vsyncpa [#allocation3], 1 }
 0x83e   :  { %12561 = vsyncpa [#allocation6], 1 }
 0x83f   :  { %12562 = vsyncpa [#allocation4], 1 }

</bundles_post_ra>
